<compile_context>
chip_gen: v5e
topology: v5e:2x2
jax: 0.10.0
libtpu: 0.0.40
codegen_flags: <defaults>
</compile_context>

<pallas_src>
import functools

import jax
import jax.numpy as jnp
from jax.experimental import pallas as pl
from jax.experimental.pallas import tpu as pltpu

N_FEATURES = 38
PREDICTION_TIME = 1
SEQUENCE_LENGTH = 20

HP = 128          # padded hidden width (lane multiple), shared by all 4 layers
FP = 128          # padded input-feature width for encoder1
GP = 4 * HP       # fused gate width [i | f | g | o], each gate padded to HP lanes


def _gate_act(gates, c_prev):
    """LSTM gate activations on a fused (rows, 4*HP) pre-activation block.

    c_prev=None means h_prev = c_prev = 0, so the forget-gate term is dropped exactly.
    Padded lanes have zero weights/bias => pre-activation 0 => c stays 0 and
    h = sigmoid(0) * tanh(0) = 0, so padding never leaks into valid lanes.
    """
    i_g = jax.nn.sigmoid(gates[:, 0 * HP:1 * HP])
    g_g = jnp.tanh(gates[:, 2 * HP:3 * HP])
    o_g = jax.nn.sigmoid(gates[:, 3 * HP:4 * HP])
    c_new = i_g * g_g
    if c_prev is not None:
        c_new = c_new + jax.nn.sigmoid(gates[:, 1 * HP:2 * HP]) * c_prev
    h_new = o_g * jnp.tanh(c_new)
    return h_new, c_new


def _autoencoder_kernel(x_ref,                       # (T*B, FP)  t-major rows
                        wx1_ref, wh1_ref, b1_ref,    # (FP,GP), (HP,GP), (1,GP)
                        b2_ref, b3_ref, b4_ref,      # (1,GP) each
                        wrest_hbm,                   # HBM (pl.ANY): (4,HP,GP)=[wx2,wh2,wx3,wx4]
                        out_ref,                     # (1, 1, HP)
                        xproj_ref,                   # VMEM scratch (T*B, GP)
                        wrest_ref,                   # VMEM scratch (4, HP, GP)
                        dma_sem,                     # DMA semaphore
                        *, B, T):
    # Kick off the enc2/dec1/dec2 weight DMA; it overlaps with the encoder1 recurrence.
    pltpu.make_async_copy(wrest_hbm, wrest_ref, dma_sem).start()

    # ---- hoisted encoder1 input projection: one (T*B, FP) @ (FP, GP) MXU push ----
    xproj_ref[...] = (jnp.dot(x_ref[...], wx1_ref[...],
                              preferred_element_type=jnp.float32) + b1_ref[...])

    # ---- encoder1 recurrence over T (static, fully unrolled); final hidden h1:(B,HP) ----
    # t = 0: h_prev = c_prev = 0 -> no Wh matmul, no forget-gate term.
    h, c = _gate_act(xproj_ref[0:B, :], None)
    for t in range(1, T):
        gates = xproj_ref[t * B:(t + 1) * B, :] + jnp.dot(
            h, wh1_ref[...], preferred_element_type=jnp.float32)
        h, c = _gate_act(gates, c)
    h1 = h

    # Weights for the remaining layers must have landed before encoder2 starts.
    pltpu.make_async_copy(wrest_hbm, wrest_ref, dma_sem).wait()

    # ---- encoder2: h1 fed batch_first => (batch=1, seq=B, 100); final hidden (1,HP) ----
    # Hoisted input projection: one (B, HP) @ (HP, GP) push + single bias add.
    hproj = jnp.dot(h1, wrest_ref[0], preferred_element_type=jnp.float32) + b2_ref[...]
    h, c = _gate_act(hproj[0:1, :], None)
    for b in range(1, B):
        gates = hproj[b:b + 1, :] + jnp.dot(
            h, wrest_ref[1], preferred_element_type=jnp.float32)
        h, c = _gate_act(gates, c)
    h2 = h

    # ---- repeat_vector: both ReplicationPad1d are identities for prediction_time == 1 ----

    # ---- decoder / decoder2: seq = 1, zero initial state => Wh terms are exactly zero ----
    g3 = jnp.dot(h2, wrest_ref[2], preferred_element_type=jnp.float32) + b3_ref[...]
    h3, _ = _gate_act(g3, None)
    g4 = jnp.dot(h3, wrest_ref[3], preferred_element_type=jnp.float32) + b4_ref[...]
    h4, _ = _gate_act(g4, None)

    # Single full-width (unmasked) store; the wrapper slices the first n_features lanes.
    out_ref[0] = h4


def _full_spec(shape):
    return pl.BlockSpec(shape, lambda i, _r=len(shape): (0,) * _r)


def lstm_autoencoder_forward(x, params, prediction_time=PREDICTION_TIME):
    """x: (B, T, n_features), batch-first like the PyTorch module. Returns (1, 1, n_features)."""
    # With prediction_time == 1 the repeat_vector is an identity (any other value would
    # also break the decoder's input_size in the original PyTorch module).
    assert prediction_time == 1
    B, T, F = x.shape

    # t-major, lane-padded input rows: row t*B + b  ==  x[b, t, :F] zero-padded to FP lanes.
    x2 = jnp.transpose(x, (1, 0, 2)).reshape(T * B, F).astype(jnp.float32)
    x_p = jnp.pad(x2, ((0, 0), (0, FP - F)))

    wx1, wh1, b1 = params["enc1"]
    wx2, wh2, b2 = params["enc2"]
    wx3, _wh3_dead, b3 = params["dec1"]   # wh3/wh4 are dead: seq=1, zero initial state
    wx4, _wh4_dead, b4 = params["dec2"]
    w_rest = jnp.stack([wx2, wh2, wx3, wx4])        # (4, HP, GP): one overlapped DMA

    kernel = functools.partial(_autoencoder_kernel, B=B, T=T)

    out = pl.pallas_call(
        kernel,
        out_shape=jax.ShapeDtypeStruct((1, 1, HP), jnp.float32),
        grid=(1,),
        in_specs=[_full_spec(x_p.shape),
                  _full_spec(wx1.shape), _full_spec(wh1.shape), _full_spec(b1.shape),
                  _full_spec(b2.shape), _full_spec(b3.shape), _full_spec(b4.shape),
                  pl.BlockSpec(memory_space=pl.ANY)],
        out_specs=_full_spec((1, 1, HP)),
        scratch_shapes=[pltpu.VMEM((T * B, GP), jnp.float32),
                        pltpu.VMEM((4, HP, GP), jnp.float32),
                        pltpu.SemaphoreType.DMA(())],
        compiler_params=pltpu.CompilerParams(
            dimension_semantics=("arbitrary",)),
    )(x_p, wx1, wh1, b1, b2, b3, b4, w_rest)

    return out[:, :, :F]


def init_lstm_params(key, input_size, hidden_size, padded_input):
    """PyTorch-style uniform(-1/sqrt(H), 1/sqrt(H)) init, repacked into the padded
    fused-gate layout consumed by the kernel:
      wx: (padded_input, 4*HP)  columns [i|f|g|o], each gate in its own 128-lane slot
      wh: (HP, 4*HP)
      b : (1, 4*HP)             b_ih + b_hh
    Unused rows/columns are zero so padded hidden lanes stay exactly zero.
    """
    k1, k2, k3, k4 = jax.random.split(key, 4)
    s = 1.0 / (hidden_size ** 0.5)
    w_ih = jax.random.uniform(k1, (4, hidden_size, input_size), jnp.float32, -s, s)
    w_hh = jax.random.uniform(k2, (4, hidden_size, hidden_size), jnp.float32, -s, s)
    b_ih = jax.random.uniform(k3, (4, hidden_size), jnp.float32, -s, s)
    b_hh = jax.random.uniform(k4, (4, hidden_size), jnp.float32, -s, s)

    wx = jnp.zeros((padded_input, GP), jnp.float32)
    wh = jnp.zeros((HP, GP), jnp.float32)
    b = jnp.zeros((1, GP), jnp.float32)
    for g in range(4):                      # gate order [i, f, g, o] as in PyTorch
        wx = wx.at[:input_size, g * HP:g * HP + hidden_size].set(w_ih[g].T)
        wh = wh.at[:hidden_size, g * HP:g * HP + hidden_size].set(w_hh[g].T)
        b = b.at[0, g * HP:g * HP + hidden_size].set(b_ih[g] + b_hh[g])
    return wx, wh, b


def init_params(key, n_features=N_FEATURES):
    ks = jax.random.split(key, 4)
    return {
        # layer 1 consumes the lane-padded feature dim; later layers consume the
        # HP-padded hidden state of the previous layer.
        "enc1": init_lstm_params(ks[0], n_features, 100, padded_input=FP),
        "enc2": init_lstm_params(ks[1], 100, 50, padded_input=HP),
        "dec1": init_lstm_params(ks[2], 50, 100, padded_input=HP),
        "dec2": init_lstm_params(ks[3], 100, n_features, padded_input=HP),
    }


if __name__ == "__main__":
    key = jax.random.PRNGKey(0)
    k_param, k_x = jax.random.split(key)

    B, T, F = 2, SEQUENCE_LENGTH, N_FEATURES
    params = init_params(k_param, F)
    x = jax.random.normal(k_x, (B, T, F), dtype=jnp.float32)

    fwd = jax.jit(lambda xx: lstm_autoencoder_forward(xx, params))
    out = jax.block_until_ready(fwd(x))

    assert out.shape == (1, 1, F), out.shape
    assert out.dtype == jnp.float32
    assert bool(jnp.all(jnp.isfinite(out)))
    print("KERNEL_OK")
</pallas_src>

<mosaic_0001>
module attributes {stable_mosaic.version = 11 : i64} {
  func.func @_autoencoder_kernel(%arg0: i32, %arg1: memref<40x128xf32, #tpu.memory_space<vmem>>, %arg2: memref<128x512xf32, #tpu.memory_space<vmem>>, %arg3: memref<128x512xf32, #tpu.memory_space<vmem>>, %arg4: memref<1x512xf32, #tpu.memory_space<vmem>>, %arg5: memref<1x512xf32, #tpu.memory_space<vmem>>, %arg6: memref<1x512xf32, #tpu.memory_space<vmem>>, %arg7: memref<1x512xf32, #tpu.memory_space<vmem>>, %arg8: memref<4x128x512xf32, #tpu.memory_space<any>>, %arg9: memref<1x1x128xf32, #tpu.memory_space<vmem>>, %arg10: memref<40x512xf32, #tpu.memory_space<vmem>>, %arg11: memref<4x128x512xf32, #tpu.memory_space<vmem>>, %arg12: memref<!tpu.dma_semaphore, #tpu.memory_space<semaphore_mem>>) attributes {dimension_semantics = [#tpu.dimension_semantics<arbitrary>], iteration_bounds = array<i64: 1>, scalar_prefetch = 0 : i64, scratch_operands = 3 : i64, tpu.core_type = #tpu.core_type<tc>, window_params = [{pipeline_mode = #tpu.pipeline_mode<synchronous>, transform_indices = @transform_0, window_bounds = array<i64: 40, 128>}, {pipeline_mode = #tpu.pipeline_mode<synchronous>, transform_indices = @transform_1, window_bounds = array<i64: 128, 512>}, {pipeline_mode = #tpu.pipeline_mode<synchronous>, transform_indices = @transform_2, window_bounds = array<i64: 128, 512>}, {pipeline_mode = #tpu.pipeline_mode<synchronous>, transform_indices = @transform_3, window_bounds = array<i64: 1, 512>}, {pipeline_mode = #tpu.pipeline_mode<synchronous>, transform_indices = @transform_4, window_bounds = array<i64: 1, 512>}, {pipeline_mode = #tpu.pipeline_mode<synchronous>, transform_indices = @transform_5, window_bounds = array<i64: 1, 512>}, {pipeline_mode = #tpu.pipeline_mode<synchronous>, transform_indices = @transform_6, window_bounds = array<i64: 1, 512>}, {}, {pipeline_mode = #tpu.pipeline_mode<synchronous>, transform_indices = @transform_8, window_bounds = array<i64: 1, 1, 128>}]} {
    tpu.enqueue_dma source(%arg8 : memref<4x128x512xf32, #tpu.memory_space<any>>) target(%arg11 : memref<4x128x512xf32, #tpu.memory_space<vmem>>) target_semaphore(%arg12 : memref<!tpu.dma_semaphore, #tpu.memory_space<semaphore_mem>>)
    %c0 = arith.constant 0 : index
    %c0_0 = arith.constant 0 : index
    %0 = vector.load %arg1[%c0, %c0_0] : memref<40x128xf32, #tpu.memory_space<vmem>>, vector<40x128xf32>
    %c0_1 = arith.constant 0 : index
    %c0_2 = arith.constant 0 : index
    %1 = vector.load %arg2[%c0_1, %c0_2] : memref<128x512xf32, #tpu.memory_space<vmem>>, vector<128x512xf32>
    %cst = arith.constant dense<0.000000e+00> : vector<40x512xf32>
    %2 = tpu.matmul %0, %1, %cst {dimension_numbers = #tpu.dot_dimension_numbers<[1], [0], [0], [1], [0, 0, 1, 1], [], []>} : vector<40x128xf32>, vector<128x512xf32>, vector<40x512xf32> -> vector<40x512xf32>
    %c0_3 = arith.constant 0 : index
    %c0_4 = arith.constant 0 : index
    %3 = vector.load %arg4[%c0_3, %c0_4] : memref<1x512xf32, #tpu.memory_space<vmem>>, vector<1x512xf32>
    %4 = vector.broadcast %3 : vector<1x512xf32> to vector<40x512xf32>
    %5 = arith.addf %2, %4 : vector<40x512xf32>
    %c0_5 = arith.constant 0 : index
    %c0_6 = arith.constant 0 : index
    %6 = vector.load %arg10[%c0_5, %c0_6] : memref<40x512xf32, #tpu.memory_space<vmem>>, vector<40x512xf32>
    tpu.vector_store %arg10[%c0_5, %c0_6], %5 {strides = array<i32>} : memref<40x512xf32, #tpu.memory_space<vmem>>, vector<40x512xf32>,
    %c0_7 = arith.constant 0 : index
    %c0_8 = arith.constant 0 : index
    %7 = vector.load %arg10[%c0_7, %c0_8] : memref<40x512xf32, #tpu.memory_space<vmem>>, vector<2x512xf32>
    %8 = vector.extract_strided_slice %7 {offsets = [0, 0], sizes = [2, 128], strides = [1, 1]} : vector<2x512xf32> to vector<2x128xf32>
    %9 = arith.negf %8 : vector<2x128xf32>
    %10 = math.exp %9 : vector<2x128xf32>
    %cst_9 = arith.constant 1.000000e+00 : f32
    %11 = vector.broadcast %cst_9 : f32 to vector<2x128xf32>
    %12 = arith.addf %11, %10 : vector<2x128xf32>
    %13 = arith.divf %11, %12 : vector<2x128xf32>
    %14 = vector.extract_strided_slice %7 {offsets = [0, 256], sizes = [2, 128], strides = [1, 1]} : vector<2x512xf32> to vector<2x128xf32>
    %15 = math.tanh %14 : vector<2x128xf32>
    %16 = vector.extract_strided_slice %7 {offsets = [0, 384], sizes = [2, 128], strides = [1, 1]} : vector<2x512xf32> to vector<2x128xf32>
    %17 = arith.negf %16 : vector<2x128xf32>
    %18 = math.exp %17 : vector<2x128xf32>
    %cst_10 = arith.constant 1.000000e+00 : f32
    %19 = vector.broadcast %cst_10 : f32 to vector<2x128xf32>
    %20 = arith.addf %19, %18 : vector<2x128xf32>
    %21 = arith.divf %19, %20 : vector<2x128xf32>
    %22 = arith.mulf %13, %15 : vector<2x128xf32>
    %23 = math.tanh %22 : vector<2x128xf32>
    %24 = arith.mulf %21, %23 : vector<2x128xf32>
    %c2 = arith.constant 2 : index
    %c0_11 = arith.constant 0 : index
    %25 = vector.load %arg10[%c2, %c0_11] : memref<40x512xf32, #tpu.memory_space<vmem>>, vector<2x512xf32>
    %c0_12 = arith.constant 0 : index
    %c0_13 = arith.constant 0 : index
    %26 = vector.load %arg3[%c0_12, %c0_13] : memref<128x512xf32, #tpu.memory_space<vmem>>, vector<128x512xf32>
    %cst_14 = arith.constant dense<0.000000e+00> : vector<2x512xf32>
    %27 = tpu.matmul %24, %26, %cst_14 {dimension_numbers = #tpu.dot_dimension_numbers<[1], [0], [0], [1], [0, 0, 1, 1], [], []>} : vector<2x128xf32>, vector<128x512xf32>, vector<2x512xf32> -> vector<2x512xf32>
    %28 = arith.addf %25, %27 : vector<2x512xf32>
    %29 = vector.extract_strided_slice %28 {offsets = [0, 0], sizes = [2, 128], strides = [1, 1]} : vector<2x512xf32> to vector<2x128xf32>
    %30 = arith.negf %29 : vector<2x128xf32>
    %31 = math.exp %30 : vector<2x128xf32>
    %cst_15 = arith.constant 1.000000e+00 : f32
    %32 = vector.broadcast %cst_15 : f32 to vector<2x128xf32>
    %33 = arith.addf %32, %31 : vector<2x128xf32>
    %34 = arith.divf %32, %33 : vector<2x128xf32>
    %35 = vector.extract_strided_slice %28 {offsets = [0, 256], sizes = [2, 128], strides = [1, 1]} : vector<2x512xf32> to vector<2x128xf32>
    %36 = math.tanh %35 : vector<2x128xf32>
    %37 = vector.extract_strided_slice %28 {offsets = [0, 384], sizes = [2, 128], strides = [1, 1]} : vector<2x512xf32> to vector<2x128xf32>
    %38 = arith.negf %37 : vector<2x128xf32>
    %39 = math.exp %38 : vector<2x128xf32>
    %cst_16 = arith.constant 1.000000e+00 : f32
    %40 = vector.broadcast %cst_16 : f32 to vector<2x128xf32>
    %41 = arith.addf %40, %39 : vector<2x128xf32>
    %42 = arith.divf %40, %41 : vector<2x128xf32>
    %43 = arith.mulf %34, %36 : vector<2x128xf32>
    %44 = vector.extract_strided_slice %28 {offsets = [0, 128], sizes = [2, 128], strides = [1, 1]} : vector<2x512xf32> to vector<2x128xf32>
    %45 = arith.negf %44 : vector<2x128xf32>
    %46 = math.exp %45 : vector<2x128xf32>
    %cst_17 = arith.constant 1.000000e+00 : f32
    %47 = vector.broadcast %cst_17 : f32 to vector<2x128xf32>
    %48 = arith.addf %47, %46 : vector<2x128xf32>
    %49 = arith.divf %47, %48 : vector<2x128xf32>
    %50 = arith.mulf %49, %22 : vector<2x128xf32>
    %51 = arith.addf %43, %50 : vector<2x128xf32>
    %52 = math.tanh %51 : vector<2x128xf32>
    %53 = arith.mulf %42, %52 : vector<2x128xf32>
    %c4 = arith.constant 4 : index
    %c0_18 = arith.constant 0 : index
    %54 = vector.load %arg10[%c4, %c0_18] : memref<40x512xf32, #tpu.memory_space<vmem>>, vector<2x512xf32>
    %c0_19 = arith.constant 0 : index
    %c0_20 = arith.constant 0 : index
    %55 = vector.load %arg3[%c0_19, %c0_20] : memref<128x512xf32, #tpu.memory_space<vmem>>, vector<128x512xf32>
    %cst_21 = arith.constant dense<0.000000e+00> : vector<2x512xf32>
    %56 = tpu.matmul %53, %55, %cst_21 {dimension_numbers = #tpu.dot_dimension_numbers<[1], [0], [0], [1], [0, 0, 1, 1], [], []>} : vector<2x128xf32>, vector<128x512xf32>, vector<2x512xf32> -> vector<2x512xf32>
    %57 = arith.addf %54, %56 : vector<2x512xf32>
    %58 = vector.extract_strided_slice %57 {offsets = [0, 0], sizes = [2, 128], strides = [1, 1]} : vector<2x512xf32> to vector<2x128xf32>
    %59 = arith.negf %58 : vector<2x128xf32>
    %60 = math.exp %59 : vector<2x128xf32>
    %cst_22 = arith.constant 1.000000e+00 : f32
    %61 = vector.broadcast %cst_22 : f32 to vector<2x128xf32>
    %62 = arith.addf %61, %60 : vector<2x128xf32>
    %63 = arith.divf %61, %62 : vector<2x128xf32>
    %64 = vector.extract_strided_slice %57 {offsets = [0, 256], sizes = [2, 128], strides = [1, 1]} : vector<2x512xf32> to vector<2x128xf32>
    %65 = math.tanh %64 : vector<2x128xf32>
    %66 = vector.extract_strided_slice %57 {offsets = [0, 384], sizes = [2, 128], strides = [1, 1]} : vector<2x512xf32> to vector<2x128xf32>
    %67 = arith.negf %66 : vector<2x128xf32>
    %68 = math.exp %67 : vector<2x128xf32>
    %cst_23 = arith.constant 1.000000e+00 : f32
    %69 = vector.broadcast %cst_23 : f32 to vector<2x128xf32>
    %70 = arith.addf %69, %68 : vector<2x128xf32>
    %71 = arith.divf %69, %70 : vector<2x128xf32>
    %72 = arith.mulf %63, %65 : vector<2x128xf32>
    %73 = vector.extract_strided_slice %57 {offsets = [0, 128], sizes = [2, 128], strides = [1, 1]} : vector<2x512xf32> to vector<2x128xf32>
    %74 = arith.negf %73 : vector<2x128xf32>
    %75 = math.exp %74 : vector<2x128xf32>
    %cst_24 = arith.constant 1.000000e+00 : f32
    %76 = vector.broadcast %cst_24 : f32 to vector<2x128xf32>
    %77 = arith.addf %76, %75 : vector<2x128xf32>
    %78 = arith.divf %76, %77 : vector<2x128xf32>
    %79 = arith.mulf %78, %51 : vector<2x128xf32>
    %80 = arith.addf %72, %79 : vector<2x128xf32>
    %81 = math.tanh %80 : vector<2x128xf32>
    %82 = arith.mulf %71, %81 : vector<2x128xf32>
    %c6 = arith.constant 6 : index
    %c0_25 = arith.constant 0 : index
    %83 = vector.load %arg10[%c6, %c0_25] : memref<40x512xf32, #tpu.memory_space<vmem>>, vector<2x512xf32>
    %c0_26 = arith.constant 0 : index
    %c0_27 = arith.constant 0 : index
    %84 = vector.load %arg3[%c0_26, %c0_27] : memref<128x512xf32, #tpu.memory_space<vmem>>, vector<128x512xf32>
    %cst_28 = arith.constant dense<0.000000e+00> : vector<2x512xf32>
    %85 = tpu.matmul %82, %84, %cst_28 {dimension_numbers = #tpu.dot_dimension_numbers<[1], [0], [0], [1], [0, 0, 1, 1], [], []>} : vector<2x128xf32>, vector<128x512xf32>, vector<2x512xf32> -> vector<2x512xf32>
    %86 = arith.addf %83, %85 : vector<2x512xf32>
    %87 = vector.extract_strided_slice %86 {offsets = [0, 0], sizes = [2, 128], strides = [1, 1]} : vector<2x512xf32> to vector<2x128xf32>
    %88 = arith.negf %87 : vector<2x128xf32>
    %89 = math.exp %88 : vector<2x128xf32>
    %cst_29 = arith.constant 1.000000e+00 : f32
    %90 = vector.broadcast %cst_29 : f32 to vector<2x128xf32>
    %91 = arith.addf %90, %89 : vector<2x128xf32>
    %92 = arith.divf %90, %91 : vector<2x128xf32>
    %93 = vector.extract_strided_slice %86 {offsets = [0, 256], sizes = [2, 128], strides = [1, 1]} : vector<2x512xf32> to vector<2x128xf32>
    %94 = math.tanh %93 : vector<2x128xf32>
    %95 = vector.extract_strided_slice %86 {offsets = [0, 384], sizes = [2, 128], strides = [1, 1]} : vector<2x512xf32> to vector<2x128xf32>
    %96 = arith.negf %95 : vector<2x128xf32>
    %97 = math.exp %96 : vector<2x128xf32>
    %cst_30 = arith.constant 1.000000e+00 : f32
    %98 = vector.broadcast %cst_30 : f32 to vector<2x128xf32>
    %99 = arith.addf %98, %97 : vector<2x128xf32>
    %100 = arith.divf %98, %99 : vector<2x128xf32>
    %101 = arith.mulf %92, %94 : vector<2x128xf32>
    %102 = vector.extract_strided_slice %86 {offsets = [0, 128], sizes = [2, 128], strides = [1, 1]} : vector<2x512xf32> to vector<2x128xf32>
    %103 = arith.negf %102 : vector<2x128xf32>
    %104 = math.exp %103 : vector<2x128xf32>
    %cst_31 = arith.constant 1.000000e+00 : f32
    %105 = vector.broadcast %cst_31 : f32 to vector<2x128xf32>
    %106 = arith.addf %105, %104 : vector<2x128xf32>
    %107 = arith.divf %105, %106 : vector<2x128xf32>
    %108 = arith.mulf %107, %80 : vector<2x128xf32>
    %109 = arith.addf %101, %108 : vector<2x128xf32>
    %110 = math.tanh %109 : vector<2x128xf32>
    %111 = arith.mulf %100, %110 : vector<2x128xf32>
    %c8 = arith.constant 8 : index
    %c0_32 = arith.constant 0 : index
    %112 = vector.load %arg10[%c8, %c0_32] : memref<40x512xf32, #tpu.memory_space<vmem>>, vector<2x512xf32>
    %c0_33 = arith.constant 0 : index
    %c0_34 = arith.constant 0 : index
    %113 = vector.load %arg3[%c0_33, %c0_34] : memref<128x512xf32, #tpu.memory_space<vmem>>, vector<128x512xf32>
    %cst_35 = arith.constant dense<0.000000e+00> : vector<2x512xf32>
    %114 = tpu.matmul %111, %113, %cst_35 {dimension_numbers = #tpu.dot_dimension_numbers<[1], [0], [0], [1], [0, 0, 1, 1], [], []>} : vector<2x128xf32>, vector<128x512xf32>, vector<2x512xf32> -> vector<2x512xf32>
    %115 = arith.addf %112, %114 : vector<2x512xf32>
    %116 = vector.extract_strided_slice %115 {offsets = [0, 0], sizes = [2, 128], strides = [1, 1]} : vector<2x512xf32> to vector<2x128xf32>
    %117 = arith.negf %116 : vector<2x128xf32>
    %118 = math.exp %117 : vector<2x128xf32>
    %cst_36 = arith.constant 1.000000e+00 : f32
    %119 = vector.broadcast %cst_36 : f32 to vector<2x128xf32>
    %120 = arith.addf %119, %118 : vector<2x128xf32>
    %121 = arith.divf %119, %120 : vector<2x128xf32>
    %122 = vector.extract_strided_slice %115 {offsets = [0, 256], sizes = [2, 128], strides = [1, 1]} : vector<2x512xf32> to vector<2x128xf32>
    %123 = math.tanh %122 : vector<2x128xf32>
    %124 = vector.extract_strided_slice %115 {offsets = [0, 384], sizes = [2, 128], strides = [1, 1]} : vector<2x512xf32> to vector<2x128xf32>
    %125 = arith.negf %124 : vector<2x128xf32>
    %126 = math.exp %125 : vector<2x128xf32>
    %cst_37 = arith.constant 1.000000e+00 : f32
    %127 = vector.broadcast %cst_37 : f32 to vector<2x128xf32>
    %128 = arith.addf %127, %126 : vector<2x128xf32>
    %129 = arith.divf %127, %128 : vector<2x128xf32>
    %130 = arith.mulf %121, %123 : vector<2x128xf32>
    %131 = vector.extract_strided_slice %115 {offsets = [0, 128], sizes = [2, 128], strides = [1, 1]} : vector<2x512xf32> to vector<2x128xf32>
    %132 = arith.negf %131 : vector<2x128xf32>
    %133 = math.exp %132 : vector<2x128xf32>
    %cst_38 = arith.constant 1.000000e+00 : f32
    %134 = vector.broadcast %cst_38 : f32 to vector<2x128xf32>
    %135 = arith.addf %134, %133 : vector<2x128xf32>
    %136 = arith.divf %134, %135 : vector<2x128xf32>
    %137 = arith.mulf %136, %109 : vector<2x128xf32>
    %138 = arith.addf %130, %137 : vector<2x128xf32>
    %139 = math.tanh %138 : vector<2x128xf32>
    %140 = arith.mulf %129, %139 : vector<2x128xf32>
    %c10 = arith.constant 10 : index
    %c0_39 = arith.constant 0 : index
    %141 = vector.load %arg10[%c10, %c0_39] : memref<40x512xf32, #tpu.memory_space<vmem>>, vector<2x512xf32>
    %c0_40 = arith.constant 0 : index
    %c0_41 = arith.constant 0 : index
    %142 = vector.load %arg3[%c0_40, %c0_41] : memref<128x512xf32, #tpu.memory_space<vmem>>, vector<128x512xf32>
    %cst_42 = arith.constant dense<0.000000e+00> : vector<2x512xf32>
    %143 = tpu.matmul %140, %142, %cst_42 {dimension_numbers = #tpu.dot_dimension_numbers<[1], [0], [0], [1], [0, 0, 1, 1], [], []>} : vector<2x128xf32>, vector<128x512xf32>, vector<2x512xf32> -> vector<2x512xf32>
    %144 = arith.addf %141, %143 : vector<2x512xf32>
    %145 = vector.extract_strided_slice %144 {offsets = [0, 0], sizes = [2, 128], strides = [1, 1]} : vector<2x512xf32> to vector<2x128xf32>
    %146 = arith.negf %145 : vector<2x128xf32>
    %147 = math.exp %146 : vector<2x128xf32>
    %cst_43 = arith.constant 1.000000e+00 : f32
    %148 = vector.broadcast %cst_43 : f32 to vector<2x128xf32>
    %149 = arith.addf %148, %147 : vector<2x128xf32>
    %150 = arith.divf %148, %149 : vector<2x128xf32>
    %151 = vector.extract_strided_slice %144 {offsets = [0, 256], sizes = [2, 128], strides = [1, 1]} : vector<2x512xf32> to vector<2x128xf32>
    %152 = math.tanh %151 : vector<2x128xf32>
    %153 = vector.extract_strided_slice %144 {offsets = [0, 384], sizes = [2, 128], strides = [1, 1]} : vector<2x512xf32> to vector<2x128xf32>
    %154 = arith.negf %153 : vector<2x128xf32>
    %155 = math.exp %154 : vector<2x128xf32>
    %cst_44 = arith.constant 1.000000e+00 : f32
    %156 = vector.broadcast %cst_44 : f32 to vector<2x128xf32>
    %157 = arith.addf %156, %155 : vector<2x128xf32>
    %158 = arith.divf %156, %157 : vector<2x128xf32>
    %159 = arith.mulf %150, %152 : vector<2x128xf32>
    %160 = vector.extract_strided_slice %144 {offsets = [0, 128], sizes = [2, 128], strides = [1, 1]} : vector<2x512xf32> to vector<2x128xf32>
    %161 = arith.negf %160 : vector<2x128xf32>
    %162 = math.exp %161 : vector<2x128xf32>
    %cst_45 = arith.constant 1.000000e+00 : f32
    %163 = vector.broadcast %cst_45 : f32 to vector<2x128xf32>
    %164 = arith.addf %163, %162 : vector<2x128xf32>
    %165 = arith.divf %163, %164 : vector<2x128xf32>
    %166 = arith.mulf %165, %138 : vector<2x128xf32>
    %167 = arith.addf %159, %166 : vector<2x128xf32>
    %168 = math.tanh %167 : vector<2x128xf32>
    %169 = arith.mulf %158, %168 : vector<2x128xf32>
    %c12 = arith.constant 12 : index
    %c0_46 = arith.constant 0 : index
    %170 = vector.load %arg10[%c12, %c0_46] : memref<40x512xf32, #tpu.memory_space<vmem>>, vector<2x512xf32>
    %c0_47 = arith.constant 0 : index
    %c0_48 = arith.constant 0 : index
    %171 = vector.load %arg3[%c0_47, %c0_48] : memref<128x512xf32, #tpu.memory_space<vmem>>, vector<128x512xf32>
    %cst_49 = arith.constant dense<0.000000e+00> : vector<2x512xf32>
    %172 = tpu.matmul %169, %171, %cst_49 {dimension_numbers = #tpu.dot_dimension_numbers<[1], [0], [0], [1], [0, 0, 1, 1], [], []>} : vector<2x128xf32>, vector<128x512xf32>, vector<2x512xf32> -> vector<2x512xf32>
    %173 = arith.addf %170, %172 : vector<2x512xf32>
    %174 = vector.extract_strided_slice %173 {offsets = [0, 0], sizes = [2, 128], strides = [1, 1]} : vector<2x512xf32> to vector<2x128xf32>
    %175 = arith.negf %174 : vector<2x128xf32>
    %176 = math.exp %175 : vector<2x128xf32>
    %cst_50 = arith.constant 1.000000e+00 : f32
    %177 = vector.broadcast %cst_50 : f32 to vector<2x128xf32>
    %178 = arith.addf %177, %176 : vector<2x128xf32>
    %179 = arith.divf %177, %178 : vector<2x128xf32>
    %180 = vector.extract_strided_slice %173 {offsets = [0, 256], sizes = [2, 128], strides = [1, 1]} : vector<2x512xf32> to vector<2x128xf32>
    %181 = math.tanh %180 : vector<2x128xf32>
    %182 = vector.extract_strided_slice %173 {offsets = [0, 384], sizes = [2, 128], strides = [1, 1]} : vector<2x512xf32> to vector<2x128xf32>
    %183 = arith.negf %182 : vector<2x128xf32>
    %184 = math.exp %183 : vector<2x128xf32>
    %cst_51 = arith.constant 1.000000e+00 : f32
    %185 = vector.broadcast %cst_51 : f32 to vector<2x128xf32>
    %186 = arith.addf %185, %184 : vector<2x128xf32>
    %187 = arith.divf %185, %186 : vector<2x128xf32>
    %188 = arith.mulf %179, %181 : vector<2x128xf32>
    %189 = vector.extract_strided_slice %173 {offsets = [0, 128], sizes = [2, 128], strides = [1, 1]} : vector<2x512xf32> to vector<2x128xf32>
    %190 = arith.negf %189 : vector<2x128xf32>
    %191 = math.exp %190 : vector<2x128xf32>
    %cst_52 = arith.constant 1.000000e+00 : f32
    %192 = vector.broadcast %cst_52 : f32 to vector<2x128xf32>
    %193 = arith.addf %192, %191 : vector<2x128xf32>
    %194 = arith.divf %192, %193 : vector<2x128xf32>
    %195 = arith.mulf %194, %167 : vector<2x128xf32>
    %196 = arith.addf %188, %195 : vector<2x128xf32>
    %197 = math.tanh %196 : vector<2x128xf32>
    %198 = arith.mulf %187, %197 : vector<2x128xf32>
    %c14 = arith.constant 14 : index
    %c0_53 = arith.constant 0 : index
    %199 = vector.load %arg10[%c14, %c0_53] : memref<40x512xf32, #tpu.memory_space<vmem>>, vector<2x512xf32>
    %c0_54 = arith.constant 0 : index
    %c0_55 = arith.constant 0 : index
    %200 = vector.load %arg3[%c0_54, %c0_55] : memref<128x512xf32, #tpu.memory_space<vmem>>, vector<128x512xf32>
    %cst_56 = arith.constant dense<0.000000e+00> : vector<2x512xf32>
    %201 = tpu.matmul %198, %200, %cst_56 {dimension_numbers = #tpu.dot_dimension_numbers<[1], [0], [0], [1], [0, 0, 1, 1], [], []>} : vector<2x128xf32>, vector<128x512xf32>, vector<2x512xf32> -> vector<2x512xf32>
    %202 = arith.addf %199, %201 : vector<2x512xf32>
    %203 = vector.extract_strided_slice %202 {offsets = [0, 0], sizes = [2, 128], strides = [1, 1]} : vector<2x512xf32> to vector<2x128xf32>
    %204 = arith.negf %203 : vector<2x128xf32>
    %205 = math.exp %204 : vector<2x128xf32>
    %cst_57 = arith.constant 1.000000e+00 : f32
    %206 = vector.broadcast %cst_57 : f32 to vector<2x128xf32>
    %207 = arith.addf %206, %205 : vector<2x128xf32>
    %208 = arith.divf %206, %207 : vector<2x128xf32>
    %209 = vector.extract_strided_slice %202 {offsets = [0, 256], sizes = [2, 128], strides = [1, 1]} : vector<2x512xf32> to vector<2x128xf32>
    %210 = math.tanh %209 : vector<2x128xf32>
    %211 = vector.extract_strided_slice %202 {offsets = [0, 384], sizes = [2, 128], strides = [1, 1]} : vector<2x512xf32> to vector<2x128xf32>
    %212 = arith.negf %211 : vector<2x128xf32>
    %213 = math.exp %212 : vector<2x128xf32>
    %cst_58 = arith.constant 1.000000e+00 : f32
    %214 = vector.broadcast %cst_58 : f32 to vector<2x128xf32>
    %215 = arith.addf %214, %213 : vector<2x128xf32>
    %216 = arith.divf %214, %215 : vector<2x128xf32>
    %217 = arith.mulf %208, %210 : vector<2x128xf32>
    %218 = vector.extract_strided_slice %202 {offsets = [0, 128], sizes = [2, 128], strides = [1, 1]} : vector<2x512xf32> to vector<2x128xf32>
    %219 = arith.negf %218 : vector<2x128xf32>
    %220 = math.exp %219 : vector<2x128xf32>
    %cst_59 = arith.constant 1.000000e+00 : f32
    %221 = vector.broadcast %cst_59 : f32 to vector<2x128xf32>
    %222 = arith.addf %221, %220 : vector<2x128xf32>
    %223 = arith.divf %221, %222 : vector<2x128xf32>
    %224 = arith.mulf %223, %196 : vector<2x128xf32>
    %225 = arith.addf %217, %224 : vector<2x128xf32>
    %226 = math.tanh %225 : vector<2x128xf32>
    %227 = arith.mulf %216, %226 : vector<2x128xf32>
    %c16 = arith.constant 16 : index
    %c0_60 = arith.constant 0 : index
    %228 = vector.load %arg10[%c16, %c0_60] : memref<40x512xf32, #tpu.memory_space<vmem>>, vector<2x512xf32>
    %c0_61 = arith.constant 0 : index
    %c0_62 = arith.constant 0 : index
    %229 = vector.load %arg3[%c0_61, %c0_62] : memref<128x512xf32, #tpu.memory_space<vmem>>, vector<128x512xf32>
    %cst_63 = arith.constant dense<0.000000e+00> : vector<2x512xf32>
    %230 = tpu.matmul %227, %229, %cst_63 {dimension_numbers = #tpu.dot_dimension_numbers<[1], [0], [0], [1], [0, 0, 1, 1], [], []>} : vector<2x128xf32>, vector<128x512xf32>, vector<2x512xf32> -> vector<2x512xf32>
    %231 = arith.addf %228, %230 : vector<2x512xf32>
    %232 = vector.extract_strided_slice %231 {offsets = [0, 0], sizes = [2, 128], strides = [1, 1]} : vector<2x512xf32> to vector<2x128xf32>
    %233 = arith.negf %232 : vector<2x128xf32>
    %234 = math.exp %233 : vector<2x128xf32>
    %cst_64 = arith.constant 1.000000e+00 : f32
    %235 = vector.broadcast %cst_64 : f32 to vector<2x128xf32>
    %236 = arith.addf %235, %234 : vector<2x128xf32>
    %237 = arith.divf %235, %236 : vector<2x128xf32>
    %238 = vector.extract_strided_slice %231 {offsets = [0, 256], sizes = [2, 128], strides = [1, 1]} : vector<2x512xf32> to vector<2x128xf32>
    %239 = math.tanh %238 : vector<2x128xf32>
    %240 = vector.extract_strided_slice %231 {offsets = [0, 384], sizes = [2, 128], strides = [1, 1]} : vector<2x512xf32> to vector<2x128xf32>
    %241 = arith.negf %240 : vector<2x128xf32>
    %242 = math.exp %241 : vector<2x128xf32>
    %cst_65 = arith.constant 1.000000e+00 : f32
    %243 = vector.broadcast %cst_65 : f32 to vector<2x128xf32>
    %244 = arith.addf %243, %242 : vector<2x128xf32>
    %245 = arith.divf %243, %244 : vector<2x128xf32>
    %246 = arith.mulf %237, %239 : vector<2x128xf32>
    %247 = vector.extract_strided_slice %231 {offsets = [0, 128], sizes = [2, 128], strides = [1, 1]} : vector<2x512xf32> to vector<2x128xf32>
    %248 = arith.negf %247 : vector<2x128xf32>
    %249 = math.exp %248 : vector<2x128xf32>
    %cst_66 = arith.constant 1.000000e+00 : f32
    %250 = vector.broadcast %cst_66 : f32 to vector<2x128xf32>
    %251 = arith.addf %250, %249 : vector<2x128xf32>
    %252 = arith.divf %250, %251 : vector<2x128xf32>
    %253 = arith.mulf %252, %225 : vector<2x128xf32>
    %254 = arith.addf %246, %253 : vector<2x128xf32>
    %255 = math.tanh %254 : vector<2x128xf32>
    %256 = arith.mulf %245, %255 : vector<2x128xf32>
    %c18 = arith.constant 18 : index
    %c0_67 = arith.constant 0 : index
    %257 = vector.load %arg10[%c18, %c0_67] : memref<40x512xf32, #tpu.memory_space<vmem>>, vector<2x512xf32>
    %c0_68 = arith.constant 0 : index
    %c0_69 = arith.constant 0 : index
    %258 = vector.load %arg3[%c0_68, %c0_69] : memref<128x512xf32, #tpu.memory_space<vmem>>, vector<128x512xf32>
    %cst_70 = arith.constant dense<0.000000e+00> : vector<2x512xf32>
    %259 = tpu.matmul %256, %258, %cst_70 {dimension_numbers = #tpu.dot_dimension_numbers<[1], [0], [0], [1], [0, 0, 1, 1], [], []>} : vector<2x128xf32>, vector<128x512xf32>, vector<2x512xf32> -> vector<2x512xf32>
    %260 = arith.addf %257, %259 : vector<2x512xf32>
    %261 = vector.extract_strided_slice %260 {offsets = [0, 0], sizes = [2, 128], strides = [1, 1]} : vector<2x512xf32> to vector<2x128xf32>
    %262 = arith.negf %261 : vector<2x128xf32>
    %263 = math.exp %262 : vector<2x128xf32>
    %cst_71 = arith.constant 1.000000e+00 : f32
    %264 = vector.broadcast %cst_71 : f32 to vector<2x128xf32>
    %265 = arith.addf %264, %263 : vector<2x128xf32>
    %266 = arith.divf %264, %265 : vector<2x128xf32>
    %267 = vector.extract_strided_slice %260 {offsets = [0, 256], sizes = [2, 128], strides = [1, 1]} : vector<2x512xf32> to vector<2x128xf32>
    %268 = math.tanh %267 : vector<2x128xf32>
    %269 = vector.extract_strided_slice %260 {offsets = [0, 384], sizes = [2, 128], strides = [1, 1]} : vector<2x512xf32> to vector<2x128xf32>
    %270 = arith.negf %269 : vector<2x128xf32>
    %271 = math.exp %270 : vector<2x128xf32>
    %cst_72 = arith.constant 1.000000e+00 : f32
    %272 = vector.broadcast %cst_72 : f32 to vector<2x128xf32>
    %273 = arith.addf %272, %271 : vector<2x128xf32>
    %274 = arith.divf %272, %273 : vector<2x128xf32>
    %275 = arith.mulf %266, %268 : vector<2x128xf32>
    %276 = vector.extract_strided_slice %260 {offsets = [0, 128], sizes = [2, 128], strides = [1, 1]} : vector<2x512xf32> to vector<2x128xf32>
    %277 = arith.negf %276 : vector<2x128xf32>
    %278 = math.exp %277 : vector<2x128xf32>
    %cst_73 = arith.constant 1.000000e+00 : f32
    %279 = vector.broadcast %cst_73 : f32 to vector<2x128xf32>
    %280 = arith.addf %279, %278 : vector<2x128xf32>
    %281 = arith.divf %279, %280 : vector<2x128xf32>
    %282 = arith.mulf %281, %254 : vector<2x128xf32>
    %283 = arith.addf %275, %282 : vector<2x128xf32>
    %284 = math.tanh %283 : vector<2x128xf32>
    %285 = arith.mulf %274, %284 : vector<2x128xf32>
    %c20 = arith.constant 20 : index
    %c0_74 = arith.constant 0 : index
    %286 = vector.load %arg10[%c20, %c0_74] : memref<40x512xf32, #tpu.memory_space<vmem>>, vector<2x512xf32>
    %c0_75 = arith.constant 0 : index
    %c0_76 = arith.constant 0 : index
    %287 = vector.load %arg3[%c0_75, %c0_76] : memref<128x512xf32, #tpu.memory_space<vmem>>, vector<128x512xf32>
    %cst_77 = arith.constant dense<0.000000e+00> : vector<2x512xf32>
    %288 = tpu.matmul %285, %287, %cst_77 {dimension_numbers = #tpu.dot_dimension_numbers<[1], [0], [0], [1], [0, 0, 1, 1], [], []>} : vector<2x128xf32>, vector<128x512xf32>, vector<2x512xf32> -> vector<2x512xf32>
    %289 = arith.addf %286, %288 : vector<2x512xf32>
    %290 = vector.extract_strided_slice %289 {offsets = [0, 0], sizes = [2, 128], strides = [1, 1]} : vector<2x512xf32> to vector<2x128xf32>
    %291 = arith.negf %290 : vector<2x128xf32>
    %292 = math.exp %291 : vector<2x128xf32>
    %cst_78 = arith.constant 1.000000e+00 : f32
    %293 = vector.broadcast %cst_78 : f32 to vector<2x128xf32>
    %294 = arith.addf %293, %292 : vector<2x128xf32>
    %295 = arith.divf %293, %294 : vector<2x128xf32>
    %296 = vector.extract_strided_slice %289 {offsets = [0, 256], sizes = [2, 128], strides = [1, 1]} : vector<2x512xf32> to vector<2x128xf32>
    %297 = math.tanh %296 : vector<2x128xf32>
    %298 = vector.extract_strided_slice %289 {offsets = [0, 384], sizes = [2, 128], strides = [1, 1]} : vector<2x512xf32> to vector<2x128xf32>
    %299 = arith.negf %298 : vector<2x128xf32>
    %300 = math.exp %299 : vector<2x128xf32>
    %cst_79 = arith.constant 1.000000e+00 : f32
    %301 = vector.broadcast %cst_79 : f32 to vector<2x128xf32>
    %302 = arith.addf %301, %300 : vector<2x128xf32>
    %303 = arith.divf %301, %302 : vector<2x128xf32>
    %304 = arith.mulf %295, %297 : vector<2x128xf32>
    %305 = vector.extract_strided_slice %289 {offsets = [0, 128], sizes = [2, 128], strides = [1, 1]} : vector<2x512xf32> to vector<2x128xf32>
    %306 = arith.negf %305 : vector<2x128xf32>
    %307 = math.exp %306 : vector<2x128xf32>
    %cst_80 = arith.constant 1.000000e+00 : f32
    %308 = vector.broadcast %cst_80 : f32 to vector<2x128xf32>
    %309 = arith.addf %308, %307 : vector<2x128xf32>
    %310 = arith.divf %308, %309 : vector<2x128xf32>
    %311 = arith.mulf %310, %283 : vector<2x128xf32>
    %312 = arith.addf %304, %311 : vector<2x128xf32>
    %313 = math.tanh %312 : vector<2x128xf32>
    %314 = arith.mulf %303, %313 : vector<2x128xf32>
    %c22 = arith.constant 22 : index
    %c0_81 = arith.constant 0 : index
    %315 = vector.load %arg10[%c22, %c0_81] : memref<40x512xf32, #tpu.memory_space<vmem>>, vector<2x512xf32>
    %c0_82 = arith.constant 0 : index
    %c0_83 = arith.constant 0 : index
    %316 = vector.load %arg3[%c0_82, %c0_83] : memref<128x512xf32, #tpu.memory_space<vmem>>, vector<128x512xf32>
    %cst_84 = arith.constant dense<0.000000e+00> : vector<2x512xf32>
    %317 = tpu.matmul %314, %316, %cst_84 {dimension_numbers = #tpu.dot_dimension_numbers<[1], [0], [0], [1], [0, 0, 1, 1], [], []>} : vector<2x128xf32>, vector<128x512xf32>, vector<2x512xf32> -> vector<2x512xf32>
    %318 = arith.addf %315, %317 : vector<2x512xf32>
    %319 = vector.extract_strided_slice %318 {offsets = [0, 0], sizes = [2, 128], strides = [1, 1]} : vector<2x512xf32> to vector<2x128xf32>
    %320 = arith.negf %319 : vector<2x128xf32>
    %321 = math.exp %320 : vector<2x128xf32>
    %cst_85 = arith.constant 1.000000e+00 : f32
    %322 = vector.broadcast %cst_85 : f32 to vector<2x128xf32>
    %323 = arith.addf %322, %321 : vector<2x128xf32>
    %324 = arith.divf %322, %323 : vector<2x128xf32>
    %325 = vector.extract_strided_slice %318 {offsets = [0, 256], sizes = [2, 128], strides = [1, 1]} : vector<2x512xf32> to vector<2x128xf32>
    %326 = math.tanh %325 : vector<2x128xf32>
    %327 = vector.extract_strided_slice %318 {offsets = [0, 384], sizes = [2, 128], strides = [1, 1]} : vector<2x512xf32> to vector<2x128xf32>
    %328 = arith.negf %327 : vector<2x128xf32>
    %329 = math.exp %328 : vector<2x128xf32>
    %cst_86 = arith.constant 1.000000e+00 : f32
    %330 = vector.broadcast %cst_86 : f32 to vector<2x128xf32>
    %331 = arith.addf %330, %329 : vector<2x128xf32>
    %332 = arith.divf %330, %331 : vector<2x128xf32>
    %333 = arith.mulf %324, %326 : vector<2x128xf32>
    %334 = vector.extract_strided_slice %318 {offsets = [0, 128], sizes = [2, 128], strides = [1, 1]} : vector<2x512xf32> to vector<2x128xf32>
    %335 = arith.negf %334 : vector<2x128xf32>
    %336 = math.exp %335 : vector<2x128xf32>
    %cst_87 = arith.constant 1.000000e+00 : f32
    %337 = vector.broadcast %cst_87 : f32 to vector<2x128xf32>
    %338 = arith.addf %337, %336 : vector<2x128xf32>
    %339 = arith.divf %337, %338 : vector<2x128xf32>
    %340 = arith.mulf %339, %312 : vector<2x128xf32>
    %341 = arith.addf %333, %340 : vector<2x128xf32>
    %342 = math.tanh %341 : vector<2x128xf32>
    %343 = arith.mulf %332, %342 : vector<2x128xf32>
    %c24 = arith.constant 24 : index
    %c0_88 = arith.constant 0 : index
    %344 = vector.load %arg10[%c24, %c0_88] : memref<40x512xf32, #tpu.memory_space<vmem>>, vector<2x512xf32>
    %c0_89 = arith.constant 0 : index
    %c0_90 = arith.constant 0 : index
    %345 = vector.load %arg3[%c0_89, %c0_90] : memref<128x512xf32, #tpu.memory_space<vmem>>, vector<128x512xf32>
    %cst_91 = arith.constant dense<0.000000e+00> : vector<2x512xf32>
    %346 = tpu.matmul %343, %345, %cst_91 {dimension_numbers = #tpu.dot_dimension_numbers<[1], [0], [0], [1], [0, 0, 1, 1], [], []>} : vector<2x128xf32>, vector<128x512xf32>, vector<2x512xf32> -> vector<2x512xf32>
    %347 = arith.addf %344, %346 : vector<2x512xf32>
    %348 = vector.extract_strided_slice %347 {offsets = [0, 0], sizes = [2, 128], strides = [1, 1]} : vector<2x512xf32> to vector<2x128xf32>
    %349 = arith.negf %348 : vector<2x128xf32>
    %350 = math.exp %349 : vector<2x128xf32>
    %cst_92 = arith.constant 1.000000e+00 : f32
    %351 = vector.broadcast %cst_92 : f32 to vector<2x128xf32>
    %352 = arith.addf %351, %350 : vector<2x128xf32>
    %353 = arith.divf %351, %352 : vector<2x128xf32>
    %354 = vector.extract_strided_slice %347 {offsets = [0, 256], sizes = [2, 128], strides = [1, 1]} : vector<2x512xf32> to vector<2x128xf32>
    %355 = math.tanh %354 : vector<2x128xf32>
    %356 = vector.extract_strided_slice %347 {offsets = [0, 384], sizes = [2, 128], strides = [1, 1]} : vector<2x512xf32> to vector<2x128xf32>
    %357 = arith.negf %356 : vector<2x128xf32>
    %358 = math.exp %357 : vector<2x128xf32>
    %cst_93 = arith.constant 1.000000e+00 : f32
    %359 = vector.broadcast %cst_93 : f32 to vector<2x128xf32>
    %360 = arith.addf %359, %358 : vector<2x128xf32>
    %361 = arith.divf %359, %360 : vector<2x128xf32>
    %362 = arith.mulf %353, %355 : vector<2x128xf32>
    %363 = vector.extract_strided_slice %347 {offsets = [0, 128], sizes = [2, 128], strides = [1, 1]} : vector<2x512xf32> to vector<2x128xf32>
    %364 = arith.negf %363 : vector<2x128xf32>
    %365 = math.exp %364 : vector<2x128xf32>
    %cst_94 = arith.constant 1.000000e+00 : f32
    %366 = vector.broadcast %cst_94 : f32 to vector<2x128xf32>
    %367 = arith.addf %366, %365 : vector<2x128xf32>
    %368 = arith.divf %366, %367 : vector<2x128xf32>
    %369 = arith.mulf %368, %341 : vector<2x128xf32>
    %370 = arith.addf %362, %369 : vector<2x128xf32>
    %371 = math.tanh %370 : vector<2x128xf32>
    %372 = arith.mulf %361, %371 : vector<2x128xf32>
    %c26 = arith.constant 26 : index
    %c0_95 = arith.constant 0 : index
    %373 = vector.load %arg10[%c26, %c0_95] : memref<40x512xf32, #tpu.memory_space<vmem>>, vector<2x512xf32>
    %c0_96 = arith.constant 0 : index
    %c0_97 = arith.constant 0 : index
    %374 = vector.load %arg3[%c0_96, %c0_97] : memref<128x512xf32, #tpu.memory_space<vmem>>, vector<128x512xf32>
    %cst_98 = arith.constant dense<0.000000e+00> : vector<2x512xf32>
    %375 = tpu.matmul %372, %374, %cst_98 {dimension_numbers = #tpu.dot_dimension_numbers<[1], [0], [0], [1], [0, 0, 1, 1], [], []>} : vector<2x128xf32>, vector<128x512xf32>, vector<2x512xf32> -> vector<2x512xf32>
    %376 = arith.addf %373, %375 : vector<2x512xf32>
    %377 = vector.extract_strided_slice %376 {offsets = [0, 0], sizes = [2, 128], strides = [1, 1]} : vector<2x512xf32> to vector<2x128xf32>
    %378 = arith.negf %377 : vector<2x128xf32>
    %379 = math.exp %378 : vector<2x128xf32>
    %cst_99 = arith.constant 1.000000e+00 : f32
    %380 = vector.broadcast %cst_99 : f32 to vector<2x128xf32>
    %381 = arith.addf %380, %379 : vector<2x128xf32>
    %382 = arith.divf %380, %381 : vector<2x128xf32>
    %383 = vector.extract_strided_slice %376 {offsets = [0, 256], sizes = [2, 128], strides = [1, 1]} : vector<2x512xf32> to vector<2x128xf32>
    %384 = math.tanh %383 : vector<2x128xf32>
    %385 = vector.extract_strided_slice %376 {offsets = [0, 384], sizes = [2, 128], strides = [1, 1]} : vector<2x512xf32> to vector<2x128xf32>
    %386 = arith.negf %385 : vector<2x128xf32>
    %387 = math.exp %386 : vector<2x128xf32>
    %cst_100 = arith.constant 1.000000e+00 : f32
    %388 = vector.broadcast %cst_100 : f32 to vector<2x128xf32>
    %389 = arith.addf %388, %387 : vector<2x128xf32>
    %390 = arith.divf %388, %389 : vector<2x128xf32>
    %391 = arith.mulf %382, %384 : vector<2x128xf32>
    %392 = vector.extract_strided_slice %376 {offsets = [0, 128], sizes = [2, 128], strides = [1, 1]} : vector<2x512xf32> to vector<2x128xf32>
    %393 = arith.negf %392 : vector<2x128xf32>
    %394 = math.exp %393 : vector<2x128xf32>
    %cst_101 = arith.constant 1.000000e+00 : f32
    %395 = vector.broadcast %cst_101 : f32 to vector<2x128xf32>
    %396 = arith.addf %395, %394 : vector<2x128xf32>
    %397 = arith.divf %395, %396 : vector<2x128xf32>
    %398 = arith.mulf %397, %370 : vector<2x128xf32>
    %399 = arith.addf %391, %398 : vector<2x128xf32>
    %400 = math.tanh %399 : vector<2x128xf32>
    %401 = arith.mulf %390, %400 : vector<2x128xf32>
    %c28 = arith.constant 28 : index
    %c0_102 = arith.constant 0 : index
    %402 = vector.load %arg10[%c28, %c0_102] : memref<40x512xf32, #tpu.memory_space<vmem>>, vector<2x512xf32>
    %c0_103 = arith.constant 0 : index
    %c0_104 = arith.constant 0 : index
    %403 = vector.load %arg3[%c0_103, %c0_104] : memref<128x512xf32, #tpu.memory_space<vmem>>, vector<128x512xf32>
    %cst_105 = arith.constant dense<0.000000e+00> : vector<2x512xf32>
    %404 = tpu.matmul %401, %403, %cst_105 {dimension_numbers = #tpu.dot_dimension_numbers<[1], [0], [0], [1], [0, 0, 1, 1], [], []>} : vector<2x128xf32>, vector<128x512xf32>, vector<2x512xf32> -> vector<2x512xf32>
    %405 = arith.addf %402, %404 : vector<2x512xf32>
    %406 = vector.extract_strided_slice %405 {offsets = [0, 0], sizes = [2, 128], strides = [1, 1]} : vector<2x512xf32> to vector<2x128xf32>
    %407 = arith.negf %406 : vector<2x128xf32>
    %408 = math.exp %407 : vector<2x128xf32>
    %cst_106 = arith.constant 1.000000e+00 : f32
    %409 = vector.broadcast %cst_106 : f32 to vector<2x128xf32>
    %410 = arith.addf %409, %408 : vector<2x128xf32>
    %411 = arith.divf %409, %410 : vector<2x128xf32>
    %412 = vector.extract_strided_slice %405 {offsets = [0, 256], sizes = [2, 128], strides = [1, 1]} : vector<2x512xf32> to vector<2x128xf32>
    %413 = math.tanh %412 : vector<2x128xf32>
    %414 = vector.extract_strided_slice %405 {offsets = [0, 384], sizes = [2, 128], strides = [1, 1]} : vector<2x512xf32> to vector<2x128xf32>
    %415 = arith.negf %414 : vector<2x128xf32>
    %416 = math.exp %415 : vector<2x128xf32>
    %cst_107 = arith.constant 1.000000e+00 : f32
    %417 = vector.broadcast %cst_107 : f32 to vector<2x128xf32>
    %418 = arith.addf %417, %416 : vector<2x128xf32>
    %419 = arith.divf %417, %418 : vector<2x128xf32>
    %420 = arith.mulf %411, %413 : vector<2x128xf32>
    %421 = vector.extract_strided_slice %405 {offsets = [0, 128], sizes = [2, 128], strides = [1, 1]} : vector<2x512xf32> to vector<2x128xf32>
    %422 = arith.negf %421 : vector<2x128xf32>
    %423 = math.exp %422 : vector<2x128xf32>
    %cst_108 = arith.constant 1.000000e+00 : f32
    %424 = vector.broadcast %cst_108 : f32 to vector<2x128xf32>
    %425 = arith.addf %424, %423 : vector<2x128xf32>
    %426 = arith.divf %424, %425 : vector<2x128xf32>
    %427 = arith.mulf %426, %399 : vector<2x128xf32>
    %428 = arith.addf %420, %427 : vector<2x128xf32>
    %429 = math.tanh %428 : vector<2x128xf32>
    %430 = arith.mulf %419, %429 : vector<2x128xf32>
    %c30 = arith.constant 30 : index
    %c0_109 = arith.constant 0 : index
    %431 = vector.load %arg10[%c30, %c0_109] : memref<40x512xf32, #tpu.memory_space<vmem>>, vector<2x512xf32>
    %c0_110 = arith.constant 0 : index
    %c0_111 = arith.constant 0 : index
    %432 = vector.load %arg3[%c0_110, %c0_111] : memref<128x512xf32, #tpu.memory_space<vmem>>, vector<128x512xf32>
    %cst_112 = arith.constant dense<0.000000e+00> : vector<2x512xf32>
    %433 = tpu.matmul %430, %432, %cst_112 {dimension_numbers = #tpu.dot_dimension_numbers<[1], [0], [0], [1], [0, 0, 1, 1], [], []>} : vector<2x128xf32>, vector<128x512xf32>, vector<2x512xf32> -> vector<2x512xf32>
    %434 = arith.addf %431, %433 : vector<2x512xf32>
    %435 = vector.extract_strided_slice %434 {offsets = [0, 0], sizes = [2, 128], strides = [1, 1]} : vector<2x512xf32> to vector<2x128xf32>
    %436 = arith.negf %435 : vector<2x128xf32>
    %437 = math.exp %436 : vector<2x128xf32>
    %cst_113 = arith.constant 1.000000e+00 : f32
    %438 = vector.broadcast %cst_113 : f32 to vector<2x128xf32>
    %439 = arith.addf %438, %437 : vector<2x128xf32>
    %440 = arith.divf %438, %439 : vector<2x128xf32>
    %441 = vector.extract_strided_slice %434 {offsets = [0, 256], sizes = [2, 128], strides = [1, 1]} : vector<2x512xf32> to vector<2x128xf32>
    %442 = math.tanh %441 : vector<2x128xf32>
    %443 = vector.extract_strided_slice %434 {offsets = [0, 384], sizes = [2, 128], strides = [1, 1]} : vector<2x512xf32> to vector<2x128xf32>
    %444 = arith.negf %443 : vector<2x128xf32>
    %445 = math.exp %444 : vector<2x128xf32>
    %cst_114 = arith.constant 1.000000e+00 : f32
    %446 = vector.broadcast %cst_114 : f32 to vector<2x128xf32>
    %447 = arith.addf %446, %445 : vector<2x128xf32>
    %448 = arith.divf %446, %447 : vector<2x128xf32>
    %449 = arith.mulf %440, %442 : vector<2x128xf32>
    %450 = vector.extract_strided_slice %434 {offsets = [0, 128], sizes = [2, 128], strides = [1, 1]} : vector<2x512xf32> to vector<2x128xf32>
    %451 = arith.negf %450 : vector<2x128xf32>
    %452 = math.exp %451 : vector<2x128xf32>
    %cst_115 = arith.constant 1.000000e+00 : f32
    %453 = vector.broadcast %cst_115 : f32 to vector<2x128xf32>
    %454 = arith.addf %453, %452 : vector<2x128xf32>
    %455 = arith.divf %453, %454 : vector<2x128xf32>
    %456 = arith.mulf %455, %428 : vector<2x128xf32>
    %457 = arith.addf %449, %456 : vector<2x128xf32>
    %458 = math.tanh %457 : vector<2x128xf32>
    %459 = arith.mulf %448, %458 : vector<2x128xf32>
    %c32 = arith.constant 32 : index
    %c0_116 = arith.constant 0 : index
    %460 = vector.load %arg10[%c32, %c0_116] : memref<40x512xf32, #tpu.memory_space<vmem>>, vector<2x512xf32>
    %c0_117 = arith.constant 0 : index
    %c0_118 = arith.constant 0 : index
    %461 = vector.load %arg3[%c0_117, %c0_118] : memref<128x512xf32, #tpu.memory_space<vmem>>, vector<128x512xf32>
    %cst_119 = arith.constant dense<0.000000e+00> : vector<2x512xf32>
    %462 = tpu.matmul %459, %461, %cst_119 {dimension_numbers = #tpu.dot_dimension_numbers<[1], [0], [0], [1], [0, 0, 1, 1], [], []>} : vector<2x128xf32>, vector<128x512xf32>, vector<2x512xf32> -> vector<2x512xf32>
    %463 = arith.addf %460, %462 : vector<2x512xf32>
    %464 = vector.extract_strided_slice %463 {offsets = [0, 0], sizes = [2, 128], strides = [1, 1]} : vector<2x512xf32> to vector<2x128xf32>
    %465 = arith.negf %464 : vector<2x128xf32>
    %466 = math.exp %465 : vector<2x128xf32>
    %cst_120 = arith.constant 1.000000e+00 : f32
    %467 = vector.broadcast %cst_120 : f32 to vector<2x128xf32>
    %468 = arith.addf %467, %466 : vector<2x128xf32>
    %469 = arith.divf %467, %468 : vector<2x128xf32>
    %470 = vector.extract_strided_slice %463 {offsets = [0, 256], sizes = [2, 128], strides = [1, 1]} : vector<2x512xf32> to vector<2x128xf32>
    %471 = math.tanh %470 : vector<2x128xf32>
    %472 = vector.extract_strided_slice %463 {offsets = [0, 384], sizes = [2, 128], strides = [1, 1]} : vector<2x512xf32> to vector<2x128xf32>
    %473 = arith.negf %472 : vector<2x128xf32>
    %474 = math.exp %473 : vector<2x128xf32>
    %cst_121 = arith.constant 1.000000e+00 : f32
    %475 = vector.broadcast %cst_121 : f32 to vector<2x128xf32>
    %476 = arith.addf %475, %474 : vector<2x128xf32>
    %477 = arith.divf %475, %476 : vector<2x128xf32>
    %478 = arith.mulf %469, %471 : vector<2x128xf32>
    %479 = vector.extract_strided_slice %463 {offsets = [0, 128], sizes = [2, 128], strides = [1, 1]} : vector<2x512xf32> to vector<2x128xf32>
    %480 = arith.negf %479 : vector<2x128xf32>
    %481 = math.exp %480 : vector<2x128xf32>
    %cst_122 = arith.constant 1.000000e+00 : f32
    %482 = vector.broadcast %cst_122 : f32 to vector<2x128xf32>
    %483 = arith.addf %482, %481 : vector<2x128xf32>
    %484 = arith.divf %482, %483 : vector<2x128xf32>
    %485 = arith.mulf %484, %457 : vector<2x128xf32>
    %486 = arith.addf %478, %485 : vector<2x128xf32>
    %487 = math.tanh %486 : vector<2x128xf32>
    %488 = arith.mulf %477, %487 : vector<2x128xf32>
    %c34 = arith.constant 34 : index
    %c0_123 = arith.constant 0 : index
    %489 = vector.load %arg10[%c34, %c0_123] : memref<40x512xf32, #tpu.memory_space<vmem>>, vector<2x512xf32>
    %c0_124 = arith.constant 0 : index
    %c0_125 = arith.constant 0 : index
    %490 = vector.load %arg3[%c0_124, %c0_125] : memref<128x512xf32, #tpu.memory_space<vmem>>, vector<128x512xf32>
    %cst_126 = arith.constant dense<0.000000e+00> : vector<2x512xf32>
    %491 = tpu.matmul %488, %490, %cst_126 {dimension_numbers = #tpu.dot_dimension_numbers<[1], [0], [0], [1], [0, 0, 1, 1], [], []>} : vector<2x128xf32>, vector<128x512xf32>, vector<2x512xf32> -> vector<2x512xf32>
    %492 = arith.addf %489, %491 : vector<2x512xf32>
    %493 = vector.extract_strided_slice %492 {offsets = [0, 0], sizes = [2, 128], strides = [1, 1]} : vector<2x512xf32> to vector<2x128xf32>
    %494 = arith.negf %493 : vector<2x128xf32>
    %495 = math.exp %494 : vector<2x128xf32>
    %cst_127 = arith.constant 1.000000e+00 : f32
    %496 = vector.broadcast %cst_127 : f32 to vector<2x128xf32>
    %497 = arith.addf %496, %495 : vector<2x128xf32>
    %498 = arith.divf %496, %497 : vector<2x128xf32>
    %499 = vector.extract_strided_slice %492 {offsets = [0, 256], sizes = [2, 128], strides = [1, 1]} : vector<2x512xf32> to vector<2x128xf32>
    %500 = math.tanh %499 : vector<2x128xf32>
    %501 = vector.extract_strided_slice %492 {offsets = [0, 384], sizes = [2, 128], strides = [1, 1]} : vector<2x512xf32> to vector<2x128xf32>
    %502 = arith.negf %501 : vector<2x128xf32>
    %503 = math.exp %502 : vector<2x128xf32>
    %cst_128 = arith.constant 1.000000e+00 : f32
    %504 = vector.broadcast %cst_128 : f32 to vector<2x128xf32>
    %505 = arith.addf %504, %503 : vector<2x128xf32>
    %506 = arith.divf %504, %505 : vector<2x128xf32>
    %507 = arith.mulf %498, %500 : vector<2x128xf32>
    %508 = vector.extract_strided_slice %492 {offsets = [0, 128], sizes = [2, 128], strides = [1, 1]} : vector<2x512xf32> to vector<2x128xf32>
    %509 = arith.negf %508 : vector<2x128xf32>
    %510 = math.exp %509 : vector<2x128xf32>
    %cst_129 = arith.constant 1.000000e+00 : f32
    %511 = vector.broadcast %cst_129 : f32 to vector<2x128xf32>
    %512 = arith.addf %511, %510 : vector<2x128xf32>
    %513 = arith.divf %511, %512 : vector<2x128xf32>
    %514 = arith.mulf %513, %486 : vector<2x128xf32>
    %515 = arith.addf %507, %514 : vector<2x128xf32>
    %516 = math.tanh %515 : vector<2x128xf32>
    %517 = arith.mulf %506, %516 : vector<2x128xf32>
    %c36 = arith.constant 36 : index
    %c0_130 = arith.constant 0 : index
    %518 = vector.load %arg10[%c36, %c0_130] : memref<40x512xf32, #tpu.memory_space<vmem>>, vector<2x512xf32>
    %c0_131 = arith.constant 0 : index
    %c0_132 = arith.constant 0 : index
    %519 = vector.load %arg3[%c0_131, %c0_132] : memref<128x512xf32, #tpu.memory_space<vmem>>, vector<128x512xf32>
    %cst_133 = arith.constant dense<0.000000e+00> : vector<2x512xf32>
    %520 = tpu.matmul %517, %519, %cst_133 {dimension_numbers = #tpu.dot_dimension_numbers<[1], [0], [0], [1], [0, 0, 1, 1], [], []>} : vector<2x128xf32>, vector<128x512xf32>, vector<2x512xf32> -> vector<2x512xf32>
    %521 = arith.addf %518, %520 : vector<2x512xf32>
    %522 = vector.extract_strided_slice %521 {offsets = [0, 0], sizes = [2, 128], strides = [1, 1]} : vector<2x512xf32> to vector<2x128xf32>
    %523 = arith.negf %522 : vector<2x128xf32>
    %524 = math.exp %523 : vector<2x128xf32>
    %cst_134 = arith.constant 1.000000e+00 : f32
    %525 = vector.broadcast %cst_134 : f32 to vector<2x128xf32>
    %526 = arith.addf %525, %524 : vector<2x128xf32>
    %527 = arith.divf %525, %526 : vector<2x128xf32>
    %528 = vector.extract_strided_slice %521 {offsets = [0, 256], sizes = [2, 128], strides = [1, 1]} : vector<2x512xf32> to vector<2x128xf32>
    %529 = math.tanh %528 : vector<2x128xf32>
    %530 = vector.extract_strided_slice %521 {offsets = [0, 384], sizes = [2, 128], strides = [1, 1]} : vector<2x512xf32> to vector<2x128xf32>
    %531 = arith.negf %530 : vector<2x128xf32>
    %532 = math.exp %531 : vector<2x128xf32>
    %cst_135 = arith.constant 1.000000e+00 : f32
    %533 = vector.broadcast %cst_135 : f32 to vector<2x128xf32>
    %534 = arith.addf %533, %532 : vector<2x128xf32>
    %535 = arith.divf %533, %534 : vector<2x128xf32>
    %536 = arith.mulf %527, %529 : vector<2x128xf32>
    %537 = vector.extract_strided_slice %521 {offsets = [0, 128], sizes = [2, 128], strides = [1, 1]} : vector<2x512xf32> to vector<2x128xf32>
    %538 = arith.negf %537 : vector<2x128xf32>
    %539 = math.exp %538 : vector<2x128xf32>
    %cst_136 = arith.constant 1.000000e+00 : f32
    %540 = vector.broadcast %cst_136 : f32 to vector<2x128xf32>
    %541 = arith.addf %540, %539 : vector<2x128xf32>
    %542 = arith.divf %540, %541 : vector<2x128xf32>
    %543 = arith.mulf %542, %515 : vector<2x128xf32>
    %544 = arith.addf %536, %543 : vector<2x128xf32>
    %545 = math.tanh %544 : vector<2x128xf32>
    %546 = arith.mulf %535, %545 : vector<2x128xf32>
    %c38 = arith.constant 38 : index
    %c0_137 = arith.constant 0 : index
    %547 = vector.load %arg10[%c38, %c0_137] : memref<40x512xf32, #tpu.memory_space<vmem>>, vector<2x512xf32>
    %c0_138 = arith.constant 0 : index
    %c0_139 = arith.constant 0 : index
    %548 = vector.load %arg3[%c0_138, %c0_139] : memref<128x512xf32, #tpu.memory_space<vmem>>, vector<128x512xf32>
    %cst_140 = arith.constant dense<0.000000e+00> : vector<2x512xf32>
    %549 = tpu.matmul %546, %548, %cst_140 {dimension_numbers = #tpu.dot_dimension_numbers<[1], [0], [0], [1], [0, 0, 1, 1], [], []>} : vector<2x128xf32>, vector<128x512xf32>, vector<2x512xf32> -> vector<2x512xf32>
    %550 = arith.addf %547, %549 : vector<2x512xf32>
    %551 = vector.extract_strided_slice %550 {offsets = [0, 0], sizes = [2, 128], strides = [1, 1]} : vector<2x512xf32> to vector<2x128xf32>
    %552 = arith.negf %551 : vector<2x128xf32>
    %553 = math.exp %552 : vector<2x128xf32>
    %cst_141 = arith.constant 1.000000e+00 : f32
    %554 = vector.broadcast %cst_141 : f32 to vector<2x128xf32>
    %555 = arith.addf %554, %553 : vector<2x128xf32>
    %556 = arith.divf %554, %555 : vector<2x128xf32>
    %557 = vector.extract_strided_slice %550 {offsets = [0, 256], sizes = [2, 128], strides = [1, 1]} : vector<2x512xf32> to vector<2x128xf32>
    %558 = math.tanh %557 : vector<2x128xf32>
    %559 = vector.extract_strided_slice %550 {offsets = [0, 384], sizes = [2, 128], strides = [1, 1]} : vector<2x512xf32> to vector<2x128xf32>
    %560 = arith.negf %559 : vector<2x128xf32>
    %561 = math.exp %560 : vector<2x128xf32>
    %cst_142 = arith.constant 1.000000e+00 : f32
    %562 = vector.broadcast %cst_142 : f32 to vector<2x128xf32>
    %563 = arith.addf %562, %561 : vector<2x128xf32>
    %564 = arith.divf %562, %563 : vector<2x128xf32>
    %565 = arith.mulf %556, %558 : vector<2x128xf32>
    %566 = vector.extract_strided_slice %550 {offsets = [0, 128], sizes = [2, 128], strides = [1, 1]} : vector<2x512xf32> to vector<2x128xf32>
    %567 = arith.negf %566 : vector<2x128xf32>
    %568 = math.exp %567 : vector<2x128xf32>
    %cst_143 = arith.constant 1.000000e+00 : f32
    %569 = vector.broadcast %cst_143 : f32 to vector<2x128xf32>
    %570 = arith.addf %569, %568 : vector<2x128xf32>
    %571 = arith.divf %569, %570 : vector<2x128xf32>
    %572 = arith.mulf %571, %544 : vector<2x128xf32>
    %573 = arith.addf %565, %572 : vector<2x128xf32>
    %574 = math.tanh %573 : vector<2x128xf32>
    %575 = arith.mulf %564, %574 : vector<2x128xf32>
    tpu.wait_dma2 semaphore(%arg12 : memref<!tpu.dma_semaphore, #tpu.memory_space<semaphore_mem>>) src(%arg8 : memref<4x128x512xf32, #tpu.memory_space<any>>) dst(%arg11 : memref<4x128x512xf32, #tpu.memory_space<vmem>>)
    %c0_144 = arith.constant 0 : index
    %c0_145 = arith.constant 0 : index
    %c0_146 = arith.constant 0 : index
    %576 = vector.load %arg11[%c0_144, %c0_145, %c0_146] : memref<4x128x512xf32, #tpu.memory_space<vmem>>, vector<1x128x512xf32>
    %577 = vector.shape_cast %576 : vector<1x128x512xf32> to vector<128x512xf32>
    %cst_147 = arith.constant dense<0.000000e+00> : vector<2x512xf32>
    %578 = tpu.matmul %575, %577, %cst_147 {dimension_numbers = #tpu.dot_dimension_numbers<[1], [0], [0], [1], [0, 0, 1, 1], [], []>} : vector<2x128xf32>, vector<128x512xf32>, vector<2x512xf32> -> vector<2x512xf32>
    %c0_148 = arith.constant 0 : index
    %c0_149 = arith.constant 0 : index
    %579 = vector.load %arg5[%c0_148, %c0_149] : memref<1x512xf32, #tpu.memory_space<vmem>>, vector<1x512xf32>
    %580 = vector.broadcast %579 : vector<1x512xf32> to vector<2x512xf32>
    %581 = arith.addf %578, %580 : vector<2x512xf32>
    %582 = vector.extract_strided_slice %581 {offsets = [0, 0], sizes = [1, 512], strides = [1, 1]} : vector<2x512xf32> to vector<1x512xf32>
    %583 = vector.extract_strided_slice %582 {offsets = [0, 0], sizes = [1, 128], strides = [1, 1]} : vector<1x512xf32> to vector<1x128xf32>
    %584 = arith.negf %583 : vector<1x128xf32>
    %585 = math.exp %584 : vector<1x128xf32>
    %cst_150 = arith.constant 1.000000e+00 : f32
    %586 = vector.broadcast %cst_150 : f32 to vector<1x128xf32>
    %587 = arith.addf %586, %585 : vector<1x128xf32>
    %588 = arith.divf %586, %587 : vector<1x128xf32>
    %589 = vector.extract_strided_slice %582 {offsets = [0, 256], sizes = [1, 128], strides = [1, 1]} : vector<1x512xf32> to vector<1x128xf32>
    %590 = math.tanh %589 : vector<1x128xf32>
    %591 = vector.extract_strided_slice %582 {offsets = [0, 384], sizes = [1, 128], strides = [1, 1]} : vector<1x512xf32> to vector<1x128xf32>
    %592 = arith.negf %591 : vector<1x128xf32>
    %593 = math.exp %592 : vector<1x128xf32>
    %cst_151 = arith.constant 1.000000e+00 : f32
    %594 = vector.broadcast %cst_151 : f32 to vector<1x128xf32>
    %595 = arith.addf %594, %593 : vector<1x128xf32>
    %596 = arith.divf %594, %595 : vector<1x128xf32>
    %597 = arith.mulf %588, %590 : vector<1x128xf32>
    %598 = math.tanh %597 : vector<1x128xf32>
    %599 = arith.mulf %596, %598 : vector<1x128xf32>
    %600 = vector.extract_strided_slice %581 {offsets = [1, 0], sizes = [1, 512], strides = [1, 1]} : vector<2x512xf32> to vector<1x512xf32>
    %c1 = arith.constant 1 : index
    %c0_152 = arith.constant 0 : index
    %c0_153 = arith.constant 0 : index
    %601 = vector.load %arg11[%c1, %c0_152, %c0_153] : memref<4x128x512xf32, #tpu.memory_space<vmem>>, vector<1x128x512xf32>
    %602 = vector.shape_cast %601 : vector<1x128x512xf32> to vector<128x512xf32>
    %cst_154 = arith.constant dense<0.000000e+00> : vector<1x512xf32>
    %603 = tpu.matmul %599, %602, %cst_154 {dimension_numbers = #tpu.dot_dimension_numbers<[1], [0], [0], [1], [0, 0, 1, 1], [], []>} : vector<1x128xf32>, vector<128x512xf32>, vector<1x512xf32> -> vector<1x512xf32>
    %604 = arith.addf %600, %603 : vector<1x512xf32>
    %605 = vector.extract_strided_slice %604 {offsets = [0, 0], sizes = [1, 128], strides = [1, 1]} : vector<1x512xf32> to vector<1x128xf32>
    %606 = arith.negf %605 : vector<1x128xf32>
    %607 = math.exp %606 : vector<1x128xf32>
    %cst_155 = arith.constant 1.000000e+00 : f32
    %608 = vector.broadcast %cst_155 : f32 to vector<1x128xf32>
    %609 = arith.addf %608, %607 : vector<1x128xf32>
    %610 = arith.divf %608, %609 : vector<1x128xf32>
    %611 = vector.extract_strided_slice %604 {offsets = [0, 256], sizes = [1, 128], strides = [1, 1]} : vector<1x512xf32> to vector<1x128xf32>
    %612 = math.tanh %611 : vector<1x128xf32>
    %613 = vector.extract_strided_slice %604 {offsets = [0, 384], sizes = [1, 128], strides = [1, 1]} : vector<1x512xf32> to vector<1x128xf32>
    %614 = arith.negf %613 : vector<1x128xf32>
    %615 = math.exp %614 : vector<1x128xf32>
    %cst_156 = arith.constant 1.000000e+00 : f32
    %616 = vector.broadcast %cst_156 : f32 to vector<1x128xf32>
    %617 = arith.addf %616, %615 : vector<1x128xf32>
    %618 = arith.divf %616, %617 : vector<1x128xf32>
    %619 = arith.mulf %610, %612 : vector<1x128xf32>
    %620 = vector.extract_strided_slice %604 {offsets = [0, 128], sizes = [1, 128], strides = [1, 1]} : vector<1x512xf32> to vector<1x128xf32>
    %621 = arith.negf %620 : vector<1x128xf32>
    %622 = math.exp %621 : vector<1x128xf32>
    %cst_157 = arith.constant 1.000000e+00 : f32
    %623 = vector.broadcast %cst_157 : f32 to vector<1x128xf32>
    %624 = arith.addf %623, %622 : vector<1x128xf32>
    %625 = arith.divf %623, %624 : vector<1x128xf32>
    %626 = arith.mulf %625, %597 : vector<1x128xf32>
    %627 = arith.addf %619, %626 : vector<1x128xf32>
    %628 = math.tanh %627 : vector<1x128xf32>
    %629 = arith.mulf %618, %628 : vector<1x128xf32>
    %c2_158 = arith.constant 2 : index
    %c0_159 = arith.constant 0 : index
    %c0_160 = arith.constant 0 : index
    %630 = vector.load %arg11[%c2_158, %c0_159, %c0_160] : memref<4x128x512xf32, #tpu.memory_space<vmem>>, vector<1x128x512xf32>
    %631 = vector.shape_cast %630 : vector<1x128x512xf32> to vector<128x512xf32>
    %cst_161 = arith.constant dense<0.000000e+00> : vector<1x512xf32>
    %632 = tpu.matmul %629, %631, %cst_161 {dimension_numbers = #tpu.dot_dimension_numbers<[1], [0], [0], [1], [0, 0, 1, 1], [], []>} : vector<1x128xf32>, vector<128x512xf32>, vector<1x512xf32> -> vector<1x512xf32>
    %c0_162 = arith.constant 0 : index
    %c0_163 = arith.constant 0 : index
    %633 = vector.load %arg6[%c0_162, %c0_163] : memref<1x512xf32, #tpu.memory_space<vmem>>, vector<1x512xf32>
    %634 = arith.addf %632, %633 : vector<1x512xf32>
    %635 = vector.extract_strided_slice %634 {offsets = [0, 0], sizes = [1, 128], strides = [1, 1]} : vector<1x512xf32> to vector<1x128xf32>
    %636 = arith.negf %635 : vector<1x128xf32>
    %637 = math.exp %636 : vector<1x128xf32>
    %cst_164 = arith.constant 1.000000e+00 : f32
    %638 = vector.broadcast %cst_164 : f32 to vector<1x128xf32>
    %639 = arith.addf %638, %637 : vector<1x128xf32>
    %640 = arith.divf %638, %639 : vector<1x128xf32>
    %641 = vector.extract_strided_slice %634 {offsets = [0, 256], sizes = [1, 128], strides = [1, 1]} : vector<1x512xf32> to vector<1x128xf32>
    %642 = math.tanh %641 : vector<1x128xf32>
    %643 = vector.extract_strided_slice %634 {offsets = [0, 384], sizes = [1, 128], strides = [1, 1]} : vector<1x512xf32> to vector<1x128xf32>
    %644 = arith.negf %643 : vector<1x128xf32>
    %645 = math.exp %644 : vector<1x128xf32>
    %cst_165 = arith.constant 1.000000e+00 : f32
    %646 = vector.broadcast %cst_165 : f32 to vector<1x128xf32>
    %647 = arith.addf %646, %645 : vector<1x128xf32>
    %648 = arith.divf %646, %647 : vector<1x128xf32>
    %649 = arith.mulf %640, %642 : vector<1x128xf32>
    %650 = math.tanh %649 : vector<1x128xf32>
    %651 = arith.mulf %648, %650 : vector<1x128xf32>
    %c3 = arith.constant 3 : index
    %c0_166 = arith.constant 0 : index
    %c0_167 = arith.constant 0 : index
    %652 = vector.load %arg11[%c3, %c0_166, %c0_167] : memref<4x128x512xf32, #tpu.memory_space<vmem>>, vector<1x128x512xf32>
    %653 = vector.shape_cast %652 : vector<1x128x512xf32> to vector<128x512xf32>
    %cst_168 = arith.constant dense<0.000000e+00> : vector<1x512xf32>
    %654 = tpu.matmul %651, %653, %cst_168 {dimension_numbers = #tpu.dot_dimension_numbers<[1], [0], [0], [1], [0, 0, 1, 1], [], []>} : vector<1x128xf32>, vector<128x512xf32>, vector<1x512xf32> -> vector<1x512xf32>
    %c0_169 = arith.constant 0 : index
    %c0_170 = arith.constant 0 : index
    %655 = vector.load %arg7[%c0_169, %c0_170] : memref<1x512xf32, #tpu.memory_space<vmem>>, vector<1x512xf32>
    %656 = arith.addf %654, %655 : vector<1x512xf32>
    %657 = vector.extract_strided_slice %656 {offsets = [0, 0], sizes = [1, 128], strides = [1, 1]} : vector<1x512xf32> to vector<1x128xf32>
    %658 = arith.negf %657 : vector<1x128xf32>
    %659 = math.exp %658 : vector<1x128xf32>
    %cst_171 = arith.constant 1.000000e+00 : f32
    %660 = vector.broadcast %cst_171 : f32 to vector<1x128xf32>
    %661 = arith.addf %660, %659 : vector<1x128xf32>
    %662 = arith.divf %660, %661 : vector<1x128xf32>
    %663 = vector.extract_strided_slice %656 {offsets = [0, 256], sizes = [1, 128], strides = [1, 1]} : vector<1x512xf32> to vector<1x128xf32>
    %664 = math.tanh %663 : vector<1x128xf32>
    %665 = vector.extract_strided_slice %656 {offsets = [0, 384], sizes = [1, 128], strides = [1, 1]} : vector<1x512xf32> to vector<1x128xf32>
    %666 = arith.negf %665 : vector<1x128xf32>
    %667 = math.exp %666 : vector<1x128xf32>
    %cst_172 = arith.constant 1.000000e+00 : f32
    %668 = vector.broadcast %cst_172 : f32 to vector<1x128xf32>
    %669 = arith.addf %668, %667 : vector<1x128xf32>
    %670 = arith.divf %668, %669 : vector<1x128xf32>
    %671 = arith.mulf %662, %664 : vector<1x128xf32>
    %672 = math.tanh %671 : vector<1x128xf32>
    %673 = arith.mulf %670, %672 : vector<1x128xf32>
    %c0_173 = arith.constant 0 : index
    %c0_174 = arith.constant 0 : index
    %c0_175 = arith.constant 0 : index
    %674 = vector.load %arg9[%c0_173, %c0_174, %c0_175] : memref<1x1x128xf32, #tpu.memory_space<vmem>>, vector<1x1x128xf32>
    %675 = vector.shape_cast %674 : vector<1x1x128xf32> to vector<1x128xf32>
    %676 = vector.shape_cast %673 : vector<1x128xf32> to vector<1x1x128xf32>
    tpu.vector_store %arg9[%c0_173, %c0_174, %c0_175], %676 {strides = array<i32>} : memref<1x1x128xf32, #tpu.memory_space<vmem>>, vector<1x1x128xf32>,
    return
  }
  func.func @transform_0(%arg0: i32) -> (i32, i32) {
    %c0_i32 = arith.constant 0 : i32
    %c0_i32_0 = arith.constant 0 : i32
    %c0_i32_1 = arith.constant 0 : i32
    return %c0_i32, %c0_i32_0 : i32, i32
  }
  func.func @transform_1(%arg0: i32) -> (i32, i32) {
    %c0_i32 = arith.constant 0 : i32
    %c0_i32_0 = arith.constant 0 : i32
    %c0_i32_1 = arith.constant 0 : i32
    return %c0_i32, %c0_i32_0 : i32, i32
  }
  func.func @transform_2(%arg0: i32) -> (i32, i32) {
    %c0_i32 = arith.constant 0 : i32
    %c0_i32_0 = arith.constant 0 : i32
    %c0_i32_1 = arith.constant 0 : i32
    return %c0_i32, %c0_i32_0 : i32, i32
  }
  func.func @transform_3(%arg0: i32) -> (i32, i32) {
    %c0_i32 = arith.constant 0 : i32
    %c0_i32_0 = arith.constant 0 : i32
    %c0_i32_1 = arith.constant 0 : i32
    return %c0_i32, %c0_i32_0 : i32, i32
  }
  func.func @transform_4(%arg0: i32) -> (i32, i32) {
    %c0_i32 = arith.constant 0 : i32
    %c0_i32_0 = arith.constant 0 : i32
    %c0_i32_1 = arith.constant 0 : i32
    return %c0_i32, %c0_i32_0 : i32, i32
  }
  func.func @transform_5(%arg0: i32) -> (i32, i32) {
    %c0_i32 = arith.constant 0 : i32
    %c0_i32_0 = arith.constant 0 : i32
    %c0_i32_1 = arith.constant 0 : i32
    return %c0_i32, %c0_i32_0 : i32, i32
  }
  func.func @transform_6(%arg0: i32) -> (i32, i32) {
    %c0_i32 = arith.constant 0 : i32
    %c0_i32_0 = arith.constant 0 : i32
    %c0_i32_1 = arith.constant 0 : i32
    return %c0_i32, %c0_i32_0 : i32, i32
  }
  func.func @transform_8(%arg0: i32) -> (i32, i32, i32) {
    %c0_i32 = arith.constant 0 : i32
    %c0_i32_0 = arith.constant 0 : i32
    %c0_i32_1 = arith.constant 0 : i32
    %c0_i32_2 = arith.constant 0 : i32
    return %c0_i32, %c0_i32_0, %c0_i32_1 : i32, i32, i32
  }
}

</mosaic_0001>

<bundles_post_ra>
// kernel: _lambda_.1
= control target key start
LH: loop header
LB: loop body
LE: loop exit
PB: predicated region body
PF: predicated region fallthrough
CT: control target
= control target key end

     0   :  { %13 = vsyncpa [#allocation6], 0  ;;  %s7229_s0 = inlined_call_operand.vmem [shape: f32[40,128], index: 0, kind: input, shape index: {}]   ;;  %s7230_s1 = inlined_call_operand.hbm [shape: f32[128,512], index: 1, kind: input, shape index: {}]   ;;  %s7231_s2 = inlined_call_operand.hbm [shape: f32[128,512], index: 2, kind: input, shape index: {}]   ;;  %s7232_s3 = inlined_call_operand.vmem [shape: f32[1,512], index: 3, kind: input, shape index: {}]   ;;  %s7233_s4 = inlined_call_operand.vmem [shape: f32[1,512], index: 4, kind: input, shape index: {}]   ;;  %s7234_s5 = inlined_call_operand.vmem [shape: f32[1,512], index: 5, kind: input, shape index: {}]   ;;  %s7235_s6 = inlined_call_operand.vmem [shape: f32[1,512], index: 6, kind: input, shape index: {}]   ;;  %s7236_s7 = inlined_call_operand.hbm [shape: f32[4,128,512], index: 7, kind: input, shape index: {}]   ;;  %s7237_s8 = inlined_call_operand.hbm [shape: f32[1,1,128], index: 8, kind: output, shape index: {}]  }
   0x1   :  { %14 = vsyncpa [#allocation9], 0 }
   0x2   :  { %15 = vsyncpa [#allocation7], 0  ;;  %s22_s29 = sshll.u32 %s7230_s1, 4  ;;  %s5137_s30 = smov [#allocation5]   ;;  %s23_s29 = int_to_ptr.hbm [resolvable:$true] %s22_s29 }
   0x3   :  { %s24_s9 = sshll.u32 %s5137_s30, 4  ;;  %s35_s12 = sshll.u32 %s7231_s2, 4  ;;  %s25_s9 = int_to_ptr.vmem [resolvable:$true] %s24_s9  ;;  %s36_s12 = int_to_ptr.hbm [resolvable:$true] %s35_s12 }
   0x4   :  { %s5138_s13 = smov 512   ;;  %s5139_s14 = smov 32  }
   0x5   :  { %30 = dma.hbm_to_vmem [thread:$0]  %s23_s29, 8192, %s25_s9, [#allocation6], %s5138_s13, %s5138_s13, %s5139_s14  }
   0x6   :  { %s5140_s15 = smov [#allocation8]  }
   0x7   :  { %s37_s16 = sshll.u32 %s5140_s15, 4  ;;  %s38_s16 = int_to_ptr.vmem [resolvable:$true] %s37_s16 }
   0x8   :  { %43 = dma.hbm_to_vmem [thread:$0]  %s36_s12, 8192, %s38_s16, [#allocation9], %s5138_s13, %s5138_s13, %s5139_s14  }
   0x9   :  { %5129 = dma.done.wait [#allocation6], 8192  }
   0xa   :  { %5130 = vsyncadd [#allocation6], 4294959104 }
   0xb   :  { %5131 = dma.done.wait [#allocation9], 8192  }
   0xc   :  { %5132 = vsyncadd [#allocation9], 4294959104  ;;  %v138_v0 = vld [vmem:[#allocation5 + $0x1e0] sm:$0xff]  ;;  %v141_v1 = vld [vmem:[#allocation5 + $0x1f8] sm:$0xff]  ;;  %s67_s27 = sshll.u32 %s7236_s7, 4  ;;  %s5141_s28 = smov [#allocation3]   ;;  %s68_s27 = int_to_ptr.hbm [resolvable:$true] %s67_s27 }
   0xd   :  { %v134_v2 = vld [vmem:[#allocation5 + $0x1c0] sm:$0xff]  ;;  %152 = vmatpush.msra.mxu0 %v138_v0  ;;  %248 = vmatpush.msra.mxu3 %v141_v1  ;;  %v137_v3 = vld [vmem:[#allocation5 + $0x1d8] sm:$0xff]  ;;  %v140_v8 = vld [vmem:[#allocation5 + $0x1f0] sm:$0xff]  ;;  %s69_s29 = sshll.u32 %s5141_s28, 4  ;;  %s70_s29 = int_to_ptr.vmem [resolvable:$true] %s69_s29 }
   0xe   :  { %v130_v4 = vld [vmem:[#allocation5 + $0x1a0] sm:$0xff]  ;;  %v133_v5 = vld [vmem:[#allocation5 + $0x1b8] sm:$0xff]  ;;  %216 = vmatpush.msra.mxu2 %v140_v8  ;;  %v136_v11 = vld [vmem:[#allocation5 + $0x1d0] sm:$0xff]  ;;  %72 = dma.hbm_to_vmem [thread:$0]  %s68_s27, 32768, %s70_s29, [#allocation4] }
   0xf   :  { %153 = vmatpush.msra.mxu0 %v134_v2  ;;  %249 = vmatpush.msra.mxu3 %v137_v3  ;;  %v126_v6 = vld [vmem:[#allocation5 + $0x180] sm:$0xff]  ;;  %v129_v7 = vld [vmem:[#allocation5 + $0x198] sm:$0xff]  ;;  %v132_v12 = vld [vmem:[#allocation5 + $0x1b0] sm:$0xff] }
  0x10   :  { %v122_v9 = vld [vmem:[#allocation5 + $0x160] sm:$0xff]  ;;  %v125_v10 = vld [vmem:[#allocation5 + $0x178] sm:$0xff]  ;;  %217 = vmatpush.msra.mxu2 %v136_v11  ;;  %v128_v15 = vld [vmem:[#allocation5 + $0x190] sm:$0xff] }
  0x11   :  { %154 = vmatpush.msra.mxu0 %v130_v4  ;;  %250 = vmatpush.msra.mxu3 %v133_v5  ;;  %v118_v13 = vld [vmem:[#allocation5 + $0x140] sm:$0xff]  ;;  %v121_v14 = vld [vmem:[#allocation5 + $0x158] sm:$0xff]  ;;  %v124_v18 = vld [vmem:[#allocation5 + $0x170] sm:$0xff] }
  0x12   :  { %v114_v16 = vld [vmem:[#allocation5 + $0x120] sm:$0xff]  ;;  %v117_v17 = vld [vmem:[#allocation5 + $0x138] sm:$0xff]  ;;  %218 = vmatpush.msra.mxu2 %v132_v12  ;;  %v120_v21 = vld [vmem:[#allocation5 + $0x150] sm:$0xff] }
  0x13   :  { %155 = vmatpush.msra.mxu0 %v126_v6  ;;  %251 = vmatpush.msra.mxu3 %v129_v7  ;;  %v110_v19 = vld [vmem:[#allocation5 + $0x100] sm:$0xff]  ;;  %v113_v20 = vld [vmem:[#allocation5 + $0x118] sm:$0xff]  ;;  %v116_v24 = vld [vmem:[#allocation5 + $0x130] sm:$0xff] }
  0x14   :  { %219 = vmatpush.msra.mxu2 %v128_v15  ;;  %v106_v22 = vld [vmem:[#allocation5 + $0xe0] sm:$0xff]  ;;  %v109_v23 = vld [vmem:[#allocation5 + $0xf8] sm:$0xff]  ;;  %v139_v27 = vld [vmem:[#allocation5 + $0x1e8] sm:$0xff] }
  0x15   :  { %156 = vmatpush.msra.mxu0 %v122_v9  ;;  %252 = vmatpush.msra.mxu3 %v125_v10  ;;  %v102_v25 = vld [vmem:[#allocation5 + $0xc0] sm:$0xff]  ;;  %v105_v26 = vld [vmem:[#allocation5 + $0xd8] sm:$0xff]  ;;  %v112_v28 = vld [vmem:[#allocation5 + $0x110] sm:$0xff] }
  0x16   :  { %220 = vmatpush.msra.mxu2 %v124_v18  ;;  %v135_v29 = vld [vmem:[#allocation5 + $0x1c8] sm:$0xff]  ;;  %v98_v30 = vld [vmem:[#allocation5 + $0xa0] sm:$0xff]  ;;  %v101_v31 = vld [vmem:[#allocation5 + $0xb8] sm:$0xff]  ;;  %184 = vmatpush.msra.mxu1 %v139_v27 }
  0x17   :  { %157 = vmatpush.msra.mxu0 %v118_v13  ;;  %253 = vmatpush.msra.mxu3 %v121_v14  ;;  %v108_v32 = vld [vmem:[#allocation5 + $0xf0] sm:$0xff]  ;;  %v131_v33 = vld [vmem:[#allocation5 + $0x1a8] sm:$0xff]  ;;  %v94_v34 = vld [vmem:[#allocation5 + $0x80] sm:$0xff] }
  0x18   :  { %221 = vmatpush.msra.mxu2 %v120_v21  ;;  %v97_v35 = vld [vmem:[#allocation5 + $0x98] sm:$0xff]  ;;  %185 = vmatpush.msra.mxu1 %v135_v29  ;;  %v104_v36 = vld [vmem:[#allocation5 + $0xd0] sm:$0xff]  ;;  %v127_v37 = vld [vmem:[#allocation5 + $0x188] sm:$0xff] }
  0x19   :  { %158 = vmatpush.msra.mxu0 %v114_v16  ;;  %254 = vmatpush.msra.mxu3 %v117_v17  ;;  %v90_v38 = vld [vmem:[#allocation5 + $0x60] sm:$0xff]  ;;  %v93_v39 = vld [vmem:[#allocation5 + $0x78] sm:$0xff]  ;;  %v100_v40 = vld [vmem:[#allocation5 + $0xb0] sm:$0xff] }
  0x1a   :  { %222 = vmatpush.msra.mxu2 %v116_v24  ;;  %186 = vmatpush.msra.mxu1 %v131_v33  ;;  %v123_v41 = vld [vmem:[#allocation5 + $0x168] sm:$0xff]  ;;  %v86_v42 = vld [vmem:[#allocation5 + $0x40] sm:$0xff]  ;;  %v89_v43 = vld [vmem:[#allocation5 + $0x58] sm:$0xff] }
  0x1b   :  { %159 = vmatpush.msra.mxu0 %v110_v19  ;;  %255 = vmatpush.msra.mxu3 %v113_v20  ;;  %v96_v44 = vld [vmem:[#allocation5 + $0x90] sm:$0xff]  ;;  %v119_v45 = vld [vmem:[#allocation5 + $0x148] sm:$0xff]  ;;  %v82_v46 = vld [vmem:[#allocation5 + $0x20] sm:$0xff] }
  0x1c   :  { %223 = vmatpush.msra.mxu2 %v112_v28  ;;  %187 = vmatpush.msra.mxu1 %v127_v37  ;;  %v85_v47 = vld [vmem:[#allocation5 + $0x38] sm:$0xff]  ;;  %v92_v48 = vld [vmem:[#allocation5 + $0x70] sm:$0xff]  ;;  %v115_v49 = vld [vmem:[#allocation5 + $0x128] sm:$0xff] }
  0x1d   :  { %160 = vmatpush.msra.mxu0 %v106_v22  ;;  %256 = vmatpush.msra.mxu3 %v109_v23  ;;  %v78_v50 = vld [vmem:[#allocation5] sm:$0xff]  ;;  %v81_v51 = vld [vmem:[#allocation5 + $0x18] sm:$0xff]  ;;  %v88_v53 = vld [vmem:[#allocation5 + $0x50] sm:$0xff] }
  0x1e   :  { %224 = vmatpush.msra.mxu2 %v108_v32  ;;  %188 = vmatpush.msra.mxu1 %v123_v41  ;;  %v73_v52 = vld [vmem:[%s7229_s0] sm:$0xff]  ;;  %v111_v54 = vld [vmem:[#allocation5 + $0x108] sm:$0xff]  ;;  %v84_v55 = vld [vmem:[#allocation5 + $0x30] sm:$0xff] }
  0x1f   :  { %161 = vmatpush.msra.mxu0 %v102_v25  ;;  %257 = vmatpush.msra.mxu3 %v105_v26  ;;  %v107_v56 = vld [vmem:[#allocation5 + $0xe8] sm:$0xff]  ;;  %v80_v57 = vld [vmem:[#allocation5 + $0x10] sm:$0xff]  ;;  %v5197_v1 = vld [vmem:[#allocation8 + $0x1e0] sm:$0xff] }
  0x20   :  { %225 = vmatpush.msra.mxu2 %v104_v36  ;;  %189 = vmatpush.msra.mxu1 %v119_v45  ;;  %v103_v58 = vld [vmem:[#allocation5 + $0xc8] sm:$0xff]  ;;  %v5201_v3 = vld [vmem:[#allocation8 + $0x1c0] sm:$0xff]  ;;  %v5211_v7 = vld [vmem:[#allocation8 + $0x1f8] sm:$0xff] }
  0x21   :  { %162 = vmatpush.msra.mxu0 %v98_v30  ;;  %258 = vmatpush.msra.mxu3 %v101_v31  ;;  %v99_v59 = vld [vmem:[#allocation5 + $0xa8] sm:$0xff]  ;;  %v5207_v5 = vld [vmem:[#allocation8 + $0x1a0] sm:$0xff]  ;;  %v5225_v11 = vld [vmem:[#allocation8 + $0x1d8] sm:$0xff] }
  0x22   :  { %226 = vmatpush.msra.mxu2 %v100_v40  ;;  %190 = vmatpush.msra.mxu1 %v115_v49  ;;  %v95_v60 = vld [vmem:[#allocation5 + $0x88] sm:$0xff]  ;;  %7508 = vst [vmem:[#allocation20_spill] sm:$0xff] %v5207_v5  ;;  %v5219_v9 = vld [vmem:[#allocation8 + $0x180] sm:$0xff]  ;;  %v5227_v12 = vld [vmem:[#allocation8 + $0x1f0] sm:$0xff] }
  0x23   :  { %163 = vmatpush.msra.mxu0 %v94_v34  ;;  %259 = vmatpush.msra.mxu3 %v97_v35  ;;  %v91_v61 = vld [vmem:[#allocation5 + $0x68] sm:$0xff]  ;;  %v5229_v13 = vld [vmem:[#allocation8 + $0x160] sm:$0xff]  ;;  %v5234_v15 = vld [vmem:[#allocation8 + $0x1b8] sm:$0xff] }
  0x24   :  { %227 = vmatpush.msra.mxu2 %v96_v44  ;;  %191 = vmatpush.msra.mxu1 %v111_v54  ;;  %v87_v62 = vld [vmem:[#allocation5 + $0x48] sm:$0xff]  ;;  %7510 = vst [vmem:[#allocation22_spill] sm:$0xff] %v5229_v13  ;;  %v5238_v16 = vld [vmem:[#allocation8 + $0x1d0] sm:$0xff]  ;;  %v5240_v17 = vld [vmem:[#allocation8 + $0x140] sm:$0xff] }
  0x25   :  { %164 = vmatpush.msra.mxu0 %v90_v38  ;;  %260 = vmatpush.msra.mxu3 %v93_v39  ;;  %v83_v63 = vld [vmem:[#allocation5 + $0x28] sm:$0xff]  ;;  %v5246_v19 = vld [vmem:[#allocation8 + $0x198] sm:$0xff]  ;;  %v5250_v20 = vld [vmem:[#allocation8 + $0x1b0] sm:$0xff] }
  0x26   :  { %228 = vmatpush.msra.mxu2 %v92_v48  ;;  %192 = vmatpush.msra.mxu1 %v107_v56  ;;  %v79_v0 = vld [vmem:[#allocation5 + $0x8] sm:$0xff]  ;;  %7512 = vst [vmem:[#allocation24_spill] sm:$0xff] %v5246_v19  ;;  %v5252_v21 = vld [vmem:[#allocation8 + $0x120] sm:$0xff]  ;;  %v5258_v23 = vld [vmem:[#allocation8 + $0x178] sm:$0xff] }
  0x27   :  { %165 = vmatpush.msra.mxu0 %v86_v42  ;;  %261 = vmatpush.msra.mxu3 %v89_v43  ;;  %v5199_v2 = vld [vmem:[#allocation8 + $0x1e8] sm:$0xff]  ;;  %v5262_v24 = vld [vmem:[#allocation8 + $0x190] sm:$0xff]  ;;  %v5276_v27 = vld [vmem:[%s7232_s3] sm:$0xf] }
  0x28   :  { %229 = vmatpush.msra.mxu2 %v88_v53  ;;  %193 = vmatpush.msra.mxu1 %v103_v58  ;;  %v5205_v4 = vld [vmem:[#allocation8 + $0x1c8] sm:$0xff]  ;;  %v75_v25 = vld [vmem:[%s7229_s0 + $0x10] sm:$0xff]  ;;  %7515 = vst [vmem:[#allocation27_spill] sm:$0xff] %v5276_v27  ;;  %v5279_v28 = vld [vmem:[#allocation8 + $0x100] sm:$0xff]  ;;  %v5293_v34 = vperm.slane %v5276_v27, 0 }
  0x29   :  { %166 = vmatpush.msra.mxu0 %v82_v46  ;;  %262 = vmatpush.msra.mxu3 %v85_v47  ;;  %7507 = vst [vmem:[#allocation19_spill] sm:$0xff] %v5205_v4  ;;  %v5209_v6 = vld [vmem:[#allocation8 + $0x1a8] sm:$0xff]  ;;  %v5271_v26 = vld [vmem:[#allocation8 + $0x170] sm:$0xff]  ;;  %v5283_v30 = vld [vmem:[#allocation8 + $0x158] sm:$0xff]  ;;  %v5328_v46 = vperm.slane %v5276_v27, 3 }
  0x2a   :  { %230 = vmatpush.msra.mxu2 %v84_v55  ;;  %194 = vmatpush.msra.mxu1 %v99_v59  ;;  %v74_v8 = vld [vmem:[%s7229_s0 + $0x8] sm:$0xff]  ;;  %7514 = vst [vmem:[#allocation26_spill] sm:$0xff] %v5271_v26  ;;  %v5285_v31 = vld [vmem:[#allocation8 + $0x150] sm:$0xff]  ;;  %v5288_v32 = vld [vmem:[#allocation8 + $0xe0] sm:$0xff] }
  0x2b   :  { %167 = vmatpush.msra.mxu0 %v78_v50  ;;  %263 = vmatpush.msra.mxu3 %v81_v51  ;;  %v5223_v10 = vld [vmem:[#allocation8 + $0x188] sm:$0xff]  ;;  %7517 = vst [vmem:[#allocation29_spill] sm:$0xff] %v5283_v30  ;;  %v5297_v35 = vld [vmem:[#allocation8 + $0x138] sm:$0xff]  ;;  %v5299_v36 = vld [vmem:[#allocation8 + $0x130] sm:$0xff] }
  0x2c   :  { %168 = vmatmul.f32.vlgmr.msra.gmra.mxu0 %v73_v52  ;;  %264 = vmatmul.f32.vlgmr.msra.gmra.mxu3 %v73_v52  ;;  %7509 = vst [vmem:[#allocation21_spill] sm:$0xff] %v5223_v10  ;;  %v5232_v14 = vld [vmem:[#allocation8 + $0x168] sm:$0xff]  ;;  %v5303_v37 = vld [vmem:[#allocation8 + $0xc0] sm:$0xff]  ;;  %v5309_v39 = vld [vmem:[#allocation8 + $0x110] sm:$0xff] }
  0x2d   :  { %231 = vmatpush.msra.mxu2 %v80_v57  ;;  %195 = vmatpush.msra.mxu1 %v95_v60  ;;  %v5244_v18 = vld [vmem:[#allocation8 + $0x148] sm:$0xff]  ;;  %7518 = vst [vmem:[#allocation30_spill] sm:$0xff] %v5293_v34  ;;  %v5311_v40 = vld [vmem:[#allocation8 + $0x118] sm:$0xff]  ;;  %v5323_v44 = vld [vmem:[#allocation8 + $0xa0] sm:$0xff]  ;;  %v5363_v60 = vperm.slane %v5276_v27, 2 }
  0x2e   :  { %232 = vmatmul.f32.vlgmr.msra.gmra.mxu2 %v73_v52  ;;  %413 = vmatpush.msrb.mxu0 %v5197_v1  ;;  %7511 = vst [vmem:[#allocation23_spill] sm:$0xff] %v5244_v18  ;;  %v5256_v22 = vld [vmem:[#allocation8 + $0x128] sm:$0xff]  ;;  %v76_v42 = vld [vmem:[%s7229_s0 + $0x18] sm:$0xff]  ;;  %v5330_v47 = vld [vmem:[#allocation8 + $0xf0] sm:$0xff] }
  0x2f   :  { %196 = vmatpush.msra.mxu1 %v91_v61  ;;  %473 = vmatpush.msrb.mxu3 %v5211_v7  ;;  %7513 = vst [vmem:[#allocation25_spill] sm:$0xff] %v5256_v22  ;;  %v5281_v29 = vld [vmem:[#allocation8 + $0x108] sm:$0xff]  ;;  %v5332_v48 = vld [vmem:[#allocation8 + $0xf8] sm:$0xff]  ;;  %v5334_v49 = vld [vmem:[#allocation8 + $0x80] sm:$0xff] }
  0x30   :  { %414 = vmatpush.msrb.mxu0 %v5201_v3  ;;  %453 = vmatpush.msrb.mxu2 %v5227_v12  ;;  %7516 = vst [vmem:[#allocation28_spill] sm:$0xff] %v5281_v29  ;;  %v5290_v33 = vld [vmem:[#allocation8 + $0xe8] sm:$0xff]  ;;  %v5340_v51 = vld [vmem:[#allocation8 + $0xd0] sm:$0xff]  ;;  %v5346_v54 = vld [vmem:[#allocation8 + $0x60] sm:$0xff] }
  0x31   :  { %197 = vmatpush.msra.mxu1 %v87_v62  ;;  %474 = vmatpush.msrb.mxu3 %v5225_v11  ;;  %7519 = vst [vmem:[#allocation31_spill] sm:$0xff] %v5299_v36  ;;  %v5305_v38 = vld [vmem:[#allocation8 + $0xc8] sm:$0xff]  ;;  %v5353_v57 = vld [vmem:[#allocation8 + $0xb0] sm:$0xff]  ;;  %v5355_v58 = vld [vmem:[#allocation8 + $0xb8] sm:$0xff] }
  0x32   :  { %415 = vmatpush.msrb.mxu0 %v5207_v5  ;;  %454 = vmatpush.msrb.mxu2 %v5238_v16  ;;  %7520 = vst [vmem:[#allocation32_spill] sm:$0xff] %v5323_v44  ;;  %v5325_v45 = vld [vmem:[#allocation8 + $0xa8] sm:$0xff]  ;;  %v77_v59 = vld [vmem:[%s7229_s0 + $0x20] sm:$0xff]  ;;  %v5367_v61 = vld [vmem:[#allocation8 + $0x90] sm:$0xff] }
  0x33   :  { %198 = vmatpush.msra.mxu1 %v83_v63  ;;  %475 = vmatpush.msrb.mxu3 %v5234_v15  ;;  %7521 = vst [vmem:[#allocation33_spill] sm:$0xff] %v5325_v45  ;;  %v5336_v50 = vld [vmem:[#allocation8 + $0x88] sm:$0xff]  ;;  %v5369_v62 = vld [vmem:[#allocation8 + $0x98] sm:$0xff] }
  0x34   :  { %171 = vmatmul.f32.gmra.mxu0 %v74_v8  ;;  %267 = vmatmul.f32.gmra.mxu3 %v74_v8  ;;  %7522 = vst [vmem:[#allocation34_spill] sm:$0xff] %v5328_v46  ;;  %v5348_v55 = vld [vmem:[#allocation8 + $0x68] sm:$0xff] }
  0x35   :  { %199 = vmatpush.msra.mxu1 %v79_v0  ;;  %416 = vmatpush.msrb.mxu0 %v5219_v9  ;;  %7523 = vst [vmem:[#allocation35_spill] sm:$0xff] %v5334_v49 }
  0x36   :  { %200 = vmatmul.f32.vlgmr.msra.gmra.mxu1 %v73_v52  ;;  %235 = vmatmul.f32.gmra.mxu2 %v74_v8  ;;  %7524 = vst [vmem:[#allocation36_spill] sm:$0xff] %v5336_v50  ;;  %v5342_v52 = vld [vmem:[#allocation8 + $0xd8] sm:$0xff] }
  0x37   :  { %433 = vmatpush.msrb.mxu1 %v5199_v2  ;;  %417 = vmatpush.msrb.mxu0 %v5229_v13  ;;  %7525 = vst [vmem:[#allocation37_spill] sm:$0xff] %v5342_v52 }
  0x38   :  { %476 = vmatpush.msrb.mxu3 %v5246_v19  ;;  %455 = vmatpush.msrb.mxu2 %v5250_v20  ;;  %7526 = vst [vmem:[#allocation38_spill] sm:$0xff] %v5346_v54 }
  0x39   :  { %434 = vmatpush.msrb.mxu1 %v5205_v4  ;;  %418 = vmatpush.msrb.mxu0 %v5240_v17  ;;  %7527 = vst [vmem:[#allocation39_spill] sm:$0xff] %v5348_v55 }
  0x3a   :  { %477 = vmatpush.msrb.mxu3 %v5258_v23  ;;  %456 = vmatpush.msrb.mxu2 %v5262_v24  ;;  %7528 = vst [vmem:[#allocation40_spill] sm:$0xff] %v5353_v57 }
  0x3b   :  { %435 = vmatpush.msrb.mxu1 %v5209_v6  ;;  %419 = vmatpush.msrb.mxu0 %v5252_v21  ;;  %7529 = vst [vmem:[#allocation41_spill] sm:$0xff] %v5355_v58 }
  0x3c   :  { %174 = vmatmul.f32.gmra.mxu0 %v75_v25  ;;  %270 = vmatmul.f32.gmra.mxu3 %v75_v25  ;;  %7530 = vst [vmem:[#allocation42_spill] sm:$0xff] %v5363_v60 }
  0x3d   :  { %436 = vmatpush.msrb.mxu1 %v5223_v10  ;;  %457 = vmatpush.msrb.mxu2 %v5271_v26  ;;  %7531 = vst [vmem:[#allocation43_spill] sm:$0xff] %v5367_v61 }
  0x3e   :  { %203 = vmatmul.f32.gmra.mxu1 %v74_v8  ;;  %238 = vmatmul.f32.gmra.mxu2 %v75_v25  ;;  %7532 = vst [vmem:[#allocation44_spill] sm:$0xff] %v5369_v62  ;;  %v5373_v8 = vld [vmem:[#allocation8 + $0x40] sm:$0xff] }
  0x3f   :  { %437 = vmatpush.msrb.mxu1 %v5232_v14  ;;  %420 = vmatpush.msrb.mxu0 %v5279_v28  ;;  %7533 = vst [vmem:[#allocation45_spill] sm:$0xff] %v5373_v8 }
  0x40   :  { %478 = vmatpush.msrb.mxu3 %v5283_v30  ;;  %458 = vmatpush.msrb.mxu2 %v5285_v31 }
  0x41   :  { %438 = vmatpush.msrb.mxu1 %v5244_v18  ;;  %421 = vmatpush.msrb.mxu0 %v5288_v32 }
  0x42   :  { %479 = vmatpush.msrb.mxu3 %v5297_v35  ;;  %459 = vmatpush.msrb.mxu2 %v5299_v36 }
  0x43   :  { %439 = vmatpush.msrb.mxu1 %v5256_v22  ;;  %422 = vmatpush.msrb.mxu0 %v5303_v37 }
  0x44   :  { %460 = vmatpush.msrb.mxu2 %v5309_v39  ;;  %480 = vmatpush.msrb.mxu3 %v5311_v40 }
  0x45   :  { %440 = vmatpush.msrb.mxu1 %v5281_v29  ;;  %177 = vmatmul.f32.gmra.mxu0 %v76_v42 }
  0x46   :  { %206 = vmatmul.f32.gmra.mxu1 %v75_v25  ;;  %241 = vmatmul.f32.gmra.mxu2 %v76_v42  ;;  %v5375_v25 = vld [vmem:[#allocation8 + $0x48] sm:$0xff] }
  0x47   :  { %441 = vmatpush.msrb.mxu1 %v5290_v33  ;;  %273 = vmatmul.f32.gmra.mxu3 %v76_v42  ;;  %7534 = vst [vmem:[#allocation46_spill] sm:$0xff] %v5375_v25 }
  0x48   :  { %423 = vmatpush.msrb.mxu0 %v5323_v44  ;;  %461 = vmatpush.msrb.mxu2 %v5330_v47 }
  0x49   :  { %442 = vmatpush.msrb.mxu1 %v5305_v38  ;;  %481 = vmatpush.msrb.mxu3 %v5332_v48 }
  0x4a   :  { %424 = vmatpush.msrb.mxu0 %v5334_v49  ;;  %462 = vmatpush.msrb.mxu2 %v5340_v51 }
  0x4b   :  { %443 = vmatpush.msrb.mxu1 %v5325_v45  ;;  %482 = vmatpush.msrb.mxu3 %v5342_v52 }
  0x4c   :  { %425 = vmatpush.msrb.mxu0 %v5346_v54  ;;  %463 = vmatpush.msrb.mxu2 %v5353_v57 }
  0x4d   :  { %444 = vmatpush.msrb.mxu1 %v5336_v50  ;;  %483 = vmatpush.msrb.mxu3 %v5355_v58 }
  0x4e   :  { %209 = vmatmul.f32.gmra.mxu1 %v76_v42  ;;  %180 = vmatmul.f32.gmra.mxu0 %v77_v59  ;;  %v5379_v42 = vld [vmem:[#allocation8 + $0x70] sm:$0xff] }
  0x4f   :  { %445 = vmatpush.msrb.mxu1 %v5348_v55  ;;  %464 = vmatpush.msrb.mxu2 %v5367_v61  ;;  %7535 = vst [vmem:[#allocation47_spill] sm:$0xff] %v5379_v42 }
  0x50   :  { %484 = vmatpush.msrb.mxu3 %v5369_v62  ;;  %244 = vmatmul.f32.gmra.mxu2 %v77_v59 }
  0x51   :  { %276 = vmatmul.f32.gmra.mxu3 %v77_v59  ;;  %426 = vmatpush.msrb.mxu0 %v5373_v8  ;;  %v5412_v8 = vld [vmem:[#allocation8 + $0x18] sm:$0xff] }
  0x52   :  { %446 = vmatpush.msrb.mxu1 %v5375_v25  ;;  %465 = vmatpush.msrb.mxu2 %v5379_v42  ;;  %v5410_v25 = vld [vmem:[#allocation8 + $0x10] sm:$0xff]  ;;  %7546 = vst [vmem:[#allocation58_spill] sm:$0xff] %v5412_v8 }
  0x53   :  { %7545 = vst [vmem:[#allocation57_spill] sm:$0xff] %v5410_v25 }
  0x56   :  { %212 = vmatmul.f32.gmra.mxu1 %v77_v59  ;;  %v5398_v59 = vld [vmem:[#allocation8 + $0x8] sm:$0xff] }
  0x57   :  { %7542 = vst [vmem:[#allocation54_spill] sm:$0xff] %v5398_v59 }
  0xa9   :  { %v169_v41 = vpop.f32.mrf.mxu0 }
  0xaa   :  { %v170_v43 = vadd.f32 %v169_v41, %v5293_v34  ;;  %v5392_v34 = vld [vmem:[#allocation8 + $0x58] sm:$0xff] }
  0xab   :  { %7540 = vst [vmem:[#allocation52_spill] sm:$0xff] %v5392_v34 }
  0xac   :  { %280 = vst [vmem:[#allocation2] sm:$0xff] %v170_v43  ;;  %v5381_v43 = vld [vmem:[#allocation8 + $0x78] sm:$0xff] }
  0xad   :  { %7536 = vst [vmem:[#allocation48_spill] sm:$0xff] %v5381_v43  ;;  %485 = vmatpush.msrb.mxu3 %v5381_v43 }
  0xaf   :  { %v265_v53 = vpop.f32.mrf.mxu3  ;;  %486 = vmatpush.msrb.mxu3 %v5392_v34 }
  0xb0   :  { %v266_v56 = vadd.f32 %v265_v53, %v5328_v46  ;;  %v5390_v46 = vld [vmem:[#allocation8 + $0x50] sm:$0xff] }
  0xb1   :  { %v233_v41 = vpop.f32.mrf.mxu2  ;;  %7539 = vst [vmem:[#allocation51_spill] sm:$0xff] %v5390_v46  ;;  %466 = vmatpush.msrb.mxu2 %v5390_v46 }
  0xb2   :  { %283 = vst [vmem:[#allocation2 + $0x18] sm:$0xff] %v266_v56  ;;  %v234_v53 = vadd.f32 %v233_v41, %v5363_v60  ;;  %v5384_v56 = vld [vmem:[#allocation8 + $0x20] sm:$0xff]  ;;  %v5404_v60 = vld [vmem:[#allocation8 + $0x38] sm:$0xff] }
  0xb3   :  { %v300_v63 = vld [vmem:[#allocation2] sm:$0x3]  ;;  %7537 = vst [vmem:[#allocation49_spill] sm:$0xff] %v5384_v56  ;;  %427 = vmatpush.msrb.mxu0 %v5384_v56  ;;  %487 = vmatpush.msrb.mxu3 %v5404_v60 }
  0xb4   :  { %v4334_v0 = vmul.f32 -1.442695, %v300_v63  ;;  %v5386_v63 = vld [vmem:[#allocation8 + $0x28] sm:$0xff]  ;;  %282 = vst [vmem:[#allocation2 + $0x50] sm:$0xff] %v234_v53  ;;  %v5396_v41 = vld [vmem:[#allocation8] sm:$0xff] }
  0xb5   :  { %7538 = vst [vmem:[#allocation50_spill] sm:$0xff] %v5386_v63  ;;  %447 = vmatpush.msrb.mxu1 %v5386_v63  ;;  %428 = vmatpush.msrb.mxu0 %v5396_v41 }
  0xb6   :  { %4409 = vpow2.f32 %v4334_v0  ;;  %7541 = vst [vmem:[#allocation53_spill] sm:$0xff] %v5396_v41  ;;  %v5402_v0 = vld [vmem:[#allocation8 + $0x30] sm:$0xff]  ;;  %488 = vmatpush.msrb.mxu3 %v5412_v8 }
  0xb7   :  { %7543 = vst [vmem:[#allocation55_spill] sm:$0xff] %v5402_v0  ;;  %448 = vmatpush.msrb.mxu1 %v5398_v59  ;;  %467 = vmatpush.msrb.mxu2 %v5402_v0 }
  0xb8   :  { %7544 = vst [vmem:[#allocation56_spill] sm:$0xff] %v5404_v60  ;;  %582 = vmatpush.msra.mxu0 %v5197_v1  ;;  %642 = vmatpush.msra.mxu3 %v5211_v7 }
  0xb9   :  { %v302_v27 = vld [vmem:[#allocation2 + $0x18] sm:$0x3]  ;;  %602 = vmatpush.msra.mxu1 %v5199_v2  ;;  %468 = vmatpush.msrb.mxu2 %v5410_v25 }
  0xba   :  { %v4335_v53 = vmul.f32 -1.442695, %v302_v27  ;;  %583 = vmatpush.msra.mxu0 %v5201_v3  ;;  %643 = vmatpush.msra.mxu3 %v5225_v11 }
  0xbb   :  { %622 = vmatpush.msra.mxu2 %v5227_v12  ;;  %603 = vmatpush.msra.mxu1 %v5205_v4 }
  0xbc   :  { %v4410_v56 = vpop.eup %4409  ;;  %4411 = vpow2.f32 %v4335_v53  ;;  %584 = vmatpush.msra.mxu0 %v5207_v5  ;;  %644 = vmatpush.msra.mxu3 %v5234_v15  ;;  %v301_v53 = vld [vmem:[#allocation2 + $0x50] sm:$0x3] }
  0xbd   :  { %v306_v63 = vadd.f32 1.0, %v4410_v56  ;;  %623 = vmatpush.msra.mxu2 %v5238_v16  ;;  %604 = vmatpush.msra.mxu1 %v5209_v6 }
  0xbe   :  { %585 = vmatpush.msra.mxu0 %v5219_v9  ;;  %645 = vmatpush.msra.mxu3 %v5246_v19 }
  0xbf   :  { %4413 = vrcp.f32 %v306_v63  ;;  %624 = vmatpush.msra.mxu2 %v5250_v20  ;;  %605 = vmatpush.msra.mxu1 %v5223_v10  ;;  %v318_v10 = vand.u32 2147483648, %v306_v63  ;;  %vm312_vm1 = vweird.f32 %v306_v63 }
  0xc0   :  { %586 = vmatpush.msra.mxu0 %v5229_v13  ;;  %646 = vmatpush.msra.mxu3 %v5258_v23  ;;  %v316_v13 = vand.u32 2147483647, %v306_v63 }
  0xc1   :  { %625 = vmatpush.msra.mxu2 %v5262_v24  ;;  %606 = vmatpush.msra.mxu1 %v5232_v14 }
  0xc2   :  { %v4412_v27 = vpop.eup %4411  ;;  %587 = vmatpush.msra.mxu0 %v5240_v17  ;;  %647 = vmatpush.msra.mxu3 %v5283_v30  ;;  %v319_v30 = vor.u32 1.1754944e-38, %v318_v10  ;;  %vm317_vm3 = vcmp.eq.f32.partialorder %v316_v13, 8.507059e+37 }
  0xc3   :  { %v5428_v56 = vadd.f32 1.0, %v4412_v27  ;;  %626 = vmatpush.msra.mxu2 %v5271_v26  ;;  %607 = vmatpush.msra.mxu1 %v5244_v18 }
  0xc4   :  { %588 = vmatpush.msra.mxu0 %v5252_v21  ;;  %648 = vmatpush.msra.mxu3 %v5297_v35 }
  0xc5   :  { %v4414_v4 = vpop.eup %4413  ;;  %4415 = vrcp.f32 %v5428_v56  ;;  %627 = vmatpush.msra.mxu2 %v5285_v31  ;;  %608 = vmatpush.msra.mxu1 %v5256_v22  ;;  %v338_v10 = vand.u32 2147483648, %v5428_v56  ;;  %vm332_vm5 = vweird.f32 %v5428_v56  ;;  %v336_v13 = vand.u32 2147483647, %v5428_v56 }
  0xc6   :  { %v308_v5 = vmul.f32 %v4414_v4, %v306_v63  ;;  %4417 = vtanh.f32 %v301_v53  ;;  %vm313_vm0 = vweird.f32 %v4414_v4  ;;  %589 = vmatpush.msra.mxu0 %v5279_v28  ;;  %649 = vmatpush.msra.mxu3 %v5311_v40 }
  0xc7   :  { %628 = vmatpush.msra.mxu2 %v5299_v36  ;;  %609 = vmatpush.msra.mxu1 %v5281_v29  ;;  %vm314_vm2 = vmor %vm312_vm1, %vm313_vm0  ;;  %vm337_vm7 = vcmp.eq.f32.partialorder %v336_v13, 8.507059e+37  ;;  %v7554_v13 = vld [vmem:[#allocation24_spill] sm:$0xff] }
  0xc8   :  { %v309_v27 = vsub.f32 1.0, %v308_v5  ;;  %590 = vmatpush.msra.mxu0 %v5288_v32  ;;  %650 = vmatpush.msra.mxu3 %v5332_v48 }
  0xc9   :  { %629 = vmatpush.msra.mxu2 %v5309_v39  ;;  %610 = vmatpush.msra.mxu1 %v5290_v33 }
  0xca   :  { %v310_v19 = vmul.f32 %v4414_v4, %v309_v27  ;;  %591 = vmatpush.msra.mxu0 %v5303_v37  ;;  %651 = vmatpush.msra.mxu3 %v5342_v52 }
  0xcb   :  { %v4416_v53 = vpop.eup %4415  ;;  %630 = vmatpush.msra.mxu2 %v5330_v47  ;;  %611 = vmatpush.msra.mxu1 %v5305_v38 }
  0xcc   :  { %v311_v5 = vadd.f32 %v4414_v4, %v310_v19  ;;  %v328_v18 = vmul.f32 %v4416_v53, %v5428_v56  ;;  %v4418_v27 = vpop.eup %4417  ;;  %vm333_vm4 = vweird.f32 %v4416_v53  ;;  %592 = vmatpush.msra.mxu0 %v5323_v44  ;;  %652 = vmatpush.msra.mxu3 %v5355_v58  ;;  %v7547_v56 = vld [vmem:[#allocation45_spill] sm:$0xff] }
  0xcd   :  { %631 = vmatpush.msra.mxu2 %v5340_v51  ;;  %612 = vmatpush.msra.mxu1 %v5325_v45  ;;  %vm334_vm6 = vmor %vm332_vm5, %vm333_vm4 }
  0xce   :  { %v315_v22 = vsel %vm314_vm2, %v4414_v4, %v311_v5  ;;  %v329_v36 = vsub.f32 1.0, %v328_v18  ;;  %593 = vmatpush.msra.mxu0 %v5334_v49  ;;  %653 = vmatpush.msra.mxu3 %v5369_v62  ;;  %v7548_v5 = vld [vmem:[#allocation46_spill] sm:$0xff] }
  0xcf   :  { %v320_v19 = vsel %vm317_vm3, %v319_v30, %v315_v22  ;;  %632 = vmatpush.msra.mxu2 %v5353_v57  ;;  %613 = vmatpush.msra.mxu1 %v5336_v50  ;;  %v339_v22 = vor.u32 1.1754944e-38, %v338_v10  ;;  %v7553_v10 = vld [vmem:[#allocation21_spill] sm:$0xff] }
  0xd0   :  { %v330_v63 = vmul.f32 %v4416_v53, %v329_v36  ;;  %v5458_v29 = vmul.f32 %v4418_v27, %v320_v19  ;;  %594 = vmatpush.msra.mxu0 %v5346_v54  ;;  %654 = vmatpush.msra.mxu3 %v5381_v43  ;;  %v7549_v27 = vld [vmem:[#allocation49_spill] sm:$0xff]  ;;  %v7550_v19 = vld [vmem:[#allocation50_spill] sm:$0xff] }
  0xd1   :  { %633 = vmatpush.msra.mxu2 %v5367_v61  ;;  %614 = vmatpush.msra.mxu1 %v5348_v55 }
  0xd2   :  { %v331_v4 = vadd.f32 %v4416_v53, %v330_v63  ;;  %4419 = vtanh.f32 %v5458_v29  ;;  %595 = vmatpush.msra.mxu0 %v7547_v56  ;;  %655 = vmatpush.msra.mxu3 %v5392_v34  ;;  %v7551_v63 = vld [vmem:[#allocation19_spill] sm:$0xff] }
  0xd3   :  { %634 = vmatpush.msra.mxu2 %v5379_v42  ;;  %615 = vmatpush.msra.mxu1 %v7548_v5 }
  0xd4   :  { %v335_v18 = vsel %vm334_vm6, %v4416_v53, %v331_v4  ;;  %596 = vmatpush.msra.mxu0 %v7549_v27  ;;  %656 = vmatpush.msra.mxu3 %v5404_v60  ;;  %v7552_v4 = vld [vmem:[#allocation20_spill] sm:$0xff] }
  0xd5   :  { %v340_v36 = vsel %vm337_vm7, %v339_v22, %v335_v18  ;;  %635 = vmatpush.msra.mxu2 %v5390_v46  ;;  %616 = vmatpush.msra.mxu1 %v7550_v19  ;;  %v7555_v18 = vld [vmem:[#allocation22_spill] sm:$0xff]  ;;  %v7556_v22 = vld [vmem:[#allocation23_spill] sm:$0xff] }
  0xd6   :  { %597 = vmatpush.msra.mxu0 %v5396_v41  ;;  %657 = vmatpush.msra.mxu3 %v5412_v8 }
  0xd7   :  { %636 = vmatpush.msra.mxu2 %v5402_v0  ;;  %617 = vmatpush.msra.mxu1 %v5398_v59 }
  0xd8   :  { %v4420_v30 = vpop.eup %4419 }
  0xd9   :  { %v344_v53 = vmul.f32 %v4420_v30, %v340_v36  ;;  %637 = vmatpush.msra.mxu2 %v5410_v25  ;;  %v7557_v30 = vld [vmem:[#allocation29_spill] sm:$0xff] }
  0xda   :  { %v7558_v36 = vld [vmem:[#allocation25_spill] sm:$0xff] }
  0xdb   :  { %429 = vmatmul.f32.vlgmr.msrb.gmra.mxu0 %v344_v53  ;;  %449 = vmatmul.f32.vlgmr.msrb.gmra.mxu1 %v344_v53 }
  0xdc   :  { %469 = vmatmul.f32.vlgmr.msrb.gmra.mxu2 %v344_v53  ;;  %489 = vmatmul.f32.vlgmr.msrb.gmra.mxu3 %v344_v53  ;;  %v7559_v53 = vld [vmem:[#allocation31_spill] sm:$0xff] }
  0xdd   :  { %751 = vmatpush.msrb.mxu0 %v5197_v1  ;;  %771 = vmatpush.msrb.mxu1 %v5199_v2 }
  0xde   :  { %791 = vmatpush.msrb.mxu2 %v5227_v12  ;;  %811 = vmatpush.msrb.mxu3 %v5211_v7 }
  0xdf   :  { %752 = vmatpush.msrb.mxu0 %v5201_v3  ;;  %772 = vmatpush.msrb.mxu1 %v7551_v63 }
  0xe0   :  { %792 = vmatpush.msrb.mxu2 %v5238_v16  ;;  %812 = vmatpush.msrb.mxu3 %v5225_v11 }
  0xe1   :  { %753 = vmatpush.msrb.mxu0 %v7552_v4  ;;  %773 = vmatpush.msrb.mxu1 %v5209_v6 }
  0xe2   :  { %793 = vmatpush.msrb.mxu2 %v5250_v20  ;;  %813 = vmatpush.msrb.mxu3 %v5234_v15 }
  0xe3   :  { %754 = vmatpush.msrb.mxu0 %v5219_v9  ;;  %774 = vmatpush.msrb.mxu1 %v7553_v10 }
  0xe4   :  { %794 = vmatpush.msrb.mxu2 %v5262_v24  ;;  %814 = vmatpush.msrb.mxu3 %v7554_v13 }
  0xe5   :  { %755 = vmatpush.msrb.mxu0 %v7555_v18  ;;  %775 = vmatpush.msrb.mxu1 %v5232_v14 }
  0xe6   :  { %795 = vmatpush.msrb.mxu2 %v5271_v26  ;;  %815 = vmatpush.msrb.mxu3 %v5258_v23  ;;  %v7560_v26 = vld [vmem:[#allocation28_spill] sm:$0xff] }
  0xe7   :  { %756 = vmatpush.msrb.mxu0 %v5240_v17  ;;  %776 = vmatpush.msrb.mxu1 %v7556_v22 }
  0xe8   :  { %796 = vmatpush.msrb.mxu2 %v5285_v31  ;;  %816 = vmatpush.msrb.mxu3 %v7557_v30 }
  0xe9   :  { %757 = vmatpush.msrb.mxu0 %v5252_v21  ;;  %777 = vmatpush.msrb.mxu1 %v7558_v36 }
  0xea   :  { %797 = vmatpush.msrb.mxu2 %v7559_v53  ;;  %817 = vmatpush.msrb.mxu3 %v5297_v35 }
  0xeb   :  { %758 = vmatpush.msrb.mxu0 %v5279_v28  ;;  %778 = vmatpush.msrb.mxu1 %v7560_v26 }
  0xec   :  { %798 = vmatpush.msrb.mxu2 %v5309_v39  ;;  %818 = vmatpush.msrb.mxu3 %v5311_v40 }
  0xed   :  { %759 = vmatpush.msrb.mxu0 %v5288_v32  ;;  %779 = vmatpush.msrb.mxu1 %v5290_v33 }
  0xee   :  { %799 = vmatpush.msrb.mxu2 %v5330_v47  ;;  %819 = vmatpush.msrb.mxu3 %v5332_v48 }
  0xef   :  { %760 = vmatpush.msrb.mxu0 %v5303_v37  ;;  %780 = vmatpush.msrb.mxu1 %v5305_v38 }
  0xf0   :  { %800 = vmatpush.msrb.mxu2 %v5340_v51  ;;  %820 = vmatpush.msrb.mxu3 %v5342_v52 }
  0xf1   :  { %761 = vmatpush.msrb.mxu0 %v5323_v44  ;;  %781 = vmatpush.msrb.mxu1 %v5325_v45 }
  0xf2   :  { %801 = vmatpush.msrb.mxu2 %v5353_v57  ;;  %821 = vmatpush.msrb.mxu3 %v5355_v58 }
  0xf3   :  { %762 = vmatpush.msrb.mxu0 %v5334_v49  ;;  %782 = vmatpush.msrb.mxu1 %v5336_v50  ;;  %v345_v50 = vld [vmem:[#allocation2] sm:$0xc] }
  0xf4   :  { %802 = vmatpush.msrb.mxu2 %v5367_v61  ;;  %822 = vmatpush.msrb.mxu3 %v5369_v62 }
  0xf5   :  { %763 = vmatpush.msrb.mxu0 %v5346_v54  ;;  %783 = vmatpush.msrb.mxu1 %v5348_v55  ;;  %v7563_v55 = vld [vmem:[#allocation42_spill] sm:$0xff] }
  0xf6   :  { %803 = vmatpush.msrb.mxu2 %v5379_v42  ;;  %823 = vmatpush.msrb.mxu3 %v5381_v43  ;;  %v7562_v43 = vld [vmem:[#allocation30_spill] sm:$0xff] }
  0xf7   :  { %764 = vmatpush.msrb.mxu0 %v7547_v56  ;;  %784 = vmatpush.msrb.mxu1 %v7548_v5  ;;  %v7561_v5 = vld [vmem:[#allocation27_spill] sm:$0xff]  ;;  %v201_v56 = vpop.f32.mrf.mxu1  ;;  %v7564_v54 = vld [vmem:[#allocation34_spill] sm:$0xff] }
  0xf8   :  { %804 = vmatpush.msrb.mxu2 %v5390_v46  ;;  %824 = vmatpush.msrb.mxu3 %v5392_v34  ;;  %v145_v46 = vperm.slane %v7561_v5, 1 }
  0xf9   :  { %765 = vmatpush.msrb.mxu0 %v7549_v27  ;;  %785 = vmatpush.msrb.mxu1 %v7550_v19  ;;  %v172_v27 = vpop.f32.mrf.mxu0 }
  0xfa   :  { %805 = vmatpush.msrb.mxu2 %v5402_v0  ;;  %825 = vmatpush.msrb.mxu3 %v5404_v60  ;;  %v202_v34 = vadd.f32 %v201_v56, %v145_v46  ;;  %v173_v19 = vadd.f32 %v172_v27, %v7562_v43  ;;  %v236_v60 = vpop.f32.mrf.mxu2 }
  0xfb   :  { %766 = vmatpush.msrb.mxu0 %v5396_v41  ;;  %786 = vmatpush.msrb.mxu1 %v5398_v59  ;;  %v268_v41 = vpop.f32.mrf.mxu3  ;;  %v237_v59 = vadd.f32 %v236_v60, %v7563_v55 }
  0xfc   :  { %806 = vmatpush.msrb.mxu2 %v5410_v25  ;;  %826 = vmatpush.msrb.mxu3 %v5412_v8  ;;  %281 = vst [vmem:[#allocation2 + $0x38] sm:$0xff] %v202_v34  ;;  %v269_v25 = vadd.f32 %v268_v41, %v7564_v54 }
  0xfd   :  { %284 = vst [vmem:[#allocation2 + $0x30] sm:$0xff] %v173_v19 }
  0xfe   :  { %286 = vst [vmem:[#allocation2 + $0x78] sm:$0xff] %v237_v59 }
  0xff   :  { %v204_v0 = vpop.f32.mrf.mxu1  ;;  %287 = vst [vmem:[#allocation2 + $0x80] sm:$0xff] %v269_v25 }
 0x100   :  { %v205_v42 = vadd.f32 %v204_v0, %v145_v46 }
 0x101   :  { %v175_v8 = vpop.f32.mrf.mxu0 }
 0x102   :  { %285 = vst [vmem:[#allocation2 + $0x68] sm:$0xff] %v205_v42  ;;  %v176_v5 = vadd.f32 %v175_v8, %v7562_v43  ;;  %v239_v27 = vpop.f32.mrf.mxu2 }
 0x103   :  { %v240_v19 = vadd.f32 %v239_v27, %v7563_v55  ;;  %v271_v0 = vpop.f32.mrf.mxu3  ;;  %v346_v49 = vld [vmem:[#allocation2 + $0x38] sm:$0xc] }
 0x104   :  { %288 = vst [vmem:[#allocation2 + $0x8] sm:$0xff] %v176_v5  ;;  %v272_v42 = vadd.f32 %v271_v0, %v7564_v54 }
 0x105   :  { %290 = vst [vmem:[#allocation2 + $0x28] sm:$0xff] %v240_v19 }
 0x106   :  { %291 = vst [vmem:[#allocation2 + $0x40] sm:$0xff] %v272_v42 }
 0x107   :  { %v207_v56 = vpop.f32.mrf.mxu1 }
 0x108   :  { %v208_v34 = vadd.f32 %v207_v56, %v145_v46 }
 0x109   :  { %v178_v62 = vpop.f32.mrf.mxu0 }
 0x10a   :  { %289 = vst [vmem:[#allocation2 + $0x88] sm:$0xff] %v208_v34  ;;  %v179_v60 = vadd.f32 %v178_v62, %v7562_v43  ;;  %v242_v8 = vpop.f32.mrf.mxu2 }
 0x10b   :  { %v274_v25 = vpop.f32.mrf.mxu3  ;;  %v243_v59 = vadd.f32 %v242_v8, %v7563_v55 }
 0x10c   :  { %292 = vst [vmem:[#allocation2 + $0x58] sm:$0xff] %v179_v60  ;;  %v275_v5 = vadd.f32 %v274_v25, %v7564_v54 }
 0x10d   :  { %294 = vst [vmem:[#allocation2 + $0x98] sm:$0xff] %v243_v59 }
 0x10e   :  { %295 = vst [vmem:[#allocation2 + $0x60] sm:$0xff] %v275_v5 }
 0x10f   :  { %v210_v61 = vpop.f32.mrf.mxu1 }
 0x110   :  { %v211_v41 = vadd.f32 %v210_v61, %v145_v46 }
 0x111   :  { %v181_v56 = vpop.f32.mrf.mxu0 }
 0x112   :  { %293 = vst [vmem:[#allocation2 + $0x10] sm:$0xff] %v211_v41  ;;  %v182_v27 = vadd.f32 %v181_v56, %v7562_v43  ;;  %v245_v62 = vpop.f32.mrf.mxu2 }
 0x113   :  { %v277_v61 = vpop.f32.mrf.mxu3  ;;  %v246_v19 = vadd.f32 %v245_v62, %v7563_v55 }
 0x114   :  { %296 = vst [vmem:[#allocation2 + $0x20] sm:$0xff] %v182_v27  ;;  %v278_v42 = vadd.f32 %v277_v61, %v7564_v54  ;;  %v348_v27 = vld [vmem:[#allocation2 + $0x18] sm:$0xc] }
 0x115   :  { %298 = vst [vmem:[#allocation2 + $0x70] sm:$0xff] %v246_v19 }
 0x116   :  { %299 = vst [vmem:[#allocation2 + $0x90] sm:$0xff] %v278_v42 }
 0x117   :  { %v213_v34 = vpop.f32.mrf.mxu1 }
 0x118   :  { %v214_v0 = vadd.f32 %v213_v34, %v145_v46 }
 0x11a   :  { %297 = vst [vmem:[#allocation2 + $0x48] sm:$0xff] %v214_v0 }
 0x158   :  { %v430_v60 = vpop.f32.mrf.mxu0  ;;  %v450_v41 = vpop.f32.mrf.mxu1 }
 0x159   :  { %v497_v8 = vrot.slane %v430_v60, 6  ;;  %v498_v25 = vrot.slane %v450_v41, 6 }
 0x15b   :  { %v505_v43 = vadd.f32 %v497_v8, %v345_v50  ;;  %v506_v46 = vadd.f32 %v498_v25, %v346_v49  ;;  %v347_v49 = vld [vmem:[#allocation2 + $0x50] sm:$0xc] }
 0x15d   :  { %v4336_v59 = vmul.f32 -1.442695, %v505_v43  ;;  %v4338_v5 = vmul.f32 -1.442695, %v506_v46 }
 0x15f   :  { %4421 = vpow2.f32 %v4336_v59  ;;  %v490_v56 = vpop.f32.mrf.mxu3  ;;  %v470_v42 = vpop.f32.mrf.mxu2 }
 0x160   :  { %4423 = vpow2.f32 %v4338_v5  ;;  %v500_v34 = vrot.slane %v490_v56, 6  ;;  %v499_v60 = vrot.slane %v470_v42, 6 }
 0x162   :  { %v508_v55 = vadd.f32 %v500_v34, %v348_v27  ;;  %v507_v25 = vadd.f32 %v499_v60, %v347_v49 }
 0x164   :  { %v4337_v0 = vmul.f32 -1.442695, %v508_v55 }
 0x165   :  { %v4422_v54 = vpop.eup %4421 }
 0x166   :  { %v4424_v62 = vpop.eup %4423  ;;  %v512_v61 = vadd.f32 1.0, %v4422_v54  ;;  %4425 = vpow2.f32 %v4337_v0 }
 0x167   :  { %v552_v19 = vadd.f32 1.0, %v4424_v62 }
 0x168   :  { %4427 = vrcp.f32 %v512_v61  ;;  %v524_v34 = vand.u32 2147483648, %v512_v61  ;;  %v522_v0 = vand.u32 2147483647, %v512_v61  ;;  %vm518_vm10 = vweird.f32 %v512_v61 }
 0x169   :  { %4429 = vrcp.f32 %v552_v19  ;;  %v564_v27 = vand.u32 2147483648, %v552_v19  ;;  %v562_v62 = vand.u32 2147483647, %v552_v19  ;;  %vm558_vm11 = vweird.f32 %v552_v19 }
 0x16a   :  { %v525_v60 = vor.u32 1.1754944e-38, %v524_v34  ;;  %vm523_vm14 = vcmp.eq.f32.partialorder %v522_v0, 8.507059e+37 }
 0x16b   :  { %vm563_vm15 = vcmp.eq.f32.partialorder %v562_v62, 8.507059e+37 }
 0x16c   :  { %v4426_v50 = vpop.eup %4425 }
 0x16d   :  { %v532_v41 = vadd.f32 1.0, %v4426_v50 }
 0x16e   :  { %v4428_v8 = vpop.eup %4427 }
 0x16f   :  { %v4430_v43 = vpop.eup %4429  ;;  %v514_v46 = vmul.f32 %v4428_v8, %v512_v61  ;;  %4431 = vrcp.f32 %v532_v41  ;;  %vm519_vm8 = vweird.f32 %v4428_v8  ;;  %vm538_vm1 = vweird.f32 %v532_v41 }
 0x170   :  { %v554_v59 = vmul.f32 %v4430_v43, %v552_v19  ;;  %4433 = vtanh.f32 %v507_v25  ;;  %vm559_vm9 = vweird.f32 %v4430_v43  ;;  %vm520_vm12 = vmor %vm518_vm10, %vm519_vm8  ;;  %v569_v25 = vrot.slane %v5458_v29, 6 }
 0x171   :  { %v515_v5 = vsub.f32 1.0, %v514_v46  ;;  %vm560_vm13 = vmor %vm558_vm11, %vm559_vm9  ;;  %v565_v46 = vor.u32 1.1754944e-38, %v564_v27  ;;  %v544_v27 = vand.u32 2147483648, %v532_v41 }
 0x172   :  { %v555_v56 = vsub.f32 1.0, %v554_v59 }
 0x173   :  { %v516_v55 = vmul.f32 %v4428_v8, %v515_v5 }
 0x174   :  { %v556_v54 = vmul.f32 %v4430_v43, %v555_v56 }
 0x175   :  { %v4432_v42 = vpop.eup %4431  ;;  %v517_v58 = vadd.f32 %v4428_v8, %v516_v55 }
 0x176   :  { %v557_v50 = vadd.f32 %v4430_v43, %v556_v54  ;;  %v534_v49 = vmul.f32 %v4432_v42, %v532_v41  ;;  %v4434_v5 = vpop.eup %4433  ;;  %vm539_vm0 = vweird.f32 %v4432_v42 }
 0x177   :  { %v521_v59 = vsel %vm520_vm12, %v4428_v8, %v517_v58  ;;  %v542_v58 = vand.u32 2147483647, %v532_v41  ;;  %vm540_vm2 = vmor %vm538_vm1, %vm539_vm0  ;;  %v545_v8 = vor.u32 1.1754944e-38, %v544_v27 }
 0x178   :  { %v526_v57 = vsel %vm523_vm14, %v525_v60, %v521_v59  ;;  %v561_v45 = vsel %vm560_vm13, %v4430_v43, %v557_v50  ;;  %v535_v56 = vsub.f32 1.0, %v534_v49  ;;  %v577_v59 = vld [vmem:[#allocation2 + $0x50] sm:$0x30] }
 0x179   :  { %v548_v44 = vmul.f32 %v4434_v5, %v526_v57  ;;  %v566_v52 = vsel %vm563_vm15, %v565_v46, %v561_v45  ;;  %vm543_vm3 = vcmp.eq.f32.partialorder %v542_v58, 8.507059e+37 }
 0x17a   :  { %v571_v55 = vmul.f32 %v569_v25, %v566_v52  ;;  %v536_v61 = vmul.f32 %v4432_v42, %v535_v56  ;;  %v576_v52 = vld [vmem:[#allocation2 + $0x38] sm:$0x30] }
 0x17c   :  { %v5570_v19 = vadd.f32 %v571_v55, %v548_v44  ;;  %v537_v34 = vadd.f32 %v4432_v42, %v536_v61 }
 0x17e   :  { %4435 = vtanh.f32 %v5570_v19  ;;  %v541_v29 = vsel %vm540_vm2, %v4432_v42, %v537_v34 }
 0x17f   :  { %v546_v0 = vsel %vm543_vm3, %v545_v8, %v541_v29 }
 0x184   :  { %v4436_v43 = vpop.eup %4435 }
 0x185   :  { %v574_v54 = vmul.f32 %v4436_v43, %v546_v0 }
 0x187   :  { %v580_v57 = vrot.slane %v574_v54, 2 }
 0x189   :  { %598 = vmatmul.f32.vlgmr.msra.gmra.mxu0 %v580_v57  ;;  %618 = vmatmul.f32.vlgmr.msra.gmra.mxu1 %v580_v57 }
 0x18a   :  { %638 = vmatmul.f32.vlgmr.msra.gmra.mxu2 %v580_v57  ;;  %658 = vmatmul.f32.vlgmr.msra.gmra.mxu3 %v580_v57 }
 0x18b   :  { %920 = vmatpush.msra.mxu0 %v5197_v1  ;;  %940 = vmatpush.msra.mxu1 %v5199_v2  ;;  %v7565_v1 = vld [vmem:[#allocation26_spill] sm:$0xff]  ;;  %v7566_v2 = vld [vmem:[#allocation37_spill] sm:$0xff] }
 0x18c   :  { %960 = vmatpush.msra.mxu2 %v5227_v12  ;;  %980 = vmatpush.msra.mxu3 %v5211_v7  ;;  %v7569_v7 = vld [vmem:[#allocation40_spill] sm:$0xff] }
 0x18d   :  { %921 = vmatpush.msra.mxu0 %v5201_v3  ;;  %941 = vmatpush.msra.mxu1 %v7551_v63  ;;  %v7567_v3 = vld [vmem:[#allocation32_spill] sm:$0xff] }
 0x18e   :  { %961 = vmatpush.msra.mxu2 %v5238_v16  ;;  %981 = vmatpush.msra.mxu3 %v5225_v11  ;;  %v7571_v11 = vld [vmem:[#allocation35_spill] sm:$0xff]  ;;  %v7572_v12 = vld [vmem:[#allocation36_spill] sm:$0xff]  ;;  %v7575_v16 = vld [vmem:[#allocation38_spill] sm:$0xff] }
 0x18f   :  { %922 = vmatpush.msra.mxu0 %v7552_v4  ;;  %942 = vmatpush.msra.mxu1 %v5209_v6  ;;  %v7568_v6 = vld [vmem:[#allocation33_spill] sm:$0xff] }
 0x190   :  { %962 = vmatpush.msra.mxu2 %v5250_v20  ;;  %982 = vmatpush.msra.mxu3 %v5234_v15  ;;  %v7574_v15 = vld [vmem:[#allocation44_spill] sm:$0xff]  ;;  %v7577_v20 = vld [vmem:[#allocation47_spill] sm:$0xff] }
 0x191   :  { %923 = vmatpush.msra.mxu0 %v5219_v9  ;;  %943 = vmatpush.msra.mxu1 %v7553_v10  ;;  %v7570_v9 = vld [vmem:[#allocation41_spill] sm:$0xff] }
 0x192   :  { %963 = vmatpush.msra.mxu2 %v5262_v24  ;;  %983 = vmatpush.msra.mxu3 %v7554_v13  ;;  %v7580_v24 = vld [vmem:[#allocation46_spill] sm:$0xff] }
 0x193   :  { %924 = vmatpush.msra.mxu0 %v7555_v18  ;;  %944 = vmatpush.msra.mxu1 %v5232_v14  ;;  %v7573_v14 = vld [vmem:[#allocation43_spill] sm:$0xff] }
 0x194   :  { %964 = vmatpush.msra.mxu2 %v7565_v1  ;;  %984 = vmatpush.msra.mxu3 %v5258_v23  ;;  %v7579_v23 = vld [vmem:[#allocation45_spill] sm:$0xff] }
 0x195   :  { %925 = vmatpush.msra.mxu0 %v5240_v17  ;;  %945 = vmatpush.msra.mxu1 %v7556_v22  ;;  %v7576_v17 = vld [vmem:[#allocation39_spill] sm:$0xff] }
 0x196   :  { %965 = vmatpush.msra.mxu2 %v5285_v31  ;;  %985 = vmatpush.msra.mxu3 %v7557_v30  ;;  %v7583_v31 = vld [vmem:[#allocation49_spill] sm:$0xff]  ;;  %v578_v30 = vld [vmem:[#allocation2 + $0x18] sm:$0x30] }
 0x197   :  { %926 = vmatpush.msra.mxu0 %v5252_v21  ;;  %946 = vmatpush.msra.mxu1 %v7558_v36  ;;  %v7578_v21 = vld [vmem:[#allocation48_spill] sm:$0xff] }
 0x198   :  { %966 = vmatpush.msra.mxu2 %v7559_v53  ;;  %986 = vmatpush.msra.mxu3 %v5297_v35  ;;  %v7586_v35 = vld [vmem:[#allocation56_spill] sm:$0xff] }
 0x199   :  { %927 = vmatpush.msra.mxu0 %v5279_v28  ;;  %947 = vmatpush.msra.mxu1 %v7560_v26  ;;  %v7581_v26 = vld [vmem:[#allocation51_spill] sm:$0xff]  ;;  %v7582_v28 = vld [vmem:[#allocation52_spill] sm:$0xff] }
 0x19a   :  { %967 = vmatpush.msra.mxu2 %v5309_v39  ;;  %987 = vmatpush.msra.mxu3 %v5311_v40  ;;  %v7589_v39 = vld [vmem:[#allocation57_spill] sm:$0xff]  ;;  %v7590_v40 = vld [vmem:[#allocation58_spill] sm:$0xff] }
 0x19b   :  { %928 = vmatpush.msra.mxu0 %v5288_v32  ;;  %948 = vmatpush.msra.mxu1 %v5290_v33  ;;  %v7584_v32 = vld [vmem:[#allocation50_spill] sm:$0xff]  ;;  %v7585_v33 = vld [vmem:[#allocation55_spill] sm:$0xff] }
 0x19c   :  { %968 = vmatpush.msra.mxu2 %v5330_v47  ;;  %988 = vmatpush.msra.mxu3 %v5332_v48 }
 0x19d   :  { %929 = vmatpush.msra.mxu0 %v5303_v37  ;;  %949 = vmatpush.msra.mxu1 %v5305_v38  ;;  %v7587_v37 = vld [vmem:[#allocation53_spill] sm:$0xff]  ;;  %v7588_v38 = vld [vmem:[#allocation54_spill] sm:$0xff] }
 0x19e   :  { %969 = vmatpush.msra.mxu2 %v5340_v51  ;;  %989 = vmatpush.msra.mxu3 %v7566_v2  ;;  %v575_v51 = vld [vmem:[#allocation2] sm:$0x30] }
 0x19f   :  { %930 = vmatpush.msra.mxu0 %v7567_v3  ;;  %950 = vmatpush.msra.mxu1 %v7568_v6 }
 0x1a0   :  { %970 = vmatpush.msra.mxu2 %v7569_v7  ;;  %990 = vmatpush.msra.mxu3 %v7570_v9  ;;  %v738_v9 = vrot.slane %v5570_v19, 6 }
 0x1a1   :  { %931 = vmatpush.msra.mxu0 %v7571_v11  ;;  %951 = vmatpush.msra.mxu1 %v7572_v12 }
 0x1a2   :  { %971 = vmatpush.msra.mxu2 %v7573_v14  ;;  %991 = vmatpush.msra.mxu3 %v7574_v15 }
 0x1a3   :  { %932 = vmatpush.msra.mxu0 %v7575_v16  ;;  %952 = vmatpush.msra.mxu1 %v7576_v17 }
 0x1a4   :  { %972 = vmatpush.msra.mxu2 %v7577_v20  ;;  %992 = vmatpush.msra.mxu3 %v7578_v21 }
 0x1a5   :  { %933 = vmatpush.msra.mxu0 %v7579_v23  ;;  %953 = vmatpush.msra.mxu1 %v7580_v24 }
 0x1a6   :  { %973 = vmatpush.msra.mxu2 %v7581_v26  ;;  %993 = vmatpush.msra.mxu3 %v7582_v28 }
 0x1a7   :  { %934 = vmatpush.msra.mxu0 %v7583_v31  ;;  %954 = vmatpush.msra.mxu1 %v7584_v32 }
 0x1a8   :  { %974 = vmatpush.msra.mxu2 %v7585_v33  ;;  %994 = vmatpush.msra.mxu3 %v7586_v35 }
 0x1a9   :  { %935 = vmatpush.msra.mxu0 %v7587_v37  ;;  %955 = vmatpush.msra.mxu1 %v7588_v38 }
 0x1aa   :  { %975 = vmatpush.msra.mxu2 %v7589_v39  ;;  %995 = vmatpush.msra.mxu3 %v7590_v40  ;;  %v5641_v40 = vld [vmem:[#allocation8 + $0x1e0] sm:$0xff] }
 0x206   :  { %v599_v44 = vpop.f32.mrf.mxu0  ;;  %v619_v45 = vpop.f32.mrf.mxu1 }
 0x207   :  { %v666_v47 = vrot.slane %v599_v44, 4  ;;  %v667_v48 = vrot.slane %v619_v45, 4  ;;  %v5644_v44 = vld [vmem:[#allocation8 + $0x1e8] sm:$0xff]  ;;  %v5647_v45 = vld [vmem:[#allocation8 + $0x1f0] sm:$0xff] }
 0x209   :  { %v674_v63 = vadd.f32 %v666_v47, %v575_v51  ;;  %v675_v4 = vadd.f32 %v667_v48, %v576_v52  ;;  %v5650_v47 = vld [vmem:[#allocation8 + $0x1f8] sm:$0xff]  ;;  %v5653_v48 = vld [vmem:[#allocation8 + $0x1c0] sm:$0xff]  ;;  %v5656_v51 = vld [vmem:[#allocation8 + $0x1c8] sm:$0xff] }
 0x20a   :  { %v5659_v52 = vld [vmem:[#allocation8 + $0x1d0] sm:$0xff] }
 0x20b   :  { %v4339_v10 = vmul.f32 -1.442695, %v674_v63  ;;  %v4341_v13 = vmul.f32 -1.442695, %v675_v4  ;;  %v5662_v63 = vld [vmem:[#allocation8 + $0x1d8] sm:$0xff]  ;;  %v5665_v4 = vld [vmem:[#allocation8 + $0x1a0] sm:$0xff] }
 0x20d   :  { %4437 = vpow2.f32 %v4339_v10  ;;  %v659_v18 = vpop.f32.mrf.mxu3  ;;  %v639_v50 = vpop.f32.mrf.mxu2  ;;  %v5668_v10 = vld [vmem:[#allocation8 + $0x1a8] sm:$0xff] }
 0x20e   :  { %4439 = vpow2.f32 %v4341_v13  ;;  %v669_v22 = vrot.slane %v659_v18, 4  ;;  %v668_v49 = vrot.slane %v639_v50, 4  ;;  %v5671_v13 = vld [vmem:[#allocation8 + $0x1b0] sm:$0xff]  ;;  %v5674_v18 = vld [vmem:[#allocation8 + $0x1b8] sm:$0xff]  ;;  %v5701_v50 = vld [vmem:[#allocation8 + $0x140] sm:$0xff] }
 0x210   :  { %v677_v36 = vadd.f32 %v669_v22, %v578_v30  ;;  %v676_v56 = vadd.f32 %v668_v49, %v577_v59  ;;  %v5677_v22 = vld [vmem:[#allocation8 + $0x180] sm:$0xff]  ;;  %v5680_v30 = vld [vmem:[#allocation8 + $0x188] sm:$0xff]  ;;  %v5710_v59 = vld [vmem:[#allocation8 + $0x158] sm:$0xff] }
 0x211   :  { %v5704_v49 = vld [vmem:[#allocation8 + $0x148] sm:$0xff] }
 0x212   :  { %v4340_v53 = vmul.f32 -1.442695, %v677_v36  ;;  %v5683_v36 = vld [vmem:[#allocation8 + $0x190] sm:$0xff] }
 0x213   :  { %v4438_v41 = vpop.eup %4437 }
 0x214   :  { %v4440_v62 = vpop.eup %4439  ;;  %v681_v42 = vadd.f32 1.0, %v4438_v41  ;;  %4441 = vpow2.f32 %v4340_v53  ;;  %v5686_v53 = vld [vmem:[#allocation8 + $0x198] sm:$0xff]  ;;  %v5689_v41 = vld [vmem:[#allocation8 + $0x160] sm:$0xff] }
 0x215   :  { %v721_v60 = vadd.f32 1.0, %v4440_v62  ;;  %v5692_v62 = vld [vmem:[#allocation8 + $0x168] sm:$0xff] }
 0x216   :  { %4443 = vrcp.f32 %v681_v42  ;;  %v693_v29 = vand.u32 2147483648, %v681_v42  ;;  %v691_v0 = vand.u32 2147483647, %v681_v42  ;;  %vm687_vm6 = vweird.f32 %v681_v42 }
 0x217   :  { %4445 = vrcp.f32 %v721_v60  ;;  %v733_v8 = vand.u32 2147483648, %v721_v60  ;;  %v731_v57 = vand.u32 2147483647, %v721_v60  ;;  %vm727_vm7 = vweird.f32 %v721_v60 }
 0x218   :  { %v694_v3 = vor.u32 1.1754944e-38, %v693_v29  ;;  %vm692_vm10 = vcmp.eq.f32.partialorder %v691_v0, 8.507059e+37  ;;  %v5737_v29 = vld [vmem:[#allocation8 + $0xe0] sm:$0xff]  ;;  %v5746_v0 = vld [vmem:[#allocation8 + $0xf8] sm:$0xff] }
 0x219   :  { %v734_v11 = vor.u32 1.1754944e-38, %v733_v8  ;;  %vm732_vm11 = vcmp.eq.f32.partialorder %v731_v57, 8.507059e+37  ;;  %v5740_v8 = vld [vmem:[#allocation8 + $0xe8] sm:$0xff] }
 0x21a   :  { %v4442_v46 = vpop.eup %4441  ;;  %v5752_v57 = vld [vmem:[#allocation8 + $0xc8] sm:$0xff] }
 0x21b   :  { %v701_v25 = vadd.f32 1.0, %v4442_v46  ;;  %v5707_v46 = vld [vmem:[#allocation8 + $0x150] sm:$0xff] }
 0x21c   :  { %v4444_v5 = vpop.eup %4443 }
 0x21d   :  { %v4446_v55 = vpop.eup %4445  ;;  %v683_v61 = vmul.f32 %v4444_v5, %v681_v42  ;;  %4447 = vrcp.f32 %v701_v25  ;;  %vm688_vm4 = vweird.f32 %v4444_v5  ;;  %v713_v19 = vand.u32 2147483648, %v701_v25  ;;  %v5695_v42 = vld [vmem:[#allocation8 + $0x170] sm:$0xff] }
 0x21e   :  { %v723_v34 = vmul.f32 %v4446_v55, %v721_v60  ;;  %4449 = vtanh.f32 %v676_v56  ;;  %vm728_vm5 = vweird.f32 %v4446_v55  ;;  %vm689_vm8 = vmor %vm687_vm6, %vm688_vm4  ;;  %vm707_vm13 = vweird.f32 %v701_v25  ;;  %v5698_v60 = vld [vmem:[#allocation8 + $0x178] sm:$0xff]  ;;  %v5719_v56 = vld [vmem:[#allocation8 + $0x130] sm:$0xff] }
 0x21f   :  { %v684_v27 = vsub.f32 1.0, %v683_v61  ;;  %vm729_vm9 = vmor %vm727_vm7, %vm728_vm5  ;;  %v711_v31 = vand.u32 2147483647, %v701_v25  ;;  %v714_v33 = vor.u32 1.1754944e-38, %v713_v19  ;;  %v5725_v61 = vld [vmem:[#allocation8 + $0x100] sm:$0xff]  ;;  %v5806_v19 = vld [vmem:[#allocation8 + $0x58] sm:$0xff] }
 0x220   :  { %v724_v58 = vsub.f32 1.0, %v723_v34  ;;  %v5728_v34 = vld [vmem:[#allocation8 + $0x108] sm:$0xff]  ;;  %7608 = vst [vmem:[#allocation33_spill] sm:$0xff] %v5806_v19 }
 0x221   :  { %v685_v43 = vmul.f32 %v4444_v5, %v684_v27  ;;  %vm712_vm15 = vcmp.eq.f32.partialorder %v711_v31, 8.507059e+37  ;;  %v5731_v27 = vld [vmem:[#allocation8 + $0x110] sm:$0xff]  ;;  %v5809_v31 = vld [vmem:[#allocation8 + $0x20] sm:$0xff] }
 0x222   :  { %v725_v54 = vmul.f32 %v4446_v55, %v724_v58  ;;  %v5734_v58 = vld [vmem:[#allocation8 + $0x118] sm:$0xff]  ;;  %7609 = vst [vmem:[#allocation40_spill] sm:$0xff] %v5809_v31 }
 0x223   :  { %v4448_v1 = vpop.eup %4447  ;;  %v686_v2 = vadd.f32 %v4444_v5, %v685_v43  ;;  %v5743_v43 = vld [vmem:[#allocation8 + $0xf0] sm:$0xff] }
 0x224   :  { %v726_v6 = vadd.f32 %v4446_v55, %v725_v54  ;;  %v703_v7 = vmul.f32 %v4448_v1, %v701_v25  ;;  %v4450_v14 = vpop.eup %4449  ;;  %vm708_vm12 = vweird.f32 %v4448_v1  ;;  %v5713_v25 = vld [vmem:[#allocation8 + $0x120] sm:$0xff] }
 0x225   :  { %v690_v12 = vsel %vm689_vm8, %v4444_v5, %v686_v2  ;;  %vm709_vm14 = vmor %vm707_vm13, %vm708_vm12  ;;  %v5716_v5 = vld [vmem:[#allocation8 + $0x128] sm:$0xff]  ;;  %v5749_v54 = vld [vmem:[#allocation8 + $0xc0] sm:$0xff] }
 0x226   :  { %v695_v15 = vsel %vm692_vm10, %v694_v3, %v690_v12  ;;  %v730_v16 = vsel %vm729_vm9, %v4446_v55, %v726_v6  ;;  %v704_v17 = vsub.f32 1.0, %v703_v7  ;;  %v5722_v55 = vld [vmem:[#allocation8 + $0x138] sm:$0xff]  ;;  %v5761_v3 = vld [vmem:[#allocation8 + $0xa0] sm:$0xff]  ;;  %v5764_v6 = vld [vmem:[#allocation8 + $0xa8] sm:$0xff] }
 0x227   :  { %v717_v20 = vmul.f32 %v4450_v14, %v695_v15  ;;  %v735_v21 = vsel %vm732_vm11, %v734_v11, %v730_v16  ;;  %v5758_v2 = vld [vmem:[#allocation8 + $0xd8] sm:$0xff]  ;;  %7593 = vst [vmem:[#allocation21_spill] sm:$0xff] %v5761_v3  ;;  %v5767_v7 = vld [vmem:[#allocation8 + $0xb0] sm:$0xff]  ;;  %v5773_v11 = vld [vmem:[#allocation8 + $0x80] sm:$0xff] }
 0x228   :  { %v740_v23 = vmul.f32 %v738_v9, %v735_v21  ;;  %v705_v24 = vmul.f32 %v4448_v1, %v704_v17  ;;  %7592 = vst [vmem:[#allocation20_spill] sm:$0xff] %v5758_v2  ;;  %v5770_v9 = vld [vmem:[#allocation8 + $0xb8] sm:$0xff]  ;;  %v5776_v12 = vld [vmem:[#allocation8 + $0x88] sm:$0xff]  ;;  %v5779_v14 = vld [vmem:[#allocation8 + $0x90] sm:$0xff] }
 0x229   :  { %7594 = vst [vmem:[#allocation24_spill] sm:$0xff] %v5764_v6  ;;  %v5782_v15 = vld [vmem:[#allocation8 + $0x98] sm:$0xff]  ;;  %v5785_v16 = vld [vmem:[#allocation8 + $0x60] sm:$0xff]  ;;  %v5788_v17 = vld [vmem:[#allocation8 + $0x68] sm:$0xff] }
 0x22a   :  { %v5638_v26 = vadd.f32 %v740_v23, %v717_v20  ;;  %v706_v28 = vadd.f32 %v4448_v1, %v705_v24  ;;  %7595 = vst [vmem:[#allocation22_spill] sm:$0xff] %v5767_v7  ;;  %v5791_v20 = vld [vmem:[#allocation8 + $0x70] sm:$0xff]  ;;  %v5794_v21 = vld [vmem:[#allocation8 + $0x78] sm:$0xff]  ;;  %v5797_v23 = vld [vmem:[#allocation8 + $0x40] sm:$0xff] }
 0x22b   :  { %7596 = vst [vmem:[#allocation23_spill] sm:$0xff] %v5770_v9  ;;  %v5800_v24 = vld [vmem:[#allocation8 + $0x48] sm:$0xff] }
 0x22c   :  { %4451 = vtanh.f32 %v5638_v26  ;;  %v710_v32 = vsel %vm709_vm14, %v4448_v1, %v706_v28  ;;  %v5755_v1 = vld [vmem:[#allocation8 + $0xd0] sm:$0xff]  ;;  %7597 = vst [vmem:[#allocation29_spill] sm:$0xff] %v5773_v11 }
 0x22d   :  { %v715_v37 = vsel %vm712_vm15, %v714_v33, %v710_v32  ;;  %7591 = vst [vmem:[#allocation19_spill] sm:$0xff] %v5755_v1  ;;  %v5803_v28 = vld [vmem:[#allocation8 + $0x50] sm:$0xff]  ;;  %v5812_v32 = vld [vmem:[#allocation8 + $0x28] sm:$0xff] }
 0x22e   :  { %7598 = vst [vmem:[#allocation25_spill] sm:$0xff] %v5776_v12  ;;  %v5815_v33 = vld [vmem:[#allocation8 + $0x30] sm:$0xff] }
 0x22f   :  { %7599 = vst [vmem:[#allocation31_spill] sm:$0xff] %v5779_v14 }
 0x230   :  { %7600 = vst [vmem:[#allocation28_spill] sm:$0xff] %v5782_v15 }
 0x231   :  { %7601 = vst [vmem:[#allocation27_spill] sm:$0xff] %v5785_v16 }
 0x232   :  { %v4452_v35 = vpop.eup %4451  ;;  %7602 = vst [vmem:[#allocation30_spill] sm:$0xff] %v5788_v17 }
 0x233   :  { %v743_v38 = vmul.f32 %v4452_v35, %v715_v37  ;;  %7603 = vst [vmem:[#allocation42_spill] sm:$0xff] %v5791_v20  ;;  %v5818_v35 = vld [vmem:[#allocation8 + $0x38] sm:$0xff]  ;;  %v5821_v37 = vld [vmem:[#allocation8] sm:$0xff] }
 0x234   :  { %7604 = vst [vmem:[#allocation34_spill] sm:$0xff] %v5794_v21 }
 0x235   :  { %v749_v39 = vrot.slane %v743_v38, 4  ;;  %7605 = vst [vmem:[#allocation26_spill] sm:$0xff] %v5797_v23  ;;  %v5824_v38 = vld [vmem:[#allocation8 + $0x8] sm:$0xff] }
 0x236   :  { %7606 = vst [vmem:[#allocation37_spill] sm:$0xff] %v5800_v24 }
 0x237   :  { %767 = vmatmul.f32.vlgmr.msrb.gmra.mxu0 %v749_v39  ;;  %787 = vmatmul.f32.vlgmr.msrb.gmra.mxu1 %v749_v39  ;;  %7607 = vst [vmem:[#allocation32_spill] sm:$0xff] %v5803_v28 }
 0x238   :  { %807 = vmatmul.f32.vlgmr.msrb.gmra.mxu2 %v749_v39  ;;  %827 = vmatmul.f32.vlgmr.msrb.gmra.mxu3 %v749_v39  ;;  %7610 = vst [vmem:[#allocation41_spill] sm:$0xff] %v5812_v32  ;;  %v5827_v39 = vld [vmem:[#allocation8 + $0x10] sm:$0xff] }
 0x239   :  { %1074 = vmatpush.msrb.mxu0 %v5641_v40  ;;  %1094 = vmatpush.msrb.mxu1 %v5644_v44  ;;  %7611 = vst [vmem:[#allocation35_spill] sm:$0xff] %v5815_v33 }
 0x23a   :  { %1114 = vmatpush.msrb.mxu2 %v5647_v45  ;;  %1134 = vmatpush.msrb.mxu3 %v5650_v47  ;;  %7612 = vst [vmem:[#allocation36_spill] sm:$0xff] %v5818_v35 }
 0x23b   :  { %1075 = vmatpush.msrb.mxu0 %v5653_v48  ;;  %1095 = vmatpush.msrb.mxu1 %v5656_v51  ;;  %7613 = vst [vmem:[#allocation43_spill] sm:$0xff] %v5821_v37 }
 0x23c   :  { %1115 = vmatpush.msrb.mxu2 %v5659_v52  ;;  %1135 = vmatpush.msrb.mxu3 %v5662_v63  ;;  %7614 = vst [vmem:[#allocation44_spill] sm:$0xff] %v5824_v38 }
 0x23d   :  { %1076 = vmatpush.msrb.mxu0 %v5665_v4  ;;  %1096 = vmatpush.msrb.mxu1 %v5668_v10  ;;  %7615 = vst [vmem:[#allocation38_spill] sm:$0xff] %v5827_v39 }
 0x23e   :  { %1116 = vmatpush.msrb.mxu2 %v5671_v13  ;;  %1136 = vmatpush.msrb.mxu3 %v5674_v18 }
 0x23f   :  { %1077 = vmatpush.msrb.mxu0 %v5677_v22  ;;  %1097 = vmatpush.msrb.mxu1 %v5680_v30 }
 0x240   :  { %1117 = vmatpush.msrb.mxu2 %v5683_v36  ;;  %1137 = vmatpush.msrb.mxu3 %v5686_v53 }
 0x241   :  { %1078 = vmatpush.msrb.mxu0 %v5689_v41  ;;  %1098 = vmatpush.msrb.mxu1 %v5692_v62 }
 0x242   :  { %1118 = vmatpush.msrb.mxu2 %v5695_v42  ;;  %1138 = vmatpush.msrb.mxu3 %v5698_v60 }
 0x243   :  { %1079 = vmatpush.msrb.mxu0 %v5701_v50  ;;  %1099 = vmatpush.msrb.mxu1 %v5704_v49 }
 0x244   :  { %1119 = vmatpush.msrb.mxu2 %v5707_v46  ;;  %1139 = vmatpush.msrb.mxu3 %v5710_v59 }
 0x245   :  { %1080 = vmatpush.msrb.mxu0 %v5713_v25  ;;  %1100 = vmatpush.msrb.mxu1 %v5716_v5 }
 0x246   :  { %1120 = vmatpush.msrb.mxu2 %v5719_v56  ;;  %1140 = vmatpush.msrb.mxu3 %v5722_v55 }
 0x247   :  { %1081 = vmatpush.msrb.mxu0 %v5725_v61  ;;  %1101 = vmatpush.msrb.mxu1 %v5728_v34 }
 0x248   :  { %1121 = vmatpush.msrb.mxu2 %v5731_v27  ;;  %1141 = vmatpush.msrb.mxu3 %v5734_v58 }
 0x249   :  { %1082 = vmatpush.msrb.mxu0 %v5737_v29  ;;  %1102 = vmatpush.msrb.mxu1 %v5740_v8 }
 0x24a   :  { %1122 = vmatpush.msrb.mxu2 %v5743_v43  ;;  %1142 = vmatpush.msrb.mxu3 %v5746_v0 }
 0x24b   :  { %1083 = vmatpush.msrb.mxu0 %v5749_v54  ;;  %1103 = vmatpush.msrb.mxu1 %v5752_v57 }
 0x24c   :  { %1123 = vmatpush.msrb.mxu2 %v5755_v1  ;;  %1143 = vmatpush.msrb.mxu3 %v5758_v2 }
 0x24d   :  { %1084 = vmatpush.msrb.mxu0 %v5761_v3  ;;  %1104 = vmatpush.msrb.mxu1 %v5764_v6 }
 0x24e   :  { %1124 = vmatpush.msrb.mxu2 %v5767_v7  ;;  %1144 = vmatpush.msrb.mxu3 %v5770_v9 }
 0x24f   :  { %1085 = vmatpush.msrb.mxu0 %v5773_v11  ;;  %1105 = vmatpush.msrb.mxu1 %v5776_v12 }
 0x250   :  { %1125 = vmatpush.msrb.mxu2 %v5779_v14  ;;  %1145 = vmatpush.msrb.mxu3 %v5782_v15 }
 0x251   :  { %1086 = vmatpush.msrb.mxu0 %v5785_v16  ;;  %1106 = vmatpush.msrb.mxu1 %v5788_v17  ;;  %v747_v16 = vld [vmem:[#allocation2 + $0x18] sm:$0xc0] }
 0x252   :  { %1126 = vmatpush.msrb.mxu2 %v5791_v20  ;;  %1146 = vmatpush.msrb.mxu3 %v5794_v21 }
 0x253   :  { %1087 = vmatpush.msrb.mxu0 %v5797_v23  ;;  %1107 = vmatpush.msrb.mxu1 %v5800_v24  ;;  %v745_v24 = vld [vmem:[#allocation2 + $0x38] sm:$0xc0] }
 0x254   :  { %1127 = vmatpush.msrb.mxu2 %v5803_v28  ;;  %1147 = vmatpush.msrb.mxu3 %v5806_v19  ;;  %v744_v28 = vld [vmem:[#allocation2] sm:$0xc0] }
 0x255   :  { %1088 = vmatpush.msrb.mxu0 %v5809_v31  ;;  %1108 = vmatpush.msrb.mxu1 %v5812_v32  ;;  %v5830_v32 = vld [vmem:[#allocation8 + $0x18] sm:$0xff] }
 0x256   :  { %1128 = vmatpush.msrb.mxu2 %v5815_v33  ;;  %1148 = vmatpush.msrb.mxu3 %v5818_v35  ;;  %7616 = vst [vmem:[#allocation39_spill] sm:$0xff] %v5830_v32 }
 0x257   :  { %1089 = vmatpush.msrb.mxu0 %v5821_v37  ;;  %1109 = vmatpush.msrb.mxu1 %v5824_v38 }
 0x258   :  { %1129 = vmatpush.msrb.mxu2 %v5827_v39  ;;  %1149 = vmatpush.msrb.mxu3 %v5830_v32 }
 0x2b4   :  { %v768_v33 = vpop.f32.mrf.mxu0  ;;  %v788_v31 = vpop.f32.mrf.mxu1 }
 0x2b5   :  { %v835_v19 = vrot.slane %v768_v33, 2  ;;  %v836_v35 = vrot.slane %v788_v31, 2 }
 0x2b7   :  { %v843_v23 = vadd.f32 %v835_v19, %v744_v28  ;;  %v844_v37 = vadd.f32 %v836_v35, %v745_v24  ;;  %v746_v24 = vld [vmem:[#allocation2 + $0x50] sm:$0xc0] }
 0x2b9   :  { %v4342_v21 = vmul.f32 -1.442695, %v843_v23  ;;  %v4344_v20 = vmul.f32 -1.442695, %v844_v37 }
 0x2bb   :  { %4453 = vpow2.f32 %v4342_v21  ;;  %v828_v38 = vpop.f32.mrf.mxu3  ;;  %v808_v33 = vpop.f32.mrf.mxu2 }
 0x2bc   :  { %4455 = vpow2.f32 %v4344_v20  ;;  %v838_v17 = vrot.slane %v828_v38, 2  ;;  %v837_v31 = vrot.slane %v808_v33, 2 }
 0x2be   :  { %v846_v39 = vadd.f32 %v838_v17, %v747_v16  ;;  %v845_v21 = vadd.f32 %v837_v31, %v746_v24 }
 0x2c0   :  { %v4343_v15 = vmul.f32 -1.442695, %v846_v39 }
 0x2c1   :  { %v4454_v14 = vpop.eup %4453 }
 0x2c2   :  { %v4456_v12 = vpop.eup %4455  ;;  %v850_v32 = vadd.f32 1.0, %v4454_v14  ;;  %4457 = vpow2.f32 %v4343_v15 }
 0x2c3   :  { %v890_v11 = vadd.f32 1.0, %v4456_v12 }
 0x2c4   :  { %4459 = vrcp.f32 %v850_v32  ;;  %v862_v38 = vand.u32 2147483648, %v850_v32  ;;  %v860_v12 = vand.u32 2147483647, %v850_v32  ;;  %vm856_vm2 = vweird.f32 %v850_v32 }
 0x2c5   :  { %4461 = vrcp.f32 %v890_v11  ;;  %v902_v14 = vand.u32 2147483648, %v890_v11  ;;  %v900_v33 = vand.u32 2147483647, %v890_v11  ;;  %vm896_vm3 = vweird.f32 %v890_v11 }
 0x2c6   :  { %v863_v31 = vor.u32 1.1754944e-38, %v862_v38  ;;  %vm861_vm6 = vcmp.eq.f32.partialorder %v860_v12, 8.507059e+37 }
 0x2c7   :  { %vm901_vm7 = vcmp.eq.f32.partialorder %v900_v33, 8.507059e+37  ;;  %v7622_v33 = vld [vmem:[#allocation23_spill] sm:$0xff] }
 0x2c8   :  { %v4458_v28 = vpop.eup %4457 }
 0x2c9   :  { %v870_v23 = vadd.f32 1.0, %v4458_v28 }
 0x2ca   :  { %v4460_v19 = vpop.eup %4459 }
 0x2cb   :  { %v4462_v35 = vpop.eup %4461  ;;  %v852_v20 = vmul.f32 %v4460_v19, %v850_v32  ;;  %4463 = vrcp.f32 %v870_v23  ;;  %vm857_vm0 = vweird.f32 %v4460_v19  ;;  %vm876_vm9 = vweird.f32 %v870_v23 }
 0x2cc   :  { %v892_v37 = vmul.f32 %v4462_v35, %v890_v11  ;;  %4465 = vtanh.f32 %v845_v21  ;;  %vm897_vm1 = vweird.f32 %v4462_v35  ;;  %vm858_vm4 = vmor %vm856_vm2, %vm857_vm0 }
 0x2cd   :  { %v853_v16 = vsub.f32 1.0, %v852_v20  ;;  %v907_v20 = vrot.slane %v5638_v26, 6  ;;  %vm898_vm5 = vmor %vm896_vm3, %vm897_vm1  ;;  %v882_v26 = vand.u32 2147483648, %v870_v23 }
 0x2ce   :  { %v893_v17 = vsub.f32 1.0, %v892_v37  ;;  %v903_v37 = vor.u32 1.1754944e-38, %v902_v14  ;;  %v880_v14 = vand.u32 2147483647, %v870_v23 }
 0x2cf   :  { %v854_v15 = vmul.f32 %v4460_v19, %v853_v16 }
 0x2d0   :  { %v894_v39 = vmul.f32 %v4462_v35, %v893_v17  ;;  %vm881_vm11 = vcmp.eq.f32.partialorder %v880_v14, 8.507059e+37  ;;  %v7635_v14 = vld [vmem:[#allocation40_spill] sm:$0xff] }
 0x2d1   :  { %v4464_v9 = vpop.eup %4463  ;;  %v855_v7 = vadd.f32 %v4460_v19, %v854_v15 }
 0x2d2   :  { %v895_v28 = vadd.f32 %v4462_v35, %v894_v39  ;;  %v872_v24 = vmul.f32 %v4464_v9, %v870_v23  ;;  %v4466_v16 = vpop.eup %4465  ;;  %vm877_vm8 = vweird.f32 %v4464_v9  ;;  %v7621_v23 = vld [vmem:[#allocation22_spill] sm:$0xff] }
 0x2d3   :  { %v859_v21 = vsel %vm858_vm4, %v4460_v19, %v855_v7  ;;  %vm878_vm10 = vmor %vm876_vm9, %vm877_vm8  ;;  %v883_v19 = vor.u32 1.1754944e-38, %v882_v26  ;;  %v7634_v26 = vld [vmem:[#allocation33_spill] sm:$0xff] }
 0x2d4   :  { %v864_v6 = vsel %vm861_vm6, %v863_v31, %v859_v21  ;;  %v899_v3 = vsel %vm898_vm5, %v4462_v35, %v895_v28  ;;  %v873_v17 = vsub.f32 1.0, %v872_v24  ;;  %v7623_v31 = vld [vmem:[#allocation29_spill] sm:$0xff]  ;;  %v7625_v24 = vld [vmem:[#allocation31_spill] sm:$0xff]  ;;  %v7628_v21 = vld [vmem:[#allocation30_spill] sm:$0xff] }
 0x2d5   :  { %v886_v2 = vmul.f32 %v4466_v16, %v864_v6  ;;  %v904_v1 = vsel %vm901_vm7, %v903_v37, %v899_v3  ;;  %v7619_v3 = vld [vmem:[#allocation21_spill] sm:$0xff]  ;;  %v7627_v37 = vld [vmem:[#allocation27_spill] sm:$0xff]  ;;  %v7629_v16 = vld [vmem:[#allocation42_spill] sm:$0xff] }
 0x2d6   :  { %v909_v15 = vmul.f32 %v907_v20, %v904_v1  ;;  %v874_v32 = vmul.f32 %v4464_v9, %v873_v17  ;;  %v7617_v1 = vld [vmem:[#allocation19_spill] sm:$0xff]  ;;  %v7624_v28 = vld [vmem:[#allocation25_spill] sm:$0xff]  ;;  %v7626_v20 = vld [vmem:[#allocation28_spill] sm:$0xff] }
 0x2d7   :  { %v7630_v17 = vld [vmem:[#allocation34_spill] sm:$0xff] }
 0x2d8   :  { %v5834_v11 = vadd.f32 %v909_v15, %v886_v2  ;;  %v875_v38 = vadd.f32 %v4464_v9, %v874_v32  ;;  %v7618_v2 = vld [vmem:[#allocation20_spill] sm:$0xff]  ;;  %v7631_v15 = vld [vmem:[#allocation26_spill] sm:$0xff]  ;;  %v7632_v32 = vld [vmem:[#allocation37_spill] sm:$0xff] }
 0x2da   :  { %4467 = vtanh.f32 %v5834_v11  ;;  %v879_v7 = vsel %vm878_vm10, %v4464_v9, %v875_v38  ;;  %v7620_v9 = vld [vmem:[#allocation24_spill] sm:$0xff] }
 0x2db   :  { %v884_v12 = vsel %vm881_vm11, %v883_v19, %v879_v7  ;;  %v7633_v38 = vld [vmem:[#allocation32_spill] sm:$0xff]  ;;  %v7636_v7 = vld [vmem:[#allocation41_spill] sm:$0xff]  ;;  %v7637_v19 = vld [vmem:[#allocation35_spill] sm:$0xff] }
 0x2e0   :  { %v4468_v35 = vpop.eup %4467 }
 0x2e1   :  { %v912_v39 = vmul.f32 %v4468_v35, %v884_v12  ;;  %v7638_v35 = vld [vmem:[#allocation36_spill] sm:$0xff]  ;;  %v7639_v12 = vld [vmem:[#allocation43_spill] sm:$0xff] }
 0x2e3   :  { %v918_v6 = vrot.slane %v912_v39, 6  ;;  %v7640_v39 = vld [vmem:[#allocation44_spill] sm:$0xff] }
 0x2e5   :  { %936 = vmatmul.f32.vlgmr.msra.gmra.mxu0 %v918_v6  ;;  %956 = vmatmul.f32.vlgmr.msra.gmra.mxu1 %v918_v6 }
 0x2e6   :  { %976 = vmatmul.f32.vlgmr.msra.gmra.mxu2 %v918_v6  ;;  %996 = vmatmul.f32.vlgmr.msra.gmra.mxu3 %v918_v6  ;;  %v7641_v6 = vld [vmem:[#allocation38_spill] sm:$0xff] }
 0x2e7   :  { %1243 = vmatpush.msra.mxu0 %v5641_v40  ;;  %1263 = vmatpush.msra.mxu1 %v5644_v44 }
 0x2e8   :  { %1283 = vmatpush.msra.mxu2 %v5647_v45  ;;  %1303 = vmatpush.msra.mxu3 %v5650_v47 }
 0x2e9   :  { %1244 = vmatpush.msra.mxu0 %v5653_v48  ;;  %1264 = vmatpush.msra.mxu1 %v5656_v51 }
 0x2ea   :  { %1284 = vmatpush.msra.mxu2 %v5659_v52  ;;  %1304 = vmatpush.msra.mxu3 %v5662_v63 }
 0x2eb   :  { %1245 = vmatpush.msra.mxu0 %v5665_v4  ;;  %1265 = vmatpush.msra.mxu1 %v5668_v10 }
 0x2ec   :  { %1285 = vmatpush.msra.mxu2 %v5671_v13  ;;  %1305 = vmatpush.msra.mxu3 %v5674_v18 }
 0x2ed   :  { %1246 = vmatpush.msra.mxu0 %v5677_v22  ;;  %1266 = vmatpush.msra.mxu1 %v5680_v30 }
 0x2ee   :  { %1286 = vmatpush.msra.mxu2 %v5683_v36  ;;  %1306 = vmatpush.msra.mxu3 %v5686_v53 }
 0x2ef   :  { %1247 = vmatpush.msra.mxu0 %v5689_v41  ;;  %1267 = vmatpush.msra.mxu1 %v5692_v62 }
 0x2f0   :  { %1287 = vmatpush.msra.mxu2 %v5695_v42  ;;  %1307 = vmatpush.msra.mxu3 %v5698_v60 }
 0x2f1   :  { %1248 = vmatpush.msra.mxu0 %v5701_v50  ;;  %1268 = vmatpush.msra.mxu1 %v5704_v49 }
 0x2f2   :  { %1288 = vmatpush.msra.mxu2 %v5707_v46  ;;  %1308 = vmatpush.msra.mxu3 %v5710_v59 }
 0x2f3   :  { %1249 = vmatpush.msra.mxu0 %v5713_v25  ;;  %1269 = vmatpush.msra.mxu1 %v5716_v5 }
 0x2f4   :  { %1289 = vmatpush.msra.mxu2 %v5719_v56  ;;  %1309 = vmatpush.msra.mxu3 %v5722_v55 }
 0x2f5   :  { %1250 = vmatpush.msra.mxu0 %v5725_v61  ;;  %1270 = vmatpush.msra.mxu1 %v5728_v34 }
 0x2f6   :  { %1290 = vmatpush.msra.mxu2 %v5731_v27  ;;  %1310 = vmatpush.msra.mxu3 %v5734_v58 }
 0x2f7   :  { %1251 = vmatpush.msra.mxu0 %v5737_v29  ;;  %1271 = vmatpush.msra.mxu1 %v5740_v8 }
 0x2f8   :  { %1291 = vmatpush.msra.mxu2 %v5743_v43  ;;  %1311 = vmatpush.msra.mxu3 %v5746_v0 }
 0x2f9   :  { %1252 = vmatpush.msra.mxu0 %v5749_v54  ;;  %1272 = vmatpush.msra.mxu1 %v5752_v57 }
 0x2fa   :  { %1292 = vmatpush.msra.mxu2 %v7617_v1  ;;  %1312 = vmatpush.msra.mxu3 %v7618_v2 }
 0x2fb   :  { %1253 = vmatpush.msra.mxu0 %v7619_v3  ;;  %1273 = vmatpush.msra.mxu1 %v7620_v9 }
 0x2fc   :  { %1293 = vmatpush.msra.mxu2 %v7621_v23  ;;  %1313 = vmatpush.msra.mxu3 %v7622_v33 }
 0x2fd   :  { %1254 = vmatpush.msra.mxu0 %v7623_v31  ;;  %1274 = vmatpush.msra.mxu1 %v7624_v28  ;;  %v915_v31 = vld [vmem:[#allocation2 + $0x78] sm:$0x3] }
 0x2fe   :  { %1294 = vmatpush.msra.mxu2 %v7625_v24  ;;  %1314 = vmatpush.msra.mxu3 %v7626_v20 }
 0x2ff   :  { %1255 = vmatpush.msra.mxu0 %v7627_v37  ;;  %1275 = vmatpush.msra.mxu1 %v7628_v21 }
 0x300   :  { %1295 = vmatpush.msra.mxu2 %v7629_v16  ;;  %1315 = vmatpush.msra.mxu3 %v7630_v17  ;;  %v914_v17 = vld [vmem:[#allocation2 + $0x68] sm:$0x3] }
 0x301   :  { %1256 = vmatpush.msra.mxu0 %v7631_v15  ;;  %1276 = vmatpush.msra.mxu1 %v7632_v32  ;;  %v7642_v15 = vld [vmem:[#allocation39_spill] sm:$0xff]  ;;  %v913_v32 = vld [vmem:[#allocation2 + $0x30] sm:$0x3] }
 0x302   :  { %1296 = vmatpush.msra.mxu2 %v7633_v38  ;;  %1316 = vmatpush.msra.mxu3 %v7634_v26 }
 0x303   :  { %1257 = vmatpush.msra.mxu0 %v7635_v14  ;;  %1277 = vmatpush.msra.mxu1 %v7636_v7 }
 0x304   :  { %1297 = vmatpush.msra.mxu2 %v7637_v19  ;;  %1317 = vmatpush.msra.mxu3 %v7638_v35  ;;  %v916_v19 = vld [vmem:[#allocation2 + $0x80] sm:$0x3] }
 0x305   :  { %1258 = vmatpush.msra.mxu0 %v7639_v12  ;;  %1278 = vmatpush.msra.mxu1 %v7640_v39 }
 0x306   :  { %1298 = vmatpush.msra.mxu2 %v7641_v6  ;;  %1318 = vmatpush.msra.mxu3 %v7642_v15 }
 0x362   :  { %v937_v38 = vpop.f32.mrf.mxu0  ;;  %v957_v26 = vpop.f32.mrf.mxu1 }
 0x363   :  { %v1000_v16 = vadd.f32 %v937_v38, %v913_v32  ;;  %v1001_v14 = vadd.f32 %v957_v26, %v914_v17 }
 0x365   :  { %v4345_v21 = vmul.f32 -1.442695, %v1000_v16  ;;  %v4347_v7 = vmul.f32 -1.442695, %v1001_v14 }
 0x367   :  { %4469 = vpow2.f32 %v4345_v21 }
 0x368   :  { %4471 = vpow2.f32 %v4347_v7 }
 0x369   :  { %v997_v35 = vpop.f32.mrf.mxu3  ;;  %v977_v15 = vpop.f32.mrf.mxu2 }
 0x36a   :  { %v1003_v37 = vadd.f32 %v997_v35, %v916_v19  ;;  %v1002_v16 = vadd.f32 %v977_v15, %v915_v31 }
 0x36c   :  { %v4346_v12 = vmul.f32 -1.442695, %v1003_v37 }
 0x36d   :  { %v4470_v20 = vpop.eup %4469 }
 0x36e   :  { %v4472_v39 = vpop.eup %4471  ;;  %v1007_v24 = vadd.f32 1.0, %v4470_v20  ;;  %4473 = vpow2.f32 %v4346_v12 }
 0x36f   :  { %v1047_v6 = vadd.f32 1.0, %v4472_v39 }
 0x370   :  { %4475 = vrcp.f32 %v1007_v24  ;;  %v1019_v37 = vand.u32 2147483648, %v1007_v24  ;;  %v1017_v35 = vand.u32 2147483647, %v1007_v24  ;;  %vm1013_vm14 = vweird.f32 %v1007_v24 }
 0x371   :  { %4477 = vrcp.f32 %v1047_v6  ;;  %v1059_v19 = vand.u32 2147483648, %v1047_v6  ;;  %v1057_v39 = vand.u32 2147483647, %v1047_v6  ;;  %vm1053_vm15 = vweird.f32 %v1047_v6 }
 0x372   :  { %v1020_v31 = vor.u32 1.1754944e-38, %v1019_v37  ;;  %vm1018_vm2 = vcmp.eq.f32.partialorder %v1017_v35, 8.507059e+37 }
 0x373   :  { %vm1058_vm3 = vcmp.eq.f32.partialorder %v1057_v39, 8.507059e+37  ;;  %v7649_v39 = vld [vmem:[#allocation29_spill] sm:$0xff] }
 0x374   :  { %v4474_v28 = vpop.eup %4473 }
 0x375   :  { %v1027_v32 = vadd.f32 1.0, %v4474_v28 }
 0x376   :  { %v4476_v17 = vpop.eup %4475 }
 0x377   :  { %v4478_v38 = vpop.eup %4477  ;;  %v1009_v21 = vmul.f32 %v4476_v17, %v1007_v24  ;;  %4479 = vrcp.f32 %v1027_v32  ;;  %vm1014_vm12 = vweird.f32 %v4476_v17  ;;  %vm1033_vm5 = vweird.f32 %v1027_v32 }
 0x378   :  { %v1049_v26 = vmul.f32 %v4478_v38, %v1047_v6  ;;  %4481 = vtanh.f32 %v1002_v16  ;;  %vm1054_vm13 = vweird.f32 %v4478_v38  ;;  %vm1015_vm0 = vmor %vm1013_vm14, %vm1014_vm12  ;;  %v1064_v16 = vrot.slane %v5834_v11, 6 }
 0x379   :  { %v1010_v14 = vsub.f32 1.0, %v1009_v21  ;;  %vm1055_vm1 = vmor %vm1053_vm15, %vm1054_vm13  ;;  %v1060_v21 = vor.u32 1.1754944e-38, %v1059_v19  ;;  %v1039_v19 = vand.u32 2147483648, %v1027_v32 }
 0x37a   :  { %v1050_v7 = vsub.f32 1.0, %v1049_v26 }
 0x37b   :  { %v1011_v20 = vmul.f32 %v4476_v17, %v1010_v14 }
 0x37c   :  { %v1051_v12 = vmul.f32 %v4478_v38, %v1050_v7 }
 0x37d   :  { %v4480_v33 = vpop.eup %4479  ;;  %v1012_v23 = vadd.f32 %v4476_v17, %v1011_v20 }
 0x37e   :  { %v1052_v28 = vadd.f32 %v4478_v38, %v1051_v12  ;;  %v1029_v15 = vmul.f32 %v4480_v33, %v1027_v32  ;;  %v4482_v14 = vpop.eup %4481  ;;  %vm1034_vm4 = vweird.f32 %v4480_v33 }
 0x37f   :  { %v1016_v26 = vsel %vm1015_vm0, %v4476_v17, %v1012_v23  ;;  %v1037_v23 = vand.u32 2147483647, %v1027_v32  ;;  %vm1035_vm6 = vmor %vm1033_vm5, %vm1034_vm4  ;;  %v1040_v17 = vor.u32 1.1754944e-38, %v1039_v19  ;;  %v7648_v32 = vld [vmem:[#allocation23_spill] sm:$0xff]  ;;  %v7661_v19 = vld [vmem:[#allocation40_spill] sm:$0xff] }
 0x380   :  { %v1021_v9 = vsel %vm1018_vm2, %v1020_v31, %v1016_v26  ;;  %v1056_v3 = vsel %vm1055_vm1, %v4478_v38, %v1052_v28  ;;  %v1030_v7 = vsub.f32 1.0, %v1029_v15  ;;  %v7650_v31 = vld [vmem:[#allocation25_spill] sm:$0xff]  ;;  %v7651_v28 = vld [vmem:[#allocation31_spill] sm:$0xff]  ;;  %v7652_v15 = vld [vmem:[#allocation28_spill] sm:$0xff] }
 0x381   :  { %v1043_v2 = vmul.f32 %v4482_v14, %v1021_v9  ;;  %v1061_v1 = vsel %vm1058_vm3, %v1060_v21, %v1056_v3  ;;  %vm1038_vm7 = vcmp.eq.f32.partialorder %v1037_v23, 8.507059e+37  ;;  %v7645_v3 = vld [vmem:[#allocation21_spill] sm:$0xff]  ;;  %v7646_v9 = vld [vmem:[#allocation24_spill] sm:$0xff]  ;;  %v7653_v21 = vld [vmem:[#allocation27_spill] sm:$0xff] }
 0x382   :  { %v1066_v20 = vmul.f32 %v1064_v16, %v1061_v1  ;;  %v1031_v24 = vmul.f32 %v4480_v33, %v1030_v7  ;;  %v7643_v1 = vld [vmem:[#allocation19_spill] sm:$0xff]  ;;  %v7654_v26 = vld [vmem:[#allocation30_spill] sm:$0xff]  ;;  %v7662_v23 = vld [vmem:[#allocation41_spill] sm:$0xff] }
 0x383   :  { %v7655_v16 = vld [vmem:[#allocation42_spill] sm:$0xff] }
 0x384   :  { %v5902_v6 = vadd.f32 %v1066_v20, %v1043_v2  ;;  %v1032_v37 = vadd.f32 %v4480_v33, %v1031_v24  ;;  %v7644_v2 = vld [vmem:[#allocation20_spill] sm:$0xff]  ;;  %v7656_v14 = vld [vmem:[#allocation34_spill] sm:$0xff]  ;;  %v7658_v20 = vld [vmem:[#allocation37_spill] sm:$0xff] }
 0x385   :  { %v7657_v7 = vld [vmem:[#allocation26_spill] sm:$0xff]  ;;  %v7659_v24 = vld [vmem:[#allocation32_spill] sm:$0xff] }
 0x386   :  { %4483 = vtanh.f32 %v5902_v6  ;;  %v1036_v11 = vsel %vm1035_vm6, %v4480_v33, %v1032_v37  ;;  %v7647_v33 = vld [vmem:[#allocation22_spill] sm:$0xff]  ;;  %v7660_v37 = vld [vmem:[#allocation33_spill] sm:$0xff] }
 0x387   :  { %v1041_v35 = vsel %vm1038_vm7, %v1040_v17, %v1036_v11  ;;  %v7663_v11 = vld [vmem:[#allocation35_spill] sm:$0xff]  ;;  %v7664_v17 = vld [vmem:[#allocation36_spill] sm:$0xff] }
 0x38c   :  { %v4484_v38 = vpop.eup %4483 }
 0x38d   :  { %v1069_v12 = vmul.f32 %v4484_v38, %v1041_v35  ;;  %v7665_v38 = vld [vmem:[#allocation43_spill] sm:$0xff]  ;;  %v7666_v35 = vld [vmem:[#allocation44_spill] sm:$0xff] }
 0x38f   :  { %1090 = vmatmul.f32.vlgmr.msrb.gmra.mxu0 %v1069_v12  ;;  %1110 = vmatmul.f32.vlgmr.msrb.gmra.mxu1 %v1069_v12 }
 0x390   :  { %1130 = vmatmul.f32.vlgmr.msrb.gmra.mxu2 %v1069_v12  ;;  %1150 = vmatmul.f32.vlgmr.msrb.gmra.mxu3 %v1069_v12  ;;  %v7667_v12 = vld [vmem:[#allocation38_spill] sm:$0xff] }
 0x391   :  { %1412 = vmatpush.msrb.mxu0 %v5641_v40  ;;  %1432 = vmatpush.msrb.mxu1 %v5644_v44 }
 0x392   :  { %1452 = vmatpush.msrb.mxu2 %v5647_v45  ;;  %1472 = vmatpush.msrb.mxu3 %v5650_v47 }
 0x393   :  { %1413 = vmatpush.msrb.mxu0 %v5653_v48  ;;  %1433 = vmatpush.msrb.mxu1 %v5656_v51 }
 0x394   :  { %1453 = vmatpush.msrb.mxu2 %v5659_v52  ;;  %1473 = vmatpush.msrb.mxu3 %v5662_v63 }
 0x395   :  { %1414 = vmatpush.msrb.mxu0 %v5665_v4  ;;  %1434 = vmatpush.msrb.mxu1 %v5668_v10 }
 0x396   :  { %1454 = vmatpush.msrb.mxu2 %v5671_v13  ;;  %1474 = vmatpush.msrb.mxu3 %v5674_v18 }
 0x397   :  { %1415 = vmatpush.msrb.mxu0 %v5677_v22  ;;  %1435 = vmatpush.msrb.mxu1 %v5680_v30 }
 0x398   :  { %1455 = vmatpush.msrb.mxu2 %v5683_v36  ;;  %1475 = vmatpush.msrb.mxu3 %v5686_v53 }
 0x399   :  { %1416 = vmatpush.msrb.mxu0 %v5689_v41  ;;  %1436 = vmatpush.msrb.mxu1 %v5692_v62 }
 0x39a   :  { %1456 = vmatpush.msrb.mxu2 %v5695_v42  ;;  %1476 = vmatpush.msrb.mxu3 %v5698_v60 }
 0x39b   :  { %1417 = vmatpush.msrb.mxu0 %v5701_v50  ;;  %1437 = vmatpush.msrb.mxu1 %v5704_v49 }
 0x39c   :  { %1457 = vmatpush.msrb.mxu2 %v5707_v46  ;;  %1477 = vmatpush.msrb.mxu3 %v5710_v59 }
 0x39d   :  { %1418 = vmatpush.msrb.mxu0 %v5713_v25  ;;  %1438 = vmatpush.msrb.mxu1 %v5716_v5 }
 0x39e   :  { %1458 = vmatpush.msrb.mxu2 %v5719_v56  ;;  %1478 = vmatpush.msrb.mxu3 %v5722_v55 }
 0x39f   :  { %1419 = vmatpush.msrb.mxu0 %v5725_v61  ;;  %1439 = vmatpush.msrb.mxu1 %v5728_v34 }
 0x3a0   :  { %1459 = vmatpush.msrb.mxu2 %v5731_v27  ;;  %1479 = vmatpush.msrb.mxu3 %v5734_v58 }
 0x3a1   :  { %1420 = vmatpush.msrb.mxu0 %v5737_v29  ;;  %1440 = vmatpush.msrb.mxu1 %v5740_v8 }
 0x3a2   :  { %1460 = vmatpush.msrb.mxu2 %v5743_v43  ;;  %1480 = vmatpush.msrb.mxu3 %v5746_v0 }
 0x3a3   :  { %1421 = vmatpush.msrb.mxu0 %v5749_v54  ;;  %1441 = vmatpush.msrb.mxu1 %v5752_v57 }
 0x3a4   :  { %1461 = vmatpush.msrb.mxu2 %v7643_v1  ;;  %1481 = vmatpush.msrb.mxu3 %v7644_v2 }
 0x3a5   :  { %1422 = vmatpush.msrb.mxu0 %v7645_v3  ;;  %1442 = vmatpush.msrb.mxu1 %v7646_v9 }
 0x3a6   :  { %1462 = vmatpush.msrb.mxu2 %v7647_v33  ;;  %1482 = vmatpush.msrb.mxu3 %v7648_v32 }
 0x3a7   :  { %1423 = vmatpush.msrb.mxu0 %v7649_v39  ;;  %1443 = vmatpush.msrb.mxu1 %v7650_v31 }
 0x3a8   :  { %1463 = vmatpush.msrb.mxu2 %v7651_v28  ;;  %1483 = vmatpush.msrb.mxu3 %v7652_v15  ;;  %v1073_v15 = vld [vmem:[#allocation2 + $0x80] sm:$0xc] }
 0x3a9   :  { %1424 = vmatpush.msrb.mxu0 %v7653_v21  ;;  %1444 = vmatpush.msrb.mxu1 %v7654_v26 }
 0x3aa   :  { %1464 = vmatpush.msrb.mxu2 %v7655_v16  ;;  %1484 = vmatpush.msrb.mxu3 %v7656_v14  ;;  %v1070_v16 = vld [vmem:[#allocation2 + $0x30] sm:$0xc] }
 0x3ab   :  { %1425 = vmatpush.msrb.mxu0 %v7657_v7  ;;  %1445 = vmatpush.msrb.mxu1 %v7658_v20  ;;  %v7668_v7 = vld [vmem:[#allocation39_spill] sm:$0xff] }
 0x3ac   :  { %1465 = vmatpush.msrb.mxu2 %v7659_v24  ;;  %1485 = vmatpush.msrb.mxu3 %v7660_v37 }
 0x3ad   :  { %1426 = vmatpush.msrb.mxu0 %v7661_v19  ;;  %1446 = vmatpush.msrb.mxu1 %v7662_v23  ;;  %v1071_v19 = vld [vmem:[#allocation2 + $0x68] sm:$0xc] }
 0x3ae   :  { %1466 = vmatpush.msrb.mxu2 %v7663_v11  ;;  %1486 = vmatpush.msrb.mxu3 %v7664_v17 }
 0x3af   :  { %1427 = vmatpush.msrb.mxu0 %v7665_v38  ;;  %1447 = vmatpush.msrb.mxu1 %v7666_v35 }
 0x3b0   :  { %1467 = vmatpush.msrb.mxu2 %v7667_v12  ;;  %1487 = vmatpush.msrb.mxu3 %v7668_v7 }
 0x40c   :  { %v1091_v20 = vpop.f32.mrf.mxu0  ;;  %v1111_v24 = vpop.f32.mrf.mxu1 }
 0x40d   :  { %v1158_v14 = vrot.slane %v1091_v20, 6  ;;  %v1159_v37 = vrot.slane %v1111_v24, 6 }
 0x40f   :  { %v1166_v26 = vadd.f32 %v1158_v14, %v1070_v16  ;;  %v1167_v23 = vadd.f32 %v1159_v37, %v1071_v19  ;;  %v1072_v14 = vld [vmem:[#allocation2 + $0x78] sm:$0xc] }
 0x411   :  { %v4348_v21 = vmul.f32 -1.442695, %v1166_v26  ;;  %v4350_v11 = vmul.f32 -1.442695, %v1167_v23 }
 0x413   :  { %4485 = vpow2.f32 %v4348_v21  ;;  %v1151_v17 = vpop.f32.mrf.mxu3  ;;  %v1131_v20 = vpop.f32.mrf.mxu2 }
 0x414   :  { %4487 = vpow2.f32 %v4350_v11  ;;  %v1161_v38 = vrot.slane %v1151_v17, 6  ;;  %v1160_v24 = vrot.slane %v1131_v20, 6 }
 0x416   :  { %v1169_v35 = vadd.f32 %v1161_v38, %v1073_v15  ;;  %v1168_v21 = vadd.f32 %v1160_v24, %v1072_v14 }
 0x418   :  { %v4349_v28 = vmul.f32 -1.442695, %v1169_v35 }
 0x419   :  { %v4486_v12 = vpop.eup %4485 }
 0x41a   :  { %v4488_v31 = vpop.eup %4487  ;;  %v1173_v7 = vadd.f32 1.0, %v4486_v12  ;;  %4489 = vpow2.f32 %v4349_v28 }
 0x41b   :  { %v1213_v39 = vadd.f32 1.0, %v4488_v31 }
 0x41c   :  { %4491 = vrcp.f32 %v1173_v7  ;;  %v1185_v38 = vand.u32 2147483648, %v1173_v7  ;;  %v1183_v31 = vand.u32 2147483647, %v1173_v7  ;;  %vm1179_vm10 = vweird.f32 %v1173_v7 }
 0x41d   :  { %4493 = vrcp.f32 %v1213_v39  ;;  %v1225_v35 = vand.u32 2147483648, %v1213_v39  ;;  %v1223_v20 = vand.u32 2147483647, %v1213_v39  ;;  %vm1219_vm11 = vweird.f32 %v1213_v39 }
 0x41e   :  { %v1186_v24 = vor.u32 1.1754944e-38, %v1185_v38  ;;  %vm1184_vm14 = vcmp.eq.f32.partialorder %v1183_v31, 8.507059e+37 }
 0x41f   :  { %vm1224_vm15 = vcmp.eq.f32.partialorder %v1223_v20, 8.507059e+37 }
 0x420   :  { %v4490_v16 = vpop.eup %4489 }
 0x421   :  { %v1193_v26 = vadd.f32 1.0, %v4490_v16 }
 0x422   :  { %v4492_v37 = vpop.eup %4491 }
 0x423   :  { %v4494_v19 = vpop.eup %4493  ;;  %v1175_v23 = vmul.f32 %v4492_v37, %v1173_v7  ;;  %4495 = vrcp.f32 %v1193_v26  ;;  %vm1180_vm8 = vweird.f32 %v4492_v37  ;;  %vm1199_vm1 = vweird.f32 %v1193_v26 }
 0x424   :  { %v1215_v11 = vmul.f32 %v4494_v19, %v1213_v39  ;;  %4497 = vtanh.f32 %v1168_v21  ;;  %vm1220_vm9 = vweird.f32 %v4494_v19  ;;  %vm1181_vm12 = vmor %vm1179_vm10, %vm1180_vm8 }
 0x425   :  { %v1176_v15 = vsub.f32 1.0, %v1175_v23  ;;  %v1230_v23 = vrot.slane %v5902_v6, 6  ;;  %vm1221_vm13 = vmor %vm1219_vm11, %vm1220_vm9  ;;  %v1205_v6 = vand.u32 2147483648, %v1193_v26 }
 0x426   :  { %v1216_v17 = vsub.f32 1.0, %v1215_v11  ;;  %v1226_v11 = vor.u32 1.1754944e-38, %v1225_v35  ;;  %v1203_v35 = vand.u32 2147483647, %v1193_v26 }
 0x427   :  { %v1177_v28 = vmul.f32 %v4492_v37, %v1176_v15 }
 0x428   :  { %v1217_v12 = vmul.f32 %v4494_v19, %v1216_v17  ;;  %vm1204_vm3 = vcmp.eq.f32.partialorder %v1203_v35, 8.507059e+37 }
 0x429   :  { %v4496_v32 = vpop.eup %4495  ;;  %v1178_v33 = vadd.f32 %v4492_v37, %v1177_v28 }
 0x42a   :  { %v1218_v16 = vadd.f32 %v4494_v19, %v1217_v12  ;;  %v1195_v14 = vmul.f32 %v4496_v32, %v1193_v26  ;;  %v4498_v15 = vpop.eup %4497  ;;  %vm1200_vm0 = vweird.f32 %v4496_v32 }
 0x42b   :  { %v1182_v21 = vsel %vm1181_vm12, %v4492_v37, %v1178_v33  ;;  %vm1201_vm2 = vmor %vm1199_vm1, %vm1200_vm0  ;;  %v1206_v37 = vor.u32 1.1754944e-38, %v1205_v6 }
 0x42c   :  { %v1187_v9 = vsel %vm1184_vm14, %v1186_v24, %v1182_v21  ;;  %v1222_v3 = vsel %vm1221_vm13, %v4494_v19, %v1218_v16  ;;  %v1196_v17 = vsub.f32 1.0, %v1195_v14 }
 0x42d   :  { %v1209_v2 = vmul.f32 %v4498_v15, %v1187_v9  ;;  %v1227_v1 = vsel %vm1224_vm15, %v1226_v11, %v1222_v3  ;;  %v1238_v11 = vld [vmem:[#allocation2 + $0x78] sm:$0x30] }
 0x42e   :  { %v1232_v28 = vmul.f32 %v1230_v23, %v1227_v1  ;;  %v1197_v7 = vmul.f32 %v4496_v32, %v1196_v17  ;;  %v1239_v1 = vld [vmem:[#allocation2 + $0x80] sm:$0x30] }
 0x430   :  { %v5970_v39 = vadd.f32 %v1232_v28, %v1209_v2  ;;  %v1198_v38 = vadd.f32 %v4496_v32, %v1197_v7 }
 0x432   :  { %4499 = vtanh.f32 %v5970_v39  ;;  %v1202_v33 = vsel %vm1201_vm2, %v4496_v32, %v1198_v38 }
 0x433   :  { %v1207_v31 = vsel %vm1204_vm3, %v1206_v37, %v1202_v33 }
 0x438   :  { %v4500_v19 = vpop.eup %4499 }
 0x439   :  { %v1235_v12 = vmul.f32 %v4500_v19, %v1207_v31 }
 0x43b   :  { %v1241_v9 = vrot.slane %v1235_v12, 2 }
 0x43d   :  { %1259 = vmatmul.f32.vlgmr.msra.gmra.mxu0 %v1241_v9  ;;  %1279 = vmatmul.f32.vlgmr.msra.gmra.mxu1 %v1241_v9 }
 0x43e   :  { %1299 = vmatmul.f32.vlgmr.msra.gmra.mxu2 %v1241_v9  ;;  %1319 = vmatmul.f32.vlgmr.msra.gmra.mxu3 %v1241_v9 }
 0x43f   :  { %1581 = vmatpush.msra.mxu0 %v5641_v40  ;;  %1601 = vmatpush.msra.mxu1 %v5644_v44  ;;  %v7669_v40 = vld [vmem:[#allocation19_spill] sm:$0xff]  ;;  %v7670_v44 = vld [vmem:[#allocation20_spill] sm:$0xff] }
 0x440   :  { %1621 = vmatpush.msra.mxu2 %v5647_v45  ;;  %1641 = vmatpush.msra.mxu3 %v5650_v47  ;;  %v7671_v45 = vld [vmem:[#allocation21_spill] sm:$0xff]  ;;  %v7672_v47 = vld [vmem:[#allocation24_spill] sm:$0xff] }
 0x441   :  { %1582 = vmatpush.msra.mxu0 %v5653_v48  ;;  %1602 = vmatpush.msra.mxu1 %v5656_v51  ;;  %v7673_v48 = vld [vmem:[#allocation22_spill] sm:$0xff]  ;;  %v7674_v51 = vld [vmem:[#allocation23_spill] sm:$0xff] }
 0x442   :  { %1622 = vmatpush.msra.mxu2 %v5659_v52  ;;  %1642 = vmatpush.msra.mxu3 %v5662_v63  ;;  %v7675_v52 = vld [vmem:[#allocation29_spill] sm:$0xff] }
 0x443   :  { %1583 = vmatpush.msra.mxu0 %v5665_v4  ;;  %1603 = vmatpush.msra.mxu1 %v5668_v10  ;;  %v7676_v63 = vld [vmem:[#allocation25_spill] sm:$0xff]  ;;  %v7677_v4 = vld [vmem:[#allocation31_spill] sm:$0xff]  ;;  %v7678_v10 = vld [vmem:[#allocation28_spill] sm:$0xff] }
 0x444   :  { %1623 = vmatpush.msra.mxu2 %v5671_v13  ;;  %1643 = vmatpush.msra.mxu3 %v5674_v18  ;;  %v7679_v13 = vld [vmem:[#allocation27_spill] sm:$0xff]  ;;  %v7680_v18 = vld [vmem:[#allocation30_spill] sm:$0xff] }
 0x445   :  { %1584 = vmatpush.msra.mxu0 %v5677_v22  ;;  %1604 = vmatpush.msra.mxu1 %v5680_v30  ;;  %v7681_v22 = vld [vmem:[#allocation42_spill] sm:$0xff] }
 0x446   :  { %1624 = vmatpush.msra.mxu2 %v5683_v36  ;;  %1644 = vmatpush.msra.mxu3 %v5686_v53  ;;  %v7682_v30 = vld [vmem:[#allocation34_spill] sm:$0xff]  ;;  %v7684_v53 = vld [vmem:[#allocation37_spill] sm:$0xff] }
 0x447   :  { %1585 = vmatpush.msra.mxu0 %v5689_v41  ;;  %1605 = vmatpush.msra.mxu1 %v5692_v62  ;;  %v7683_v36 = vld [vmem:[#allocation26_spill] sm:$0xff]  ;;  %v7685_v41 = vld [vmem:[#allocation32_spill] sm:$0xff]  ;;  %v7686_v62 = vld [vmem:[#allocation33_spill] sm:$0xff] }
 0x448   :  { %1625 = vmatpush.msra.mxu2 %v5695_v42  ;;  %1645 = vmatpush.msra.mxu3 %v5698_v60  ;;  %v7687_v42 = vld [vmem:[#allocation40_spill] sm:$0xff]  ;;  %v7688_v60 = vld [vmem:[#allocation41_spill] sm:$0xff] }
 0x449   :  { %1586 = vmatpush.msra.mxu0 %v5701_v50  ;;  %1606 = vmatpush.msra.mxu1 %v5704_v49  ;;  %v7689_v50 = vld [vmem:[#allocation35_spill] sm:$0xff]  ;;  %v7690_v49 = vld [vmem:[#allocation36_spill] sm:$0xff] }
 0x44a   :  { %1626 = vmatpush.msra.mxu2 %v5707_v46  ;;  %1646 = vmatpush.msra.mxu3 %v5710_v59  ;;  %v7691_v46 = vld [vmem:[#allocation43_spill] sm:$0xff]  ;;  %v7692_v59 = vld [vmem:[#allocation44_spill] sm:$0xff] }
 0x44b   :  { %1587 = vmatpush.msra.mxu0 %v5713_v25  ;;  %1607 = vmatpush.msra.mxu1 %v5716_v5  ;;  %v7693_v25 = vld [vmem:[#allocation38_spill] sm:$0xff]  ;;  %v7694_v5 = vld [vmem:[#allocation39_spill] sm:$0xff] }
 0x44c   :  { %1627 = vmatpush.msra.mxu2 %v5719_v56  ;;  %1647 = vmatpush.msra.mxu3 %v5722_v55 }
 0x44d   :  { %1588 = vmatpush.msra.mxu0 %v5725_v61  ;;  %1608 = vmatpush.msra.mxu1 %v5728_v34 }
 0x44e   :  { %1628 = vmatpush.msra.mxu2 %v5731_v27  ;;  %1648 = vmatpush.msra.mxu3 %v5734_v58  ;;  %v1236_v27 = vld [vmem:[#allocation2 + $0x30] sm:$0x30]  ;;  %v1237_v58 = vld [vmem:[#allocation2 + $0x68] sm:$0x30] }
 0x44f   :  { %1589 = vmatpush.msra.mxu0 %v5737_v29  ;;  %1609 = vmatpush.msra.mxu1 %v5740_v8 }
 0x450   :  { %1629 = vmatpush.msra.mxu2 %v5743_v43  ;;  %1649 = vmatpush.msra.mxu3 %v5746_v0 }
 0x451   :  { %1590 = vmatpush.msra.mxu0 %v5749_v54  ;;  %1610 = vmatpush.msra.mxu1 %v5752_v57 }
 0x452   :  { %1630 = vmatpush.msra.mxu2 %v7669_v40  ;;  %1650 = vmatpush.msra.mxu3 %v7670_v44 }
 0x453   :  { %1591 = vmatpush.msra.mxu0 %v7671_v45  ;;  %1611 = vmatpush.msra.mxu1 %v7672_v47 }
 0x454   :  { %1631 = vmatpush.msra.mxu2 %v7673_v48  ;;  %1651 = vmatpush.msra.mxu3 %v7674_v51  ;;  %v1399_v51 = vrot.slane %v5970_v39, 6 }
 0x455   :  { %1592 = vmatpush.msra.mxu0 %v7675_v52  ;;  %1612 = vmatpush.msra.mxu1 %v7676_v63 }
 0x456   :  { %1632 = vmatpush.msra.mxu2 %v7677_v4  ;;  %1652 = vmatpush.msra.mxu3 %v7678_v10 }
 0x457   :  { %1593 = vmatpush.msra.mxu0 %v7679_v13  ;;  %1613 = vmatpush.msra.mxu1 %v7680_v18 }
 0x458   :  { %1633 = vmatpush.msra.mxu2 %v7681_v22  ;;  %1653 = vmatpush.msra.mxu3 %v7682_v30 }
 0x459   :  { %1594 = vmatpush.msra.mxu0 %v7683_v36  ;;  %1614 = vmatpush.msra.mxu1 %v7684_v53 }
 0x45a   :  { %1634 = vmatpush.msra.mxu2 %v7685_v41  ;;  %1654 = vmatpush.msra.mxu3 %v7686_v62 }
 0x45b   :  { %1595 = vmatpush.msra.mxu0 %v7687_v42  ;;  %1615 = vmatpush.msra.mxu1 %v7688_v60 }
 0x45c   :  { %1635 = vmatpush.msra.mxu2 %v7689_v50  ;;  %1655 = vmatpush.msra.mxu3 %v7690_v49 }
 0x45d   :  { %1596 = vmatpush.msra.mxu0 %v7691_v46  ;;  %1616 = vmatpush.msra.mxu1 %v7692_v59 }
 0x45e   :  { %1636 = vmatpush.msra.mxu2 %v7693_v25  ;;  %1656 = vmatpush.msra.mxu3 %v7694_v5  ;;  %v6041_v5 = vld [vmem:[#allocation8 + $0x1e0] sm:$0xff] }
 0x4ba   :  { %v1260_v56 = vpop.f32.mrf.mxu0  ;;  %v1280_v55 = vpop.f32.mrf.mxu1 }
 0x4bb   :  { %v1327_v61 = vrot.slane %v1260_v56, 4  ;;  %v1328_v34 = vrot.slane %v1280_v55, 4  ;;  %v6044_v56 = vld [vmem:[#allocation8 + $0x1e8] sm:$0xff]  ;;  %v6047_v55 = vld [vmem:[#allocation8 + $0x1f0] sm:$0xff] }
 0x4bd   :  { %v1335_v29 = vadd.f32 %v1327_v61, %v1236_v27  ;;  %v1336_v8 = vadd.f32 %v1328_v34, %v1237_v58  ;;  %v6050_v61 = vld [vmem:[#allocation8 + $0x1f8] sm:$0xff]  ;;  %v6053_v34 = vld [vmem:[#allocation8 + $0x1c0] sm:$0xff]  ;;  %v6056_v27 = vld [vmem:[#allocation8 + $0x1c8] sm:$0xff] }
 0x4be   :  { %v6059_v58 = vld [vmem:[#allocation8 + $0x1d0] sm:$0xff] }
 0x4bf   :  { %v4351_v43 = vmul.f32 -1.442695, %v1335_v29  ;;  %v4353_v0 = vmul.f32 -1.442695, %v1336_v8  ;;  %v6062_v29 = vld [vmem:[#allocation8 + $0x1d8] sm:$0xff]  ;;  %v6065_v8 = vld [vmem:[#allocation8 + $0x1a0] sm:$0xff] }
 0x4c1   :  { %4501 = vpow2.f32 %v4351_v43  ;;  %v1320_v54 = vpop.f32.mrf.mxu3  ;;  %v1300_v16 = vpop.f32.mrf.mxu2  ;;  %v6068_v43 = vld [vmem:[#allocation8 + $0x1a8] sm:$0xff] }
 0x4c2   :  { %4503 = vpow2.f32 %v4353_v0  ;;  %v1330_v57 = vrot.slane %v1320_v54, 4  ;;  %v1329_v14 = vrot.slane %v1300_v16, 4  ;;  %v6071_v0 = vld [vmem:[#allocation8 + $0x1b0] sm:$0xff]  ;;  %v6074_v54 = vld [vmem:[#allocation8 + $0x1b8] sm:$0xff]  ;;  %v6101_v16 = vld [vmem:[#allocation8 + $0x140] sm:$0xff] }
 0x4c4   :  { %v1338_v2 = vadd.f32 %v1330_v57, %v1239_v1  ;;  %v1337_v17 = vadd.f32 %v1329_v14, %v1238_v11  ;;  %v6077_v57 = vld [vmem:[#allocation8 + $0x180] sm:$0xff]  ;;  %v6080_v1 = vld [vmem:[#allocation8 + $0x188] sm:$0xff]  ;;  %v6110_v11 = vld [vmem:[#allocation8 + $0x158] sm:$0xff] }
 0x4c5   :  { %v6104_v14 = vld [vmem:[#allocation8 + $0x148] sm:$0xff] }
 0x4c6   :  { %v4352_v3 = vmul.f32 -1.442695, %v1338_v2  ;;  %v6083_v2 = vld [vmem:[#allocation8 + $0x190] sm:$0xff] }
 0x4c7   :  { %v4502_v32 = vpop.eup %4501 }
 0x4c8   :  { %v4504_v26 = vpop.eup %4503  ;;  %v1342_v20 = vadd.f32 1.0, %v4502_v32  ;;  %4505 = vpow2.f32 %v4352_v3  ;;  %v6086_v3 = vld [vmem:[#allocation8 + $0x198] sm:$0xff]  ;;  %v6089_v32 = vld [vmem:[#allocation8 + $0x160] sm:$0xff] }
 0x4c9   :  { %v1382_v24 = vadd.f32 1.0, %v4504_v26  ;;  %v6092_v26 = vld [vmem:[#allocation8 + $0x168] sm:$0xff] }
 0x4ca   :  { %4507 = vrcp.f32 %v1342_v20  ;;  %v1354_v33 = vand.u32 2147483648, %v1342_v20  ;;  %v1352_v31 = vand.u32 2147483647, %v1342_v20  ;;  %vm1348_vm6 = vweird.f32 %v1342_v20 }
 0x4cb   :  { %4509 = vrcp.f32 %v1382_v24  ;;  %v1394_v37 = vand.u32 2147483648, %v1382_v24  ;;  %v1392_v9 = vand.u32 2147483647, %v1382_v24  ;;  %vm1388_vm7 = vweird.f32 %v1382_v24 }
 0x4cc   :  { %v1355_v45 = vor.u32 1.1754944e-38, %v1354_v33  ;;  %vm1353_vm10 = vcmp.eq.f32.partialorder %v1352_v31, 8.507059e+37  ;;  %v6137_v33 = vld [vmem:[#allocation8 + $0xe0] sm:$0xff]  ;;  %v6146_v31 = vld [vmem:[#allocation8 + $0xf8] sm:$0xff] }
 0x4cd   :  { %v1395_v52 = vor.u32 1.1754944e-38, %v1394_v37  ;;  %vm1393_vm11 = vcmp.eq.f32.partialorder %v1392_v9, 8.507059e+37  ;;  %v6140_v37 = vld [vmem:[#allocation8 + $0xe8] sm:$0xff] }
 0x4ce   :  { %v4506_v23 = vpop.eup %4505  ;;  %v6152_v9 = vld [vmem:[#allocation8 + $0xc8] sm:$0xff] }
 0x4cf   :  { %v1362_v21 = vadd.f32 1.0, %v4506_v23  ;;  %v6107_v23 = vld [vmem:[#allocation8 + $0x150] sm:$0xff] }
 0x4d0   :  { %v4508_v15 = vpop.eup %4507 }
 0x4d1   :  { %v4510_v28 = vpop.eup %4509  ;;  %v1344_v7 = vmul.f32 %v4508_v15, %v1342_v20  ;;  %4511 = vrcp.f32 %v1362_v21  ;;  %vm1349_vm4 = vweird.f32 %v4508_v15  ;;  %v1374_v39 = vand.u32 2147483648, %v1362_v21  ;;  %v6095_v20 = vld [vmem:[#allocation8 + $0x170] sm:$0xff] }
 0x4d2   :  { %v1384_v38 = vmul.f32 %v4510_v28, %v1382_v24  ;;  %4513 = vtanh.f32 %v1337_v17  ;;  %vm1389_vm5 = vweird.f32 %v4510_v28  ;;  %vm1350_vm8 = vmor %vm1348_vm6, %vm1349_vm4  ;;  %vm1368_vm13 = vweird.f32 %v1362_v21  ;;  %v6098_v24 = vld [vmem:[#allocation8 + $0x178] sm:$0xff]  ;;  %v6119_v17 = vld [vmem:[#allocation8 + $0x130] sm:$0xff] }
 0x4d3   :  { %v1345_v6 = vsub.f32 1.0, %v1344_v7  ;;  %vm1390_vm9 = vmor %vm1388_vm7, %vm1389_vm5  ;;  %v1372_v42 = vand.u32 2147483647, %v1362_v21  ;;  %v1375_v50 = vor.u32 1.1754944e-38, %v1374_v39  ;;  %v6125_v7 = vld [vmem:[#allocation8 + $0x100] sm:$0xff]  ;;  %v6206_v39 = vld [vmem:[#allocation8 + $0x58] sm:$0xff] }
 0x4d4   :  { %v1385_v35 = vsub.f32 1.0, %v1384_v38  ;;  %v6128_v38 = vld [vmem:[#allocation8 + $0x108] sm:$0xff]  ;;  %7712 = vst [vmem:[#allocation24_spill] sm:$0xff] %v6206_v39 }
 0x4d5   :  { %v1346_v19 = vmul.f32 %v4508_v15, %v1345_v6  ;;  %vm1373_vm15 = vcmp.eq.f32.partialorder %v1372_v42, 8.507059e+37  ;;  %v6131_v6 = vld [vmem:[#allocation8 + $0x110] sm:$0xff]  ;;  %v6209_v42 = vld [vmem:[#allocation8 + $0x20] sm:$0xff] }
 0x4d6   :  { %v1386_v12 = vmul.f32 %v4510_v28, %v1385_v35  ;;  %v6134_v35 = vld [vmem:[#allocation8 + $0x118] sm:$0xff]  ;;  %7713 = vst [vmem:[#allocation22_spill] sm:$0xff] %v6209_v42 }
 0x4d7   :  { %v4512_v40 = vpop.eup %4511  ;;  %v1347_v44 = vadd.f32 %v4508_v15, %v1346_v19  ;;  %v6143_v19 = vld [vmem:[#allocation8 + $0xf0] sm:$0xff] }
 0x4d8   :  { %v1387_v47 = vadd.f32 %v4510_v28, %v1386_v12  ;;  %v1364_v48 = vmul.f32 %v4512_v40, %v1362_v21  ;;  %v4514_v4 = vpop.eup %4513  ;;  %vm1369_vm12 = vweird.f32 %v4512_v40  ;;  %v6113_v21 = vld [vmem:[#allocation8 + $0x120] sm:$0xff] }
 0x4d9   :  { %v1351_v63 = vsel %vm1350_vm8, %v4508_v15, %v1347_v44  ;;  %vm1370_vm14 = vmor %vm1368_vm13, %vm1369_vm12  ;;  %v6116_v15 = vld [vmem:[#allocation8 + $0x128] sm:$0xff]  ;;  %v6149_v12 = vld [vmem:[#allocation8 + $0xc0] sm:$0xff] }
 0x4da   :  { %v1356_v10 = vsel %vm1353_vm10, %v1355_v45, %v1351_v63  ;;  %v1391_v13 = vsel %vm1390_vm9, %v4510_v28, %v1387_v47  ;;  %v1365_v18 = vsub.f32 1.0, %v1364_v48  ;;  %v6122_v28 = vld [vmem:[#allocation8 + $0x138] sm:$0xff]  ;;  %v6161_v45 = vld [vmem:[#allocation8 + $0xa0] sm:$0xff]  ;;  %v6164_v47 = vld [vmem:[#allocation8 + $0xa8] sm:$0xff] }
 0x4db   :  { %v1378_v22 = vmul.f32 %v4514_v4, %v1356_v10  ;;  %v1396_v30 = vsel %vm1393_vm11, %v1395_v52, %v1391_v13  ;;  %v6158_v44 = vld [vmem:[#allocation8 + $0xd8] sm:$0xff]  ;;  %7697 = vst [vmem:[#allocation45_spill] sm:$0xff] %v6161_v45  ;;  %v6167_v48 = vld [vmem:[#allocation8 + $0xb0] sm:$0xff]  ;;  %v6173_v52 = vld [vmem:[#allocation8 + $0x80] sm:$0xff] }
 0x4dc   :  { %v1401_v36 = vmul.f32 %v1399_v51, %v1396_v30  ;;  %v1366_v53 = vmul.f32 %v4512_v40, %v1365_v18  ;;  %7696 = vst [vmem:[#allocation48_spill] sm:$0xff] %v6158_v44  ;;  %v6170_v51 = vld [vmem:[#allocation8 + $0xb8] sm:$0xff]  ;;  %v6176_v63 = vld [vmem:[#allocation8 + $0x88] sm:$0xff]  ;;  %v6179_v4 = vld [vmem:[#allocation8 + $0x90] sm:$0xff] }
 0x4dd   :  { %7698 = vst [vmem:[#allocation46_spill] sm:$0xff] %v6164_v47  ;;  %v6182_v10 = vld [vmem:[#allocation8 + $0x98] sm:$0xff]  ;;  %v6185_v13 = vld [vmem:[#allocation8 + $0x60] sm:$0xff]  ;;  %v6188_v18 = vld [vmem:[#allocation8 + $0x68] sm:$0xff] }
 0x4de   :  { %v6038_v41 = vadd.f32 %v1401_v36, %v1378_v22  ;;  %v1367_v62 = vadd.f32 %v4512_v40, %v1366_v53  ;;  %7699 = vst [vmem:[#allocation51_spill] sm:$0xff] %v6167_v48  ;;  %v6191_v22 = vld [vmem:[#allocation8 + $0x70] sm:$0xff]  ;;  %v6194_v30 = vld [vmem:[#allocation8 + $0x78] sm:$0xff]  ;;  %v6197_v36 = vld [vmem:[#allocation8 + $0x40] sm:$0xff] }
 0x4df   :  { %7700 = vst [vmem:[#allocation52_spill] sm:$0xff] %v6170_v51  ;;  %v6200_v53 = vld [vmem:[#allocation8 + $0x48] sm:$0xff] }
 0x4e0   :  { %4515 = vtanh.f32 %v6038_v41  ;;  %v1371_v60 = vsel %vm1370_vm14, %v4512_v40, %v1367_v62  ;;  %v6155_v40 = vld [vmem:[#allocation8 + $0xd0] sm:$0xff]  ;;  %7701 = vst [vmem:[#allocation49_spill] sm:$0xff] %v6173_v52 }
 0x4e1   :  { %v1376_v46 = vsel %vm1373_vm15, %v1375_v50, %v1371_v60  ;;  %7695 = vst [vmem:[#allocation47_spill] sm:$0xff] %v6155_v40  ;;  %v6203_v62 = vld [vmem:[#allocation8 + $0x50] sm:$0xff]  ;;  %v6212_v60 = vld [vmem:[#allocation8 + $0x28] sm:$0xff] }
 0x4e2   :  { %7702 = vst [vmem:[#allocation50_spill] sm:$0xff] %v6176_v63  ;;  %v6215_v50 = vld [vmem:[#allocation8 + $0x30] sm:$0xff] }
 0x4e3   :  { %7703 = vst [vmem:[#allocation55_spill] sm:$0xff] %v6179_v4 }
 0x4e4   :  { %7704 = vst [vmem:[#allocation56_spill] sm:$0xff] %v6182_v10 }
 0x4e5   :  { %7705 = vst [vmem:[#allocation53_spill] sm:$0xff] %v6185_v13 }
 0x4e6   :  { %v4516_v49 = vpop.eup %4515  ;;  %7706 = vst [vmem:[#allocation54_spill] sm:$0xff] %v6188_v18 }
 0x4e7   :  { %v1404_v59 = vmul.f32 %v4516_v49, %v1376_v46  ;;  %7707 = vst [vmem:[#allocation57_spill] sm:$0xff] %v6191_v22  ;;  %v6218_v49 = vld [vmem:[#allocation8 + $0x38] sm:$0xff]  ;;  %v6221_v46 = vld [vmem:[#allocation8] sm:$0xff] }
 0x4e8   :  { %7708 = vst [vmem:[#allocation58_spill] sm:$0xff] %v6194_v30 }
 0x4e9   :  { %v1410_v25 = vrot.slane %v1404_v59, 4  ;;  %7709 = vst [vmem:[#allocation19_spill] sm:$0xff] %v6197_v36  ;;  %v6224_v59 = vld [vmem:[#allocation8 + $0x8] sm:$0xff] }
 0x4ea   :  { %7710 = vst [vmem:[#allocation20_spill] sm:$0xff] %v6200_v53 }
 0x4eb   :  { %1428 = vmatmul.f32.vlgmr.msrb.gmra.mxu0 %v1410_v25  ;;  %1448 = vmatmul.f32.vlgmr.msrb.gmra.mxu1 %v1410_v25  ;;  %7711 = vst [vmem:[#allocation21_spill] sm:$0xff] %v6203_v62 }
 0x4ec   :  { %1468 = vmatmul.f32.vlgmr.msrb.gmra.mxu2 %v1410_v25  ;;  %1488 = vmatmul.f32.vlgmr.msrb.gmra.mxu3 %v1410_v25  ;;  %7714 = vst [vmem:[#allocation23_spill] sm:$0xff] %v6212_v60  ;;  %v6227_v25 = vld [vmem:[#allocation8 + $0x10] sm:$0xff] }
 0x4ed   :  { %1735 = vmatpush.msrb.mxu0 %v6041_v5  ;;  %1755 = vmatpush.msrb.mxu1 %v6044_v56  ;;  %7715 = vst [vmem:[#allocation29_spill] sm:$0xff] %v6215_v50 }
 0x4ee   :  { %1775 = vmatpush.msrb.mxu2 %v6047_v55  ;;  %1795 = vmatpush.msrb.mxu3 %v6050_v61  ;;  %7716 = vst [vmem:[#allocation25_spill] sm:$0xff] %v6218_v49 }
 0x4ef   :  { %1736 = vmatpush.msrb.mxu0 %v6053_v34  ;;  %1756 = vmatpush.msrb.mxu1 %v6056_v27  ;;  %7717 = vst [vmem:[#allocation31_spill] sm:$0xff] %v6221_v46 }
 0x4f0   :  { %1776 = vmatpush.msrb.mxu2 %v6059_v58  ;;  %1796 = vmatpush.msrb.mxu3 %v6062_v29  ;;  %7718 = vst [vmem:[#allocation28_spill] sm:$0xff] %v6224_v59 }
 0x4f1   :  { %1737 = vmatpush.msrb.mxu0 %v6065_v8  ;;  %1757 = vmatpush.msrb.mxu1 %v6068_v43  ;;  %7719 = vst [vmem:[#allocation27_spill] sm:$0xff] %v6227_v25 }
 0x4f2   :  { %1777 = vmatpush.msrb.mxu2 %v6071_v0  ;;  %1797 = vmatpush.msrb.mxu3 %v6074_v54 }
 0x4f3   :  { %1738 = vmatpush.msrb.mxu0 %v6077_v57  ;;  %1758 = vmatpush.msrb.mxu1 %v6080_v1 }
 0x4f4   :  { %1778 = vmatpush.msrb.mxu2 %v6083_v2  ;;  %1798 = vmatpush.msrb.mxu3 %v6086_v3 }
 0x4f5   :  { %1739 = vmatpush.msrb.mxu0 %v6089_v32  ;;  %1759 = vmatpush.msrb.mxu1 %v6092_v26 }
 0x4f6   :  { %1779 = vmatpush.msrb.mxu2 %v6095_v20  ;;  %1799 = vmatpush.msrb.mxu3 %v6098_v24 }
 0x4f7   :  { %1740 = vmatpush.msrb.mxu0 %v6101_v16  ;;  %1760 = vmatpush.msrb.mxu1 %v6104_v14 }
 0x4f8   :  { %1780 = vmatpush.msrb.mxu2 %v6107_v23  ;;  %1800 = vmatpush.msrb.mxu3 %v6110_v11 }
 0x4f9   :  { %1741 = vmatpush.msrb.mxu0 %v6113_v21  ;;  %1761 = vmatpush.msrb.mxu1 %v6116_v15 }
 0x4fa   :  { %1781 = vmatpush.msrb.mxu2 %v6119_v17  ;;  %1801 = vmatpush.msrb.mxu3 %v6122_v28 }
 0x4fb   :  { %1742 = vmatpush.msrb.mxu0 %v6125_v7  ;;  %1762 = vmatpush.msrb.mxu1 %v6128_v38 }
 0x4fc   :  { %1782 = vmatpush.msrb.mxu2 %v6131_v6  ;;  %1802 = vmatpush.msrb.mxu3 %v6134_v35 }
 0x4fd   :  { %1743 = vmatpush.msrb.mxu0 %v6137_v33  ;;  %1763 = vmatpush.msrb.mxu1 %v6140_v37 }
 0x4fe   :  { %1783 = vmatpush.msrb.mxu2 %v6143_v19  ;;  %1803 = vmatpush.msrb.mxu3 %v6146_v31 }
 0x4ff   :  { %1744 = vmatpush.msrb.mxu0 %v6149_v12  ;;  %1764 = vmatpush.msrb.mxu1 %v6152_v9 }
 0x500   :  { %1784 = vmatpush.msrb.mxu2 %v6155_v40  ;;  %1804 = vmatpush.msrb.mxu3 %v6158_v44 }
 0x501   :  { %1745 = vmatpush.msrb.mxu0 %v6161_v45  ;;  %1765 = vmatpush.msrb.mxu1 %v6164_v47 }
 0x502   :  { %1785 = vmatpush.msrb.mxu2 %v6167_v48  ;;  %1805 = vmatpush.msrb.mxu3 %v6170_v51 }
 0x503   :  { %1746 = vmatpush.msrb.mxu0 %v6173_v52  ;;  %1766 = vmatpush.msrb.mxu1 %v6176_v63 }
 0x504   :  { %1786 = vmatpush.msrb.mxu2 %v6179_v4  ;;  %1806 = vmatpush.msrb.mxu3 %v6182_v10 }
 0x505   :  { %1747 = vmatpush.msrb.mxu0 %v6185_v13  ;;  %1767 = vmatpush.msrb.mxu1 %v6188_v18  ;;  %v1408_v13 = vld [vmem:[#allocation2 + $0x80] sm:$0xc0] }
 0x506   :  { %1787 = vmatpush.msrb.mxu2 %v6191_v22  ;;  %1807 = vmatpush.msrb.mxu3 %v6194_v30 }
 0x507   :  { %1748 = vmatpush.msrb.mxu0 %v6197_v36  ;;  %1768 = vmatpush.msrb.mxu1 %v6200_v53  ;;  %v1406_v53 = vld [vmem:[#allocation2 + $0x68] sm:$0xc0] }
 0x508   :  { %1788 = vmatpush.msrb.mxu2 %v6203_v62  ;;  %1808 = vmatpush.msrb.mxu3 %v6206_v39  ;;  %v1405_v62 = vld [vmem:[#allocation2 + $0x30] sm:$0xc0] }
 0x509   :  { %1749 = vmatpush.msrb.mxu0 %v6209_v42  ;;  %1769 = vmatpush.msrb.mxu1 %v6212_v60  ;;  %v6230_v60 = vld [vmem:[#allocation8 + $0x18] sm:$0xff] }
 0x50a   :  { %1789 = vmatpush.msrb.mxu2 %v6215_v50  ;;  %1809 = vmatpush.msrb.mxu3 %v6218_v49  ;;  %7720 = vst [vmem:[#allocation30_spill] sm:$0xff] %v6230_v60 }
 0x50b   :  { %1750 = vmatpush.msrb.mxu0 %v6221_v46  ;;  %1770 = vmatpush.msrb.mxu1 %v6224_v59 }
 0x50c   :  { %1790 = vmatpush.msrb.mxu2 %v6227_v25  ;;  %1810 = vmatpush.msrb.mxu3 %v6230_v60 }
 0x568   :  { %v1429_v50 = vpop.f32.mrf.mxu0  ;;  %v1449_v42 = vpop.f32.mrf.mxu1 }
 0x569   :  { %v1496_v39 = vrot.slane %v1429_v50, 2  ;;  %v1497_v49 = vrot.slane %v1449_v42, 2 }
 0x56b   :  { %v1504_v36 = vadd.f32 %v1496_v39, %v1405_v62  ;;  %v1505_v46 = vadd.f32 %v1497_v49, %v1406_v53  ;;  %v1407_v53 = vld [vmem:[#allocation2 + $0x78] sm:$0xc0] }
 0x56d   :  { %v4354_v30 = vmul.f32 -1.442695, %v1504_v36  ;;  %v4356_v22 = vmul.f32 -1.442695, %v1505_v46 }
 0x56f   :  { %4517 = vpow2.f32 %v4354_v30  ;;  %v1489_v59 = vpop.f32.mrf.mxu3  ;;  %v1469_v50 = vpop.f32.mrf.mxu2 }
 0x570   :  { %4519 = vpow2.f32 %v4356_v22  ;;  %v1499_v18 = vrot.slane %v1489_v59, 2  ;;  %v1498_v42 = vrot.slane %v1469_v50, 2 }
 0x572   :  { %v1507_v25 = vadd.f32 %v1499_v18, %v1408_v13  ;;  %v1506_v30 = vadd.f32 %v1498_v42, %v1407_v53 }
 0x574   :  { %v4355_v10 = vmul.f32 -1.442695, %v1507_v25 }
 0x575   :  { %v4518_v4 = vpop.eup %4517 }
 0x576   :  { %v4520_v63 = vpop.eup %4519  ;;  %v1511_v60 = vadd.f32 1.0, %v4518_v4  ;;  %4521 = vpow2.f32 %v4355_v10 }
 0x577   :  { %v1551_v52 = vadd.f32 1.0, %v4520_v63 }
 0x578   :  { %4523 = vrcp.f32 %v1511_v60  ;;  %v1523_v59 = vand.u32 2147483648, %v1511_v60  ;;  %v1521_v63 = vand.u32 2147483647, %v1511_v60  ;;  %vm1517_vm2 = vweird.f32 %v1511_v60 }
 0x579   :  { %4525 = vrcp.f32 %v1551_v52  ;;  %v1563_v4 = vand.u32 2147483648, %v1551_v52  ;;  %v1561_v50 = vand.u32 2147483647, %v1551_v52  ;;  %vm1557_vm3 = vweird.f32 %v1551_v52 }
 0x57a   :  { %v1524_v42 = vor.u32 1.1754944e-38, %v1523_v59  ;;  %vm1522_vm6 = vcmp.eq.f32.partialorder %v1521_v63, 8.507059e+37 }
 0x57b   :  { %vm1562_vm7 = vcmp.eq.f32.partialorder %v1561_v50, 8.507059e+37  ;;  %v7726_v50 = vld [vmem:[#allocation52_spill] sm:$0xff] }
 0x57c   :  { %v4522_v62 = vpop.eup %4521 }
 0x57d   :  { %v1531_v36 = vadd.f32 1.0, %v4522_v62 }
 0x57e   :  { %v4524_v39 = vpop.eup %4523 }
 0x57f   :  { %v4526_v49 = vpop.eup %4525  ;;  %v1513_v22 = vmul.f32 %v4524_v39, %v1511_v60  ;;  %4527 = vrcp.f32 %v1531_v36  ;;  %vm1518_vm0 = vweird.f32 %v4524_v39  ;;  %vm1537_vm9 = vweird.f32 %v1531_v36 }
 0x580   :  { %v1553_v46 = vmul.f32 %v4526_v49, %v1551_v52  ;;  %4529 = vtanh.f32 %v1506_v30  ;;  %vm1558_vm1 = vweird.f32 %v4526_v49  ;;  %vm1519_vm4 = vmor %vm1517_vm2, %vm1518_vm0 }
 0x581   :  { %v1514_v13 = vsub.f32 1.0, %v1513_v22  ;;  %v1568_v22 = vrot.slane %v6038_v41, 6  ;;  %vm1559_vm5 = vmor %vm1557_vm3, %vm1558_vm1  ;;  %v1543_v41 = vand.u32 2147483648, %v1531_v36 }
 0x582   :  { %v1554_v18 = vsub.f32 1.0, %v1553_v46  ;;  %v1564_v46 = vor.u32 1.1754944e-38, %v1563_v4  ;;  %v1541_v4 = vand.u32 2147483647, %v1531_v36 }
 0x583   :  { %v1515_v10 = vmul.f32 %v4524_v39, %v1514_v13 }
 0x584   :  { %v1555_v25 = vmul.f32 %v4526_v49, %v1554_v18  ;;  %vm1542_vm11 = vcmp.eq.f32.partialorder %v1541_v4, 8.507059e+37  ;;  %v7739_v4 = vld [vmem:[#allocation22_spill] sm:$0xff] }
 0x585   :  { %v4528_v51 = vpop.eup %4527  ;;  %v1516_v48 = vadd.f32 %v4524_v39, %v1515_v10 }
 0x586   :  { %v1556_v62 = vadd.f32 %v4526_v49, %v1555_v25  ;;  %v1533_v53 = vmul.f32 %v4528_v51, %v1531_v36  ;;  %v4530_v13 = vpop.eup %4529  ;;  %vm1538_vm8 = vweird.f32 %v4528_v51  ;;  %v7725_v36 = vld [vmem:[#allocation51_spill] sm:$0xff] }
 0x587   :  { %v1520_v30 = vsel %vm1519_vm4, %v4524_v39, %v1516_v48  ;;  %vm1539_vm10 = vmor %vm1537_vm9, %vm1538_vm8  ;;  %v1544_v39 = vor.u32 1.1754944e-38, %v1543_v41  ;;  %v7738_v41 = vld [vmem:[#allocation24_spill] sm:$0xff] }
 0x588   :  { %v1525_v47 = vsel %vm1522_vm6, %v1524_v42, %v1520_v30  ;;  %v1560_v45 = vsel %vm1559_vm5, %v4526_v49, %v1556_v62  ;;  %v1534_v18 = vsub.f32 1.0, %v1533_v53  ;;  %v7727_v42 = vld [vmem:[#allocation49_spill] sm:$0xff]  ;;  %v7728_v62 = vld [vmem:[#allocation50_spill] sm:$0xff]  ;;  %v7729_v53 = vld [vmem:[#allocation55_spill] sm:$0xff] }
 0x589   :  { %v1547_v44 = vmul.f32 %v4530_v13, %v1525_v47  ;;  %v1565_v40 = vsel %vm1562_vm7, %v1564_v46, %v1560_v45  ;;  %v7723_v45 = vld [vmem:[#allocation45_spill] sm:$0xff]  ;;  %v7732_v30 = vld [vmem:[#allocation54_spill] sm:$0xff] }
 0x58a   :  { %v1570_v10 = vmul.f32 %v1568_v22, %v1565_v40  ;;  %v1535_v60 = vmul.f32 %v4528_v51, %v1534_v18  ;;  %v7721_v40 = vld [vmem:[#allocation47_spill] sm:$0xff]  ;;  %v7730_v22 = vld [vmem:[#allocation56_spill] sm:$0xff]  ;;  %v7731_v46 = vld [vmem:[#allocation53_spill] sm:$0xff] }
 0x58b   :  { %v7733_v13 = vld [vmem:[#allocation57_spill] sm:$0xff]  ;;  %v7734_v18 = vld [vmem:[#allocation58_spill] sm:$0xff] }
 0x58c   :  { %v6234_v52 = vadd.f32 %v1570_v10, %v1547_v44  ;;  %v1536_v59 = vadd.f32 %v4528_v51, %v1535_v60  ;;  %v7722_v44 = vld [vmem:[#allocation48_spill] sm:$0xff]  ;;  %v7735_v10 = vld [vmem:[#allocation19_spill] sm:$0xff] }
 0x58d   :  { %v7736_v60 = vld [vmem:[#allocation20_spill] sm:$0xff] }
 0x58e   :  { %4531 = vtanh.f32 %v6234_v52  ;;  %v1540_v48 = vsel %vm1539_vm10, %v4528_v51, %v1536_v59  ;;  %v7724_v51 = vld [vmem:[#allocation46_spill] sm:$0xff]  ;;  %v7737_v59 = vld [vmem:[#allocation21_spill] sm:$0xff] }
 0x58f   :  { %v1545_v63 = vsel %vm1542_vm11, %v1544_v39, %v1540_v48  ;;  %v7740_v48 = vld [vmem:[#allocation23_spill] sm:$0xff]  ;;  %v7741_v39 = vld [vmem:[#allocation29_spill] sm:$0xff] }
 0x594   :  { %v4532_v49 = vpop.eup %4531 }
 0x595   :  { %v1573_v25 = vmul.f32 %v4532_v49, %v1545_v63  ;;  %v7742_v49 = vld [vmem:[#allocation25_spill] sm:$0xff]  ;;  %v7743_v63 = vld [vmem:[#allocation31_spill] sm:$0xff] }
 0x597   :  { %v1579_v47 = vrot.slane %v1573_v25, 6  ;;  %v7744_v25 = vld [vmem:[#allocation28_spill] sm:$0xff] }
 0x599   :  { %1597 = vmatmul.f32.vlgmr.msra.gmra.mxu0 %v1579_v47  ;;  %1617 = vmatmul.f32.vlgmr.msra.gmra.mxu1 %v1579_v47 }
 0x59a   :  { %1637 = vmatmul.f32.vlgmr.msra.gmra.mxu2 %v1579_v47  ;;  %1657 = vmatmul.f32.vlgmr.msra.gmra.mxu3 %v1579_v47  ;;  %v7745_v47 = vld [vmem:[#allocation27_spill] sm:$0xff] }
 0x59b   :  { %1904 = vmatpush.msra.mxu0 %v6041_v5  ;;  %1924 = vmatpush.msra.mxu1 %v6044_v56 }
 0x59c   :  { %1944 = vmatpush.msra.mxu2 %v6047_v55  ;;  %1964 = vmatpush.msra.mxu3 %v6050_v61 }
 0x59d   :  { %1905 = vmatpush.msra.mxu0 %v6053_v34  ;;  %1925 = vmatpush.msra.mxu1 %v6056_v27 }
 0x59e   :  { %1945 = vmatpush.msra.mxu2 %v6059_v58  ;;  %1965 = vmatpush.msra.mxu3 %v6062_v29 }
 0x59f   :  { %1906 = vmatpush.msra.mxu0 %v6065_v8  ;;  %1926 = vmatpush.msra.mxu1 %v6068_v43 }
 0x5a0   :  { %1946 = vmatpush.msra.mxu2 %v6071_v0  ;;  %1966 = vmatpush.msra.mxu3 %v6074_v54 }
 0x5a1   :  { %1907 = vmatpush.msra.mxu0 %v6077_v57  ;;  %1927 = vmatpush.msra.mxu1 %v6080_v1 }
 0x5a2   :  { %1947 = vmatpush.msra.mxu2 %v6083_v2  ;;  %1967 = vmatpush.msra.mxu3 %v6086_v3 }
 0x5a3   :  { %1908 = vmatpush.msra.mxu0 %v6089_v32  ;;  %1928 = vmatpush.msra.mxu1 %v6092_v26 }
 0x5a4   :  { %1948 = vmatpush.msra.mxu2 %v6095_v20  ;;  %1968 = vmatpush.msra.mxu3 %v6098_v24 }
 0x5a5   :  { %1909 = vmatpush.msra.mxu0 %v6101_v16  ;;  %1929 = vmatpush.msra.mxu1 %v6104_v14 }
 0x5a6   :  { %1949 = vmatpush.msra.mxu2 %v6107_v23  ;;  %1969 = vmatpush.msra.mxu3 %v6110_v11 }
 0x5a7   :  { %1910 = vmatpush.msra.mxu0 %v6113_v21  ;;  %1930 = vmatpush.msra.mxu1 %v6116_v15 }
 0x5a8   :  { %1950 = vmatpush.msra.mxu2 %v6119_v17  ;;  %1970 = vmatpush.msra.mxu3 %v6122_v28 }
 0x5a9   :  { %1911 = vmatpush.msra.mxu0 %v6125_v7  ;;  %1931 = vmatpush.msra.mxu1 %v6128_v38 }
 0x5aa   :  { %1951 = vmatpush.msra.mxu2 %v6131_v6  ;;  %1971 = vmatpush.msra.mxu3 %v6134_v35 }
 0x5ab   :  { %1912 = vmatpush.msra.mxu0 %v6137_v33  ;;  %1932 = vmatpush.msra.mxu1 %v6140_v37 }
 0x5ac   :  { %1952 = vmatpush.msra.mxu2 %v6143_v19  ;;  %1972 = vmatpush.msra.mxu3 %v6146_v31 }
 0x5ad   :  { %1913 = vmatpush.msra.mxu0 %v6149_v12  ;;  %1933 = vmatpush.msra.mxu1 %v6152_v9 }
 0x5ae   :  { %1953 = vmatpush.msra.mxu2 %v7721_v40  ;;  %1973 = vmatpush.msra.mxu3 %v7722_v44 }
 0x5af   :  { %1914 = vmatpush.msra.mxu0 %v7723_v45  ;;  %1934 = vmatpush.msra.mxu1 %v7724_v51 }
 0x5b0   :  { %1954 = vmatpush.msra.mxu2 %v7725_v36  ;;  %1974 = vmatpush.msra.mxu3 %v7726_v50 }
 0x5b1   :  { %1915 = vmatpush.msra.mxu0 %v7727_v42  ;;  %1935 = vmatpush.msra.mxu1 %v7728_v62  ;;  %v1576_v42 = vld [vmem:[#allocation2 + $0x28] sm:$0x3] }
 0x5b2   :  { %1955 = vmatpush.msra.mxu2 %v7729_v53  ;;  %1975 = vmatpush.msra.mxu3 %v7730_v22 }
 0x5b3   :  { %1916 = vmatpush.msra.mxu0 %v7731_v46  ;;  %1936 = vmatpush.msra.mxu1 %v7732_v30 }
 0x5b4   :  { %1956 = vmatpush.msra.mxu2 %v7733_v13  ;;  %1976 = vmatpush.msra.mxu3 %v7734_v18  ;;  %v1575_v18 = vld [vmem:[#allocation2 + $0x88] sm:$0x3] }
 0x5b5   :  { %1917 = vmatpush.msra.mxu0 %v7735_v10  ;;  %1937 = vmatpush.msra.mxu1 %v7736_v60  ;;  %v7746_v10 = vld [vmem:[#allocation30_spill] sm:$0xff]  ;;  %v1574_v60 = vld [vmem:[#allocation2 + $0x8] sm:$0x3] }
 0x5b6   :  { %1957 = vmatpush.msra.mxu2 %v7737_v59  ;;  %1977 = vmatpush.msra.mxu3 %v7738_v41 }
 0x5b7   :  { %1918 = vmatpush.msra.mxu0 %v7739_v4  ;;  %1938 = vmatpush.msra.mxu1 %v7740_v48 }
 0x5b8   :  { %1958 = vmatpush.msra.mxu2 %v7741_v39  ;;  %1978 = vmatpush.msra.mxu3 %v7742_v49  ;;  %v1577_v39 = vld [vmem:[#allocation2 + $0x40] sm:$0x3] }
 0x5b9   :  { %1919 = vmatpush.msra.mxu0 %v7743_v63  ;;  %1939 = vmatpush.msra.mxu1 %v7744_v25 }
 0x5ba   :  { %1959 = vmatpush.msra.mxu2 %v7745_v47  ;;  %1979 = vmatpush.msra.mxu3 %v7746_v10 }
 0x616   :  { %v1598_v59 = vpop.f32.mrf.mxu0  ;;  %v1618_v41 = vpop.f32.mrf.mxu1 }
 0x617   :  { %v1661_v13 = vadd.f32 %v1598_v59, %v1574_v60  ;;  %v1662_v4 = vadd.f32 %v1618_v41, %v1575_v18 }
 0x619   :  { %v4357_v30 = vmul.f32 -1.442695, %v1661_v13  ;;  %v4359_v48 = vmul.f32 -1.442695, %v1662_v4 }
 0x61b   :  { %4533 = vpow2.f32 %v4357_v30 }
 0x61c   :  { %4535 = vpow2.f32 %v4359_v48 }
 0x61d   :  { %v1658_v49 = vpop.f32.mrf.mxu3  ;;  %v1638_v10 = vpop.f32.mrf.mxu2 }
 0x61e   :  { %v1664_v46 = vadd.f32 %v1658_v49, %v1577_v39  ;;  %v1663_v13 = vadd.f32 %v1638_v10, %v1576_v42 }
 0x620   :  { %v4358_v63 = vmul.f32 -1.442695, %v1664_v46 }
 0x621   :  { %v4534_v22 = vpop.eup %4533 }
 0x622   :  { %v4536_v25 = vpop.eup %4535  ;;  %v1668_v53 = vadd.f32 1.0, %v4534_v22  ;;  %4537 = vpow2.f32 %v4358_v63 }
 0x623   :  { %v1708_v47 = vadd.f32 1.0, %v4536_v25 }
 0x624   :  { %4539 = vrcp.f32 %v1668_v53  ;;  %v1680_v46 = vand.u32 2147483648, %v1668_v53  ;;  %v1678_v49 = vand.u32 2147483647, %v1668_v53  ;;  %vm1674_vm14 = vweird.f32 %v1668_v53 }
 0x625   :  { %4541 = vrcp.f32 %v1708_v47  ;;  %v1720_v39 = vand.u32 2147483648, %v1708_v47  ;;  %v1718_v25 = vand.u32 2147483647, %v1708_v47  ;;  %vm1714_vm15 = vweird.f32 %v1708_v47 }
 0x626   :  { %v1681_v42 = vor.u32 1.1754944e-38, %v1680_v46  ;;  %vm1679_vm2 = vcmp.eq.f32.partialorder %v1678_v49, 8.507059e+37 }
 0x627   :  { %vm1719_vm3 = vcmp.eq.f32.partialorder %v1718_v25, 8.507059e+37  ;;  %v7753_v25 = vld [vmem:[#allocation49_spill] sm:$0xff] }
 0x628   :  { %v4538_v62 = vpop.eup %4537 }
 0x629   :  { %v1688_v60 = vadd.f32 1.0, %v4538_v62 }
 0x62a   :  { %v4540_v18 = vpop.eup %4539 }
 0x62b   :  { %v4542_v59 = vpop.eup %4541  ;;  %v1670_v30 = vmul.f32 %v4540_v18, %v1668_v53  ;;  %4543 = vrcp.f32 %v1688_v60  ;;  %vm1675_vm12 = vweird.f32 %v4540_v18  ;;  %vm1694_vm5 = vweird.f32 %v1688_v60 }
 0x62c   :  { %v1710_v41 = vmul.f32 %v4542_v59, %v1708_v47  ;;  %4545 = vtanh.f32 %v1663_v13  ;;  %vm1715_vm13 = vweird.f32 %v4542_v59  ;;  %vm1676_vm0 = vmor %vm1674_vm14, %vm1675_vm12  ;;  %v1725_v13 = vrot.slane %v6234_v52, 6 }
 0x62d   :  { %v1671_v4 = vsub.f32 1.0, %v1670_v30  ;;  %vm1716_vm1 = vmor %vm1714_vm15, %vm1715_vm13  ;;  %v1721_v30 = vor.u32 1.1754944e-38, %v1720_v39  ;;  %v1700_v39 = vand.u32 2147483648, %v1688_v60 }
 0x62e   :  { %v1711_v48 = vsub.f32 1.0, %v1710_v41 }
 0x62f   :  { %v1672_v22 = vmul.f32 %v4540_v18, %v1671_v4 }
 0x630   :  { %v1712_v63 = vmul.f32 %v4542_v59, %v1711_v48 }
 0x631   :  { %v4544_v50 = vpop.eup %4543  ;;  %v1673_v36 = vadd.f32 %v4540_v18, %v1672_v22 }
 0x632   :  { %v1713_v62 = vadd.f32 %v4542_v59, %v1712_v63  ;;  %v1690_v10 = vmul.f32 %v4544_v50, %v1688_v60  ;;  %v4546_v4 = vpop.eup %4545  ;;  %vm1695_vm4 = vweird.f32 %v4544_v50 }
 0x633   :  { %v1677_v41 = vsel %vm1676_vm0, %v4540_v18, %v1673_v36  ;;  %v1698_v36 = vand.u32 2147483647, %v1688_v60  ;;  %vm1696_vm6 = vmor %vm1694_vm5, %vm1695_vm4  ;;  %v1701_v18 = vor.u32 1.1754944e-38, %v1700_v39  ;;  %v7752_v60 = vld [vmem:[#allocation52_spill] sm:$0xff]  ;;  %v7765_v39 = vld [vmem:[#allocation22_spill] sm:$0xff] }
 0x634   :  { %v1682_v51 = vsel %vm1679_vm2, %v1681_v42, %v1677_v41  ;;  %v1717_v45 = vsel %vm1716_vm1, %v4542_v59, %v1713_v62  ;;  %v1691_v48 = vsub.f32 1.0, %v1690_v10  ;;  %v7754_v42 = vld [vmem:[#allocation50_spill] sm:$0xff]  ;;  %v7755_v62 = vld [vmem:[#allocation55_spill] sm:$0xff]  ;;  %v7756_v10 = vld [vmem:[#allocation56_spill] sm:$0xff] }
 0x635   :  { %v1704_v44 = vmul.f32 %v4546_v4, %v1682_v51  ;;  %v1722_v40 = vsel %vm1719_vm3, %v1721_v30, %v1717_v45  ;;  %vm1699_vm7 = vcmp.eq.f32.partialorder %v1698_v36, 8.507059e+37  ;;  %v7749_v45 = vld [vmem:[#allocation45_spill] sm:$0xff]  ;;  %v7750_v51 = vld [vmem:[#allocation46_spill] sm:$0xff]  ;;  %v7766_v36 = vld [vmem:[#allocation23_spill] sm:$0xff] }
 0x636   :  { %v1727_v22 = vmul.f32 %v1725_v13, %v1722_v40  ;;  %v1692_v53 = vmul.f32 %v4544_v50, %v1691_v48  ;;  %v7747_v40 = vld [vmem:[#allocation47_spill] sm:$0xff]  ;;  %v7757_v30 = vld [vmem:[#allocation53_spill] sm:$0xff]  ;;  %v7758_v41 = vld [vmem:[#allocation54_spill] sm:$0xff] }
 0x637   :  { %v7759_v13 = vld [vmem:[#allocation57_spill] sm:$0xff]  ;;  %v7760_v4 = vld [vmem:[#allocation58_spill] sm:$0xff]  ;;  %v7761_v48 = vld [vmem:[#allocation19_spill] sm:$0xff] }
 0x638   :  { %v6302_v47 = vadd.f32 %v1727_v22, %v1704_v44  ;;  %v1693_v46 = vadd.f32 %v4544_v50, %v1692_v53  ;;  %v7748_v44 = vld [vmem:[#allocation48_spill] sm:$0xff]  ;;  %v7763_v53 = vld [vmem:[#allocation21_spill] sm:$0xff] }
 0x639   :  { %v7762_v22 = vld [vmem:[#allocation20_spill] sm:$0xff] }
 0x63a   :  { %4547 = vtanh.f32 %v6302_v47  ;;  %v1697_v52 = vsel %vm1696_vm6, %v4544_v50, %v1693_v46  ;;  %v7751_v50 = vld [vmem:[#allocation51_spill] sm:$0xff]  ;;  %v7764_v46 = vld [vmem:[#allocation24_spill] sm:$0xff] }
 0x63b   :  { %v1702_v49 = vsel %vm1699_vm7, %v1701_v18, %v1697_v52  ;;  %v7767_v52 = vld [vmem:[#allocation29_spill] sm:$0xff] }
 0x63c   :  { %v7768_v18 = vld [vmem:[#allocation25_spill] sm:$0xff] }
 0x640   :  { %v4548_v59 = vpop.eup %4547 }
 0x641   :  { %v1730_v63 = vmul.f32 %v4548_v59, %v1702_v49  ;;  %v7769_v59 = vld [vmem:[#allocation31_spill] sm:$0xff]  ;;  %v7770_v49 = vld [vmem:[#allocation28_spill] sm:$0xff] }
 0x643   :  { %1751 = vmatmul.f32.vlgmr.msrb.gmra.mxu0 %v1730_v63  ;;  %1771 = vmatmul.f32.vlgmr.msrb.gmra.mxu1 %v1730_v63 }
 0x644   :  { %1791 = vmatmul.f32.vlgmr.msrb.gmra.mxu2 %v1730_v63  ;;  %1811 = vmatmul.f32.vlgmr.msrb.gmra.mxu3 %v1730_v63  ;;  %v7771_v63 = vld [vmem:[#allocation27_spill] sm:$0xff] }
 0x645   :  { %2073 = vmatpush.msrb.mxu0 %v6041_v5  ;;  %2093 = vmatpush.msrb.mxu1 %v6044_v56 }
 0x646   :  { %2113 = vmatpush.msrb.mxu2 %v6047_v55  ;;  %2133 = vmatpush.msrb.mxu3 %v6050_v61 }
 0x647   :  { %2074 = vmatpush.msrb.mxu0 %v6053_v34  ;;  %2094 = vmatpush.msrb.mxu1 %v6056_v27 }
 0x648   :  { %2114 = vmatpush.msrb.mxu2 %v6059_v58  ;;  %2134 = vmatpush.msrb.mxu3 %v6062_v29 }
 0x649   :  { %2075 = vmatpush.msrb.mxu0 %v6065_v8  ;;  %2095 = vmatpush.msrb.mxu1 %v6068_v43 }
 0x64a   :  { %2115 = vmatpush.msrb.mxu2 %v6071_v0  ;;  %2135 = vmatpush.msrb.mxu3 %v6074_v54 }
 0x64b   :  { %2076 = vmatpush.msrb.mxu0 %v6077_v57  ;;  %2096 = vmatpush.msrb.mxu1 %v6080_v1 }
 0x64c   :  { %2116 = vmatpush.msrb.mxu2 %v6083_v2  ;;  %2136 = vmatpush.msrb.mxu3 %v6086_v3 }
 0x64d   :  { %2077 = vmatpush.msrb.mxu0 %v6089_v32  ;;  %2097 = vmatpush.msrb.mxu1 %v6092_v26 }
 0x64e   :  { %2117 = vmatpush.msrb.mxu2 %v6095_v20  ;;  %2137 = vmatpush.msrb.mxu3 %v6098_v24 }
 0x64f   :  { %2078 = vmatpush.msrb.mxu0 %v6101_v16  ;;  %2098 = vmatpush.msrb.mxu1 %v6104_v14 }
 0x650   :  { %2118 = vmatpush.msrb.mxu2 %v6107_v23  ;;  %2138 = vmatpush.msrb.mxu3 %v6110_v11 }
 0x651   :  { %2079 = vmatpush.msrb.mxu0 %v6113_v21  ;;  %2099 = vmatpush.msrb.mxu1 %v6116_v15 }
 0x652   :  { %2119 = vmatpush.msrb.mxu2 %v6119_v17  ;;  %2139 = vmatpush.msrb.mxu3 %v6122_v28 }
 0x653   :  { %2080 = vmatpush.msrb.mxu0 %v6125_v7  ;;  %2100 = vmatpush.msrb.mxu1 %v6128_v38 }
 0x654   :  { %2120 = vmatpush.msrb.mxu2 %v6131_v6  ;;  %2140 = vmatpush.msrb.mxu3 %v6134_v35 }
 0x655   :  { %2081 = vmatpush.msrb.mxu0 %v6137_v33  ;;  %2101 = vmatpush.msrb.mxu1 %v6140_v37 }
 0x656   :  { %2121 = vmatpush.msrb.mxu2 %v6143_v19  ;;  %2141 = vmatpush.msrb.mxu3 %v6146_v31 }
 0x657   :  { %2082 = vmatpush.msrb.mxu0 %v6149_v12  ;;  %2102 = vmatpush.msrb.mxu1 %v6152_v9 }
 0x658   :  { %2122 = vmatpush.msrb.mxu2 %v7747_v40  ;;  %2142 = vmatpush.msrb.mxu3 %v7748_v44 }
 0x659   :  { %2083 = vmatpush.msrb.mxu0 %v7749_v45  ;;  %2103 = vmatpush.msrb.mxu1 %v7750_v51 }
 0x65a   :  { %2123 = vmatpush.msrb.mxu2 %v7751_v50  ;;  %2143 = vmatpush.msrb.mxu3 %v7752_v60 }
 0x65b   :  { %2084 = vmatpush.msrb.mxu0 %v7753_v25  ;;  %2104 = vmatpush.msrb.mxu1 %v7754_v42 }
 0x65c   :  { %2124 = vmatpush.msrb.mxu2 %v7755_v62  ;;  %2144 = vmatpush.msrb.mxu3 %v7756_v10  ;;  %v1734_v10 = vld [vmem:[#allocation2 + $0x40] sm:$0xc] }
 0x65d   :  { %2085 = vmatpush.msrb.mxu0 %v7757_v30  ;;  %2105 = vmatpush.msrb.mxu1 %v7758_v41 }
 0x65e   :  { %2125 = vmatpush.msrb.mxu2 %v7759_v13  ;;  %2145 = vmatpush.msrb.mxu3 %v7760_v4  ;;  %v1731_v13 = vld [vmem:[#allocation2 + $0x8] sm:$0xc] }
 0x65f   :  { %2086 = vmatpush.msrb.mxu0 %v7761_v48  ;;  %2106 = vmatpush.msrb.mxu1 %v7762_v22  ;;  %v7772_v48 = vld [vmem:[#allocation30_spill] sm:$0xff] }
 0x660   :  { %2126 = vmatpush.msrb.mxu2 %v7763_v53  ;;  %2146 = vmatpush.msrb.mxu3 %v7764_v46 }
 0x661   :  { %2087 = vmatpush.msrb.mxu0 %v7765_v39  ;;  %2107 = vmatpush.msrb.mxu1 %v7766_v36  ;;  %v1732_v39 = vld [vmem:[#allocation2 + $0x88] sm:$0xc] }
 0x662   :  { %2127 = vmatpush.msrb.mxu2 %v7767_v52  ;;  %2147 = vmatpush.msrb.mxu3 %v7768_v18 }
 0x663   :  { %2088 = vmatpush.msrb.mxu0 %v7769_v59  ;;  %2108 = vmatpush.msrb.mxu1 %v7770_v49 }
 0x664   :  { %2128 = vmatpush.msrb.mxu2 %v7771_v63  ;;  %2148 = vmatpush.msrb.mxu3 %v7772_v48 }
 0x6c0   :  { %v1752_v22 = vpop.f32.mrf.mxu0  ;;  %v1772_v53 = vpop.f32.mrf.mxu1 }
 0x6c1   :  { %v1819_v4 = vrot.slane %v1752_v22, 6  ;;  %v1820_v46 = vrot.slane %v1772_v53, 6 }
 0x6c3   :  { %v1827_v41 = vadd.f32 %v1819_v4, %v1731_v13  ;;  %v1828_v36 = vadd.f32 %v1820_v46, %v1732_v39  ;;  %v1733_v4 = vld [vmem:[#allocation2 + $0x28] sm:$0xc] }
 0x6c5   :  { %v4360_v30 = vmul.f32 -1.442695, %v1827_v41  ;;  %v4362_v52 = vmul.f32 -1.442695, %v1828_v36 }
 0x6c7   :  { %4549 = vpow2.f32 %v4360_v30  ;;  %v1812_v18 = vpop.f32.mrf.mxu3  ;;  %v1792_v22 = vpop.f32.mrf.mxu2 }
 0x6c8   :  { %4551 = vpow2.f32 %v4362_v52  ;;  %v1822_v59 = vrot.slane %v1812_v18, 6  ;;  %v1821_v53 = vrot.slane %v1792_v22, 6 }
 0x6ca   :  { %v1830_v49 = vadd.f32 %v1822_v59, %v1734_v10  ;;  %v1829_v30 = vadd.f32 %v1821_v53, %v1733_v4 }
 0x6cc   :  { %v4361_v62 = vmul.f32 -1.442695, %v1830_v49 }
 0x6cd   :  { %v4550_v63 = vpop.eup %4549 }
 0x6ce   :  { %v4552_v42 = vpop.eup %4551  ;;  %v1834_v48 = vadd.f32 1.0, %v4550_v63  ;;  %4553 = vpow2.f32 %v4361_v62 }
 0x6cf   :  { %v1874_v25 = vadd.f32 1.0, %v4552_v42 }
 0x6d0   :  { %4555 = vrcp.f32 %v1834_v48  ;;  %v1846_v59 = vand.u32 2147483648, %v1834_v48  ;;  %v1844_v42 = vand.u32 2147483647, %v1834_v48  ;;  %vm1840_vm10 = vweird.f32 %v1834_v48 }
 0x6d1   :  { %4557 = vrcp.f32 %v1874_v25  ;;  %v1886_v49 = vand.u32 2147483648, %v1874_v25  ;;  %v1884_v22 = vand.u32 2147483647, %v1874_v25  ;;  %vm1880_vm11 = vweird.f32 %v1874_v25 }
 0x6d2   :  { %v1847_v53 = vor.u32 1.1754944e-38, %v1846_v59  ;;  %vm1845_vm14 = vcmp.eq.f32.partialorder %v1844_v42, 8.507059e+37 }
 0x6d3   :  { %vm1885_vm15 = vcmp.eq.f32.partialorder %v1884_v22, 8.507059e+37 }
 0x6d4   :  { %v4554_v13 = vpop.eup %4553 }
 0x6d5   :  { %v1854_v41 = vadd.f32 1.0, %v4554_v13 }
 0x6d6   :  { %v4556_v46 = vpop.eup %4555 }
 0x6d7   :  { %v4558_v39 = vpop.eup %4557  ;;  %v1836_v36 = vmul.f32 %v4556_v46, %v1834_v48  ;;  %4559 = vrcp.f32 %v1854_v41  ;;  %vm1841_vm8 = vweird.f32 %v4556_v46  ;;  %vm1860_vm1 = vweird.f32 %v1854_v41 }
 0x6d8   :  { %v1876_v52 = vmul.f32 %v4558_v39, %v1874_v25  ;;  %4561 = vtanh.f32 %v1829_v30  ;;  %vm1881_vm9 = vweird.f32 %v4558_v39  ;;  %vm1842_vm12 = vmor %vm1840_vm10, %vm1841_vm8 }
 0x6d9   :  { %v1837_v10 = vsub.f32 1.0, %v1836_v36  ;;  %v1891_v36 = vrot.slane %v6302_v47, 6  ;;  %vm1882_vm13 = vmor %vm1880_vm11, %vm1881_vm9  ;;  %v1866_v47 = vand.u32 2147483648, %v1854_v41 }
 0x6da   :  { %v1877_v18 = vsub.f32 1.0, %v1876_v52  ;;  %v1887_v52 = vor.u32 1.1754944e-38, %v1886_v49  ;;  %v1864_v49 = vand.u32 2147483647, %v1854_v41 }
 0x6db   :  { %v1838_v62 = vmul.f32 %v4556_v46, %v1837_v10 }
 0x6dc   :  { %v1878_v63 = vmul.f32 %v4558_v39, %v1877_v18  ;;  %vm1865_vm3 = vcmp.eq.f32.partialorder %v1864_v49, 8.507059e+37 }
 0x6dd   :  { %v4560_v60 = vpop.eup %4559  ;;  %v1839_v50 = vadd.f32 %v4556_v46, %v1838_v62 }
 0x6de   :  { %v1879_v13 = vadd.f32 %v4558_v39, %v1878_v63  ;;  %v1856_v4 = vmul.f32 %v4560_v60, %v1854_v41  ;;  %v4562_v10 = vpop.eup %4561  ;;  %vm1861_vm0 = vweird.f32 %v4560_v60 }
 0x6df   :  { %v1843_v30 = vsel %vm1842_vm12, %v4556_v46, %v1839_v50  ;;  %vm1862_vm2 = vmor %vm1860_vm1, %vm1861_vm0  ;;  %v1867_v46 = vor.u32 1.1754944e-38, %v1866_v47 }
 0x6e0   :  { %v1848_v51 = vsel %vm1845_vm14, %v1847_v53, %v1843_v30  ;;  %v1883_v45 = vsel %vm1882_vm13, %v4558_v39, %v1879_v13  ;;  %v1857_v18 = vsub.f32 1.0, %v1856_v4 }
 0x6e1   :  { %v1870_v44 = vmul.f32 %v4562_v10, %v1848_v51  ;;  %v1888_v40 = vsel %vm1885_vm15, %v1887_v52, %v1883_v45  ;;  %v1899_v52 = vld [vmem:[#allocation2 + $0x28] sm:$0x30] }
 0x6e2   :  { %v1893_v62 = vmul.f32 %v1891_v36, %v1888_v40  ;;  %v1858_v48 = vmul.f32 %v4560_v60, %v1857_v18  ;;  %v1900_v40 = vld [vmem:[#allocation2 + $0x40] sm:$0x30] }
 0x6e4   :  { %v6370_v25 = vadd.f32 %v1893_v62, %v1870_v44  ;;  %v1859_v59 = vadd.f32 %v4560_v60, %v1858_v48 }
 0x6e6   :  { %4563 = vtanh.f32 %v6370_v25  ;;  %v1863_v50 = vsel %vm1862_vm2, %v4560_v60, %v1859_v59 }
 0x6e7   :  { %v1868_v42 = vsel %vm1865_vm3, %v1867_v46, %v1863_v50 }
 0x6ec   :  { %v4564_v39 = vpop.eup %4563 }
 0x6ed   :  { %v1896_v63 = vmul.f32 %v4564_v39, %v1868_v42 }
 0x6ef   :  { %v1902_v51 = vrot.slane %v1896_v63, 2 }
 0x6f1   :  { %1920 = vmatmul.f32.vlgmr.msra.gmra.mxu0 %v1902_v51  ;;  %1940 = vmatmul.f32.vlgmr.msra.gmra.mxu1 %v1902_v51 }
 0x6f2   :  { %1960 = vmatmul.f32.vlgmr.msra.gmra.mxu2 %v1902_v51  ;;  %1980 = vmatmul.f32.vlgmr.msra.gmra.mxu3 %v1902_v51 }
 0x6f3   :  { %2242 = vmatpush.msra.mxu0 %v6041_v5  ;;  %2262 = vmatpush.msra.mxu1 %v6044_v56  ;;  %v7773_v5 = vld [vmem:[#allocation47_spill] sm:$0xff]  ;;  %v7774_v56 = vld [vmem:[#allocation48_spill] sm:$0xff] }
 0x6f4   :  { %2282 = vmatpush.msra.mxu2 %v6047_v55  ;;  %2302 = vmatpush.msra.mxu3 %v6050_v61  ;;  %v7775_v55 = vld [vmem:[#allocation45_spill] sm:$0xff]  ;;  %v7776_v61 = vld [vmem:[#allocation46_spill] sm:$0xff] }
 0x6f5   :  { %2243 = vmatpush.msra.mxu0 %v6053_v34  ;;  %2263 = vmatpush.msra.mxu1 %v6056_v27  ;;  %v7777_v34 = vld [vmem:[#allocation51_spill] sm:$0xff]  ;;  %v7778_v27 = vld [vmem:[#allocation52_spill] sm:$0xff] }
 0x6f6   :  { %2283 = vmatpush.msra.mxu2 %v6059_v58  ;;  %2303 = vmatpush.msra.mxu3 %v6062_v29  ;;  %v7779_v58 = vld [vmem:[#allocation49_spill] sm:$0xff]  ;;  %v7780_v29 = vld [vmem:[#allocation50_spill] sm:$0xff] }
 0x6f7   :  { %2244 = vmatpush.msra.mxu0 %v6065_v8  ;;  %2264 = vmatpush.msra.mxu1 %v6068_v43  ;;  %v7781_v8 = vld [vmem:[#allocation55_spill] sm:$0xff]  ;;  %v7782_v43 = vld [vmem:[#allocation56_spill] sm:$0xff] }
 0x6f8   :  { %2284 = vmatpush.msra.mxu2 %v6071_v0  ;;  %2304 = vmatpush.msra.mxu3 %v6074_v54  ;;  %v7783_v0 = vld [vmem:[#allocation53_spill] sm:$0xff]  ;;  %v7784_v54 = vld [vmem:[#allocation54_spill] sm:$0xff] }
 0x6f9   :  { %2245 = vmatpush.msra.mxu0 %v6077_v57  ;;  %2265 = vmatpush.msra.mxu1 %v6080_v1  ;;  %v7785_v57 = vld [vmem:[#allocation57_spill] sm:$0xff]  ;;  %v7786_v1 = vld [vmem:[#allocation58_spill] sm:$0xff] }
 0x6fa   :  { %2285 = vmatpush.msra.mxu2 %v6083_v2  ;;  %2305 = vmatpush.msra.mxu3 %v6086_v3  ;;  %v7787_v2 = vld [vmem:[#allocation19_spill] sm:$0xff]  ;;  %v7788_v3 = vld [vmem:[#allocation20_spill] sm:$0xff] }
 0x6fb   :  { %2246 = vmatpush.msra.mxu0 %v6089_v32  ;;  %2266 = vmatpush.msra.mxu1 %v6092_v26  ;;  %v7789_v32 = vld [vmem:[#allocation21_spill] sm:$0xff]  ;;  %v7790_v26 = vld [vmem:[#allocation24_spill] sm:$0xff] }
 0x6fc   :  { %2286 = vmatpush.msra.mxu2 %v6095_v20  ;;  %2306 = vmatpush.msra.mxu3 %v6098_v24  ;;  %v7791_v20 = vld [vmem:[#allocation22_spill] sm:$0xff]  ;;  %v7792_v24 = vld [vmem:[#allocation23_spill] sm:$0xff] }
 0x6fd   :  { %2247 = vmatpush.msra.mxu0 %v6101_v16  ;;  %2267 = vmatpush.msra.mxu1 %v6104_v14  ;;  %v7793_v16 = vld [vmem:[#allocation29_spill] sm:$0xff] }
 0x6fe   :  { %2287 = vmatpush.msra.mxu2 %v6107_v23  ;;  %2307 = vmatpush.msra.mxu3 %v6110_v11  ;;  %v7794_v14 = vld [vmem:[#allocation25_spill] sm:$0xff]  ;;  %v7795_v23 = vld [vmem:[#allocation31_spill] sm:$0xff]  ;;  %v7796_v11 = vld [vmem:[#allocation28_spill] sm:$0xff] }
 0x6ff   :  { %2248 = vmatpush.msra.mxu0 %v6113_v21  ;;  %2268 = vmatpush.msra.mxu1 %v6116_v15  ;;  %v7797_v21 = vld [vmem:[#allocation27_spill] sm:$0xff]  ;;  %v7798_v15 = vld [vmem:[#allocation30_spill] sm:$0xff] }
 0x700   :  { %2288 = vmatpush.msra.mxu2 %v6119_v17  ;;  %2308 = vmatpush.msra.mxu3 %v6122_v28 }
 0x701   :  { %2249 = vmatpush.msra.mxu0 %v6125_v7  ;;  %2269 = vmatpush.msra.mxu1 %v6128_v38 }
 0x702   :  { %2289 = vmatpush.msra.mxu2 %v6131_v6  ;;  %2309 = vmatpush.msra.mxu3 %v6134_v35  ;;  %v1897_v6 = vld [vmem:[#allocation2 + $0x8] sm:$0x30] }
 0x703   :  { %2250 = vmatpush.msra.mxu0 %v6137_v33  ;;  %2270 = vmatpush.msra.mxu1 %v6140_v37  ;;  %v1898_v35 = vld [vmem:[#allocation2 + $0x88] sm:$0x30] }
 0x704   :  { %2290 = vmatpush.msra.mxu2 %v6143_v19  ;;  %2310 = vmatpush.msra.mxu3 %v6146_v31 }
 0x705   :  { %2251 = vmatpush.msra.mxu0 %v6149_v12  ;;  %2271 = vmatpush.msra.mxu1 %v6152_v9 }
 0x706   :  { %2291 = vmatpush.msra.mxu2 %v7773_v5  ;;  %2311 = vmatpush.msra.mxu3 %v7774_v56 }
 0x707   :  { %2252 = vmatpush.msra.mxu0 %v7775_v55  ;;  %2272 = vmatpush.msra.mxu1 %v7776_v61 }
 0x708   :  { %2292 = vmatpush.msra.mxu2 %v7777_v34  ;;  %2312 = vmatpush.msra.mxu3 %v7778_v27  ;;  %v2060_v27 = vrot.slane %v6370_v25, 6 }
 0x709   :  { %2253 = vmatpush.msra.mxu0 %v7779_v58  ;;  %2273 = vmatpush.msra.mxu1 %v7780_v29 }
 0x70a   :  { %2293 = vmatpush.msra.mxu2 %v7781_v8  ;;  %2313 = vmatpush.msra.mxu3 %v7782_v43 }
 0x70b   :  { %2254 = vmatpush.msra.mxu0 %v7783_v0  ;;  %2274 = vmatpush.msra.mxu1 %v7784_v54 }
 0x70c   :  { %2294 = vmatpush.msra.mxu2 %v7785_v57  ;;  %2314 = vmatpush.msra.mxu3 %v7786_v1 }
 0x70d   :  { %2255 = vmatpush.msra.mxu0 %v7787_v2  ;;  %2275 = vmatpush.msra.mxu1 %v7788_v3 }
 0x70e   :  { %2295 = vmatpush.msra.mxu2 %v7789_v32  ;;  %2315 = vmatpush.msra.mxu3 %v7790_v26 }
 0x70f   :  { %2256 = vmatpush.msra.mxu0 %v7791_v20  ;;  %2276 = vmatpush.msra.mxu1 %v7792_v24 }
 0x710   :  { %2296 = vmatpush.msra.mxu2 %v7793_v16  ;;  %2316 = vmatpush.msra.mxu3 %v7794_v14 }
 0x711   :  { %2257 = vmatpush.msra.mxu0 %v7795_v23  ;;  %2277 = vmatpush.msra.mxu1 %v7796_v11 }
 0x712   :  { %2297 = vmatpush.msra.mxu2 %v7797_v21  ;;  %2317 = vmatpush.msra.mxu3 %v7798_v15  ;;  %v6441_v15 = vld [vmem:[#allocation8 + $0x1e0] sm:$0xff] }
 0x76e   :  { %v1921_v17 = vpop.f32.mrf.mxu0  ;;  %v1941_v28 = vpop.f32.mrf.mxu1 }
 0x76f   :  { %v1988_v7 = vrot.slane %v1921_v17, 4  ;;  %v1989_v38 = vrot.slane %v1941_v28, 4  ;;  %v6444_v17 = vld [vmem:[#allocation8 + $0x1e8] sm:$0xff]  ;;  %v6447_v28 = vld [vmem:[#allocation8 + $0x1f0] sm:$0xff] }
 0x771   :  { %v1996_v33 = vadd.f32 %v1988_v7, %v1897_v6  ;;  %v1997_v37 = vadd.f32 %v1989_v38, %v1898_v35  ;;  %v6450_v7 = vld [vmem:[#allocation8 + $0x1f8] sm:$0xff]  ;;  %v6453_v38 = vld [vmem:[#allocation8 + $0x1c0] sm:$0xff]  ;;  %v6456_v6 = vld [vmem:[#allocation8 + $0x1c8] sm:$0xff] }
 0x772   :  { %v6459_v35 = vld [vmem:[#allocation8 + $0x1d0] sm:$0xff] }
 0x773   :  { %v4363_v19 = vmul.f32 -1.442695, %v1996_v33  ;;  %v4365_v31 = vmul.f32 -1.442695, %v1997_v37  ;;  %v6462_v33 = vld [vmem:[#allocation8 + $0x1d8] sm:$0xff]  ;;  %v6465_v37 = vld [vmem:[#allocation8 + $0x1a0] sm:$0xff] }
 0x775   :  { %4565 = vpow2.f32 %v4363_v19  ;;  %v1981_v12 = vpop.f32.mrf.mxu3  ;;  %v1961_v13 = vpop.f32.mrf.mxu2  ;;  %v6468_v19 = vld [vmem:[#allocation8 + $0x1a8] sm:$0xff] }
 0x776   :  { %4567 = vpow2.f32 %v4365_v31  ;;  %v1991_v9 = vrot.slane %v1981_v12, 4  ;;  %v1990_v4 = vrot.slane %v1961_v13, 4  ;;  %v6471_v31 = vld [vmem:[#allocation8 + $0x1b0] sm:$0xff]  ;;  %v6474_v12 = vld [vmem:[#allocation8 + $0x1b8] sm:$0xff]  ;;  %v6501_v13 = vld [vmem:[#allocation8 + $0x140] sm:$0xff] }
 0x778   :  { %v1999_v44 = vadd.f32 %v1991_v9, %v1900_v40  ;;  %v1998_v18 = vadd.f32 %v1990_v4, %v1899_v52  ;;  %v6477_v9 = vld [vmem:[#allocation8 + $0x180] sm:$0xff]  ;;  %v6480_v40 = vld [vmem:[#allocation8 + $0x188] sm:$0xff]  ;;  %v6510_v52 = vld [vmem:[#allocation8 + $0x158] sm:$0xff] }
 0x779   :  { %v6504_v4 = vld [vmem:[#allocation8 + $0x148] sm:$0xff] }
 0x77a   :  { %v4364_v45 = vmul.f32 -1.442695, %v1999_v44  ;;  %v6483_v44 = vld [vmem:[#allocation8 + $0x190] sm:$0xff] }
 0x77b   :  { %v4566_v60 = vpop.eup %4565 }
 0x77c   :  { %v4568_v41 = vpop.eup %4567  ;;  %v2003_v22 = vadd.f32 1.0, %v4566_v60  ;;  %4569 = vpow2.f32 %v4364_v45  ;;  %v6486_v45 = vld [vmem:[#allocation8 + $0x198] sm:$0xff]  ;;  %v6489_v60 = vld [vmem:[#allocation8 + $0x160] sm:$0xff] }
 0x77d   :  { %v2043_v53 = vadd.f32 1.0, %v4568_v41  ;;  %v6492_v41 = vld [vmem:[#allocation8 + $0x168] sm:$0xff] }
 0x77e   :  { %4571 = vrcp.f32 %v2003_v22  ;;  %v2015_v50 = vand.u32 2147483648, %v2003_v22  ;;  %v2013_v42 = vand.u32 2147483647, %v2003_v22  ;;  %vm2009_vm6 = vweird.f32 %v2003_v22 }
 0x77f   :  { %4573 = vrcp.f32 %v2043_v53  ;;  %v2055_v46 = vand.u32 2147483648, %v2043_v53  ;;  %v2053_v51 = vand.u32 2147483647, %v2043_v53  ;;  %vm2049_vm7 = vweird.f32 %v2043_v53 }
 0x780   :  { %v2016_v55 = vor.u32 1.1754944e-38, %v2015_v50  ;;  %vm2014_vm10 = vcmp.eq.f32.partialorder %v2013_v42, 8.507059e+37  ;;  %v6537_v50 = vld [vmem:[#allocation8 + $0xe0] sm:$0xff]  ;;  %v6546_v42 = vld [vmem:[#allocation8 + $0xf8] sm:$0xff] }
 0x781   :  { %v2056_v58 = vor.u32 1.1754944e-38, %v2055_v46  ;;  %vm2054_vm11 = vcmp.eq.f32.partialorder %v2053_v51, 8.507059e+37  ;;  %v6540_v46 = vld [vmem:[#allocation8 + $0xe8] sm:$0xff] }
 0x782   :  { %v4570_v36 = vpop.eup %4569  ;;  %v6552_v51 = vld [vmem:[#allocation8 + $0xc8] sm:$0xff] }
 0x783   :  { %v2023_v30 = vadd.f32 1.0, %v4570_v36  ;;  %v6507_v36 = vld [vmem:[#allocation8 + $0x150] sm:$0xff] }
 0x784   :  { %v4572_v10 = vpop.eup %4571 }
 0x785   :  { %v4574_v62 = vpop.eup %4573  ;;  %v2005_v48 = vmul.f32 %v4572_v10, %v2003_v22  ;;  %4575 = vrcp.f32 %v2023_v30  ;;  %vm2010_vm4 = vweird.f32 %v4572_v10  ;;  %v2035_v25 = vand.u32 2147483648, %v2023_v30  ;;  %v6495_v22 = vld [vmem:[#allocation8 + $0x170] sm:$0xff] }
 0x786   :  { %v2045_v59 = vmul.f32 %v4574_v62, %v2043_v53  ;;  %4577 = vtanh.f32 %v1998_v18  ;;  %vm2050_vm5 = vweird.f32 %v4574_v62  ;;  %vm2011_vm8 = vmor %vm2009_vm6, %vm2010_vm4  ;;  %vm2029_vm13 = vweird.f32 %v2023_v30  ;;  %v6498_v53 = vld [vmem:[#allocation8 + $0x178] sm:$0xff]  ;;  %v6519_v18 = vld [vmem:[#allocation8 + $0x130] sm:$0xff] }
 0x787   :  { %v2006_v47 = vsub.f32 1.0, %v2005_v48  ;;  %vm2051_vm9 = vmor %vm2049_vm7, %vm2050_vm5  ;;  %v2033_v20 = vand.u32 2147483647, %v2023_v30  ;;  %v2036_v16 = vor.u32 1.1754944e-38, %v2035_v25  ;;  %v6525_v48 = vld [vmem:[#allocation8 + $0x100] sm:$0xff]  ;;  %v6606_v25 = vld [vmem:[#allocation8 + $0x58] sm:$0xff] }
 0x788   :  { %v2046_v49 = vsub.f32 1.0, %v2045_v59  ;;  %v6528_v59 = vld [vmem:[#allocation8 + $0x108] sm:$0xff]  ;;  %7816 = vst [vmem:[#allocation46_spill] sm:$0xff] %v6606_v25 }
 0x789   :  { %v2007_v39 = vmul.f32 %v4572_v10, %v2006_v47  ;;  %vm2034_vm15 = vcmp.eq.f32.partialorder %v2033_v20, 8.507059e+37  ;;  %v6531_v47 = vld [vmem:[#allocation8 + $0x110] sm:$0xff]  ;;  %v6609_v20 = vld [vmem:[#allocation8 + $0x20] sm:$0xff] }
 0x78a   :  { %v2047_v63 = vmul.f32 %v4574_v62, %v2046_v49  ;;  %v6534_v49 = vld [vmem:[#allocation8 + $0x118] sm:$0xff]  ;;  %7817 = vst [vmem:[#allocation51_spill] sm:$0xff] %v6609_v20 }
 0x78b   :  { %v4576_v5 = vpop.eup %4575  ;;  %v2008_v56 = vadd.f32 %v4572_v10, %v2007_v39  ;;  %v6543_v39 = vld [vmem:[#allocation8 + $0xf0] sm:$0xff] }
 0x78c   :  { %v2048_v61 = vadd.f32 %v4574_v62, %v2047_v63  ;;  %v2025_v34 = vmul.f32 %v4576_v5, %v2023_v30  ;;  %v4578_v8 = vpop.eup %4577  ;;  %vm2030_vm12 = vweird.f32 %v4576_v5  ;;  %v6513_v30 = vld [vmem:[#allocation8 + $0x120] sm:$0xff] }
 0x78d   :  { %v2012_v29 = vsel %vm2011_vm8, %v4572_v10, %v2008_v56  ;;  %vm2031_vm14 = vmor %vm2029_vm13, %vm2030_vm12  ;;  %v6516_v10 = vld [vmem:[#allocation8 + $0x128] sm:$0xff]  ;;  %v6549_v63 = vld [vmem:[#allocation8 + $0xc0] sm:$0xff] }
 0x78e   :  { %v2017_v43 = vsel %vm2014_vm10, %v2016_v55, %v2012_v29  ;;  %v2052_v0 = vsel %vm2051_vm9, %v4574_v62, %v2048_v61  ;;  %v2026_v54 = vsub.f32 1.0, %v2025_v34  ;;  %v6522_v62 = vld [vmem:[#allocation8 + $0x138] sm:$0xff]  ;;  %v6561_v55 = vld [vmem:[#allocation8 + $0xa0] sm:$0xff]  ;;  %v6564_v61 = vld [vmem:[#allocation8 + $0xa8] sm:$0xff] }
 0x78f   :  { %v2039_v57 = vmul.f32 %v4578_v8, %v2017_v43  ;;  %v2057_v1 = vsel %vm2054_vm11, %v2056_v58, %v2052_v0  ;;  %v6558_v56 = vld [vmem:[#allocation8 + $0xd8] sm:$0xff]  ;;  %7801 = vst [vmem:[#allocation26_spill] sm:$0xff] %v6561_v55  ;;  %v6567_v34 = vld [vmem:[#allocation8 + $0xb0] sm:$0xff]  ;;  %v6573_v58 = vld [vmem:[#allocation8 + $0x80] sm:$0xff] }
 0x790   :  { %v2062_v2 = vmul.f32 %v2060_v27, %v2057_v1  ;;  %v2027_v3 = vmul.f32 %v4576_v5, %v2026_v54  ;;  %7800 = vst [vmem:[#allocation34_spill] sm:$0xff] %v6558_v56  ;;  %v6570_v27 = vld [vmem:[#allocation8 + $0xb8] sm:$0xff]  ;;  %v6576_v29 = vld [vmem:[#allocation8 + $0x88] sm:$0xff]  ;;  %v6579_v8 = vld [vmem:[#allocation8 + $0x90] sm:$0xff] }
 0x791   :  { %7802 = vst [vmem:[#allocation37_spill] sm:$0xff] %v6564_v61  ;;  %v6582_v43 = vld [vmem:[#allocation8 + $0x98] sm:$0xff]  ;;  %v6585_v0 = vld [vmem:[#allocation8 + $0x60] sm:$0xff]  ;;  %v6588_v54 = vld [vmem:[#allocation8 + $0x68] sm:$0xff] }
 0x792   :  { %v6438_v32 = vadd.f32 %v2062_v2, %v2039_v57  ;;  %v2028_v26 = vadd.f32 %v4576_v5, %v2027_v3  ;;  %7803 = vst [vmem:[#allocation32_spill] sm:$0xff] %v6567_v34  ;;  %v6591_v57 = vld [vmem:[#allocation8 + $0x70] sm:$0xff]  ;;  %v6594_v1 = vld [vmem:[#allocation8 + $0x78] sm:$0xff]  ;;  %v6597_v2 = vld [vmem:[#allocation8 + $0x40] sm:$0xff] }
 0x793   :  { %7804 = vst [vmem:[#allocation33_spill] sm:$0xff] %v6570_v27  ;;  %v6600_v3 = vld [vmem:[#allocation8 + $0x48] sm:$0xff] }
 0x794   :  { %4579 = vtanh.f32 %v6438_v32  ;;  %v2032_v24 = vsel %vm2031_vm14, %v4576_v5, %v2028_v26  ;;  %v6555_v5 = vld [vmem:[#allocation8 + $0xd0] sm:$0xff]  ;;  %7805 = vst [vmem:[#allocation40_spill] sm:$0xff] %v6573_v58 }
 0x795   :  { %v2037_v23 = vsel %vm2034_vm15, %v2036_v16, %v2032_v24  ;;  %7799 = vst [vmem:[#allocation42_spill] sm:$0xff] %v6555_v5  ;;  %v6603_v26 = vld [vmem:[#allocation8 + $0x50] sm:$0xff]  ;;  %v6612_v24 = vld [vmem:[#allocation8 + $0x28] sm:$0xff] }
 0x796   :  { %7806 = vst [vmem:[#allocation41_spill] sm:$0xff] %v6576_v29  ;;  %v6615_v16 = vld [vmem:[#allocation8 + $0x30] sm:$0xff] }
 0x797   :  { %7807 = vst [vmem:[#allocation35_spill] sm:$0xff] %v6579_v8 }
 0x798   :  { %7808 = vst [vmem:[#allocation36_spill] sm:$0xff] %v6582_v43 }
 0x799   :  { %7809 = vst [vmem:[#allocation43_spill] sm:$0xff] %v6585_v0 }
 0x79a   :  { %v4580_v14 = vpop.eup %4579  ;;  %7810 = vst [vmem:[#allocation44_spill] sm:$0xff] %v6588_v54 }
 0x79b   :  { %v2065_v11 = vmul.f32 %v4580_v14, %v2037_v23  ;;  %7811 = vst [vmem:[#allocation38_spill] sm:$0xff] %v6591_v57  ;;  %v6618_v14 = vld [vmem:[#allocation8 + $0x38] sm:$0xff]  ;;  %v6621_v23 = vld [vmem:[#allocation8] sm:$0xff] }
 0x79c   :  { %7812 = vst [vmem:[#allocation39_spill] sm:$0xff] %v6594_v1 }
 0x79d   :  { %v2071_v21 = vrot.slane %v2065_v11, 4  ;;  %7813 = vst [vmem:[#allocation47_spill] sm:$0xff] %v6597_v2  ;;  %v6624_v11 = vld [vmem:[#allocation8 + $0x8] sm:$0xff] }
 0x79e   :  { %7814 = vst [vmem:[#allocation48_spill] sm:$0xff] %v6600_v3 }
 0x79f   :  { %2089 = vmatmul.f32.vlgmr.msrb.gmra.mxu0 %v2071_v21  ;;  %2109 = vmatmul.f32.vlgmr.msrb.gmra.mxu1 %v2071_v21  ;;  %7815 = vst [vmem:[#allocation45_spill] sm:$0xff] %v6603_v26 }
 0x7a0   :  { %2129 = vmatmul.f32.vlgmr.msrb.gmra.mxu2 %v2071_v21  ;;  %2149 = vmatmul.f32.vlgmr.msrb.gmra.mxu3 %v2071_v21  ;;  %7818 = vst [vmem:[#allocation52_spill] sm:$0xff] %v6612_v24  ;;  %v6627_v21 = vld [vmem:[#allocation8 + $0x10] sm:$0xff] }
 0x7a1   :  { %2396 = vmatpush.msrb.mxu0 %v6441_v15  ;;  %2416 = vmatpush.msrb.mxu1 %v6444_v17  ;;  %7819 = vst [vmem:[#allocation49_spill] sm:$0xff] %v6615_v16 }
 0x7a2   :  { %2436 = vmatpush.msrb.mxu2 %v6447_v28  ;;  %2456 = vmatpush.msrb.mxu3 %v6450_v7  ;;  %7820 = vst [vmem:[#allocation50_spill] sm:$0xff] %v6618_v14 }
 0x7a3   :  { %2397 = vmatpush.msrb.mxu0 %v6453_v38  ;;  %2417 = vmatpush.msrb.mxu1 %v6456_v6  ;;  %7821 = vst [vmem:[#allocation55_spill] sm:$0xff] %v6621_v23 }
 0x7a4   :  { %2437 = vmatpush.msrb.mxu2 %v6459_v35  ;;  %2457 = vmatpush.msrb.mxu3 %v6462_v33  ;;  %7822 = vst [vmem:[#allocation56_spill] sm:$0xff] %v6624_v11 }
 0x7a5   :  { %2398 = vmatpush.msrb.mxu0 %v6465_v37  ;;  %2418 = vmatpush.msrb.mxu1 %v6468_v19  ;;  %7823 = vst [vmem:[#allocation53_spill] sm:$0xff] %v6627_v21 }
 0x7a6   :  { %2438 = vmatpush.msrb.mxu2 %v6471_v31  ;;  %2458 = vmatpush.msrb.mxu3 %v6474_v12 }
 0x7a7   :  { %2399 = vmatpush.msrb.mxu0 %v6477_v9  ;;  %2419 = vmatpush.msrb.mxu1 %v6480_v40 }
 0x7a8   :  { %2439 = vmatpush.msrb.mxu2 %v6483_v44  ;;  %2459 = vmatpush.msrb.mxu3 %v6486_v45 }
 0x7a9   :  { %2400 = vmatpush.msrb.mxu0 %v6489_v60  ;;  %2420 = vmatpush.msrb.mxu1 %v6492_v41 }
 0x7aa   :  { %2440 = vmatpush.msrb.mxu2 %v6495_v22  ;;  %2460 = vmatpush.msrb.mxu3 %v6498_v53 }
 0x7ab   :  { %2401 = vmatpush.msrb.mxu0 %v6501_v13  ;;  %2421 = vmatpush.msrb.mxu1 %v6504_v4 }
 0x7ac   :  { %2441 = vmatpush.msrb.mxu2 %v6507_v36  ;;  %2461 = vmatpush.msrb.mxu3 %v6510_v52 }
 0x7ad   :  { %2402 = vmatpush.msrb.mxu0 %v6513_v30  ;;  %2422 = vmatpush.msrb.mxu1 %v6516_v10 }
 0x7ae   :  { %2442 = vmatpush.msrb.mxu2 %v6519_v18  ;;  %2462 = vmatpush.msrb.mxu3 %v6522_v62 }
 0x7af   :  { %2403 = vmatpush.msrb.mxu0 %v6525_v48  ;;  %2423 = vmatpush.msrb.mxu1 %v6528_v59 }
 0x7b0   :  { %2443 = vmatpush.msrb.mxu2 %v6531_v47  ;;  %2463 = vmatpush.msrb.mxu3 %v6534_v49 }
 0x7b1   :  { %2404 = vmatpush.msrb.mxu0 %v6537_v50  ;;  %2424 = vmatpush.msrb.mxu1 %v6540_v46 }
 0x7b2   :  { %2444 = vmatpush.msrb.mxu2 %v6543_v39  ;;  %2464 = vmatpush.msrb.mxu3 %v6546_v42 }
 0x7b3   :  { %2405 = vmatpush.msrb.mxu0 %v6549_v63  ;;  %2425 = vmatpush.msrb.mxu1 %v6552_v51 }
 0x7b4   :  { %2445 = vmatpush.msrb.mxu2 %v6555_v5  ;;  %2465 = vmatpush.msrb.mxu3 %v6558_v56 }
 0x7b5   :  { %2406 = vmatpush.msrb.mxu0 %v6561_v55  ;;  %2426 = vmatpush.msrb.mxu1 %v6564_v61 }
 0x7b6   :  { %2446 = vmatpush.msrb.mxu2 %v6567_v34  ;;  %2466 = vmatpush.msrb.mxu3 %v6570_v27 }
 0x7b7   :  { %2407 = vmatpush.msrb.mxu0 %v6573_v58  ;;  %2427 = vmatpush.msrb.mxu1 %v6576_v29 }
 0x7b8   :  { %2447 = vmatpush.msrb.mxu2 %v6579_v8  ;;  %2467 = vmatpush.msrb.mxu3 %v6582_v43 }
 0x7b9   :  { %2408 = vmatpush.msrb.mxu0 %v6585_v0  ;;  %2428 = vmatpush.msrb.mxu1 %v6588_v54  ;;  %v2069_v0 = vld [vmem:[#allocation2 + $0x40] sm:$0xc0] }
 0x7ba   :  { %2448 = vmatpush.msrb.mxu2 %v6591_v57  ;;  %2468 = vmatpush.msrb.mxu3 %v6594_v1 }
 0x7bb   :  { %2409 = vmatpush.msrb.mxu0 %v6597_v2  ;;  %2429 = vmatpush.msrb.mxu1 %v6600_v3  ;;  %v2067_v3 = vld [vmem:[#allocation2 + $0x88] sm:$0xc0] }
 0x7bc   :  { %2449 = vmatpush.msrb.mxu2 %v6603_v26  ;;  %2469 = vmatpush.msrb.mxu3 %v6606_v25  ;;  %v2066_v26 = vld [vmem:[#allocation2 + $0x8] sm:$0xc0] }
 0x7bd   :  { %2410 = vmatpush.msrb.mxu0 %v6609_v20  ;;  %2430 = vmatpush.msrb.mxu1 %v6612_v24  ;;  %v6630_v24 = vld [vmem:[#allocation8 + $0x18] sm:$0xff] }
 0x7be   :  { %2450 = vmatpush.msrb.mxu2 %v6615_v16  ;;  %2470 = vmatpush.msrb.mxu3 %v6618_v14  ;;  %7824 = vst [vmem:[#allocation54_spill] sm:$0xff] %v6630_v24 }
 0x7bf   :  { %2411 = vmatpush.msrb.mxu0 %v6621_v23  ;;  %2431 = vmatpush.msrb.mxu1 %v6624_v11 }
 0x7c0   :  { %2451 = vmatpush.msrb.mxu2 %v6627_v21  ;;  %2471 = vmatpush.msrb.mxu3 %v6630_v24 }
 0x81c   :  { %v2090_v16 = vpop.f32.mrf.mxu0  ;;  %v2110_v20 = vpop.f32.mrf.mxu1 }
 0x81d   :  { %v2157_v25 = vrot.slane %v2090_v16, 2  ;;  %v2158_v14 = vrot.slane %v2110_v20, 2 }
 0x81f   :  { %v2165_v2 = vadd.f32 %v2157_v25, %v2066_v26  ;;  %v2166_v23 = vadd.f32 %v2158_v14, %v2067_v3  ;;  %v2068_v3 = vld [vmem:[#allocation2 + $0x28] sm:$0xc0] }
 0x821   :  { %v4366_v1 = vmul.f32 -1.442695, %v2165_v2  ;;  %v4368_v57 = vmul.f32 -1.442695, %v2166_v23 }
 0x823   :  { %4581 = vpow2.f32 %v4366_v1  ;;  %v2150_v11 = vpop.f32.mrf.mxu3  ;;  %v2130_v16 = vpop.f32.mrf.mxu2 }
 0x824   :  { %4583 = vpow2.f32 %v4368_v57  ;;  %v2160_v54 = vrot.slane %v2150_v11, 2  ;;  %v2159_v20 = vrot.slane %v2130_v16, 2 }
 0x826   :  { %v2168_v21 = vadd.f32 %v2160_v54, %v2069_v0  ;;  %v2167_v1 = vadd.f32 %v2159_v20, %v2068_v3 }
 0x828   :  { %v4367_v43 = vmul.f32 -1.442695, %v2168_v21 }
 0x829   :  { %v4582_v8 = vpop.eup %4581 }
 0x82a   :  { %v4584_v29 = vpop.eup %4583  ;;  %v2172_v24 = vadd.f32 1.0, %v4582_v8  ;;  %4585 = vpow2.f32 %v4367_v43 }
 0x82b   :  { %v2212_v58 = vadd.f32 1.0, %v4584_v29 }
 0x82c   :  { %4587 = vrcp.f32 %v2172_v24  ;;  %v2184_v11 = vand.u32 2147483648, %v2172_v24  ;;  %v2182_v29 = vand.u32 2147483647, %v2172_v24  ;;  %vm2178_vm2 = vweird.f32 %v2172_v24 }
 0x82d   :  { %4589 = vrcp.f32 %v2212_v58  ;;  %v2224_v8 = vand.u32 2147483648, %v2212_v58  ;;  %v2222_v16 = vand.u32 2147483647, %v2212_v58  ;;  %vm2218_vm3 = vweird.f32 %v2212_v58 }
 0x82e   :  { %v2185_v20 = vor.u32 1.1754944e-38, %v2184_v11  ;;  %vm2183_vm6 = vcmp.eq.f32.partialorder %v2182_v29, 8.507059e+37 }
 0x82f   :  { %vm2223_vm7 = vcmp.eq.f32.partialorder %v2222_v16, 8.507059e+37  ;;  %v7830_v16 = vld [vmem:[#allocation33_spill] sm:$0xff] }
 0x830   :  { %v4586_v26 = vpop.eup %4585 }
 0x831   :  { %v2192_v2 = vadd.f32 1.0, %v4586_v26 }
 0x832   :  { %v4588_v25 = vpop.eup %4587 }
 0x833   :  { %v4590_v14 = vpop.eup %4589  ;;  %v2174_v57 = vmul.f32 %v4588_v25, %v2172_v24  ;;  %4591 = vrcp.f32 %v2192_v2  ;;  %vm2179_vm0 = vweird.f32 %v4588_v25  ;;  %vm2198_vm9 = vweird.f32 %v2192_v2 }
 0x834   :  { %v2214_v23 = vmul.f32 %v4590_v14, %v2212_v58  ;;  %4593 = vtanh.f32 %v2167_v1  ;;  %vm2219_vm1 = vweird.f32 %v4590_v14  ;;  %vm2180_vm4 = vmor %vm2178_vm2, %vm2179_vm0 }
 0x835   :  { %v2175_v0 = vsub.f32 1.0, %v2174_v57  ;;  %v2229_v57 = vrot.slane %v6438_v32, 6  ;;  %vm2220_vm5 = vmor %vm2218_vm3, %vm2219_vm1  ;;  %v2204_v32 = vand.u32 2147483648, %v2192_v2 }
 0x836   :  { %v2215_v54 = vsub.f32 1.0, %v2214_v23  ;;  %v2225_v23 = vor.u32 1.1754944e-38, %v2224_v8  ;;  %v2202_v8 = vand.u32 2147483647, %v2192_v2 }
 0x837   :  { %v2176_v43 = vmul.f32 %v4588_v25, %v2175_v0 }
 0x838   :  { %v2216_v21 = vmul.f32 %v4590_v14, %v2215_v54  ;;  %vm2203_vm11 = vcmp.eq.f32.partialorder %v2202_v8, 8.507059e+37  ;;  %v7843_v8 = vld [vmem:[#allocation51_spill] sm:$0xff] }
 0x839   :  { %v4592_v27 = vpop.eup %4591  ;;  %v2177_v34 = vadd.f32 %v4588_v25, %v2176_v43 }
 0x83a   :  { %v2217_v26 = vadd.f32 %v4590_v14, %v2216_v21  ;;  %v2194_v3 = vmul.f32 %v4592_v27, %v2192_v2  ;;  %v4594_v0 = vpop.eup %4593  ;;  %vm2199_vm8 = vweird.f32 %v4592_v27  ;;  %v7829_v2 = vld [vmem:[#allocation32_spill] sm:$0xff] }
 0x83b   :  { %v2181_v1 = vsel %vm2180_vm4, %v4588_v25, %v2177_v34  ;;  %vm2200_vm10 = vmor %vm2198_vm9, %vm2199_vm8  ;;  %v2205_v25 = vor.u32 1.1754944e-38, %v2204_v32  ;;  %v7842_v32 = vld [vmem:[#allocation46_spill] sm:$0xff] }
 0x83c   :  { %v2186_v61 = vsel %vm2183_vm6, %v2185_v20, %v2181_v1  ;;  %v2221_v55 = vsel %vm2220_vm5, %v4590_v14, %v2217_v26  ;;  %v2195_v54 = vsub.f32 1.0, %v2194_v3  ;;  %v7831_v20 = vld [vmem:[#allocation40_spill] sm:$0xff]  ;;  %v7832_v26 = vld [vmem:[#allocation41_spill] sm:$0xff]  ;;  %v7833_v3 = vld [vmem:[#allocation35_spill] sm:$0xff] }
 0x83d   :  { %v2208_v56 = vmul.f32 %v4594_v0, %v2186_v61  ;;  %v2226_v5 = vsel %vm2223_vm7, %v2225_v23, %v2221_v55  ;;  %v7827_v55 = vld [vmem:[#allocation26_spill] sm:$0xff]  ;;  %v7835_v23 = vld [vmem:[#allocation43_spill] sm:$0xff]  ;;  %v7836_v1 = vld [vmem:[#allocation44_spill] sm:$0xff] }
 0x83e   :  { %v2231_v43 = vmul.f32 %v2229_v57, %v2226_v5  ;;  %v2196_v24 = vmul.f32 %v4592_v27, %v2195_v54  ;;  %v7825_v5 = vld [vmem:[#allocation42_spill] sm:$0xff]  ;;  %v7834_v57 = vld [vmem:[#allocation36_spill] sm:$0xff]  ;;  %v7838_v54 = vld [vmem:[#allocation39_spill] sm:$0xff] }
 0x83f   :  { %v7837_v0 = vld [vmem:[#allocation38_spill] sm:$0xff] }
 0x840   :  { %v6634_v58 = vadd.f32 %v2231_v43, %v2208_v56  ;;  %v2197_v11 = vadd.f32 %v4592_v27, %v2196_v24  ;;  %v7826_v56 = vld [vmem:[#allocation34_spill] sm:$0xff]  ;;  %v7839_v43 = vld [vmem:[#allocation47_spill] sm:$0xff]  ;;  %v7840_v24 = vld [vmem:[#allocation48_spill] sm:$0xff] }
 0x842   :  { %4595 = vtanh.f32 %v6634_v58  ;;  %v2201_v34 = vsel %vm2200_vm10, %v4592_v27, %v2197_v11  ;;  %v7828_v27 = vld [vmem:[#allocation37_spill] sm:$0xff] }
 0x843   :  { %v2206_v29 = vsel %vm2203_vm11, %v2205_v25, %v2201_v34  ;;  %v7841_v11 = vld [vmem:[#allocation45_spill] sm:$0xff]  ;;  %v7844_v34 = vld [vmem:[#allocation52_spill] sm:$0xff] }
 0x844   :  { %v7845_v25 = vld [vmem:[#allocation49_spill] sm:$0xff] }
 0x848   :  { %v4596_v14 = vpop.eup %4595 }
 0x849   :  { %v2234_v21 = vmul.f32 %v4596_v14, %v2206_v29  ;;  %v7846_v14 = vld [vmem:[#allocation50_spill] sm:$0xff]  ;;  %v7847_v29 = vld [vmem:[#allocation55_spill] sm:$0xff] }
 0x84b   :  { %v2240_v61 = vrot.slane %v2234_v21, 6  ;;  %v7848_v21 = vld [vmem:[#allocation56_spill] sm:$0xff] }
 0x84d   :  { %2258 = vmatmul.f32.vlgmr.msra.gmra.mxu0 %v2240_v61  ;;  %2278 = vmatmul.f32.vlgmr.msra.gmra.mxu1 %v2240_v61 }
 0x84e   :  { %2298 = vmatmul.f32.vlgmr.msra.gmra.mxu2 %v2240_v61  ;;  %2318 = vmatmul.f32.vlgmr.msra.gmra.mxu3 %v2240_v61  ;;  %v7849_v61 = vld [vmem:[#allocation53_spill] sm:$0xff] }
 0x84f   :  { %2565 = vmatpush.msra.mxu0 %v6441_v15  ;;  %2585 = vmatpush.msra.mxu1 %v6444_v17 }
 0x850   :  { %2605 = vmatpush.msra.mxu2 %v6447_v28  ;;  %2625 = vmatpush.msra.mxu3 %v6450_v7 }
 0x851   :  { %2566 = vmatpush.msra.mxu0 %v6453_v38  ;;  %2586 = vmatpush.msra.mxu1 %v6456_v6 }
 0x852   :  { %2606 = vmatpush.msra.mxu2 %v6459_v35  ;;  %2626 = vmatpush.msra.mxu3 %v6462_v33 }
 0x853   :  { %2567 = vmatpush.msra.mxu0 %v6465_v37  ;;  %2587 = vmatpush.msra.mxu1 %v6468_v19 }
 0x854   :  { %2607 = vmatpush.msra.mxu2 %v6471_v31  ;;  %2627 = vmatpush.msra.mxu3 %v6474_v12 }
 0x855   :  { %2568 = vmatpush.msra.mxu0 %v6477_v9  ;;  %2588 = vmatpush.msra.mxu1 %v6480_v40 }
 0x856   :  { %2608 = vmatpush.msra.mxu2 %v6483_v44  ;;  %2628 = vmatpush.msra.mxu3 %v6486_v45 }
 0x857   :  { %2569 = vmatpush.msra.mxu0 %v6489_v60  ;;  %2589 = vmatpush.msra.mxu1 %v6492_v41 }
 0x858   :  { %2609 = vmatpush.msra.mxu2 %v6495_v22  ;;  %2629 = vmatpush.msra.mxu3 %v6498_v53 }
 0x859   :  { %2570 = vmatpush.msra.mxu0 %v6501_v13  ;;  %2590 = vmatpush.msra.mxu1 %v6504_v4 }
 0x85a   :  { %2610 = vmatpush.msra.mxu2 %v6507_v36  ;;  %2630 = vmatpush.msra.mxu3 %v6510_v52 }
 0x85b   :  { %2571 = vmatpush.msra.mxu0 %v6513_v30  ;;  %2591 = vmatpush.msra.mxu1 %v6516_v10 }
 0x85c   :  { %2611 = vmatpush.msra.mxu2 %v6519_v18  ;;  %2631 = vmatpush.msra.mxu3 %v6522_v62 }
 0x85d   :  { %2572 = vmatpush.msra.mxu0 %v6525_v48  ;;  %2592 = vmatpush.msra.mxu1 %v6528_v59 }
 0x85e   :  { %2612 = vmatpush.msra.mxu2 %v6531_v47  ;;  %2632 = vmatpush.msra.mxu3 %v6534_v49 }
 0x85f   :  { %2573 = vmatpush.msra.mxu0 %v6537_v50  ;;  %2593 = vmatpush.msra.mxu1 %v6540_v46 }
 0x860   :  { %2613 = vmatpush.msra.mxu2 %v6543_v39  ;;  %2633 = vmatpush.msra.mxu3 %v6546_v42 }
 0x861   :  { %2574 = vmatpush.msra.mxu0 %v6549_v63  ;;  %2594 = vmatpush.msra.mxu1 %v6552_v51 }
 0x862   :  { %2614 = vmatpush.msra.mxu2 %v7825_v5  ;;  %2634 = vmatpush.msra.mxu3 %v7826_v56 }
 0x863   :  { %2575 = vmatpush.msra.mxu0 %v7827_v55  ;;  %2595 = vmatpush.msra.mxu1 %v7828_v27 }
 0x864   :  { %2615 = vmatpush.msra.mxu2 %v7829_v2  ;;  %2635 = vmatpush.msra.mxu3 %v7830_v16 }
 0x865   :  { %2576 = vmatpush.msra.mxu0 %v7831_v20  ;;  %2596 = vmatpush.msra.mxu1 %v7832_v26  ;;  %v2237_v20 = vld [vmem:[#allocation2 + $0x98] sm:$0x3] }
 0x866   :  { %2616 = vmatpush.msra.mxu2 %v7833_v3  ;;  %2636 = vmatpush.msra.mxu3 %v7834_v57 }
 0x867   :  { %2577 = vmatpush.msra.mxu0 %v7835_v23  ;;  %2597 = vmatpush.msra.mxu1 %v7836_v1 }
 0x868   :  { %2617 = vmatpush.msra.mxu2 %v7837_v0  ;;  %2637 = vmatpush.msra.mxu3 %v7838_v54  ;;  %v2236_v54 = vld [vmem:[#allocation2 + $0x10] sm:$0x3] }
 0x869   :  { %2578 = vmatpush.msra.mxu0 %v7839_v43  ;;  %2598 = vmatpush.msra.mxu1 %v7840_v24  ;;  %v7850_v43 = vld [vmem:[#allocation54_spill] sm:$0xff]  ;;  %v2235_v24 = vld [vmem:[#allocation2 + $0x58] sm:$0x3] }
 0x86a   :  { %2618 = vmatpush.msra.mxu2 %v7841_v11  ;;  %2638 = vmatpush.msra.mxu3 %v7842_v32 }
 0x86b   :  { %2579 = vmatpush.msra.mxu0 %v7843_v8  ;;  %2599 = vmatpush.msra.mxu1 %v7844_v34 }
 0x86c   :  { %2619 = vmatpush.msra.mxu2 %v7845_v25  ;;  %2639 = vmatpush.msra.mxu3 %v7846_v14  ;;  %v2238_v25 = vld [vmem:[#allocation2 + $0x60] sm:$0x3] }
 0x86d   :  { %2580 = vmatpush.msra.mxu0 %v7847_v29  ;;  %2600 = vmatpush.msra.mxu1 %v7848_v21 }
 0x86e   :  { %2620 = vmatpush.msra.mxu2 %v7849_v61  ;;  %2640 = vmatpush.msra.mxu3 %v7850_v43 }
 0x8ca   :  { %v2259_v11 = vpop.f32.mrf.mxu0  ;;  %v2279_v32 = vpop.f32.mrf.mxu1 }
 0x8cb   :  { %v2322_v0 = vadd.f32 %v2259_v11, %v2235_v24  ;;  %v2323_v8 = vadd.f32 %v2279_v32, %v2236_v54 }
 0x8cd   :  { %v4369_v1 = vmul.f32 -1.442695, %v2322_v0  ;;  %v4371_v34 = vmul.f32 -1.442695, %v2323_v8 }
 0x8cf   :  { %4597 = vpow2.f32 %v4369_v1 }
 0x8d0   :  { %4599 = vpow2.f32 %v4371_v34 }
 0x8d1   :  { %v2319_v14 = vpop.f32.mrf.mxu3  ;;  %v2299_v43 = vpop.f32.mrf.mxu2 }
 0x8d2   :  { %v2325_v23 = vadd.f32 %v2319_v14, %v2238_v25  ;;  %v2324_v0 = vadd.f32 %v2299_v43, %v2237_v20 }
 0x8d4   :  { %v4370_v29 = vmul.f32 -1.442695, %v2325_v23 }
 0x8d5   :  { %v4598_v57 = vpop.eup %4597 }
 0x8d6   :  { %v4600_v21 = vpop.eup %4599  ;;  %v2329_v3 = vadd.f32 1.0, %v4598_v57  ;;  %4601 = vpow2.f32 %v4370_v29 }
 0x8d7   :  { %v2369_v61 = vadd.f32 1.0, %v4600_v21 }
 0x8d8   :  { %4603 = vrcp.f32 %v2329_v3  ;;  %v2341_v23 = vand.u32 2147483648, %v2329_v3  ;;  %v2339_v14 = vand.u32 2147483647, %v2329_v3  ;;  %vm2335_vm14 = vweird.f32 %v2329_v3 }
 0x8d9   :  { %4605 = vrcp.f32 %v2369_v61  ;;  %v2381_v25 = vand.u32 2147483648, %v2369_v61  ;;  %v2379_v21 = vand.u32 2147483647, %v2369_v61  ;;  %vm2375_vm15 = vweird.f32 %v2369_v61 }
 0x8da   :  { %v2342_v20 = vor.u32 1.1754944e-38, %v2341_v23  ;;  %vm2340_vm2 = vcmp.eq.f32.partialorder %v2339_v14, 8.507059e+37 }
 0x8db   :  { %vm2380_vm3 = vcmp.eq.f32.partialorder %v2379_v21, 8.507059e+37  ;;  %v7857_v21 = vld [vmem:[#allocation40_spill] sm:$0xff] }
 0x8dc   :  { %v4602_v26 = vpop.eup %4601 }
 0x8dd   :  { %v2349_v24 = vadd.f32 1.0, %v4602_v26 }
 0x8de   :  { %v4604_v54 = vpop.eup %4603 }
 0x8df   :  { %v4606_v11 = vpop.eup %4605  ;;  %v2331_v1 = vmul.f32 %v4604_v54, %v2329_v3  ;;  %4607 = vrcp.f32 %v2349_v24  ;;  %vm2336_vm12 = vweird.f32 %v4604_v54  ;;  %vm2355_vm5 = vweird.f32 %v2349_v24 }
 0x8e0   :  { %v2371_v32 = vmul.f32 %v4606_v11, %v2369_v61  ;;  %4609 = vtanh.f32 %v2324_v0  ;;  %vm2376_vm13 = vweird.f32 %v4606_v11  ;;  %vm2337_vm0 = vmor %vm2335_vm14, %vm2336_vm12  ;;  %v2386_v0 = vrot.slane %v6634_v58, 6 }
 0x8e1   :  { %v2332_v8 = vsub.f32 1.0, %v2331_v1  ;;  %vm2377_vm1 = vmor %vm2375_vm15, %vm2376_vm13  ;;  %v2382_v1 = vor.u32 1.1754944e-38, %v2381_v25  ;;  %v2361_v25 = vand.u32 2147483648, %v2349_v24 }
 0x8e2   :  { %v2372_v34 = vsub.f32 1.0, %v2371_v32 }
 0x8e3   :  { %v2333_v57 = vmul.f32 %v4604_v54, %v2332_v8 }
 0x8e4   :  { %v2373_v29 = vmul.f32 %v4606_v11, %v2372_v34 }
 0x8e5   :  { %v4608_v16 = vpop.eup %4607  ;;  %v2334_v2 = vadd.f32 %v4604_v54, %v2333_v57 }
 0x8e6   :  { %v2374_v26 = vadd.f32 %v4606_v11, %v2373_v29  ;;  %v2351_v43 = vmul.f32 %v4608_v16, %v2349_v24  ;;  %v4610_v8 = vpop.eup %4609  ;;  %vm2356_vm4 = vweird.f32 %v4608_v16 }
 0x8e7   :  { %v2338_v32 = vsel %vm2337_vm0, %v4604_v54, %v2334_v2  ;;  %v2359_v2 = vand.u32 2147483647, %v2349_v24  ;;  %vm2357_vm6 = vmor %vm2355_vm5, %vm2356_vm4  ;;  %v2362_v54 = vor.u32 1.1754944e-38, %v2361_v25  ;;  %v7856_v24 = vld [vmem:[#allocation33_spill] sm:$0xff]  ;;  %v7869_v25 = vld [vmem:[#allocation51_spill] sm:$0xff] }
 0x8e8   :  { %v2343_v27 = vsel %vm2340_vm2, %v2342_v20, %v2338_v32  ;;  %v2378_v55 = vsel %vm2377_vm1, %v4606_v11, %v2374_v26  ;;  %v2352_v34 = vsub.f32 1.0, %v2351_v43  ;;  %v7858_v20 = vld [vmem:[#allocation41_spill] sm:$0xff]  ;;  %v7859_v26 = vld [vmem:[#allocation35_spill] sm:$0xff]  ;;  %v7860_v43 = vld [vmem:[#allocation36_spill] sm:$0xff] }
 0x8e9   :  { %v2365_v56 = vmul.f32 %v4610_v8, %v2343_v27  ;;  %v2383_v5 = vsel %vm2380_vm3, %v2382_v1, %v2378_v55  ;;  %vm2360_vm7 = vcmp.eq.f32.partialorder %v2359_v2, 8.507059e+37  ;;  %v7853_v55 = vld [vmem:[#allocation26_spill] sm:$0xff]  ;;  %v7854_v27 = vld [vmem:[#allocation37_spill] sm:$0xff]  ;;  %v7861_v1 = vld [vmem:[#allocation43_spill] sm:$0xff] }
 0x8ea   :  { %v2388_v57 = vmul.f32 %v2386_v0, %v2383_v5  ;;  %v2353_v3 = vmul.f32 %v4608_v16, %v2352_v34  ;;  %v7851_v5 = vld [vmem:[#allocation42_spill] sm:$0xff]  ;;  %v7862_v32 = vld [vmem:[#allocation44_spill] sm:$0xff]  ;;  %v7864_v8 = vld [vmem:[#allocation39_spill] sm:$0xff] }
 0x8eb   :  { %v7863_v0 = vld [vmem:[#allocation38_spill] sm:$0xff]  ;;  %v7865_v34 = vld [vmem:[#allocation47_spill] sm:$0xff]  ;;  %v7870_v2 = vld [vmem:[#allocation52_spill] sm:$0xff] }
 0x8ec   :  { %v6702_v61 = vadd.f32 %v2388_v57, %v2365_v56  ;;  %v2354_v23 = vadd.f32 %v4608_v16, %v2353_v3  ;;  %v7852_v56 = vld [vmem:[#allocation34_spill] sm:$0xff]  ;;  %v7866_v57 = vld [vmem:[#allocation48_spill] sm:$0xff]  ;;  %v7867_v3 = vld [vmem:[#allocation45_spill] sm:$0xff] }
 0x8ee   :  { %4611 = vtanh.f32 %v6702_v61  ;;  %v2358_v58 = vsel %vm2357_vm6, %v4608_v16, %v2354_v23  ;;  %v7855_v16 = vld [vmem:[#allocation32_spill] sm:$0xff]  ;;  %v7868_v23 = vld [vmem:[#allocation46_spill] sm:$0xff] }
 0x8ef   :  { %v2363_v14 = vsel %vm2360_vm7, %v2362_v54, %v2358_v58  ;;  %v7871_v58 = vld [vmem:[#allocation49_spill] sm:$0xff]  ;;  %v7872_v54 = vld [vmem:[#allocation50_spill] sm:$0xff] }
 0x8f4   :  { %v4612_v11 = vpop.eup %4611 }
 0x8f5   :  { %v2391_v29 = vmul.f32 %v4612_v11, %v2363_v14  ;;  %v7873_v11 = vld [vmem:[#allocation55_spill] sm:$0xff]  ;;  %v7874_v14 = vld [vmem:[#allocation56_spill] sm:$0xff] }
 0x8f7   :  { %2412 = vmatmul.f32.vlgmr.msrb.gmra.mxu0 %v2391_v29  ;;  %2432 = vmatmul.f32.vlgmr.msrb.gmra.mxu1 %v2391_v29 }
 0x8f8   :  { %2452 = vmatmul.f32.vlgmr.msrb.gmra.mxu2 %v2391_v29  ;;  %2472 = vmatmul.f32.vlgmr.msrb.gmra.mxu3 %v2391_v29  ;;  %v7875_v29 = vld [vmem:[#allocation53_spill] sm:$0xff] }
 0x8f9   :  { %2734 = vmatpush.msrb.mxu0 %v6441_v15  ;;  %2754 = vmatpush.msrb.mxu1 %v6444_v17 }
 0x8fa   :  { %2774 = vmatpush.msrb.mxu2 %v6447_v28  ;;  %2794 = vmatpush.msrb.mxu3 %v6450_v7 }
 0x8fb   :  { %2735 = vmatpush.msrb.mxu0 %v6453_v38  ;;  %2755 = vmatpush.msrb.mxu1 %v6456_v6 }
 0x8fc   :  { %2775 = vmatpush.msrb.mxu2 %v6459_v35  ;;  %2795 = vmatpush.msrb.mxu3 %v6462_v33 }
 0x8fd   :  { %2736 = vmatpush.msrb.mxu0 %v6465_v37  ;;  %2756 = vmatpush.msrb.mxu1 %v6468_v19 }
 0x8fe   :  { %2776 = vmatpush.msrb.mxu2 %v6471_v31  ;;  %2796 = vmatpush.msrb.mxu3 %v6474_v12 }
 0x8ff   :  { %2737 = vmatpush.msrb.mxu0 %v6477_v9  ;;  %2757 = vmatpush.msrb.mxu1 %v6480_v40 }
 0x900   :  { %2777 = vmatpush.msrb.mxu2 %v6483_v44  ;;  %2797 = vmatpush.msrb.mxu3 %v6486_v45 }
 0x901   :  { %2738 = vmatpush.msrb.mxu0 %v6489_v60  ;;  %2758 = vmatpush.msrb.mxu1 %v6492_v41 }
 0x902   :  { %2778 = vmatpush.msrb.mxu2 %v6495_v22  ;;  %2798 = vmatpush.msrb.mxu3 %v6498_v53 }
 0x903   :  { %2739 = vmatpush.msrb.mxu0 %v6501_v13  ;;  %2759 = vmatpush.msrb.mxu1 %v6504_v4 }
 0x904   :  { %2779 = vmatpush.msrb.mxu2 %v6507_v36  ;;  %2799 = vmatpush.msrb.mxu3 %v6510_v52 }
 0x905   :  { %2740 = vmatpush.msrb.mxu0 %v6513_v30  ;;  %2760 = vmatpush.msrb.mxu1 %v6516_v10 }
 0x906   :  { %2780 = vmatpush.msrb.mxu2 %v6519_v18  ;;  %2800 = vmatpush.msrb.mxu3 %v6522_v62 }
 0x907   :  { %2741 = vmatpush.msrb.mxu0 %v6525_v48  ;;  %2761 = vmatpush.msrb.mxu1 %v6528_v59 }
 0x908   :  { %2781 = vmatpush.msrb.mxu2 %v6531_v47  ;;  %2801 = vmatpush.msrb.mxu3 %v6534_v49 }
 0x909   :  { %2742 = vmatpush.msrb.mxu0 %v6537_v50  ;;  %2762 = vmatpush.msrb.mxu1 %v6540_v46 }
 0x90a   :  { %2782 = vmatpush.msrb.mxu2 %v6543_v39  ;;  %2802 = vmatpush.msrb.mxu3 %v6546_v42 }
 0x90b   :  { %2743 = vmatpush.msrb.mxu0 %v6549_v63  ;;  %2763 = vmatpush.msrb.mxu1 %v6552_v51 }
 0x90c   :  { %2783 = vmatpush.msrb.mxu2 %v7851_v5  ;;  %2803 = vmatpush.msrb.mxu3 %v7852_v56 }
 0x90d   :  { %2744 = vmatpush.msrb.mxu0 %v7853_v55  ;;  %2764 = vmatpush.msrb.mxu1 %v7854_v27 }
 0x90e   :  { %2784 = vmatpush.msrb.mxu2 %v7855_v16  ;;  %2804 = vmatpush.msrb.mxu3 %v7856_v24 }
 0x90f   :  { %2745 = vmatpush.msrb.mxu0 %v7857_v21  ;;  %2765 = vmatpush.msrb.mxu1 %v7858_v20 }
 0x910   :  { %2785 = vmatpush.msrb.mxu2 %v7859_v26  ;;  %2805 = vmatpush.msrb.mxu3 %v7860_v43  ;;  %v2395_v43 = vld [vmem:[#allocation2 + $0x60] sm:$0xc] }
 0x911   :  { %2746 = vmatpush.msrb.mxu0 %v7861_v1  ;;  %2766 = vmatpush.msrb.mxu1 %v7862_v32 }
 0x912   :  { %2786 = vmatpush.msrb.mxu2 %v7863_v0  ;;  %2806 = vmatpush.msrb.mxu3 %v7864_v8  ;;  %v2392_v0 = vld [vmem:[#allocation2 + $0x58] sm:$0xc] }
 0x913   :  { %2747 = vmatpush.msrb.mxu0 %v7865_v34  ;;  %2767 = vmatpush.msrb.mxu1 %v7866_v57  ;;  %v7876_v34 = vld [vmem:[#allocation54_spill] sm:$0xff] }
 0x914   :  { %2787 = vmatpush.msrb.mxu2 %v7867_v3  ;;  %2807 = vmatpush.msrb.mxu3 %v7868_v23 }
 0x915   :  { %2748 = vmatpush.msrb.mxu0 %v7869_v25  ;;  %2768 = vmatpush.msrb.mxu1 %v7870_v2  ;;  %v2393_v25 = vld [vmem:[#allocation2 + $0x10] sm:$0xc] }
 0x916   :  { %2788 = vmatpush.msrb.mxu2 %v7871_v58  ;;  %2808 = vmatpush.msrb.mxu3 %v7872_v54 }
 0x917   :  { %2749 = vmatpush.msrb.mxu0 %v7873_v11  ;;  %2769 = vmatpush.msrb.mxu1 %v7874_v14 }
 0x918   :  { %2789 = vmatpush.msrb.mxu2 %v7875_v29  ;;  %2809 = vmatpush.msrb.mxu3 %v7876_v34 }
 0x974   :  { %v2413_v57 = vpop.f32.mrf.mxu0  ;;  %v2433_v3 = vpop.f32.mrf.mxu1 }
 0x975   :  { %v2480_v8 = vrot.slane %v2413_v57, 6  ;;  %v2481_v23 = vrot.slane %v2433_v3, 6 }
 0x977   :  { %v2488_v32 = vadd.f32 %v2480_v8, %v2392_v0  ;;  %v2489_v2 = vadd.f32 %v2481_v23, %v2393_v25  ;;  %v2394_v8 = vld [vmem:[#allocation2 + $0x98] sm:$0xc] }
 0x979   :  { %v4372_v1 = vmul.f32 -1.442695, %v2488_v32  ;;  %v4374_v58 = vmul.f32 -1.442695, %v2489_v2 }
 0x97b   :  { %4613 = vpow2.f32 %v4372_v1  ;;  %v2473_v54 = vpop.f32.mrf.mxu3  ;;  %v2453_v57 = vpop.f32.mrf.mxu2 }
 0x97c   :  { %4615 = vpow2.f32 %v4374_v58  ;;  %v2483_v11 = vrot.slane %v2473_v54, 6  ;;  %v2482_v3 = vrot.slane %v2453_v57, 6 }
 0x97e   :  { %v2491_v14 = vadd.f32 %v2483_v11, %v2395_v43  ;;  %v2490_v1 = vadd.f32 %v2482_v3, %v2394_v8 }
 0x980   :  { %v4373_v26 = vmul.f32 -1.442695, %v2491_v14 }
 0x981   :  { %v4614_v29 = vpop.eup %4613 }
 0x982   :  { %v4616_v20 = vpop.eup %4615  ;;  %v2495_v34 = vadd.f32 1.0, %v4614_v29  ;;  %4617 = vpow2.f32 %v4373_v26 }
 0x983   :  { %v2535_v21 = vadd.f32 1.0, %v4616_v20 }
 0x984   :  { %4619 = vrcp.f32 %v2495_v34  ;;  %v2507_v11 = vand.u32 2147483648, %v2495_v34  ;;  %v2505_v20 = vand.u32 2147483647, %v2495_v34  ;;  %vm2501_vm10 = vweird.f32 %v2495_v34 }
 0x985   :  { %4621 = vrcp.f32 %v2535_v21  ;;  %v2547_v14 = vand.u32 2147483648, %v2535_v21  ;;  %v2545_v57 = vand.u32 2147483647, %v2535_v21  ;;  %vm2541_vm11 = vweird.f32 %v2535_v21 }
 0x986   :  { %v2508_v3 = vor.u32 1.1754944e-38, %v2507_v11  ;;  %vm2506_vm14 = vcmp.eq.f32.partialorder %v2505_v20, 8.507059e+37 }
 0x987   :  { %vm2546_vm15 = vcmp.eq.f32.partialorder %v2545_v57, 8.507059e+37 }
 0x988   :  { %v4618_v0 = vpop.eup %4617 }
 0x989   :  { %v2515_v32 = vadd.f32 1.0, %v4618_v0 }
 0x98a   :  { %v4620_v23 = vpop.eup %4619 }
 0x98b   :  { %v4622_v25 = vpop.eup %4621  ;;  %v2497_v2 = vmul.f32 %v4620_v23, %v2495_v34  ;;  %4623 = vrcp.f32 %v2515_v32  ;;  %vm2502_vm8 = vweird.f32 %v4620_v23  ;;  %vm2521_vm1 = vweird.f32 %v2515_v32 }
 0x98c   :  { %v2537_v58 = vmul.f32 %v4622_v25, %v2535_v21  ;;  %4625 = vtanh.f32 %v2490_v1  ;;  %vm2542_vm9 = vweird.f32 %v4622_v25  ;;  %vm2503_vm12 = vmor %vm2501_vm10, %vm2502_vm8 }
 0x98d   :  { %v2498_v43 = vsub.f32 1.0, %v2497_v2  ;;  %v2552_v2 = vrot.slane %v6702_v61, 6  ;;  %vm2543_vm13 = vmor %vm2541_vm11, %vm2542_vm9  ;;  %v2527_v61 = vand.u32 2147483648, %v2515_v32 }
 0x98e   :  { %v2538_v54 = vsub.f32 1.0, %v2537_v58  ;;  %v2548_v58 = vor.u32 1.1754944e-38, %v2547_v14  ;;  %v2525_v14 = vand.u32 2147483647, %v2515_v32 }
 0x98f   :  { %v2499_v26 = vmul.f32 %v4620_v23, %v2498_v43 }
 0x990   :  { %v2539_v29 = vmul.f32 %v4622_v25, %v2538_v54  ;;  %vm2526_vm3 = vcmp.eq.f32.partialorder %v2525_v14, 8.507059e+37 }
 0x991   :  { %v4624_v24 = vpop.eup %4623  ;;  %v2500_v16 = vadd.f32 %v4620_v23, %v2499_v26 }
 0x992   :  { %v2540_v0 = vadd.f32 %v4622_v25, %v2539_v29  ;;  %v2517_v8 = vmul.f32 %v4624_v24, %v2515_v32  ;;  %v4626_v43 = vpop.eup %4625  ;;  %vm2522_vm0 = vweird.f32 %v4624_v24 }
 0x993   :  { %v2504_v1 = vsel %vm2503_vm12, %v4620_v23, %v2500_v16  ;;  %vm2523_vm2 = vmor %vm2521_vm1, %vm2522_vm0  ;;  %v2528_v23 = vor.u32 1.1754944e-38, %v2527_v61 }
 0x994   :  { %v2509_v27 = vsel %vm2506_vm14, %v2508_v3, %v2504_v1  ;;  %v2544_v55 = vsel %vm2543_vm13, %v4622_v25, %v2540_v0  ;;  %v2518_v54 = vsub.f32 1.0, %v2517_v8 }
 0x995   :  { %v2531_v56 = vmul.f32 %v4626_v43, %v2509_v27  ;;  %v2549_v5 = vsel %vm2546_vm15, %v2548_v58, %v2544_v55  ;;  %v2560_v58 = vld [vmem:[#allocation2 + $0x98] sm:$0x30] }
 0x996   :  { %v2554_v26 = vmul.f32 %v2552_v2, %v2549_v5  ;;  %v2519_v34 = vmul.f32 %v4624_v24, %v2518_v54  ;;  %v2561_v5 = vld [vmem:[#allocation2 + $0x60] sm:$0x30] }
 0x998   :  { %v6770_v21 = vadd.f32 %v2554_v26, %v2531_v56  ;;  %v2520_v11 = vadd.f32 %v4624_v24, %v2519_v34 }
 0x99a   :  { %4627 = vtanh.f32 %v6770_v21  ;;  %v2524_v16 = vsel %vm2523_vm2, %v4624_v24, %v2520_v11 }
 0x99b   :  { %v2529_v20 = vsel %vm2526_vm3, %v2528_v23, %v2524_v16 }
 0x9a0   :  { %v4628_v25 = vpop.eup %4627 }
 0x9a1   :  { %v2557_v29 = vmul.f32 %v4628_v25, %v2529_v20 }
 0x9a3   :  { %v2563_v27 = vrot.slane %v2557_v29, 2 }
 0x9a5   :  { %2581 = vmatmul.f32.vlgmr.msra.gmra.mxu0 %v2563_v27  ;;  %2601 = vmatmul.f32.vlgmr.msra.gmra.mxu1 %v2563_v27 }
 0x9a6   :  { %2621 = vmatmul.f32.vlgmr.msra.gmra.mxu2 %v2563_v27  ;;  %2641 = vmatmul.f32.vlgmr.msra.gmra.mxu3 %v2563_v27 }
 0x9a7   :  { %2903 = vmatpush.msra.mxu0 %v6441_v15  ;;  %2923 = vmatpush.msra.mxu1 %v6444_v17  ;;  %v7877_v15 = vld [vmem:[#allocation42_spill] sm:$0xff] }
 0x9a8   :  { %2943 = vmatpush.msra.mxu2 %v6447_v28  ;;  %2963 = vmatpush.msra.mxu3 %v6450_v7  ;;  %v7878_v17 = vld [vmem:[#allocation34_spill] sm:$0xff]  ;;  %v7880_v7 = vld [vmem:[#allocation37_spill] sm:$0xff] }
 0x9a9   :  { %2904 = vmatpush.msra.mxu0 %v6453_v38  ;;  %2924 = vmatpush.msra.mxu1 %v6456_v6  ;;  %v7879_v28 = vld [vmem:[#allocation26_spill] sm:$0xff]  ;;  %v7881_v38 = vld [vmem:[#allocation32_spill] sm:$0xff]  ;;  %v7882_v6 = vld [vmem:[#allocation33_spill] sm:$0xff] }
 0x9aa   :  { %2944 = vmatpush.msra.mxu2 %v6459_v35  ;;  %2964 = vmatpush.msra.mxu3 %v6462_v33  ;;  %v7883_v35 = vld [vmem:[#allocation40_spill] sm:$0xff]  ;;  %v7884_v33 = vld [vmem:[#allocation41_spill] sm:$0xff] }
 0x9ab   :  { %2905 = vmatpush.msra.mxu0 %v6465_v37  ;;  %2925 = vmatpush.msra.mxu1 %v6468_v19  ;;  %v7885_v37 = vld [vmem:[#allocation35_spill] sm:$0xff]  ;;  %v7886_v19 = vld [vmem:[#allocation36_spill] sm:$0xff] }
 0x9ac   :  { %2945 = vmatpush.msra.mxu2 %v6471_v31  ;;  %2965 = vmatpush.msra.mxu3 %v6474_v12  ;;  %v7887_v31 = vld [vmem:[#allocation43_spill] sm:$0xff]  ;;  %v7888_v12 = vld [vmem:[#allocation44_spill] sm:$0xff] }
 0x9ad   :  { %2906 = vmatpush.msra.mxu0 %v6477_v9  ;;  %2926 = vmatpush.msra.mxu1 %v6480_v40  ;;  %v7889_v9 = vld [vmem:[#allocation38_spill] sm:$0xff]  ;;  %v7890_v40 = vld [vmem:[#allocation39_spill] sm:$0xff] }
 0x9ae   :  { %2946 = vmatpush.msra.mxu2 %v6483_v44  ;;  %2966 = vmatpush.msra.mxu3 %v6486_v45  ;;  %v7891_v44 = vld [vmem:[#allocation47_spill] sm:$0xff]  ;;  %v7892_v45 = vld [vmem:[#allocation48_spill] sm:$0xff] }
 0x9af   :  { %2907 = vmatpush.msra.mxu0 %v6489_v60  ;;  %2927 = vmatpush.msra.mxu1 %v6492_v41  ;;  %v7893_v60 = vld [vmem:[#allocation45_spill] sm:$0xff]  ;;  %v7894_v41 = vld [vmem:[#allocation46_spill] sm:$0xff] }
 0x9b0   :  { %2947 = vmatpush.msra.mxu2 %v6495_v22  ;;  %2967 = vmatpush.msra.mxu3 %v6498_v53  ;;  %v7895_v22 = vld [vmem:[#allocation51_spill] sm:$0xff]  ;;  %v7896_v53 = vld [vmem:[#allocation52_spill] sm:$0xff] }
 0x9b1   :  { %2908 = vmatpush.msra.mxu0 %v6501_v13  ;;  %2928 = vmatpush.msra.mxu1 %v6504_v4  ;;  %v7897_v13 = vld [vmem:[#allocation49_spill] sm:$0xff]  ;;  %v7898_v4 = vld [vmem:[#allocation50_spill] sm:$0xff] }
 0x9b2   :  { %2948 = vmatpush.msra.mxu2 %v6507_v36  ;;  %2968 = vmatpush.msra.mxu3 %v6510_v52  ;;  %v7899_v36 = vld [vmem:[#allocation55_spill] sm:$0xff]  ;;  %v7900_v52 = vld [vmem:[#allocation56_spill] sm:$0xff] }
 0x9b3   :  { %2909 = vmatpush.msra.mxu0 %v6513_v30  ;;  %2929 = vmatpush.msra.mxu1 %v6516_v10  ;;  %v7901_v30 = vld [vmem:[#allocation53_spill] sm:$0xff]  ;;  %v7902_v10 = vld [vmem:[#allocation54_spill] sm:$0xff] }
 0x9b4   :  { %2949 = vmatpush.msra.mxu2 %v6519_v18  ;;  %2969 = vmatpush.msra.mxu3 %v6522_v62 }
 0x9b5   :  { %2910 = vmatpush.msra.mxu0 %v6525_v48  ;;  %2930 = vmatpush.msra.mxu1 %v6528_v59 }
 0x9b6   :  { %2950 = vmatpush.msra.mxu2 %v6531_v47  ;;  %2970 = vmatpush.msra.mxu3 %v6534_v49  ;;  %v2558_v47 = vld [vmem:[#allocation2 + $0x58] sm:$0x30]  ;;  %v2559_v49 = vld [vmem:[#allocation2 + $0x10] sm:$0x30] }
 0x9b7   :  { %2911 = vmatpush.msra.mxu0 %v6537_v50  ;;  %2931 = vmatpush.msra.mxu1 %v6540_v46 }
 0x9b8   :  { %2951 = vmatpush.msra.mxu2 %v6543_v39  ;;  %2971 = vmatpush.msra.mxu3 %v6546_v42 }
 0x9b9   :  { %2912 = vmatpush.msra.mxu0 %v6549_v63  ;;  %2932 = vmatpush.msra.mxu1 %v6552_v51 }
 0x9ba   :  { %2952 = vmatpush.msra.mxu2 %v7877_v15  ;;  %2972 = vmatpush.msra.mxu3 %v7878_v17 }
 0x9bb   :  { %2913 = vmatpush.msra.mxu0 %v7879_v28  ;;  %2933 = vmatpush.msra.mxu1 %v7880_v7 }
 0x9bc   :  { %2953 = vmatpush.msra.mxu2 %v7881_v38  ;;  %2973 = vmatpush.msra.mxu3 %v7882_v6  ;;  %v2721_v6 = vrot.slane %v6770_v21, 6 }
 0x9bd   :  { %2914 = vmatpush.msra.mxu0 %v7883_v35  ;;  %2934 = vmatpush.msra.mxu1 %v7884_v33 }
 0x9be   :  { %2954 = vmatpush.msra.mxu2 %v7885_v37  ;;  %2974 = vmatpush.msra.mxu3 %v7886_v19 }
 0x9bf   :  { %2915 = vmatpush.msra.mxu0 %v7887_v31  ;;  %2935 = vmatpush.msra.mxu1 %v7888_v12 }
 0x9c0   :  { %2955 = vmatpush.msra.mxu2 %v7889_v9  ;;  %2975 = vmatpush.msra.mxu3 %v7890_v40 }
 0x9c1   :  { %2916 = vmatpush.msra.mxu0 %v7891_v44  ;;  %2936 = vmatpush.msra.mxu1 %v7892_v45 }
 0x9c2   :  { %2956 = vmatpush.msra.mxu2 %v7893_v60  ;;  %2976 = vmatpush.msra.mxu3 %v7894_v41 }
 0x9c3   :  { %2917 = vmatpush.msra.mxu0 %v7895_v22  ;;  %2937 = vmatpush.msra.mxu1 %v7896_v53 }
 0x9c4   :  { %2957 = vmatpush.msra.mxu2 %v7897_v13  ;;  %2977 = vmatpush.msra.mxu3 %v7898_v4 }
 0x9c5   :  { %2918 = vmatpush.msra.mxu0 %v7899_v36  ;;  %2938 = vmatpush.msra.mxu1 %v7900_v52 }
 0x9c6   :  { %2958 = vmatpush.msra.mxu2 %v7901_v30  ;;  %2978 = vmatpush.msra.mxu3 %v7902_v10  ;;  %v6841_v10 = vld [vmem:[#allocation8 + $0x1e0] sm:$0xff] }
 0xa22   :  { %v2582_v18 = vpop.f32.mrf.mxu0  ;;  %v2602_v62 = vpop.f32.mrf.mxu1 }
 0xa23   :  { %v2649_v48 = vrot.slane %v2582_v18, 4  ;;  %v2650_v59 = vrot.slane %v2602_v62, 4  ;;  %v6844_v18 = vld [vmem:[#allocation8 + $0x1e8] sm:$0xff]  ;;  %v6847_v62 = vld [vmem:[#allocation8 + $0x1f0] sm:$0xff] }
 0xa25   :  { %v2657_v50 = vadd.f32 %v2649_v48, %v2558_v47  ;;  %v2658_v46 = vadd.f32 %v2650_v59, %v2559_v49  ;;  %v6850_v48 = vld [vmem:[#allocation8 + $0x1f8] sm:$0xff]  ;;  %v6853_v59 = vld [vmem:[#allocation8 + $0x1c0] sm:$0xff]  ;;  %v6856_v47 = vld [vmem:[#allocation8 + $0x1c8] sm:$0xff] }
 0xa26   :  { %v6859_v49 = vld [vmem:[#allocation8 + $0x1d0] sm:$0xff] }
 0xa27   :  { %v4375_v39 = vmul.f32 -1.442695, %v2657_v50  ;;  %v4377_v42 = vmul.f32 -1.442695, %v2658_v46  ;;  %v6862_v50 = vld [vmem:[#allocation8 + $0x1d8] sm:$0xff]  ;;  %v6865_v46 = vld [vmem:[#allocation8 + $0x1a0] sm:$0xff] }
 0xa29   :  { %4629 = vpow2.f32 %v4375_v39  ;;  %v2642_v63 = vpop.f32.mrf.mxu3  ;;  %v2622_v0 = vpop.f32.mrf.mxu2  ;;  %v6868_v39 = vld [vmem:[#allocation8 + $0x1a8] sm:$0xff] }
 0xa2a   :  { %4631 = vpow2.f32 %v4377_v42  ;;  %v2652_v51 = vrot.slane %v2642_v63, 4  ;;  %v2651_v8 = vrot.slane %v2622_v0, 4  ;;  %v6871_v42 = vld [vmem:[#allocation8 + $0x1b0] sm:$0xff]  ;;  %v6874_v63 = vld [vmem:[#allocation8 + $0x1b8] sm:$0xff]  ;;  %v6901_v0 = vld [vmem:[#allocation8 + $0x140] sm:$0xff] }
 0xa2c   :  { %v2660_v56 = vadd.f32 %v2652_v51, %v2561_v5  ;;  %v2659_v54 = vadd.f32 %v2651_v8, %v2560_v58  ;;  %v6877_v51 = vld [vmem:[#allocation8 + $0x180] sm:$0xff]  ;;  %v6880_v5 = vld [vmem:[#allocation8 + $0x188] sm:$0xff]  ;;  %v6910_v58 = vld [vmem:[#allocation8 + $0x158] sm:$0xff] }
 0xa2d   :  { %v6904_v8 = vld [vmem:[#allocation8 + $0x148] sm:$0xff] }
 0xa2e   :  { %v4376_v55 = vmul.f32 -1.442695, %v2660_v56  ;;  %v6883_v56 = vld [vmem:[#allocation8 + $0x190] sm:$0xff] }
 0xa2f   :  { %v4630_v24 = vpop.eup %4629 }
 0xa30   :  { %v4632_v32 = vpop.eup %4631  ;;  %v2664_v57 = vadd.f32 1.0, %v4630_v24  ;;  %4633 = vpow2.f32 %v4376_v55  ;;  %v6886_v55 = vld [vmem:[#allocation8 + $0x198] sm:$0xff]  ;;  %v6889_v24 = vld [vmem:[#allocation8 + $0x160] sm:$0xff] }
 0xa31   :  { %v2704_v3 = vadd.f32 1.0, %v4632_v32  ;;  %v6892_v32 = vld [vmem:[#allocation8 + $0x168] sm:$0xff] }
 0xa32   :  { %4635 = vrcp.f32 %v2664_v57  ;;  %v2676_v16 = vand.u32 2147483648, %v2664_v57  ;;  %v2674_v20 = vand.u32 2147483647, %v2664_v57  ;;  %vm2670_vm6 = vweird.f32 %v2664_v57 }
 0xa33   :  { %4637 = vrcp.f32 %v2704_v3  ;;  %v2716_v23 = vand.u32 2147483648, %v2704_v3  ;;  %v2714_v27 = vand.u32 2147483647, %v2704_v3  ;;  %vm2710_vm7 = vweird.f32 %v2704_v3 }
 0xa34   :  { %v2677_v28 = vor.u32 1.1754944e-38, %v2676_v16  ;;  %vm2675_vm10 = vcmp.eq.f32.partialorder %v2674_v20, 8.507059e+37  ;;  %v6937_v16 = vld [vmem:[#allocation8 + $0xe0] sm:$0xff]  ;;  %v6946_v20 = vld [vmem:[#allocation8 + $0xf8] sm:$0xff] }
 0xa35   :  { %v2717_v35 = vor.u32 1.1754944e-38, %v2716_v23  ;;  %vm2715_vm11 = vcmp.eq.f32.partialorder %v2714_v27, 8.507059e+37  ;;  %v6940_v23 = vld [vmem:[#allocation8 + $0xe8] sm:$0xff] }
 0xa36   :  { %v4634_v2 = vpop.eup %4633  ;;  %v6952_v27 = vld [vmem:[#allocation8 + $0xc8] sm:$0xff] }
 0xa37   :  { %v2684_v1 = vadd.f32 1.0, %v4634_v2  ;;  %v6907_v2 = vld [vmem:[#allocation8 + $0x150] sm:$0xff] }
 0xa38   :  { %v4636_v43 = vpop.eup %4635 }
 0xa39   :  { %v4638_v26 = vpop.eup %4637  ;;  %v2666_v34 = vmul.f32 %v4636_v43, %v2664_v57  ;;  %4639 = vrcp.f32 %v2684_v1  ;;  %vm2671_vm4 = vweird.f32 %v4636_v43  ;;  %v2696_v21 = vand.u32 2147483648, %v2684_v1  ;;  %v6895_v57 = vld [vmem:[#allocation8 + $0x170] sm:$0xff] }
 0xa3a   :  { %v2706_v11 = vmul.f32 %v4638_v26, %v2704_v3  ;;  %4641 = vtanh.f32 %v2659_v54  ;;  %vm2711_vm5 = vweird.f32 %v4638_v26  ;;  %vm2672_vm8 = vmor %vm2670_vm6, %vm2671_vm4  ;;  %vm2690_vm13 = vweird.f32 %v2684_v1  ;;  %v6898_v3 = vld [vmem:[#allocation8 + $0x178] sm:$0xff]  ;;  %v6919_v54 = vld [vmem:[#allocation8 + $0x130] sm:$0xff] }
 0xa3b   :  { %v2667_v61 = vsub.f32 1.0, %v2666_v34  ;;  %vm2712_vm9 = vmor %vm2710_vm7, %vm2711_vm5  ;;  %v2694_v22 = vand.u32 2147483647, %v2684_v1  ;;  %v2697_v13 = vor.u32 1.1754944e-38, %v2696_v21  ;;  %v6925_v34 = vld [vmem:[#allocation8 + $0x100] sm:$0xff]  ;;  %v7006_v21 = vld [vmem:[#allocation8 + $0x58] sm:$0xff] }
 0xa3c   :  { %v2707_v14 = vsub.f32 1.0, %v2706_v11  ;;  %v6928_v11 = vld [vmem:[#allocation8 + $0x108] sm:$0xff]  ;;  %7920 = vst [vmem:[#allocation37_spill] sm:$0xff] %v7006_v21 }
 0xa3d   :  { %v2668_v25 = vmul.f32 %v4636_v43, %v2667_v61  ;;  %vm2695_vm15 = vcmp.eq.f32.partialorder %v2694_v22, 8.507059e+37  ;;  %v6931_v61 = vld [vmem:[#allocation8 + $0x110] sm:$0xff]  ;;  %v7009_v22 = vld [vmem:[#allocation8 + $0x20] sm:$0xff] }
 0xa3e   :  { %v2708_v29 = vmul.f32 %v4638_v26, %v2707_v14  ;;  %v6934_v14 = vld [vmem:[#allocation8 + $0x118] sm:$0xff]  ;;  %7921 = vst [vmem:[#allocation32_spill] sm:$0xff] %v7009_v22 }
 0xa3f   :  { %v4640_v15 = vpop.eup %4639  ;;  %v2669_v17 = vadd.f32 %v4636_v43, %v2668_v25  ;;  %v6943_v25 = vld [vmem:[#allocation8 + $0xf0] sm:$0xff] }
 0xa40   :  { %v2709_v7 = vadd.f32 %v4638_v26, %v2708_v29  ;;  %v2686_v38 = vmul.f32 %v4640_v15, %v2684_v1  ;;  %v4642_v37 = vpop.eup %4641  ;;  %vm2691_vm12 = vweird.f32 %v4640_v15  ;;  %v6913_v1 = vld [vmem:[#allocation8 + $0x120] sm:$0xff] }
 0xa41   :  { %v2673_v33 = vsel %vm2672_vm8, %v4636_v43, %v2669_v17  ;;  %vm2692_vm14 = vmor %vm2690_vm13, %vm2691_vm12  ;;  %v6916_v43 = vld [vmem:[#allocation8 + $0x128] sm:$0xff]  ;;  %v6949_v29 = vld [vmem:[#allocation8 + $0xc0] sm:$0xff] }
 0xa42   :  { %v2678_v19 = vsel %vm2675_vm10, %v2677_v28, %v2673_v33  ;;  %v2713_v31 = vsel %vm2712_vm9, %v4638_v26, %v2709_v7  ;;  %v2687_v12 = vsub.f32 1.0, %v2686_v38  ;;  %v6922_v26 = vld [vmem:[#allocation8 + $0x138] sm:$0xff]  ;;  %v6961_v28 = vld [vmem:[#allocation8 + $0xa0] sm:$0xff]  ;;  %v6964_v7 = vld [vmem:[#allocation8 + $0xa8] sm:$0xff] }
 0xa43   :  { %v2700_v9 = vmul.f32 %v4642_v37, %v2678_v19  ;;  %v2718_v40 = vsel %vm2715_vm11, %v2717_v35, %v2713_v31  ;;  %v6958_v17 = vld [vmem:[#allocation8 + $0xd8] sm:$0xff]  ;;  %7905 = vst [vmem:[#allocation19_spill] sm:$0xff] %v6961_v28  ;;  %v6967_v38 = vld [vmem:[#allocation8 + $0xb0] sm:$0xff]  ;;  %v6973_v35 = vld [vmem:[#allocation8 + $0x80] sm:$0xff] }
 0xa44   :  { %v2723_v44 = vmul.f32 %v2721_v6, %v2718_v40  ;;  %v2688_v45 = vmul.f32 %v4640_v15, %v2687_v12  ;;  %7904 = vst [vmem:[#allocation58_spill] sm:$0xff] %v6958_v17  ;;  %v6970_v6 = vld [vmem:[#allocation8 + $0xb8] sm:$0xff]  ;;  %v6976_v33 = vld [vmem:[#allocation8 + $0x88] sm:$0xff]  ;;  %v6979_v37 = vld [vmem:[#allocation8 + $0x90] sm:$0xff] }
 0xa45   :  { %7906 = vst [vmem:[#allocation20_spill] sm:$0xff] %v6964_v7  ;;  %v6982_v19 = vld [vmem:[#allocation8 + $0x98] sm:$0xff]  ;;  %v6985_v31 = vld [vmem:[#allocation8 + $0x60] sm:$0xff]  ;;  %v6988_v12 = vld [vmem:[#allocation8 + $0x68] sm:$0xff] }
 0xa46   :  { %v6838_v60 = vadd.f32 %v2723_v44, %v2700_v9  ;;  %v2689_v41 = vadd.f32 %v4640_v15, %v2688_v45  ;;  %7907 = vst [vmem:[#allocation21_spill] sm:$0xff] %v6967_v38  ;;  %v6991_v9 = vld [vmem:[#allocation8 + $0x70] sm:$0xff]  ;;  %v6994_v40 = vld [vmem:[#allocation8 + $0x78] sm:$0xff]  ;;  %v6997_v44 = vld [vmem:[#allocation8 + $0x40] sm:$0xff] }
 0xa47   :  { %7908 = vst [vmem:[#allocation24_spill] sm:$0xff] %v6970_v6  ;;  %v7000_v45 = vld [vmem:[#allocation8 + $0x48] sm:$0xff] }
 0xa48   :  { %4643 = vtanh.f32 %v6838_v60  ;;  %v2693_v53 = vsel %vm2692_vm14, %v4640_v15, %v2689_v41  ;;  %v6955_v15 = vld [vmem:[#allocation8 + $0xd0] sm:$0xff]  ;;  %7909 = vst [vmem:[#allocation22_spill] sm:$0xff] %v6973_v35 }
 0xa49   :  { %v2698_v36 = vsel %vm2695_vm15, %v2697_v13, %v2693_v53  ;;  %7903 = vst [vmem:[#allocation57_spill] sm:$0xff] %v6955_v15  ;;  %v7003_v41 = vld [vmem:[#allocation8 + $0x50] sm:$0xff]  ;;  %v7012_v53 = vld [vmem:[#allocation8 + $0x28] sm:$0xff] }
 0xa4a   :  { %7910 = vst [vmem:[#allocation23_spill] sm:$0xff] %v6976_v33  ;;  %v7015_v13 = vld [vmem:[#allocation8 + $0x30] sm:$0xff] }
 0xa4b   :  { %7911 = vst [vmem:[#allocation29_spill] sm:$0xff] %v6979_v37 }
 0xa4c   :  { %7912 = vst [vmem:[#allocation25_spill] sm:$0xff] %v6982_v19 }
 0xa4d   :  { %7913 = vst [vmem:[#allocation31_spill] sm:$0xff] %v6985_v31 }
 0xa4e   :  { %v4644_v4 = vpop.eup %4643  ;;  %7914 = vst [vmem:[#allocation28_spill] sm:$0xff] %v6988_v12 }
 0xa4f   :  { %v2726_v52 = vmul.f32 %v4644_v4, %v2698_v36  ;;  %7915 = vst [vmem:[#allocation27_spill] sm:$0xff] %v6991_v9  ;;  %v7018_v4 = vld [vmem:[#allocation8 + $0x38] sm:$0xff]  ;;  %v7021_v36 = vld [vmem:[#allocation8] sm:$0xff] }
 0xa50   :  { %7916 = vst [vmem:[#allocation30_spill] sm:$0xff] %v6994_v40 }
 0xa51   :  { %v2732_v30 = vrot.slane %v2726_v52, 4  ;;  %7917 = vst [vmem:[#allocation42_spill] sm:$0xff] %v6997_v44  ;;  %v7024_v52 = vld [vmem:[#allocation8 + $0x8] sm:$0xff] }
 0xa52   :  { %7918 = vst [vmem:[#allocation34_spill] sm:$0xff] %v7000_v45 }
 0xa53   :  { %2750 = vmatmul.f32.vlgmr.msrb.gmra.mxu0 %v2732_v30  ;;  %2770 = vmatmul.f32.vlgmr.msrb.gmra.mxu1 %v2732_v30  ;;  %7919 = vst [vmem:[#allocation26_spill] sm:$0xff] %v7003_v41 }
 0xa54   :  { %2790 = vmatmul.f32.vlgmr.msrb.gmra.mxu2 %v2732_v30  ;;  %2810 = vmatmul.f32.vlgmr.msrb.gmra.mxu3 %v2732_v30  ;;  %7922 = vst [vmem:[#allocation33_spill] sm:$0xff] %v7012_v53  ;;  %v7027_v30 = vld [vmem:[#allocation8 + $0x10] sm:$0xff] }
 0xa55   :  { %3057 = vmatpush.msrb.mxu0 %v6841_v10  ;;  %3077 = vmatpush.msrb.mxu1 %v6844_v18  ;;  %7923 = vst [vmem:[#allocation40_spill] sm:$0xff] %v7015_v13 }
 0xa56   :  { %3097 = vmatpush.msrb.mxu2 %v6847_v62  ;;  %3117 = vmatpush.msrb.mxu3 %v6850_v48  ;;  %7924 = vst [vmem:[#allocation41_spill] sm:$0xff] %v7018_v4 }
 0xa57   :  { %3058 = vmatpush.msrb.mxu0 %v6853_v59  ;;  %3078 = vmatpush.msrb.mxu1 %v6856_v47  ;;  %7925 = vst [vmem:[#allocation35_spill] sm:$0xff] %v7021_v36 }
 0xa58   :  { %3098 = vmatpush.msrb.mxu2 %v6859_v49  ;;  %3118 = vmatpush.msrb.mxu3 %v6862_v50  ;;  %7926 = vst [vmem:[#allocation36_spill] sm:$0xff] %v7024_v52 }
 0xa59   :  { %3059 = vmatpush.msrb.mxu0 %v6865_v46  ;;  %3079 = vmatpush.msrb.mxu1 %v6868_v39  ;;  %7927 = vst [vmem:[#allocation43_spill] sm:$0xff] %v7027_v30 }
 0xa5a   :  { %3099 = vmatpush.msrb.mxu2 %v6871_v42  ;;  %3119 = vmatpush.msrb.mxu3 %v6874_v63 }
 0xa5b   :  { %3060 = vmatpush.msrb.mxu0 %v6877_v51  ;;  %3080 = vmatpush.msrb.mxu1 %v6880_v5 }
 0xa5c   :  { %3100 = vmatpush.msrb.mxu2 %v6883_v56  ;;  %3120 = vmatpush.msrb.mxu3 %v6886_v55 }
 0xa5d   :  { %3061 = vmatpush.msrb.mxu0 %v6889_v24  ;;  %3081 = vmatpush.msrb.mxu1 %v6892_v32 }
 0xa5e   :  { %3101 = vmatpush.msrb.mxu2 %v6895_v57  ;;  %3121 = vmatpush.msrb.mxu3 %v6898_v3 }
 0xa5f   :  { %3062 = vmatpush.msrb.mxu0 %v6901_v0  ;;  %3082 = vmatpush.msrb.mxu1 %v6904_v8 }
 0xa60   :  { %3102 = vmatpush.msrb.mxu2 %v6907_v2  ;;  %3122 = vmatpush.msrb.mxu3 %v6910_v58 }
 0xa61   :  { %3063 = vmatpush.msrb.mxu0 %v6913_v1  ;;  %3083 = vmatpush.msrb.mxu1 %v6916_v43 }
 0xa62   :  { %3103 = vmatpush.msrb.mxu2 %v6919_v54  ;;  %3123 = vmatpush.msrb.mxu3 %v6922_v26 }
 0xa63   :  { %3064 = vmatpush.msrb.mxu0 %v6925_v34  ;;  %3084 = vmatpush.msrb.mxu1 %v6928_v11 }
 0xa64   :  { %3104 = vmatpush.msrb.mxu2 %v6931_v61  ;;  %3124 = vmatpush.msrb.mxu3 %v6934_v14 }
 0xa65   :  { %3065 = vmatpush.msrb.mxu0 %v6937_v16  ;;  %3085 = vmatpush.msrb.mxu1 %v6940_v23 }
 0xa66   :  { %3105 = vmatpush.msrb.mxu2 %v6943_v25  ;;  %3125 = vmatpush.msrb.mxu3 %v6946_v20 }
 0xa67   :  { %3066 = vmatpush.msrb.mxu0 %v6949_v29  ;;  %3086 = vmatpush.msrb.mxu1 %v6952_v27 }
 0xa68   :  { %3106 = vmatpush.msrb.mxu2 %v6955_v15  ;;  %3126 = vmatpush.msrb.mxu3 %v6958_v17 }
 0xa69   :  { %3067 = vmatpush.msrb.mxu0 %v6961_v28  ;;  %3087 = vmatpush.msrb.mxu1 %v6964_v7 }
 0xa6a   :  { %3107 = vmatpush.msrb.mxu2 %v6967_v38  ;;  %3127 = vmatpush.msrb.mxu3 %v6970_v6 }
 0xa6b   :  { %3068 = vmatpush.msrb.mxu0 %v6973_v35  ;;  %3088 = vmatpush.msrb.mxu1 %v6976_v33 }
 0xa6c   :  { %3108 = vmatpush.msrb.mxu2 %v6979_v37  ;;  %3128 = vmatpush.msrb.mxu3 %v6982_v19 }
 0xa6d   :  { %3069 = vmatpush.msrb.mxu0 %v6985_v31  ;;  %3089 = vmatpush.msrb.mxu1 %v6988_v12  ;;  %v2730_v31 = vld [vmem:[#allocation2 + $0x60] sm:$0xc0] }
 0xa6e   :  { %3109 = vmatpush.msrb.mxu2 %v6991_v9  ;;  %3129 = vmatpush.msrb.mxu3 %v6994_v40 }
 0xa6f   :  { %3070 = vmatpush.msrb.mxu0 %v6997_v44  ;;  %3090 = vmatpush.msrb.mxu1 %v7000_v45  ;;  %v2728_v45 = vld [vmem:[#allocation2 + $0x10] sm:$0xc0] }
 0xa70   :  { %3110 = vmatpush.msrb.mxu2 %v7003_v41  ;;  %3130 = vmatpush.msrb.mxu3 %v7006_v21  ;;  %v2727_v41 = vld [vmem:[#allocation2 + $0x58] sm:$0xc0] }
 0xa71   :  { %3071 = vmatpush.msrb.mxu0 %v7009_v22  ;;  %3091 = vmatpush.msrb.mxu1 %v7012_v53  ;;  %v7030_v53 = vld [vmem:[#allocation8 + $0x18] sm:$0xff] }
 0xa72   :  { %3111 = vmatpush.msrb.mxu2 %v7015_v13  ;;  %3131 = vmatpush.msrb.mxu3 %v7018_v4  ;;  %7928 = vst [vmem:[#allocation44_spill] sm:$0xff] %v7030_v53 }
 0xa73   :  { %3072 = vmatpush.msrb.mxu0 %v7021_v36  ;;  %3092 = vmatpush.msrb.mxu1 %v7024_v52 }
 0xa74   :  { %3112 = vmatpush.msrb.mxu2 %v7027_v30  ;;  %3132 = vmatpush.msrb.mxu3 %v7030_v53 }
 0xad0   :  { %v2751_v13 = vpop.f32.mrf.mxu0  ;;  %v2771_v22 = vpop.f32.mrf.mxu1 }
 0xad1   :  { %v2818_v21 = vrot.slane %v2751_v13, 2  ;;  %v2819_v4 = vrot.slane %v2771_v22, 2 }
 0xad3   :  { %v2826_v44 = vadd.f32 %v2818_v21, %v2727_v41  ;;  %v2827_v36 = vadd.f32 %v2819_v4, %v2728_v45  ;;  %v2729_v45 = vld [vmem:[#allocation2 + $0x98] sm:$0xc0] }
 0xad5   :  { %v4378_v40 = vmul.f32 -1.442695, %v2826_v44  ;;  %v4380_v9 = vmul.f32 -1.442695, %v2827_v36 }
 0xad7   :  { %4645 = vpow2.f32 %v4378_v40  ;;  %v2811_v52 = vpop.f32.mrf.mxu3  ;;  %v2791_v13 = vpop.f32.mrf.mxu2 }
 0xad8   :  { %4647 = vpow2.f32 %v4380_v9  ;;  %v2821_v12 = vrot.slane %v2811_v52, 2  ;;  %v2820_v22 = vrot.slane %v2791_v13, 2 }
 0xada   :  { %v2829_v30 = vadd.f32 %v2821_v12, %v2730_v31  ;;  %v2828_v40 = vadd.f32 %v2820_v22, %v2729_v45 }
 0xadc   :  { %v4379_v19 = vmul.f32 -1.442695, %v2829_v30 }
 0xadd   :  { %v4646_v37 = vpop.eup %4645 }
 0xade   :  { %v4648_v33 = vpop.eup %4647  ;;  %v2833_v53 = vadd.f32 1.0, %v4646_v37  ;;  %4649 = vpow2.f32 %v4379_v19 }
 0xadf   :  { %v2873_v35 = vadd.f32 1.0, %v4648_v33 }
 0xae0   :  { %4651 = vrcp.f32 %v2833_v53  ;;  %v2845_v52 = vand.u32 2147483648, %v2833_v53  ;;  %v2843_v33 = vand.u32 2147483647, %v2833_v53  ;;  %vm2839_vm2 = vweird.f32 %v2833_v53 }
 0xae1   :  { %4653 = vrcp.f32 %v2873_v35  ;;  %v2885_v37 = vand.u32 2147483648, %v2873_v35  ;;  %v2883_v13 = vand.u32 2147483647, %v2873_v35  ;;  %vm2879_vm3 = vweird.f32 %v2873_v35 }
 0xae2   :  { %v2846_v22 = vor.u32 1.1754944e-38, %v2845_v52  ;;  %vm2844_vm6 = vcmp.eq.f32.partialorder %v2843_v33, 8.507059e+37 }
 0xae3   :  { %vm2884_vm7 = vcmp.eq.f32.partialorder %v2883_v13, 8.507059e+37  ;;  %v7934_v13 = vld [vmem:[#allocation24_spill] sm:$0xff] }
 0xae4   :  { %v4650_v41 = vpop.eup %4649 }
 0xae5   :  { %v2853_v44 = vadd.f32 1.0, %v4650_v41 }
 0xae6   :  { %v4652_v21 = vpop.eup %4651 }
 0xae7   :  { %v4654_v4 = vpop.eup %4653  ;;  %v2835_v9 = vmul.f32 %v4652_v21, %v2833_v53  ;;  %4655 = vrcp.f32 %v2853_v44  ;;  %vm2840_vm0 = vweird.f32 %v4652_v21  ;;  %vm2859_vm9 = vweird.f32 %v2853_v44 }
 0xae8   :  { %v2875_v36 = vmul.f32 %v4654_v4, %v2873_v35  ;;  %4657 = vtanh.f32 %v2828_v40  ;;  %vm2880_vm1 = vweird.f32 %v4654_v4  ;;  %vm2841_vm4 = vmor %vm2839_vm2, %vm2840_vm0 }
 0xae9   :  { %v2836_v31 = vsub.f32 1.0, %v2835_v9  ;;  %v2890_v9 = vrot.slane %v6838_v60, 6  ;;  %vm2881_vm5 = vmor %vm2879_vm3, %vm2880_vm1  ;;  %v2865_v60 = vand.u32 2147483648, %v2853_v44 }
 0xaea   :  { %v2876_v12 = vsub.f32 1.0, %v2875_v36  ;;  %v2886_v36 = vor.u32 1.1754944e-38, %v2885_v37  ;;  %v2863_v37 = vand.u32 2147483647, %v2853_v44 }
 0xaeb   :  { %v2837_v19 = vmul.f32 %v4652_v21, %v2836_v31 }
 0xaec   :  { %v2877_v30 = vmul.f32 %v4654_v4, %v2876_v12  ;;  %vm2864_vm11 = vcmp.eq.f32.partialorder %v2863_v37, 8.507059e+37  ;;  %v7947_v37 = vld [vmem:[#allocation32_spill] sm:$0xff] }
 0xaed   :  { %v4656_v6 = vpop.eup %4655  ;;  %v2838_v38 = vadd.f32 %v4652_v21, %v2837_v19 }
 0xaee   :  { %v2878_v41 = vadd.f32 %v4654_v4, %v2877_v30  ;;  %v2855_v45 = vmul.f32 %v4656_v6, %v2853_v44  ;;  %v4658_v31 = vpop.eup %4657  ;;  %vm2860_vm8 = vweird.f32 %v4656_v6  ;;  %v7933_v44 = vld [vmem:[#allocation21_spill] sm:$0xff] }
 0xaef   :  { %v2842_v40 = vsel %vm2841_vm4, %v4652_v21, %v2838_v38  ;;  %vm2861_vm10 = vmor %vm2859_vm9, %vm2860_vm8  ;;  %v2866_v21 = vor.u32 1.1754944e-38, %v2865_v60  ;;  %v7946_v60 = vld [vmem:[#allocation37_spill] sm:$0xff] }
 0xaf0   :  { %v2847_v7 = vsel %vm2844_vm6, %v2846_v22, %v2842_v40  ;;  %v2882_v28 = vsel %vm2881_vm5, %v4654_v4, %v2878_v41  ;;  %v2856_v12 = vsub.f32 1.0, %v2855_v45  ;;  %v7935_v22 = vld [vmem:[#allocation22_spill] sm:$0xff]  ;;  %v7936_v41 = vld [vmem:[#allocation23_spill] sm:$0xff]  ;;  %v7937_v45 = vld [vmem:[#allocation29_spill] sm:$0xff] }
 0xaf1   :  { %v2869_v17 = vmul.f32 %v4658_v31, %v2847_v7  ;;  %v2887_v15 = vsel %vm2884_vm7, %v2886_v36, %v2882_v28  ;;  %v7931_v28 = vld [vmem:[#allocation19_spill] sm:$0xff]  ;;  %v7940_v40 = vld [vmem:[#allocation28_spill] sm:$0xff] }
 0xaf2   :  { %v2892_v19 = vmul.f32 %v2890_v9, %v2887_v15  ;;  %v2857_v53 = vmul.f32 %v4656_v6, %v2856_v12  ;;  %v7929_v15 = vld [vmem:[#allocation57_spill] sm:$0xff]  ;;  %v7939_v36 = vld [vmem:[#allocation31_spill] sm:$0xff]  ;;  %v7942_v12 = vld [vmem:[#allocation30_spill] sm:$0xff] }
 0xaf3   :  { %v7938_v9 = vld [vmem:[#allocation25_spill] sm:$0xff]  ;;  %v7941_v31 = vld [vmem:[#allocation27_spill] sm:$0xff] }
 0xaf4   :  { %v7034_v35 = vadd.f32 %v2892_v19, %v2869_v17  ;;  %v2858_v52 = vadd.f32 %v4656_v6, %v2857_v53  ;;  %v7930_v17 = vld [vmem:[#allocation58_spill] sm:$0xff] }
 0xaf5   :  { %v7943_v19 = vld [vmem:[#allocation42_spill] sm:$0xff] }
 0xaf6   :  { %4659 = vtanh.f32 %v7034_v35  ;;  %v2862_v38 = vsel %vm2861_vm10, %v4656_v6, %v2858_v52  ;;  %v7932_v6 = vld [vmem:[#allocation20_spill] sm:$0xff]  ;;  %v7944_v53 = vld [vmem:[#allocation34_spill] sm:$0xff] }
 0xaf7   :  { %v2867_v33 = vsel %vm2864_vm11, %v2866_v21, %v2862_v38  ;;  %v7945_v52 = vld [vmem:[#allocation26_spill] sm:$0xff]  ;;  %v7948_v38 = vld [vmem:[#allocation33_spill] sm:$0xff]  ;;  %v7949_v21 = vld [vmem:[#allocation40_spill] sm:$0xff] }
 0xafc   :  { %v4660_v4 = vpop.eup %4659 }
 0xafd   :  { %v2895_v30 = vmul.f32 %v4660_v4, %v2867_v33  ;;  %v7950_v4 = vld [vmem:[#allocation41_spill] sm:$0xff]  ;;  %v7951_v33 = vld [vmem:[#allocation35_spill] sm:$0xff] }
 0xaff   :  { %v2901_v7 = vrot.slane %v2895_v30, 6  ;;  %v7952_v30 = vld [vmem:[#allocation36_spill] sm:$0xff] }
 0xb01   :  { %2919 = vmatmul.f32.vlgmr.msra.gmra.mxu0 %v2901_v7  ;;  %2939 = vmatmul.f32.vlgmr.msra.gmra.mxu1 %v2901_v7 }
 0xb02   :  { %2959 = vmatmul.f32.vlgmr.msra.gmra.mxu2 %v2901_v7  ;;  %2979 = vmatmul.f32.vlgmr.msra.gmra.mxu3 %v2901_v7  ;;  %v7953_v7 = vld [vmem:[#allocation43_spill] sm:$0xff] }
 0xb03   :  { %3226 = vmatpush.msra.mxu0 %v6841_v10  ;;  %3246 = vmatpush.msra.mxu1 %v6844_v18 }
 0xb04   :  { %3266 = vmatpush.msra.mxu2 %v6847_v62  ;;  %3286 = vmatpush.msra.mxu3 %v6850_v48 }
 0xb05   :  { %3227 = vmatpush.msra.mxu0 %v6853_v59  ;;  %3247 = vmatpush.msra.mxu1 %v6856_v47 }
 0xb06   :  { %3267 = vmatpush.msra.mxu2 %v6859_v49  ;;  %3287 = vmatpush.msra.mxu3 %v6862_v50 }
 0xb07   :  { %3228 = vmatpush.msra.mxu0 %v6865_v46  ;;  %3248 = vmatpush.msra.mxu1 %v6868_v39 }
 0xb08   :  { %3268 = vmatpush.msra.mxu2 %v6871_v42  ;;  %3288 = vmatpush.msra.mxu3 %v6874_v63 }
 0xb09   :  { %3229 = vmatpush.msra.mxu0 %v6877_v51  ;;  %3249 = vmatpush.msra.mxu1 %v6880_v5 }
 0xb0a   :  { %3269 = vmatpush.msra.mxu2 %v6883_v56  ;;  %3289 = vmatpush.msra.mxu3 %v6886_v55 }
 0xb0b   :  { %3230 = vmatpush.msra.mxu0 %v6889_v24  ;;  %3250 = vmatpush.msra.mxu1 %v6892_v32 }
 0xb0c   :  { %3270 = vmatpush.msra.mxu2 %v6895_v57  ;;  %3290 = vmatpush.msra.mxu3 %v6898_v3 }
 0xb0d   :  { %3231 = vmatpush.msra.mxu0 %v6901_v0  ;;  %3251 = vmatpush.msra.mxu1 %v6904_v8 }
 0xb0e   :  { %3271 = vmatpush.msra.mxu2 %v6907_v2  ;;  %3291 = vmatpush.msra.mxu3 %v6910_v58 }
 0xb0f   :  { %3232 = vmatpush.msra.mxu0 %v6913_v1  ;;  %3252 = vmatpush.msra.mxu1 %v6916_v43 }
 0xb10   :  { %3272 = vmatpush.msra.mxu2 %v6919_v54  ;;  %3292 = vmatpush.msra.mxu3 %v6922_v26 }
 0xb11   :  { %3233 = vmatpush.msra.mxu0 %v6925_v34  ;;  %3253 = vmatpush.msra.mxu1 %v6928_v11 }
 0xb12   :  { %3273 = vmatpush.msra.mxu2 %v6931_v61  ;;  %3293 = vmatpush.msra.mxu3 %v6934_v14 }
 0xb13   :  { %3234 = vmatpush.msra.mxu0 %v6937_v16  ;;  %3254 = vmatpush.msra.mxu1 %v6940_v23 }
 0xb14   :  { %3274 = vmatpush.msra.mxu2 %v6943_v25  ;;  %3294 = vmatpush.msra.mxu3 %v6946_v20 }
 0xb15   :  { %3235 = vmatpush.msra.mxu0 %v6949_v29  ;;  %3255 = vmatpush.msra.mxu1 %v6952_v27 }
 0xb16   :  { %3275 = vmatpush.msra.mxu2 %v7929_v15  ;;  %3295 = vmatpush.msra.mxu3 %v7930_v17 }
 0xb17   :  { %3236 = vmatpush.msra.mxu0 %v7931_v28  ;;  %3256 = vmatpush.msra.mxu1 %v7932_v6 }
 0xb18   :  { %3276 = vmatpush.msra.mxu2 %v7933_v44  ;;  %3296 = vmatpush.msra.mxu3 %v7934_v13 }
 0xb19   :  { %3237 = vmatpush.msra.mxu0 %v7935_v22  ;;  %3257 = vmatpush.msra.mxu1 %v7936_v41  ;;  %v2898_v22 = vld [vmem:[#allocation2 + $0x70] sm:$0x3] }
 0xb1a   :  { %3277 = vmatpush.msra.mxu2 %v7937_v45  ;;  %3297 = vmatpush.msra.mxu3 %v7938_v9 }
 0xb1b   :  { %3238 = vmatpush.msra.mxu0 %v7939_v36  ;;  %3258 = vmatpush.msra.mxu1 %v7940_v40 }
 0xb1c   :  { %3278 = vmatpush.msra.mxu2 %v7941_v31  ;;  %3298 = vmatpush.msra.mxu3 %v7942_v12  ;;  %v2897_v12 = vld [vmem:[#allocation2 + $0x48] sm:$0x3] }
 0xb1d   :  { %3239 = vmatpush.msra.mxu0 %v7943_v19  ;;  %3259 = vmatpush.msra.mxu1 %v7944_v53  ;;  %v7954_v19 = vld [vmem:[#allocation44_spill] sm:$0xff]  ;;  %v2896_v53 = vld [vmem:[#allocation2 + $0x20] sm:$0x3] }
 0xb1e   :  { %3279 = vmatpush.msra.mxu2 %v7945_v52  ;;  %3299 = vmatpush.msra.mxu3 %v7946_v60 }
 0xb1f   :  { %3240 = vmatpush.msra.mxu0 %v7947_v37  ;;  %3260 = vmatpush.msra.mxu1 %v7948_v38 }
 0xb20   :  { %3280 = vmatpush.msra.mxu2 %v7949_v21  ;;  %3300 = vmatpush.msra.mxu3 %v7950_v4  ;;  %v2899_v21 = vld [vmem:[#allocation2 + $0x90] sm:$0x3] }
 0xb21   :  { %3241 = vmatpush.msra.mxu0 %v7951_v33  ;;  %3261 = vmatpush.msra.mxu1 %v7952_v30 }
 0xb22   :  { %3281 = vmatpush.msra.mxu2 %v7953_v7  ;;  %3301 = vmatpush.msra.mxu3 %v7954_v19 }
 0xb7e   :  { %v2920_v52 = vpop.f32.mrf.mxu0  ;;  %v2940_v60 = vpop.f32.mrf.mxu1 }
 0xb7f   :  { %v2983_v31 = vadd.f32 %v2920_v52, %v2896_v53  ;;  %v2984_v37 = vadd.f32 %v2940_v60, %v2897_v12 }
 0xb81   :  { %v4381_v40 = vmul.f32 -1.442695, %v2983_v31  ;;  %v4383_v38 = vmul.f32 -1.442695, %v2984_v37 }
 0xb83   :  { %4661 = vpow2.f32 %v4381_v40 }
 0xb84   :  { %4663 = vpow2.f32 %v4383_v38 }
 0xb85   :  { %v2980_v4 = vpop.f32.mrf.mxu3  ;;  %v2960_v19 = vpop.f32.mrf.mxu2 }
 0xb86   :  { %v2986_v36 = vadd.f32 %v2980_v4, %v2899_v21  ;;  %v2985_v31 = vadd.f32 %v2960_v19, %v2898_v22 }
 0xb88   :  { %v4382_v33 = vmul.f32 -1.442695, %v2986_v36 }
 0xb89   :  { %v4662_v9 = vpop.eup %4661 }
 0xb8a   :  { %v4664_v30 = vpop.eup %4663  ;;  %v2990_v45 = vadd.f32 1.0, %v4662_v9  ;;  %4665 = vpow2.f32 %v4382_v33 }
 0xb8b   :  { %v3030_v7 = vadd.f32 1.0, %v4664_v30 }
 0xb8c   :  { %4667 = vrcp.f32 %v2990_v45  ;;  %v3002_v36 = vand.u32 2147483648, %v2990_v45  ;;  %v3000_v4 = vand.u32 2147483647, %v2990_v45  ;;  %vm2996_vm14 = vweird.f32 %v2990_v45 }
 0xb8d   :  { %4669 = vrcp.f32 %v3030_v7  ;;  %v3042_v21 = vand.u32 2147483648, %v3030_v7  ;;  %v3040_v30 = vand.u32 2147483647, %v3030_v7  ;;  %vm3036_vm15 = vweird.f32 %v3030_v7 }
 0xb8e   :  { %v3003_v22 = vor.u32 1.1754944e-38, %v3002_v36  ;;  %vm3001_vm2 = vcmp.eq.f32.partialorder %v3000_v4, 8.507059e+37 }
 0xb8f   :  { %vm3041_vm3 = vcmp.eq.f32.partialorder %v3040_v30, 8.507059e+37 }
 0xb90   :  { %v4666_v41 = vpop.eup %4665 }
 0xb91   :  { %v3010_v53 = vadd.f32 1.0, %v4666_v41 }
 0xb92   :  { %v4668_v12 = vpop.eup %4667 }
 0xb93   :  { %v4670_v52 = vpop.eup %4669  ;;  %v2992_v40 = vmul.f32 %v4668_v12, %v2990_v45  ;;  %4671 = vrcp.f32 %v3010_v53  ;;  %vm2997_vm12 = vweird.f32 %v4668_v12  ;;  %vm3016_vm5 = vweird.f32 %v3010_v53 }
 0xb94   :  { %v3032_v60 = vmul.f32 %v4670_v52, %v3030_v7  ;;  %4673 = vtanh.f32 %v2985_v31  ;;  %vm3037_vm13 = vweird.f32 %v4670_v52  ;;  %vm2998_vm0 = vmor %vm2996_vm14, %vm2997_vm12  ;;  %v3047_v31 = vrot.slane %v7034_v35, 6 }
 0xb95   :  { %v2993_v37 = vsub.f32 1.0, %v2992_v40  ;;  %vm3038_vm1 = vmor %vm3036_vm15, %vm3037_vm13  ;;  %v3043_v40 = vor.u32 1.1754944e-38, %v3042_v21  ;;  %v3022_v21 = vand.u32 2147483648, %v3010_v53 }
 0xb96   :  { %v3033_v38 = vsub.f32 1.0, %v3032_v60 }
 0xb97   :  { %v2994_v9 = vmul.f32 %v4668_v12, %v2993_v37 }
 0xb98   :  { %v3034_v33 = vmul.f32 %v4670_v52, %v3033_v38 }
 0xb99   :  { %v4672_v13 = vpop.eup %4671  ;;  %v2995_v44 = vadd.f32 %v4668_v12, %v2994_v9 }
 0xb9a   :  { %v3035_v41 = vadd.f32 %v4670_v52, %v3034_v33  ;;  %v3012_v19 = vmul.f32 %v4672_v13, %v3010_v53  ;;  %v4674_v37 = vpop.eup %4673  ;;  %vm3017_vm4 = vweird.f32 %v4672_v13 }
 0xb9b   :  { %v2999_v60 = vsel %vm2998_vm0, %v4668_v12, %v2995_v44  ;;  %v3020_v44 = vand.u32 2147483647, %v3010_v53  ;;  %vm3018_vm6 = vmor %vm3016_vm5, %vm3017_vm4  ;;  %v3023_v12 = vor.u32 1.1754944e-38, %v3022_v21 }
 0xb9c   :  { %v3004_v6 = vsel %vm3001_vm2, %v3003_v22, %v2999_v60  ;;  %v3039_v28 = vsel %vm3038_vm1, %v4670_v52, %v3035_v41  ;;  %v3013_v38 = vsub.f32 1.0, %v3012_v19 }
 0xb9d   :  { %v3026_v17 = vmul.f32 %v4674_v37, %v3004_v6  ;;  %v3044_v15 = vsel %vm3041_vm3, %v3043_v40, %v3039_v28  ;;  %vm3021_vm7 = vcmp.eq.f32.partialorder %v3020_v44, 8.507059e+37  ;;  %v3055_v40 = vld [vmem:[#allocation2 + $0x70] sm:$0xc] }
 0xb9e   :  { %v3049_v9 = vmul.f32 %v3047_v31, %v3044_v15  ;;  %v3014_v45 = vmul.f32 %v4672_v13, %v3013_v38  ;;  %v3056_v15 = vld [vmem:[#allocation2 + $0x90] sm:$0xc] }
 0xba0   :  { %v7102_v7 = vadd.f32 %v3049_v9, %v3026_v17  ;;  %v3015_v36 = vadd.f32 %v4672_v13, %v3014_v45 }
 0xba2   :  { %4675 = vtanh.f32 %v7102_v7  ;;  %v3019_v35 = vsel %vm3018_vm6, %v4672_v13, %v3015_v36 }
 0xba3   :  { %v3024_v4 = vsel %vm3021_vm7, %v3023_v12, %v3019_v35 }
 0xba8   :  { %v4676_v52 = vpop.eup %4675 }
 0xba9   :  { %v3052_v33 = vmul.f32 %v4676_v52, %v3024_v4 }
 0xbab   :  { %3073 = vmatmul.f32.vlgmr.msrb.gmra.mxu0 %v3052_v33  ;;  %3093 = vmatmul.f32.vlgmr.msrb.gmra.mxu1 %v3052_v33 }
 0xbac   :  { %3113 = vmatmul.f32.vlgmr.msrb.gmra.mxu2 %v3052_v33  ;;  %3133 = vmatmul.f32.vlgmr.msrb.gmra.mxu3 %v3052_v33 }
 0xbad   :  { %3395 = vmatpush.msrb.mxu0 %v6841_v10  ;;  %3415 = vmatpush.msrb.mxu1 %v6844_v18  ;;  %v7955_v10 = vld [vmem:[#allocation57_spill] sm:$0xff]  ;;  %v7956_v18 = vld [vmem:[#allocation58_spill] sm:$0xff] }
 0xbae   :  { %3435 = vmatpush.msrb.mxu2 %v6847_v62  ;;  %3455 = vmatpush.msrb.mxu3 %v6850_v48  ;;  %v7957_v62 = vld [vmem:[#allocation19_spill] sm:$0xff]  ;;  %v7958_v48 = vld [vmem:[#allocation20_spill] sm:$0xff] }
 0xbaf   :  { %3396 = vmatpush.msrb.mxu0 %v6853_v59  ;;  %3416 = vmatpush.msrb.mxu1 %v6856_v47  ;;  %v7959_v59 = vld [vmem:[#allocation21_spill] sm:$0xff]  ;;  %v7960_v47 = vld [vmem:[#allocation24_spill] sm:$0xff] }
 0xbb0   :  { %3436 = vmatpush.msrb.mxu2 %v6859_v49  ;;  %3456 = vmatpush.msrb.mxu3 %v6862_v50  ;;  %v7961_v49 = vld [vmem:[#allocation22_spill] sm:$0xff]  ;;  %v7962_v50 = vld [vmem:[#allocation23_spill] sm:$0xff] }
 0xbb1   :  { %3397 = vmatpush.msrb.mxu0 %v6865_v46  ;;  %3417 = vmatpush.msrb.mxu1 %v6868_v39  ;;  %v7963_v46 = vld [vmem:[#allocation29_spill] sm:$0xff] }
 0xbb2   :  { %3437 = vmatpush.msrb.mxu2 %v6871_v42  ;;  %3457 = vmatpush.msrb.mxu3 %v6874_v63  ;;  %v7964_v39 = vld [vmem:[#allocation25_spill] sm:$0xff]  ;;  %v7965_v42 = vld [vmem:[#allocation31_spill] sm:$0xff]  ;;  %v7966_v63 = vld [vmem:[#allocation28_spill] sm:$0xff] }
 0xbb3   :  { %3398 = vmatpush.msrb.mxu0 %v6877_v51  ;;  %3418 = vmatpush.msrb.mxu1 %v6880_v5  ;;  %v7967_v51 = vld [vmem:[#allocation27_spill] sm:$0xff]  ;;  %v7968_v5 = vld [vmem:[#allocation30_spill] sm:$0xff] }
 0xbb4   :  { %3438 = vmatpush.msrb.mxu2 %v6883_v56  ;;  %3458 = vmatpush.msrb.mxu3 %v6886_v55  ;;  %v7969_v56 = vld [vmem:[#allocation42_spill] sm:$0xff] }
 0xbb5   :  { %3399 = vmatpush.msrb.mxu0 %v6889_v24  ;;  %3419 = vmatpush.msrb.mxu1 %v6892_v32  ;;  %v7970_v55 = vld [vmem:[#allocation34_spill] sm:$0xff]  ;;  %v7972_v32 = vld [vmem:[#allocation37_spill] sm:$0xff] }
 0xbb6   :  { %3439 = vmatpush.msrb.mxu2 %v6895_v57  ;;  %3459 = vmatpush.msrb.mxu3 %v6898_v3  ;;  %v7971_v24 = vld [vmem:[#allocation26_spill] sm:$0xff]  ;;  %v7973_v57 = vld [vmem:[#allocation32_spill] sm:$0xff]  ;;  %v7974_v3 = vld [vmem:[#allocation33_spill] sm:$0xff] }
 0xbb7   :  { %3400 = vmatpush.msrb.mxu0 %v6901_v0  ;;  %3420 = vmatpush.msrb.mxu1 %v6904_v8  ;;  %v7975_v0 = vld [vmem:[#allocation40_spill] sm:$0xff]  ;;  %v7976_v8 = vld [vmem:[#allocation41_spill] sm:$0xff] }
 0xbb8   :  { %3440 = vmatpush.msrb.mxu2 %v6907_v2  ;;  %3460 = vmatpush.msrb.mxu3 %v6910_v58  ;;  %v7977_v2 = vld [vmem:[#allocation35_spill] sm:$0xff]  ;;  %v7978_v58 = vld [vmem:[#allocation36_spill] sm:$0xff] }
 0xbb9   :  { %3401 = vmatpush.msrb.mxu0 %v6913_v1  ;;  %3421 = vmatpush.msrb.mxu1 %v6916_v43  ;;  %v7979_v1 = vld [vmem:[#allocation43_spill] sm:$0xff]  ;;  %v7980_v43 = vld [vmem:[#allocation44_spill] sm:$0xff] }
 0xbba   :  { %3441 = vmatpush.msrb.mxu2 %v6919_v54  ;;  %3461 = vmatpush.msrb.mxu3 %v6922_v26 }
 0xbbb   :  { %3402 = vmatpush.msrb.mxu0 %v6925_v34  ;;  %3422 = vmatpush.msrb.mxu1 %v6928_v11 }
 0xbbc   :  { %3442 = vmatpush.msrb.mxu2 %v6931_v61  ;;  %3462 = vmatpush.msrb.mxu3 %v6934_v14  ;;  %v3053_v61 = vld [vmem:[#allocation2 + $0x20] sm:$0xc]  ;;  %v3054_v14 = vld [vmem:[#allocation2 + $0x48] sm:$0xc] }
 0xbbd   :  { %3403 = vmatpush.msrb.mxu0 %v6937_v16  ;;  %3423 = vmatpush.msrb.mxu1 %v6940_v23 }
 0xbbe   :  { %3443 = vmatpush.msrb.mxu2 %v6943_v25  ;;  %3463 = vmatpush.msrb.mxu3 %v6946_v20 }
 0xbbf   :  { %3404 = vmatpush.msrb.mxu0 %v6949_v29  ;;  %3424 = vmatpush.msrb.mxu1 %v6952_v27 }
 0xbc0   :  { %3444 = vmatpush.msrb.mxu2 %v7955_v10  ;;  %3464 = vmatpush.msrb.mxu3 %v7956_v18 }
 0xbc1   :  { %3405 = vmatpush.msrb.mxu0 %v7957_v62  ;;  %3425 = vmatpush.msrb.mxu1 %v7958_v48 }
 0xbc2   :  { %3445 = vmatpush.msrb.mxu2 %v7959_v59  ;;  %3465 = vmatpush.msrb.mxu3 %v7960_v47  ;;  %v3213_v47 = vrot.slane %v7102_v7, 6 }
 0xbc3   :  { %3406 = vmatpush.msrb.mxu0 %v7961_v49  ;;  %3426 = vmatpush.msrb.mxu1 %v7962_v50 }
 0xbc4   :  { %3446 = vmatpush.msrb.mxu2 %v7963_v46  ;;  %3466 = vmatpush.msrb.mxu3 %v7964_v39 }
 0xbc5   :  { %3407 = vmatpush.msrb.mxu0 %v7965_v42  ;;  %3427 = vmatpush.msrb.mxu1 %v7966_v63 }
 0xbc6   :  { %3447 = vmatpush.msrb.mxu2 %v7967_v51  ;;  %3467 = vmatpush.msrb.mxu3 %v7968_v5 }
 0xbc7   :  { %3408 = vmatpush.msrb.mxu0 %v7969_v56  ;;  %3428 = vmatpush.msrb.mxu1 %v7970_v55 }
 0xbc8   :  { %3448 = vmatpush.msrb.mxu2 %v7971_v24  ;;  %3468 = vmatpush.msrb.mxu3 %v7972_v32 }
 0xbc9   :  { %3409 = vmatpush.msrb.mxu0 %v7973_v57  ;;  %3429 = vmatpush.msrb.mxu1 %v7974_v3 }
 0xbca   :  { %3449 = vmatpush.msrb.mxu2 %v7975_v0  ;;  %3469 = vmatpush.msrb.mxu3 %v7976_v8 }
 0xbcb   :  { %3410 = vmatpush.msrb.mxu0 %v7977_v2  ;;  %3430 = vmatpush.msrb.mxu1 %v7978_v58 }
 0xbcc   :  { %3450 = vmatpush.msrb.mxu2 %v7979_v1  ;;  %3470 = vmatpush.msrb.mxu3 %v7980_v43 }
 0xc28   :  { %v3074_v54 = vpop.f32.mrf.mxu0  ;;  %v3094_v26 = vpop.f32.mrf.mxu1 }
 0xc29   :  { %v3141_v34 = vrot.slane %v3074_v54, 6  ;;  %v3142_v11 = vrot.slane %v3094_v26, 6 }
 0xc2b   :  { %v3149_v16 = vadd.f32 %v3141_v34, %v3053_v61  ;;  %v3150_v23 = vadd.f32 %v3142_v11, %v3054_v14  ;;  %v3219_v11 = vld [vmem:[#allocation2 + $0x20] sm:$0x30]  ;;  %v3220_v61 = vld [vmem:[#allocation2 + $0x48] sm:$0x30] }
 0xc2d   :  { %v4384_v25 = vmul.f32 -1.442695, %v3149_v16  ;;  %v4386_v20 = vmul.f32 -1.442695, %v3150_v23 }
 0xc2f   :  { %4677 = vpow2.f32 %v4384_v25  ;;  %v3134_v29 = vpop.f32.mrf.mxu3  ;;  %v3114_v22 = vpop.f32.mrf.mxu2 }
 0xc30   :  { %4679 = vpow2.f32 %v4386_v20  ;;  %v3144_v27 = vrot.slane %v3134_v29, 6  ;;  %v3143_v41 = vrot.slane %v3114_v22, 6 }
 0xc32   :  { %v3152_v17 = vadd.f32 %v3144_v27, %v3056_v15  ;;  %v3151_v37 = vadd.f32 %v3143_v41, %v3055_v40  ;;  %v3222_v27 = vld [vmem:[#allocation2 + $0x90] sm:$0x30] }
 0xc34   :  { %v4385_v28 = vmul.f32 -1.442695, %v3152_v17 }
 0xc35   :  { %v4678_v6 = vpop.eup %4677 }
 0xc36   :  { %v4680_v13 = vpop.eup %4679  ;;  %v3156_v53 = vadd.f32 1.0, %v4678_v6  ;;  %4681 = vpow2.f32 %v4385_v28 }
 0xc37   :  { %v3196_v30 = vadd.f32 1.0, %v4680_v13 }
 0xc38   :  { %4683 = vrcp.f32 %v3156_v53  ;;  %v3168_v44 = vand.u32 2147483648, %v3156_v53  ;;  %v3166_v52 = vand.u32 2147483647, %v3156_v53  ;;  %vm3162_vm10 = vweird.f32 %v3156_v53 }
 0xc39   :  { %4685 = vrcp.f32 %v3196_v30  ;;  %v3208_v35 = vand.u32 2147483648, %v3196_v30  ;;  %v3206_v33 = vand.u32 2147483647, %v3196_v30  ;;  %vm3202_vm11 = vweird.f32 %v3196_v30 }
 0xc3a   :  { %v3169_v62 = vor.u32 1.1754944e-38, %v3168_v44  ;;  %vm3167_vm14 = vcmp.eq.f32.partialorder %v3166_v52, 8.507059e+37 }
 0xc3b   :  { %v3209_v49 = vor.u32 1.1754944e-38, %v3208_v35  ;;  %vm3207_vm15 = vcmp.eq.f32.partialorder %v3206_v33, 8.507059e+37 }
 0xc3c   :  { %v4682_v19 = vpop.eup %4681 }
 0xc3d   :  { %v3176_v60 = vadd.f32 1.0, %v4682_v19  ;;  %v3221_v19 = vld [vmem:[#allocation2 + $0x70] sm:$0x30] }
 0xc3e   :  { %v4684_v31 = vpop.eup %4683 }
 0xc3f   :  { %v4686_v38 = vpop.eup %4685  ;;  %v3158_v9 = vmul.f32 %v4684_v31, %v3156_v53  ;;  %4687 = vrcp.f32 %v3176_v60  ;;  %vm3163_vm8 = vweird.f32 %v4684_v31  ;;  %v3188_v7 = vand.u32 2147483648, %v3176_v60 }
 0xc40   :  { %v3198_v45 = vmul.f32 %v4686_v38, %v3196_v30  ;;  %4689 = vtanh.f32 %v3151_v37  ;;  %vm3203_vm9 = vweird.f32 %v4686_v38  ;;  %vm3164_vm12 = vmor %vm3162_vm10, %vm3163_vm8  ;;  %vm3182_vm1 = vweird.f32 %v3176_v60 }
 0xc41   :  { %v3159_v36 = vsub.f32 1.0, %v3158_v9  ;;  %vm3204_vm13 = vmor %vm3202_vm11, %vm3203_vm9  ;;  %v3186_v57 = vand.u32 2147483647, %v3176_v60  ;;  %v3189_v0 = vor.u32 1.1754944e-38, %v3188_v7 }
 0xc42   :  { %v3199_v21 = vsub.f32 1.0, %v3198_v45 }
 0xc43   :  { %v3160_v12 = vmul.f32 %v4684_v31, %v3159_v36  ;;  %vm3187_vm3 = vcmp.eq.f32.partialorder %v3186_v57, 8.507059e+37 }
 0xc44   :  { %v3200_v4 = vmul.f32 %v4686_v38, %v3199_v21 }
 0xc45   :  { %v4688_v10 = vpop.eup %4687  ;;  %v3161_v18 = vadd.f32 %v4684_v31, %v3160_v12 }
 0xc46   :  { %v3201_v48 = vadd.f32 %v4686_v38, %v3200_v4  ;;  %v3178_v59 = vmul.f32 %v4688_v10, %v3176_v60  ;;  %v4690_v46 = vpop.eup %4689  ;;  %vm3183_vm0 = vweird.f32 %v4688_v10 }
 0xc47   :  { %v3165_v50 = vsel %vm3164_vm12, %v4684_v31, %v3161_v18  ;;  %vm3184_vm2 = vmor %vm3182_vm1, %vm3183_vm0 }
 0xc48   :  { %v3170_v39 = vsel %vm3167_vm14, %v3169_v62, %v3165_v50  ;;  %v3205_v42 = vsel %vm3204_vm13, %v4686_v38, %v3201_v48  ;;  %v3179_v63 = vsub.f32 1.0, %v3178_v59 }
 0xc49   :  { %v3192_v51 = vmul.f32 %v4690_v46, %v3170_v39  ;;  %v3210_v5 = vsel %vm3207_vm15, %v3209_v49, %v3205_v42 }
 0xc4a   :  { %v3215_v56 = vmul.f32 %v3213_v47, %v3210_v5  ;;  %v3180_v55 = vmul.f32 %v4688_v10, %v3179_v63 }
 0xc4c   :  { %v7170_v24 = vadd.f32 %v3215_v56, %v3192_v51  ;;  %v3181_v32 = vadd.f32 %v4688_v10, %v3180_v55 }
 0xc4e   :  { %4691 = vtanh.f32 %v7170_v24  ;;  %v3185_v3 = vsel %vm3184_vm2, %v4688_v10, %v3181_v32  ;;  %v3382_v59 = vrot.slane %v7170_v24, 6 }
 0xc4f   :  { %v3190_v2 = vsel %vm3187_vm3, %v3189_v0, %v3185_v3 }
 0xc54   :  { %v4692_v8 = vpop.eup %4691 }
 0xc55   :  { %v3218_v58 = vmul.f32 %v4692_v8, %v3190_v2 }
 0xc57   :  { %v3224_v1 = vrot.slane %v3218_v58, 2 }
 0xc59   :  { %3242 = vmatmul.f32.vlgmr.msra.gmra.mxu0 %v3224_v1  ;;  %3262 = vmatmul.f32.vlgmr.msra.gmra.mxu1 %v3224_v1 }
 0xc5a   :  { %3282 = vmatmul.f32.vlgmr.msra.gmra.mxu2 %v3224_v1  ;;  %3302 = vmatmul.f32.vlgmr.msra.gmra.mxu3 %v3224_v1 }
 0xcd6   :  { %v3243_v43 = vpop.f32.mrf.mxu0  ;;  %v3263_v54 = vpop.f32.mrf.mxu1 }
 0xcd7   :  { %v3310_v26 = vrot.slane %v3243_v43, 4  ;;  %v3311_v34 = vrot.slane %v3263_v54, 4 }
 0xcd9   :  { %v3318_v14 = vadd.f32 %v3310_v26, %v3219_v11  ;;  %v3319_v16 = vadd.f32 %v3311_v34, %v3220_v61  ;;  %v3388_v34 = vld [vmem:[#allocation2 + $0x20] sm:$0xc0]  ;;  %v3389_v11 = vld [vmem:[#allocation2 + $0x48] sm:$0xc0] }
 0xcdb   :  { %v4387_v23 = vmul.f32 -1.442695, %v3318_v14  ;;  %v4389_v25 = vmul.f32 -1.442695, %v3319_v16 }
 0xcdd   :  { %4693 = vpow2.f32 %v4387_v23  ;;  %v3303_v20 = vpop.f32.mrf.mxu3  ;;  %v3283_v30 = vpop.f32.mrf.mxu2 }
 0xcde   :  { %4695 = vpow2.f32 %v4389_v25  ;;  %v3313_v29 = vrot.slane %v3303_v20, 4  ;;  %v3312_v22 = vrot.slane %v3283_v30, 4 }
 0xce0   :  { %v3321_v15 = vadd.f32 %v3313_v29, %v3222_v27  ;;  %v3320_v31 = vadd.f32 %v3312_v22, %v3221_v19  ;;  %v3391_v29 = vld [vmem:[#allocation2 + $0x90] sm:$0xc0] }
 0xce2   :  { %v4388_v17 = vmul.f32 -1.442695, %v3321_v15 }
 0xce3   :  { %v4694_v28 = vpop.eup %4693 }
 0xce4   :  { %v4696_v6 = vpop.eup %4695  ;;  %v3325_v13 = vadd.f32 1.0, %v4694_v28  ;;  %4697 = vpow2.f32 %v4388_v17 }
 0xce5   :  { %v3365_v53 = vadd.f32 1.0, %v4696_v6 }
 0xce6   :  { %4699 = vrcp.f32 %v3325_v13  ;;  %v3337_v21 = vand.u32 2147483648, %v3325_v13  ;;  %v3335_v12 = vand.u32 2147483647, %v3325_v13  ;;  %vm3331_vm6 = vweird.f32 %v3325_v13 }
 0xce7   :  { %4701 = vrcp.f32 %v3365_v53  ;;  %v3377_v44 = vand.u32 2147483648, %v3365_v53  ;;  %v3375_v4 = vand.u32 2147483647, %v3365_v53  ;;  %vm3371_vm7 = vweird.f32 %v3365_v53 }
 0xce8   :  { %v3338_v18 = vor.u32 1.1754944e-38, %v3337_v21  ;;  %vm3336_vm10 = vcmp.eq.f32.partialorder %v3335_v12, 8.507059e+37 }
 0xce9   :  { %v3378_v47 = vor.u32 1.1754944e-38, %v3377_v44  ;;  %vm3376_vm11 = vcmp.eq.f32.partialorder %v3375_v4, 8.507059e+37 }
 0xcea   :  { %v4698_v41 = vpop.eup %4697 }
 0xceb   :  { %v3345_v40 = vadd.f32 1.0, %v4698_v41  ;;  %v3390_v41 = vld [vmem:[#allocation2 + $0x70] sm:$0xc0] }
 0xcec   :  { %v4700_v60 = vpop.eup %4699 }
 0xced   :  { %v4702_v37 = vpop.eup %4701  ;;  %v3327_v38 = vmul.f32 %v4700_v60, %v3325_v13  ;;  %4703 = vrcp.f32 %v3345_v40  ;;  %vm3332_vm4 = vweird.f32 %v4700_v60  ;;  %v3357_v24 = vand.u32 2147483648, %v3345_v40 }
 0xcee   :  { %v3367_v9 = vmul.f32 %v4702_v37, %v3365_v53  ;;  %4705 = vtanh.f32 %v3320_v31  ;;  %vm3372_vm5 = vweird.f32 %v4702_v37  ;;  %vm3333_vm8 = vmor %vm3331_vm6, %vm3332_vm4  ;;  %vm3351_vm13 = vweird.f32 %v3345_v40 }
 0xcef   :  { %v3328_v45 = vsub.f32 1.0, %v3327_v38  ;;  %vm3373_vm9 = vmor %vm3371_vm7, %vm3372_vm5  ;;  %v3355_v7 = vand.u32 2147483647, %v3345_v40  ;;  %v3358_v3 = vor.u32 1.1754944e-38, %v3357_v24 }
 0xcf0   :  { %v3368_v36 = vsub.f32 1.0, %v3367_v9 }
 0xcf1   :  { %v3329_v35 = vmul.f32 %v4700_v60, %v3328_v45  ;;  %vm3356_vm15 = vcmp.eq.f32.partialorder %v3355_v7, 8.507059e+37 }
 0xcf2   :  { %v3369_v52 = vmul.f32 %v4702_v37, %v3368_v36 }
 0xcf3   :  { %v4704_v33 = vpop.eup %4703  ;;  %v3330_v10 = vadd.f32 %v4700_v60, %v3329_v35 }
 0xcf4   :  { %v3370_v62 = vadd.f32 %v4702_v37, %v3369_v52  ;;  %v3347_v48 = vmul.f32 %v4704_v33, %v3345_v40  ;;  %v4706_v50 = vpop.eup %4705  ;;  %vm3352_vm12 = vweird.f32 %v4704_v33 }
 0xcf5   :  { %v3334_v49 = vsel %vm3333_vm8, %v4700_v60, %v3330_v10  ;;  %vm3353_vm14 = vmor %vm3351_vm13, %vm3352_vm12 }
 0xcf6   :  { %v3339_v46 = vsel %vm3336_vm10, %v3338_v18, %v3334_v49  ;;  %v3374_v39 = vsel %vm3373_vm9, %v4702_v37, %v3370_v62  ;;  %v3348_v42 = vsub.f32 1.0, %v3347_v48 }
 0xcf7   :  { %v3361_v63 = vmul.f32 %v4706_v50, %v3339_v46  ;;  %v3379_v51 = vsel %vm3376_vm11, %v3378_v47, %v3374_v39 }
 0xcf8   :  { %v3384_v5 = vmul.f32 %v3382_v59, %v3379_v51  ;;  %v3349_v56 = vmul.f32 %v4704_v33, %v3348_v42 }
 0xcfa   :  { %v7174_v55 = vadd.f32 %v3384_v5, %v3361_v63  ;;  %v3350_v32 = vadd.f32 %v4704_v33, %v3349_v56 }
 0xcfc   :  { %4707 = vtanh.f32 %v7174_v55  ;;  %v3354_v57 = vsel %vm3353_vm14, %v4704_v33, %v3350_v32  ;;  %v3551_v48 = vrot.slane %v7174_v55, 6 }
 0xcfd   :  { %v3359_v8 = vsel %vm3356_vm15, %v3358_v3, %v3354_v57 }
 0xd02   :  { %v4708_v0 = vpop.eup %4707 }
 0xd03   :  { %v3387_v2 = vmul.f32 %v4708_v0, %v3359_v8 }
 0xd05   :  { %v3393_v58 = vrot.slane %v3387_v2, 4 }
 0xd07   :  { %3411 = vmatmul.f32.vlgmr.msrb.gmra.mxu0 %v3393_v58  ;;  %3431 = vmatmul.f32.vlgmr.msrb.gmra.mxu1 %v3393_v58 }
 0xd08   :  { %3451 = vmatmul.f32.vlgmr.msrb.gmra.mxu2 %v3393_v58  ;;  %3471 = vmatmul.f32.vlgmr.msrb.gmra.mxu3 %v3393_v58 }
 0xd84   :  { %v3412_v1 = vpop.f32.mrf.mxu0  ;;  %v3432_v43 = vpop.f32.mrf.mxu1 }
 0xd85   :  { %v3479_v54 = vrot.slane %v3412_v1, 2  ;;  %v3480_v26 = vrot.slane %v3432_v43, 2 }
 0xd87   :  { %v3487_v61 = vadd.f32 %v3479_v54, %v3388_v34  ;;  %v3488_v14 = vadd.f32 %v3480_v26, %v3389_v11 }
 0xd89   :  { %v4390_v16 = vmul.f32 -1.442695, %v3487_v61  ;;  %v4392_v23 = vmul.f32 -1.442695, %v3488_v14 }
 0xd8b   :  { %4709 = vpow2.f32 %v4390_v16  ;;  %v3472_v25 = vpop.f32.mrf.mxu3  ;;  %v3452_v53 = vpop.f32.mrf.mxu2 }
 0xd8c   :  { %4711 = vpow2.f32 %v4392_v23  ;;  %v3482_v20 = vrot.slane %v3472_v25, 2  ;;  %v3481_v30 = vrot.slane %v3452_v53, 2 }
 0xd8e   :  { %v3490_v27 = vadd.f32 %v3482_v20, %v3391_v29  ;;  %v3489_v60 = vadd.f32 %v3481_v30, %v3390_v41 }
 0xd90   :  { %v4391_v15 = vmul.f32 -1.442695, %v3490_v27 }
 0xd91   :  { %v4710_v17 = vpop.eup %4709 }
 0xd92   :  { %v4712_v28 = vpop.eup %4711  ;;  %v3494_v6 = vadd.f32 1.0, %v4710_v17  ;;  %4713 = vpow2.f32 %v4391_v15 }
 0xd93   :  { %v3534_v13 = vadd.f32 1.0, %v4712_v28 }
 0xd94   :  { %4715 = vrcp.f32 %v3494_v6  ;;  %v3506_v36 = vand.u32 2147483648, %v3494_v6  ;;  %v3504_v35 = vand.u32 2147483647, %v3494_v6  ;;  %vm3500_vm2 = vweird.f32 %v3494_v6 }
 0xd95   :  { %4717 = vrcp.f32 %v3534_v13  ;;  %v3546_v21 = vand.u32 2147483648, %v3534_v13  ;;  %v3544_v52 = vand.u32 2147483647, %v3534_v13  ;;  %vm3540_vm3 = vweird.f32 %v3534_v13 }
 0xd96   :  { %v3507_v10 = vor.u32 1.1754944e-38, %v3506_v36  ;;  %vm3505_vm6 = vcmp.eq.f32.partialorder %v3504_v35, 8.507059e+37 }
 0xd97   :  { %v3547_v59 = vor.u32 1.1754944e-38, %v3546_v21  ;;  %vm3545_vm7 = vcmp.eq.f32.partialorder %v3544_v52, 8.507059e+37 }
 0xd98   :  { %v4714_v22 = vpop.eup %4713 }
 0xd99   :  { %v3514_v19 = vadd.f32 1.0, %v4714_v22 }
 0xd9a   :  { %v4716_v40 = vpop.eup %4715 }
 0xd9b   :  { %v4718_v31 = vpop.eup %4717  ;;  %v3496_v37 = vmul.f32 %v4716_v40, %v3494_v6  ;;  %4719 = vrcp.f32 %v3514_v19  ;;  %vm3501_vm0 = vweird.f32 %v4716_v40  ;;  %v3526_v24 = vand.u32 2147483648, %v3514_v19 }
 0xd9c   :  { %v3536_v38 = vmul.f32 %v4718_v31, %v3534_v13  ;;  %4721 = vtanh.f32 %v3489_v60  ;;  %vm3541_vm1 = vweird.f32 %v4718_v31  ;;  %vm3502_vm4 = vmor %vm3500_vm2, %vm3501_vm0  ;;  %vm3520_vm9 = vweird.f32 %v3514_v19 }
 0xd9d   :  { %v3497_v9 = vsub.f32 1.0, %v3496_v37  ;;  %vm3542_vm5 = vmor %vm3540_vm3, %vm3541_vm1  ;;  %v3524_v55 = vand.u32 2147483647, %v3514_v19  ;;  %v3527_v57 = vor.u32 1.1754944e-38, %v3526_v24 }
 0xd9e   :  { %v3537_v45 = vsub.f32 1.0, %v3536_v38 }
 0xd9f   :  { %v3498_v44 = vmul.f32 %v4716_v40, %v3497_v9  ;;  %vm3525_vm11 = vcmp.eq.f32.partialorder %v3524_v55, 8.507059e+37 }
 0xda0   :  { %v3538_v12 = vmul.f32 %v4718_v31, %v3537_v45 }
 0xda1   :  { %v4720_v4 = vpop.eup %4719  ;;  %v3499_v33 = vadd.f32 %v4716_v40, %v3498_v44 }
 0xda2   :  { %v3539_v18 = vadd.f32 %v4718_v31, %v3538_v12  ;;  %v3516_v62 = vmul.f32 %v4720_v4, %v3514_v19  ;;  %v4722_v49 = vpop.eup %4721  ;;  %vm3521_vm8 = vweird.f32 %v4720_v4 }
 0xda3   :  { %v3503_v47 = vsel %vm3502_vm4, %v4716_v40, %v3499_v33  ;;  %vm3522_vm10 = vmor %vm3520_vm9, %vm3521_vm8 }
 0xda4   :  { %v3508_v50 = vsel %vm3505_vm6, %v3507_v10, %v3503_v47  ;;  %v3543_v46 = vsel %vm3542_vm5, %v4718_v31, %v3539_v18  ;;  %v3517_v39 = vsub.f32 1.0, %v3516_v62 }
 0xda5   :  { %v3530_v42 = vmul.f32 %v4722_v49, %v3508_v50  ;;  %v3548_v63 = vsel %vm3545_vm7, %v3547_v59, %v3543_v46 }
 0xda6   :  { %v3553_v51 = vmul.f32 %v3551_v48, %v3548_v63  ;;  %v3518_v5 = vmul.f32 %v4720_v4, %v3517_v39 }
 0xda8   :  { %v3554_v56 = vadd.f32 %v3553_v51, %v3530_v42  ;;  %v3519_v32 = vadd.f32 %v4720_v4, %v3518_v5 }
 0xdaa   :  { %4723 = vtanh.f32 %v3554_v56  ;;  %v3523_v7 = vsel %vm3522_vm10, %v4720_v4, %v3519_v32 }
 0xdab   :  { %v3528_v0 = vsel %vm3525_vm11, %v3527_v57, %v3523_v7 }
 0xdb0   :  { %v4724_v3 = vpop.eup %4723 }
 0xdb1   :  { %v7181_v8 = vmul.f32 %v4724_v3, %v3528_v0 }
 0xdb2   :  { %5133 = dma.done.wait [#allocation4], 32768 }
 0xdb3   :  { %5134 = vsyncadd [#allocation4], 4294934528  ;;  %v3622_v2 = vld [vmem:[#allocation3 + $0x1e0] sm:$0xff]  ;;  %v3625_v58 = vld [vmem:[#allocation3 + $0x1f8] sm:$0xff]  ;;  %v7184_v63 = vrot.slane %v7181_v8, 6  ;;  %s4317_s14 = sshll.u32 %s7237_s8, 4  ;;  %s4318_s14 = int_to_ptr.hbm [resolvable:$true] %s4317_s14 }
 0xdb4   :  { %v3618_v1 = vld [vmem:[#allocation3 + $0x1c0] sm:$0xff]  ;;  %3639 = vmatpush.msra.mxu0 %v3622_v2  ;;  %3699 = vmatpush.msra.mxu3 %v3625_v58  ;;  %v3621_v43 = vld [vmem:[#allocation3 + $0x1d8] sm:$0xff]  ;;  %v3624_v61 = vld [vmem:[#allocation3 + $0x1f0] sm:$0xff] }
 0xdb5   :  { %v3614_v54 = vld [vmem:[#allocation3 + $0x1a0] sm:$0xff]  ;;  %v3617_v26 = vld [vmem:[#allocation3 + $0x1b8] sm:$0xff]  ;;  %3679 = vmatpush.msra.mxu2 %v3624_v61  ;;  %v3620_v23 = vld [vmem:[#allocation3 + $0x1d0] sm:$0xff] }
 0xdb6   :  { %3640 = vmatpush.msra.mxu0 %v3618_v1  ;;  %3700 = vmatpush.msra.mxu3 %v3621_v43  ;;  %v3610_v34 = vld [vmem:[#allocation3 + $0x180] sm:$0xff]  ;;  %v3613_v11 = vld [vmem:[#allocation3 + $0x198] sm:$0xff]  ;;  %v3616_v25 = vld [vmem:[#allocation3 + $0x1b0] sm:$0xff] }
 0xdb7   :  { %v3606_v14 = vld [vmem:[#allocation3 + $0x160] sm:$0xff]  ;;  %v3609_v16 = vld [vmem:[#allocation3 + $0x178] sm:$0xff]  ;;  %3680 = vmatpush.msra.mxu2 %v3620_v23  ;;  %v3612_v27 = vld [vmem:[#allocation3 + $0x190] sm:$0xff] }
 0xdb8   :  { %3641 = vmatpush.msra.mxu0 %v3614_v54  ;;  %3701 = vmatpush.msra.mxu3 %v3617_v26  ;;  %v3602_v20 = vld [vmem:[#allocation3 + $0x140] sm:$0xff]  ;;  %v3605_v29 = vld [vmem:[#allocation3 + $0x158] sm:$0xff]  ;;  %v3608_v28 = vld [vmem:[#allocation3 + $0x170] sm:$0xff] }
 0xdb9   :  { %v3598_v15 = vld [vmem:[#allocation3 + $0x120] sm:$0xff]  ;;  %v3601_v17 = vld [vmem:[#allocation3 + $0x138] sm:$0xff]  ;;  %3681 = vmatpush.msra.mxu2 %v3616_v25  ;;  %v3604_v53 = vld [vmem:[#allocation3 + $0x150] sm:$0xff] }
 0xdba   :  { %3642 = vmatpush.msra.mxu0 %v3610_v34  ;;  %3702 = vmatpush.msra.mxu3 %v3613_v11  ;;  %v3594_v6 = vld [vmem:[#allocation3 + $0x100] sm:$0xff]  ;;  %v3597_v13 = vld [vmem:[#allocation3 + $0x118] sm:$0xff]  ;;  %v3600_v41 = vld [vmem:[#allocation3 + $0x130] sm:$0xff] }
 0xdbb   :  { %3682 = vmatpush.msra.mxu2 %v3612_v27  ;;  %v3590_v30 = vld [vmem:[#allocation3 + $0xe0] sm:$0xff]  ;;  %v3593_v22 = vld [vmem:[#allocation3 + $0xf8] sm:$0xff]  ;;  %v3623_v60 = vld [vmem:[#allocation3 + $0x1e8] sm:$0xff] }
 0xdbc   :  { %3643 = vmatpush.msra.mxu0 %v3606_v14  ;;  %3703 = vmatpush.msra.mxu3 %v3609_v16  ;;  %v3586_v19 = vld [vmem:[#allocation3 + $0xc0] sm:$0xff]  ;;  %v3589_v40 = vld [vmem:[#allocation3 + $0xd8] sm:$0xff]  ;;  %v3596_v31 = vld [vmem:[#allocation3 + $0x110] sm:$0xff] }
 0xdbd   :  { %3683 = vmatpush.msra.mxu2 %v3608_v28  ;;  %v3619_v37 = vld [vmem:[#allocation3 + $0x1c8] sm:$0xff]  ;;  %v3582_v38 = vld [vmem:[#allocation3 + $0xa0] sm:$0xff]  ;;  %v3585_v9 = vld [vmem:[#allocation3 + $0xb8] sm:$0xff]  ;;  %3659 = vmatpush.msra.mxu1 %v3623_v60 }
 0xdbe   :  { %3644 = vmatpush.msra.mxu0 %v3602_v20  ;;  %3704 = vmatpush.msra.mxu3 %v3605_v29  ;;  %v3592_v45 = vld [vmem:[#allocation3 + $0xf0] sm:$0xff]  ;;  %v3615_v36 = vld [vmem:[#allocation3 + $0x1a8] sm:$0xff]  ;;  %v3578_v21 = vld [vmem:[#allocation3 + $0x80] sm:$0xff] }
 0xdbf   :  { %3684 = vmatpush.msra.mxu2 %v3604_v53  ;;  %v3581_v44 = vld [vmem:[#allocation3 + $0x98] sm:$0xff]  ;;  %3660 = vmatpush.msra.mxu1 %v3619_v37  ;;  %v3588_v35 = vld [vmem:[#allocation3 + $0xd0] sm:$0xff]  ;;  %v3611_v12 = vld [vmem:[#allocation3 + $0x188] sm:$0xff] }
 0xdc0   :  { %3645 = vmatpush.msra.mxu0 %v3598_v15  ;;  %3705 = vmatpush.msra.mxu3 %v3601_v17  ;;  %v3574_v52 = vld [vmem:[#allocation3 + $0x60] sm:$0xff]  ;;  %v3577_v4 = vld [vmem:[#allocation3 + $0x78] sm:$0xff]  ;;  %v3584_v33 = vld [vmem:[#allocation3 + $0xb0] sm:$0xff] }
 0xdc1   :  { %3685 = vmatpush.msra.mxu2 %v3600_v41  ;;  %3661 = vmatpush.msra.mxu1 %v3615_v36  ;;  %v3607_v10 = vld [vmem:[#allocation3 + $0x168] sm:$0xff]  ;;  %v3570_v18 = vld [vmem:[#allocation3 + $0x40] sm:$0xff]  ;;  %v3573_v62 = vld [vmem:[#allocation3 + $0x58] sm:$0xff] }
 0xdc2   :  { %3646 = vmatpush.msra.mxu0 %v3594_v6  ;;  %3706 = vmatpush.msra.mxu3 %v3597_v13  ;;  %v3580_v48 = vld [vmem:[#allocation3 + $0x90] sm:$0xff]  ;;  %v3603_v59 = vld [vmem:[#allocation3 + $0x148] sm:$0xff]  ;;  %v3566_v47 = vld [vmem:[#allocation3 + $0x20] sm:$0xff] }
 0xdc3   :  { %3686 = vmatpush.msra.mxu2 %v3596_v31  ;;  %3662 = vmatpush.msra.mxu1 %v3611_v12  ;;  %v3569_v49 = vld [vmem:[#allocation3 + $0x38] sm:$0xff]  ;;  %v3576_v50 = vld [vmem:[#allocation3 + $0x70] sm:$0xff]  ;;  %v3599_v46 = vld [vmem:[#allocation3 + $0x128] sm:$0xff] }
 0xdc4   :  { %3647 = vmatpush.msra.mxu0 %v3590_v30  ;;  %3707 = vmatpush.msra.mxu3 %v3593_v22  ;;  %v3562_v39 = vld [vmem:[#allocation3] sm:$0xff]  ;;  %v3565_v42 = vld [vmem:[#allocation3 + $0x18] sm:$0xff]  ;;  %v3572_v51 = vld [vmem:[#allocation3 + $0x50] sm:$0xff] }
 0xdc5   :  { %3687 = vmatpush.msra.mxu2 %v3592_v45  ;;  %3663 = vmatpush.msra.mxu1 %v3607_v10  ;;  %v3595_v5 = vld [vmem:[#allocation3 + $0x108] sm:$0xff]  ;;  %v3568_v56 = vld [vmem:[#allocation3 + $0x30] sm:$0xff]  ;;  %v3822_v58 = vld [vmem:[#allocation3 + $0x3e0] sm:$0xff] }
 0xdc6   :  { %3648 = vmatpush.msra.mxu0 %v3586_v19  ;;  %3708 = vmatpush.msra.mxu3 %v3589_v40  ;;  %v3591_v32 = vld [vmem:[#allocation3 + $0xe8] sm:$0xff]  ;;  %v3564_v24 = vld [vmem:[#allocation3 + $0x10] sm:$0xff]  ;;  %v3825_v54 = vld [vmem:[#allocation3 + $0x3f8] sm:$0xff] }
 0xdc7   :  { %3688 = vmatpush.msra.mxu2 %v3588_v35  ;;  %3664 = vmatpush.msra.mxu1 %v3603_v59  ;;  %v3587_v55 = vld [vmem:[#allocation3 + $0xc8] sm:$0xff]  ;;  %v3824_v43 = vld [vmem:[#allocation3 + $0x3f0] sm:$0xff]  ;;  %v3818_v26 = vld [vmem:[#allocation3 + $0x3c0] sm:$0xff] }
 0xdc8   :  { %3649 = vmatpush.msra.mxu0 %v3582_v38  ;;  %3709 = vmatpush.msra.mxu3 %v3585_v9  ;;  %v3583_v7 = vld [vmem:[#allocation3 + $0xa8] sm:$0xff]  ;;  %v3820_v11 = vld [vmem:[#allocation3 + $0x3d0] sm:$0xff]  ;;  %v3821_v61 = vld [vmem:[#allocation3 + $0x3d8] sm:$0xff] }
 0xdc9   :  { %3689 = vmatpush.msra.mxu2 %v3584_v33  ;;  %3665 = vmatpush.msra.mxu1 %v3599_v46  ;;  %v3579_v57 = vld [vmem:[#allocation3 + $0x88] sm:$0xff]  ;;  %v3814_v14 = vld [vmem:[#allocation3 + $0x3a0] sm:$0xff]  ;;  %v3816_v23 = vld [vmem:[#allocation3 + $0x3b0] sm:$0xff] }
 0xdca   :  { %3650 = vmatpush.msra.mxu0 %v3578_v21  ;;  %3710 = vmatpush.msra.mxu3 %v3581_v44  ;;  %v3575_v3 = vld [vmem:[#allocation3 + $0x68] sm:$0xff]  ;;  %v3817_v25 = vld [vmem:[#allocation3 + $0x3b8] sm:$0xff]  ;;  %v3810_v20 = vld [vmem:[#allocation3 + $0x380] sm:$0xff] }
 0xdcb   :  { %3690 = vmatpush.msra.mxu2 %v3580_v48  ;;  %3666 = vmatpush.msra.mxu1 %v3595_v5  ;;  %v3571_v0 = vld [vmem:[#allocation3 + $0x48] sm:$0xff]  ;;  %v3812_v27 = vld [vmem:[#allocation3 + $0x390] sm:$0xff]  ;;  %v3813_v15 = vld [vmem:[#allocation3 + $0x398] sm:$0xff] }
 0xdcc   :  { %3651 = vmatpush.msra.mxu0 %v3574_v52  ;;  %3711 = vmatpush.msra.mxu3 %v3577_v4  ;;  %v3567_v8 = vld [vmem:[#allocation3 + $0x28] sm:$0xff]  ;;  %v3806_v17 = vld [vmem:[#allocation3 + $0x360] sm:$0xff]  ;;  %v3808_v6 = vld [vmem:[#allocation3 + $0x370] sm:$0xff] }
 0xdcd   :  { %3691 = vmatpush.msra.mxu2 %v3576_v50  ;;  %3667 = vmatpush.msra.mxu1 %v3591_v32  ;;  %v3563_v2 = vld [vmem:[#allocation3 + $0x8] sm:$0xff]  ;;  %v3809_v13 = vld [vmem:[#allocation3 + $0x378] sm:$0xff]  ;;  %v3802_v53 = vld [vmem:[#allocation3 + $0x340] sm:$0xff] }
 0xdce   :  { %3652 = vmatpush.msra.mxu0 %v3570_v18  ;;  %3712 = vmatpush.msra.mxu3 %v3573_v62  ;;  %v3823_v1 = vld [vmem:[#allocation3 + $0x3e8] sm:$0xff]  ;;  %v3804_v22 = vld [vmem:[#allocation3 + $0x350] sm:$0xff]  ;;  %v3805_v41 = vld [vmem:[#allocation3 + $0x358] sm:$0xff] }
 0xdcf   :  { %3692 = vmatpush.msra.mxu2 %v3572_v51  ;;  %3668 = vmatpush.msra.mxu1 %v3587_v55  ;;  %v3819_v34 = vld [vmem:[#allocation3 + $0x3c8] sm:$0xff]  ;;  %v3798_v19 = vld [vmem:[#allocation3 + $0x320] sm:$0xff]  ;;  %v3800_v60 = vld [vmem:[#allocation3 + $0x330] sm:$0xff] }
 0xdd0   :  { %3653 = vmatpush.msra.mxu0 %v3566_v47  ;;  %3713 = vmatpush.msra.mxu3 %v3569_v49  ;;  %v3815_v16 = vld [vmem:[#allocation3 + $0x3a8] sm:$0xff]  ;;  %v3801_v31 = vld [vmem:[#allocation3 + $0x338] sm:$0xff]  ;;  %v3794_v37 = vld [vmem:[#allocation3 + $0x300] sm:$0xff] }
 0xdd1   :  { %3693 = vmatpush.msra.mxu2 %v3568_v56  ;;  %3669 = vmatpush.msra.mxu1 %v3583_v7  ;;  %v3811_v29 = vld [vmem:[#allocation3 + $0x388] sm:$0xff]  ;;  %v3796_v9 = vld [vmem:[#allocation3 + $0x310] sm:$0xff]  ;;  %v7192_v45 = vld [vmem:[%s7233_s4] sm:$0xf] }
 0xdd2   :  { %3654 = vmatpush.msra.mxu0 %v3562_v39  ;;  %3714 = vmatpush.msra.mxu3 %v3565_v42  ;;  %v3807_v28 = vld [vmem:[#allocation3 + $0x368] sm:$0xff]  ;;  %v3797_v36 = vld [vmem:[#allocation3 + $0x318] sm:$0xff]  ;;  %v3790_v21 = vld [vmem:[#allocation3 + $0x2e0] sm:$0xff]  ;;  %v3628_v10 = vperm.slane %v7192_v45, 0 }
 0xdd3   :  { %3655 = vmatmul.f32.vlgmr.msra.gmra.mxu0 %v7184_v63  ;;  %3715 = vmatmul.f32.vlgmr.msra.gmra.mxu3 %v7184_v63  ;;  %v3803_v30 = vld [vmem:[#allocation3 + $0x348] sm:$0xff]  ;;  %v3792_v35 = vld [vmem:[#allocation3 + $0x2f0] sm:$0xff]  ;;  %v3793_v12 = vld [vmem:[#allocation3 + $0x2f8] sm:$0xff] }
 0xdd4   :  { %3694 = vmatpush.msra.mxu2 %v3564_v24  ;;  %3670 = vmatpush.msra.mxu1 %v3579_v57  ;;  %v3799_v40 = vld [vmem:[#allocation3 + $0x328] sm:$0xff]  ;;  %v3786_v52 = vld [vmem:[#allocation3 + $0x2c0] sm:$0xff]  ;;  %v3788_v33 = vld [vmem:[#allocation3 + $0x2d0] sm:$0xff]  ;;  %v3631_v57 = vperm.slane %v7192_v45, 3 }
 0xdd5   :  { %3695 = vmatmul.f32.vlgmr.msra.gmra.mxu2 %v7184_v63  ;;  %3826 = vmatpush.msrb.mxu0 %v3822_v58  ;;  %v3795_v38 = vld [vmem:[#allocation3 + $0x308] sm:$0xff]  ;;  %v3789_v18 = vld [vmem:[#allocation3 + $0x2d8] sm:$0xff]  ;;  %v3782_v62 = vld [vmem:[#allocation3 + $0x2a0] sm:$0xff] }
 0xdd6   :  { %3671 = vmatpush.msra.mxu1 %v3575_v3  ;;  %3866 = vmatpush.msrb.mxu2 %v3824_v43  ;;  %v3791_v44 = vld [vmem:[#allocation3 + $0x2e8] sm:$0xff]  ;;  %v3784_v59 = vld [vmem:[#allocation3 + $0x2b0] sm:$0xff]  ;;  %v3785_v47 = vld [vmem:[#allocation3 + $0x2b8] sm:$0xff] }
 0xdd7   :  { %3886 = vmatpush.msrb.mxu3 %v3825_v54  ;;  %3827 = vmatpush.msrb.mxu0 %v3818_v26  ;;  %v3787_v4 = vld [vmem:[#allocation3 + $0x2c8] sm:$0xff]  ;;  %v3778_v50 = vld [vmem:[#allocation3 + $0x280] sm:$0xff]  ;;  %v3780_v39 = vld [vmem:[#allocation3 + $0x290] sm:$0xff] }
 0xdd8   :  { %3672 = vmatpush.msra.mxu1 %v3571_v0  ;;  %3867 = vmatpush.msrb.mxu2 %v3820_v11  ;;  %v3783_v48 = vld [vmem:[#allocation3 + $0x2a8] sm:$0xff]  ;;  %v3781_v51 = vld [vmem:[#allocation3 + $0x298] sm:$0xff]  ;;  %v3774_v5 = vld [vmem:[#allocation3 + $0x260] sm:$0xff] }
 0xdd9   :  { %3887 = vmatpush.msrb.mxu3 %v3821_v61  ;;  %3828 = vmatpush.msrb.mxu0 %v3814_v14  ;;  %v3779_v46 = vld [vmem:[#allocation3 + $0x288] sm:$0xff]  ;;  %v3776_v32 = vld [vmem:[#allocation3 + $0x270] sm:$0xff]  ;;  %v3777_v24 = vld [vmem:[#allocation3 + $0x278] sm:$0xff] }
 0xdda   :  { %3673 = vmatpush.msra.mxu1 %v3567_v8  ;;  %3868 = vmatpush.msrb.mxu2 %v3816_v23  ;;  %v3775_v56 = vld [vmem:[#allocation3 + $0x268] sm:$0xff]  ;;  %v3770_v55 = vld [vmem:[#allocation3 + $0x240] sm:$0xff]  ;;  %v3772_v0 = vld [vmem:[#allocation3 + $0x250] sm:$0xff] }
 0xddb   :  { %3888 = vmatpush.msrb.mxu3 %v3817_v25  ;;  %3829 = vmatpush.msrb.mxu0 %v3810_v20  ;;  %v3771_v3 = vld [vmem:[#allocation3 + $0x248] sm:$0xff]  ;;  %v3773_v8 = vld [vmem:[#allocation3 + $0x258] sm:$0xff]  ;;  %v3762_v26 = vld [vmem:[#allocation3 + $0x200] sm:$0xff]  ;;  %v3630_v25 = vperm.slane %v7192_v45, 2 }
 0xddc   :  { %3674 = vmatpush.msra.mxu1 %v3563_v2  ;;  %3869 = vmatpush.msrb.mxu2 %v3812_v27  ;;  %v3766_v2 = vld [vmem:[#allocation3 + $0x220] sm:$0xff]  ;;  %v3767_v58 = vld [vmem:[#allocation3 + $0x228] sm:$0xff]  ;;  %v3769_v54 = vld [vmem:[#allocation3 + $0x238] sm:$0xff] }
 0xddd   :  { %3889 = vmatpush.msrb.mxu3 %v3813_v15  ;;  %3830 = vmatpush.msrb.mxu0 %v3806_v17  ;;  %v3764_v11 = vld [vmem:[#allocation3 + $0x210] sm:$0xff]  ;;  %v3765_v61 = vld [vmem:[#allocation3 + $0x218] sm:$0xff] }
 0xdde   :  { %3846 = vmatpush.msrb.mxu1 %v3823_v1  ;;  %3870 = vmatpush.msrb.mxu2 %v3808_v6  ;;  %v3768_v1 = vld [vmem:[#allocation3 + $0x230] sm:$0xff] }
 0xddf   :  { %3890 = vmatpush.msrb.mxu3 %v3809_v13  ;;  %3831 = vmatpush.msrb.mxu0 %v3802_v53 }
 0xde0   :  { %3847 = vmatpush.msrb.mxu1 %v3819_v34  ;;  %3871 = vmatpush.msrb.mxu2 %v3804_v22 }
 0xde1   :  { %3891 = vmatpush.msrb.mxu3 %v3805_v41  ;;  %3832 = vmatpush.msrb.mxu0 %v3798_v19 }
 0xde2   :  { %3848 = vmatpush.msrb.mxu1 %v3815_v16  ;;  %3872 = vmatpush.msrb.mxu2 %v3800_v60 }
 0xde3   :  { %3892 = vmatpush.msrb.mxu3 %v3801_v31  ;;  %3833 = vmatpush.msrb.mxu0 %v3794_v37 }
 0xde4   :  { %3849 = vmatpush.msrb.mxu1 %v3811_v29  ;;  %3873 = vmatpush.msrb.mxu2 %v3796_v9 }
 0xde5   :  { %3893 = vmatpush.msrb.mxu3 %v3797_v36  ;;  %3834 = vmatpush.msrb.mxu0 %v3790_v21 }
 0xde6   :  { %3850 = vmatpush.msrb.mxu1 %v3807_v28  ;;  %3874 = vmatpush.msrb.mxu2 %v3792_v35 }
 0xde7   :  { %3894 = vmatpush.msrb.mxu3 %v3793_v12  ;;  %3835 = vmatpush.msrb.mxu0 %v3786_v52 }
 0xde8   :  { %3851 = vmatpush.msrb.mxu1 %v3803_v30  ;;  %3875 = vmatpush.msrb.mxu2 %v3788_v33 }
 0xde9   :  { %3895 = vmatpush.msrb.mxu3 %v3789_v18  ;;  %3836 = vmatpush.msrb.mxu0 %v3782_v62  ;;  %v4034_v18 = vld [vmem:[#allocation3 + $0x5e0] sm:$0xff]  ;;  %v4035_v62 = vld [vmem:[#allocation3 + $0x5f0] sm:$0xff] }
 0xdea   :  { %3852 = vmatpush.msrb.mxu1 %v3799_v40  ;;  %3876 = vmatpush.msrb.mxu2 %v3784_v59  ;;  %v4031_v59 = vld [vmem:[#allocation3 + $0x5c0] sm:$0xff] }
 0xdeb   :  { %3896 = vmatpush.msrb.mxu3 %v3785_v47  ;;  %3837 = vmatpush.msrb.mxu0 %v3778_v50  ;;  %v4032_v47 = vld [vmem:[#allocation3 + $0x5d0] sm:$0xff]  ;;  %v4028_v50 = vld [vmem:[#allocation3 + $0x5a0] sm:$0xff] }
 0xdec   :  { %3853 = vmatpush.msrb.mxu1 %v3795_v38  ;;  %3877 = vmatpush.msrb.mxu2 %v3780_v39  ;;  %v4030_v39 = vld [vmem:[#allocation3 + $0x5b8] sm:$0xff] }
 0xded   :  { %3897 = vmatpush.msrb.mxu3 %v3781_v51  ;;  %3675 = vmatmul.f32.vlgmr.msra.gmra.mxu1 %v7184_v63  ;;  %v3763_v63 = vld [vmem:[#allocation3 + $0x208] sm:$0xff] }
 0xdee   :  { %3854 = vmatpush.msrb.mxu1 %v3791_v44  ;;  %3838 = vmatpush.msrb.mxu0 %v3774_v5  ;;  %v4025_v5 = vld [vmem:[#allocation3 + $0x580] sm:$0xff] }
 0xdef   :  { %3878 = vmatpush.msrb.mxu2 %v3776_v32  ;;  %3898 = vmatpush.msrb.mxu3 %v3777_v24  ;;  %v4027_v32 = vld [vmem:[#allocation3 + $0x598] sm:$0xff]  ;;  %v4022_v24 = vld [vmem:[#allocation3 + $0x560] sm:$0xff] }
 0xdf0   :  { %3855 = vmatpush.msrb.mxu1 %v3787_v4  ;;  %3839 = vmatpush.msrb.mxu0 %v3770_v55  ;;  %v4023_v55 = vld [vmem:[#allocation3 + $0x570] sm:$0xff] }
 0xdf1   :  { %3879 = vmatpush.msrb.mxu2 %v3772_v0  ;;  %3899 = vmatpush.msrb.mxu3 %v3773_v8  ;;  %v4021_v0 = vld [vmem:[#allocation3 + $0x558] sm:$0xff]  ;;  %v3629_v8 = vperm.slane %v7192_v45, 1  ;;  %v4011_v45 = vld [vmem:[#allocation3 + $0x4f0] sm:$0xff] }
 0xdf2   :  { %3856 = vmatpush.msrb.mxu1 %v3783_v48  ;;  %3840 = vmatpush.msrb.mxu0 %v3766_v2  ;;  %v4036_v48 = vld [vmem:[#allocation3 + $0x5f8] sm:$0xff]  ;;  %v4016_v2 = vld [vmem:[#allocation3 + $0x520] sm:$0xff] }
 0xdf3   :  { %3880 = vmatpush.msrb.mxu2 %v3768_v1  ;;  %3900 = vmatpush.msrb.mxu3 %v3769_v54  ;;  %v4018_v1 = vld [vmem:[#allocation3 + $0x538] sm:$0xff]  ;;  %v4014_v54 = vld [vmem:[#allocation3 + $0x510] sm:$0xff] }
 0xdf4   :  { %3857 = vmatpush.msrb.mxu1 %v3779_v46  ;;  %3841 = vmatpush.msrb.mxu0 %v3762_v26  ;;  %v4029_v46 = vld [vmem:[#allocation3 + $0x5b0] sm:$0xff]  ;;  %v4015_v26 = vld [vmem:[#allocation3 + $0x518] sm:$0xff] }
 0xdf5   :  { %3881 = vmatpush.msrb.mxu2 %v3764_v11  ;;  %3901 = vmatpush.msrb.mxu3 %v3765_v61 }
 0xdf6   :  { %3858 = vmatpush.msrb.mxu1 %v3775_v56  ;;  %4048 = vmatpush.msra.mxu0 %v4034_v18  ;;  %v4026_v56 = vld [vmem:[#allocation3 + $0x590] sm:$0xff]  ;;  %v3989_v18 = vld [vmem:[#allocation3 + $0x400] sm:$0xff] }
 0xdf7   :  { %4088 = vmatpush.msra.mxu2 %v4036_v48 }
 0xdf8   :  { %3859 = vmatpush.msrb.mxu1 %v3771_v3  ;;  %4049 = vmatpush.msra.mxu0 %v4031_v59  ;;  %v4020_v3 = vld [vmem:[#allocation3 + $0x550] sm:$0xff] }
 0xdfa   :  { %3860 = vmatpush.msrb.mxu1 %v3767_v58  ;;  %4050 = vmatpush.msra.mxu0 %v4028_v50  ;;  %v4017_v58 = vld [vmem:[#allocation3 + $0x530] sm:$0xff] }
 0xdfc   :  { %3861 = vmatpush.msrb.mxu1 %v3763_v63  ;;  %4051 = vmatpush.msra.mxu0 %v4025_v5 }
 0xdfe   :  { %4068 = vmatpush.msra.mxu1 %v4035_v62  ;;  %4052 = vmatpush.msra.mxu0 %v4022_v24  ;;  %v3990_v62 = vld [vmem:[#allocation3 + $0x410] sm:$0xff] }
 0xe00   :  { %4069 = vmatpush.msra.mxu1 %v4032_v47 }
 0xe02   :  { %4070 = vmatpush.msra.mxu1 %v4029_v46 }
 0xe04   :  { %4071 = vmatpush.msra.mxu1 %v4026_v56 }
 0xe06   :  { %4072 = vmatpush.msra.mxu1 %v4023_v55 }
 0xe08   :  { %4073 = vmatpush.msra.mxu1 %v4020_v3 }
 0xe0a   :  { %4074 = vmatpush.msra.mxu1 %v4017_v58 }
 0xe0c   :  { %4075 = vmatpush.msra.mxu1 %v4014_v54 }
 0xe0e   :  { %4076 = vmatpush.msra.mxu1 %v4011_v45 }
 0xe50   :  { %v3656_v49 = vpop.f32.mrf.mxu0 }
 0xe51   :  { %v7195_v42 = vadd.f32 %v3656_v49, %v3628_v10  ;;  %v4033_v49 = vld [vmem:[#allocation3 + $0x5d8] sm:$0xff] }
 0xe52   :  { %4089 = vmatpush.msra.mxu2 %v4033_v49 }
 0xe53   :  { %v4393_v7 = vmul.f32 -1.442695, %v7195_v42 }
 0xe54   :  { %4090 = vmatpush.msra.mxu2 %v4030_v39 }
 0xe55   :  { %4981 = vpow2.f32 %v4393_v7  ;;  %v4024_v7 = vld [vmem:[#allocation3 + $0x578] sm:$0xff] }
 0xe56   :  { %v3716_v43 = vpop.f32.mrf.mxu3  ;;  %4091 = vmatpush.msra.mxu2 %v4027_v32 }
 0xe57   :  { %v7200_v34 = vadd.f32 %v3716_v43, %v3631_v57  ;;  %v4019_v57 = vld [vmem:[#allocation3 + $0x540] sm:$0xff] }
 0xe58   :  { %v3696_v20 = vpop.f32.mrf.mxu2  ;;  %4092 = vmatpush.msra.mxu2 %v4024_v7  ;;  %4053 = vmatpush.msra.mxu0 %v4019_v57  ;;  %v4013_v43 = vld [vmem:[#allocation3 + $0x500] sm:$0xff] }
 0xe59   :  { %v4394_v14 = vmul.f32 -1.442695, %v7200_v34  ;;  %v7204_v15 = vadd.f32 %v3696_v20, %v3630_v25  ;;  %v4012_v25 = vld [vmem:[#allocation3 + $0x4f8] sm:$0xff] }
 0xe5a   :  { %4093 = vmatpush.msra.mxu2 %v4021_v0  ;;  %4054 = vmatpush.msra.mxu0 %v4016_v2 }
 0xe5b   :  { %v4982_v16 = vpop.eup %4981  ;;  %4983 = vpow2.f32 %v4394_v14 }
 0xe5c   :  { %v3722_v23 = vadd.f32 1.0, %v4982_v16  ;;  %4094 = vmatpush.msra.mxu2 %v4018_v1  ;;  %4055 = vmatpush.msra.mxu0 %v4013_v43 }
 0xe5e   :  { %4985 = vrcp.f32 %v3722_v23  ;;  %v3734_v13 = vand.u32 2147483648, %v3722_v23  ;;  %v3732_v30 = vand.u32 2147483647, %v3722_v23  ;;  %vm3728_vm13 = vweird.f32 %v3722_v23  ;;  %4095 = vmatpush.msra.mxu2 %v4015_v26 }
 0xe60   :  { %v3735_v60 = vor.u32 1.1754944e-38, %v3734_v13  ;;  %vm3733_vm15 = vcmp.eq.f32.partialorder %v3732_v30, 8.507059e+37  ;;  %4096 = vmatpush.msra.mxu2 %v4012_v25  ;;  %v4005_v30 = vld [vmem:[#allocation3 + $0x4b0] sm:$0xff] }
 0xe61   :  { %v4984_v29 = vpop.eup %4983 }
 0xe62   :  { %v3742_v27 = vadd.f32 1.0, %v4984_v29 }
 0xe64   :  { %v4986_v17 = vpop.eup %4985  ;;  %4987 = vrcp.f32 %v3742_v27  ;;  %v3754_v44 = vand.u32 2147483648, %v3742_v27  ;;  %vm3748_vm1 = vweird.f32 %v3742_v27  ;;  %v3752_v35 = vand.u32 2147483647, %v3742_v27 }
 0xe65   :  { %v3724_v28 = vmul.f32 %v4986_v17, %v3722_v23  ;;  %4989 = vtanh.f32 %v7204_v15  ;;  %vm3729_vm12 = vweird.f32 %v4986_v17  ;;  %v4010_v23 = vld [vmem:[#allocation3 + $0x4e0] sm:$0xff] }
 0xe66   :  { %vm3730_vm14 = vmor %vm3728_vm13, %vm3729_vm12  ;;  %v3755_v52 = vor.u32 1.1754944e-38, %v3754_v44  ;;  %vm3753_vm3 = vcmp.eq.f32.partialorder %v3752_v35, 8.507059e+37  ;;  %4056 = vmatpush.msra.mxu0 %v4010_v23  ;;  %v3997_v35 = vld [vmem:[#allocation3 + $0x458] sm:$0xff] }
 0xe67   :  { %v3725_v6 = vsub.f32 1.0, %v3724_v28  ;;  %v4009_v28 = vld [vmem:[#allocation3 + $0x4d8] sm:$0xff] }
 0xe68   :  { %4097 = vmatpush.msra.mxu2 %v4009_v28 }
 0xe69   :  { %v3726_v53 = vmul.f32 %v4986_v17, %v3725_v6 }
 0xe6a   :  { %v4988_v22 = vpop.eup %4987  ;;  %v3676_v51 = vpop.f32.mrf.mxu1 }
 0xe6b   :  { %v3744_v41 = vmul.f32 %v4988_v22, %v3742_v27  ;;  %v3727_v19 = vadd.f32 %v4986_v17, %v3726_v53  ;;  %v4990_v40 = vpop.eup %4989  ;;  %vm3749_vm0 = vweird.f32 %v4988_v22  ;;  %v3677_v61 = vadd.f32 %v3676_v51, %v3629_v8  ;;  %v4007_v27 = vld [vmem:[#allocation3 + $0x4c0] sm:$0xff] }
 0xe6c   :  { %vm3750_vm2 = vmor %vm3748_vm1, %vm3749_vm0  ;;  %4057 = vmatpush.msra.mxu0 %v4007_v27  ;;  %v4004_v53 = vld [vmem:[#allocation3 + $0x4a0] sm:$0xff] }
 0xe6d   :  { %v3745_v31 = vsub.f32 1.0, %v3744_v41  ;;  %v3731_v37 = vsel %vm3730_vm14, %v4986_v17, %v3727_v19  ;;  %v4008_v17 = vld [vmem:[#allocation3 + $0x4d0] sm:$0xff]  ;;  %v4001_v41 = vld [vmem:[#allocation3 + $0x480] sm:$0xff] }
 0xe6e   :  { %v3736_v38 = vsel %vm3733_vm15, %v3735_v60, %v3731_v37  ;;  %4077 = vmatpush.msra.mxu1 %v4008_v17  ;;  %4058 = vmatpush.msra.mxu0 %v4004_v53  ;;  %v4002_v19 = vld [vmem:[#allocation3 + $0x490] sm:$0xff]  ;;  %v3998_v60 = vld [vmem:[#allocation3 + $0x460] sm:$0xff] }
 0xe6f   :  { %v7207_v9 = vmul.f32 %v4990_v40, %v3736_v38  ;;  %v3746_v36 = vmul.f32 %v4988_v22, %v3745_v31  ;;  %v3999_v31 = vld [vmem:[#allocation3 + $0x470] sm:$0xff]  ;;  %v4000_v38 = vld [vmem:[#allocation3 + $0x478] sm:$0xff] }
 0xe70   :  { %4078 = vmatpush.msra.mxu1 %v4005_v30  ;;  %4059 = vmatpush.msra.mxu0 %v4001_v41 }
 0xe71   :  { %4991 = vtanh.f32 %v7207_v9  ;;  %v3747_v21 = vadd.f32 %v4988_v22, %v3746_v36  ;;  %v3995_v36 = vld [vmem:[#allocation3 + $0x440] sm:$0xff] }
 0xe72   :  { %4079 = vmatpush.msra.mxu1 %v4002_v19  ;;  %4060 = vmatpush.msra.mxu0 %v3998_v60  ;;  %v4198_v60 = vld [vmem:[#allocation3 + $0x7f8] sm:$0xff] }
 0xe73   :  { %v3751_v12 = vsel %vm3750_vm2, %v4988_v22, %v3747_v21  ;;  %v4006_v22 = vld [vmem:[#allocation3 + $0x4b8] sm:$0xff]  ;;  %v3996_v21 = vld [vmem:[#allocation3 + $0x450] sm:$0xff] }
 0xe74   :  { %v3756_v33 = vsel %vm3753_vm3, %v3755_v52, %v3751_v12  ;;  %4098 = vmatpush.msra.mxu2 %v4006_v22  ;;  %4080 = vmatpush.msra.mxu1 %v3999_v31  ;;  %v3992_v12 = vld [vmem:[#allocation3 + $0x420] sm:$0xff]  ;;  %v3993_v52 = vld [vmem:[#allocation3 + $0x430] sm:$0xff] }
 0xe75   :  { %4061 = vmatpush.msra.mxu0 %v3995_v36  ;;  %v4193_v31 = vld [vmem:[#allocation3 + $0x7c0] sm:$0xff] }
 0xe76   :  { %4081 = vmatpush.msra.mxu1 %v3996_v21  ;;  %v4190_v36 = vld [vmem:[#allocation3 + $0x7a0] sm:$0xff]  ;;  %v4191_v21 = vld [vmem:[#allocation3 + $0x7b0] sm:$0xff] }
 0xe77   :  { %v4992_v4 = vpop.eup %4991  ;;  %4062 = vmatpush.msra.mxu0 %v3992_v12  ;;  %v4188_v12 = vld [vmem:[#allocation3 + $0x790] sm:$0xff] }
 0xe78   :  { %v3760_v10 = vmul.f32 %v4992_v4, %v3756_v33  ;;  %v3994_v33 = vld [vmem:[#allocation3 + $0x438] sm:$0xff]  ;;  %4082 = vmatpush.msra.mxu1 %v3993_v52 }
 0xe79   :  { %4063 = vmatpush.msra.mxu0 %v3989_v18  ;;  %v4189_v52 = vld [vmem:[#allocation3 + $0x798] sm:$0xff]  ;;  %v4181_v18 = vld [vmem:[#allocation3 + $0x740] sm:$0xff] }
 0xe7a   :  { %3842 = vmatmul.f32.vlgmr.msrb.gmra.mxu0 %v3760_v10  ;;  %3862 = vmatmul.f32.vlgmr.msrb.gmra.mxu1 %v3760_v10 }
 0xe7b   :  { %3882 = vmatmul.f32.vlgmr.msrb.gmra.mxu2 %v3760_v10  ;;  %3902 = vmatmul.f32.vlgmr.msrb.gmra.mxu3 %v3760_v10 }
 0xe7c   :  { %4083 = vmatpush.msra.mxu1 %v3990_v62  ;;  %v4182_v62 = vld [vmem:[#allocation3 + $0x750] sm:$0xff] }
 0xe7e   :  { %4247 = vmatpush.msrb.mxu1 %v4198_v60 }
 0xef7   :  { %v3843_v63 = vpop.f32.mrf.mxu0  ;;  %v3863_v11 = vpop.f32.mrf.mxu1 }
 0xef8   :  { %v3910_v14 = vrot.slane %v3843_v63, 7  ;;  %v3911_v16 = vrot.slane %v3863_v11, 7  ;;  %v3982_v63 = vrot.slane %v7207_v9, 7 }
 0xefa   :  { %v3918_v20 = vadd.f32 %v3910_v14, %v7195_v42  ;;  %v3919_v29 = vadd.f32 %v3911_v16, %v3677_v61  ;;  %v4003_v42 = vld [vmem:[#allocation3 + $0x498] sm:$0xff] }
 0xefb   :  { %4099 = vmatpush.msra.mxu2 %v4003_v42  ;;  %v4197_v42 = vld [vmem:[#allocation3 + $0x7f0] sm:$0xff] }
 0xefc   :  { %v4395_v6 = vmul.f32 -1.442695, %v3918_v20  ;;  %v4397_v13 = vmul.f32 -1.442695, %v3919_v29  ;;  %4227 = vmatpush.msrb.mxu0 %v4197_v42 }
 0xefd   :  { %4100 = vmatpush.msra.mxu2 %v4000_v38  ;;  %v4195_v38 = vld [vmem:[#allocation3 + $0x7d8] sm:$0xff] }
 0xefe   :  { %4993 = vpow2.f32 %v4395_v6  ;;  %v3903_v40 = vpop.f32.mrf.mxu3  ;;  %v3883_v49 = vpop.f32.mrf.mxu2  ;;  %4248 = vmatpush.msrb.mxu1 %v4195_v38 }
 0xeff   :  { %4995 = vpow2.f32 %v4397_v13  ;;  %v3913_v37 = vrot.slane %v3903_v40, 7  ;;  %4101 = vmatpush.msra.mxu2 %v3997_v35  ;;  %v3912_v50 = vrot.slane %v3883_v49, 7  ;;  %v4196_v40 = vld [vmem:[#allocation3 + $0x7e0] sm:$0xff] }
 0xf00   :  { %4207 = vmatpush.msra.mxu3 %v4196_v40  ;;  %v4187_v35 = vld [vmem:[#allocation3 + $0x780] sm:$0xff] }
 0xf01   :  { %v3921_v44 = vadd.f32 %v3913_v37, %v7200_v34  ;;  %v3991_v34 = vld [vmem:[#allocation3 + $0x418] sm:$0xff]  ;;  %4102 = vmatpush.msra.mxu2 %v3994_v33  ;;  %v3920_v5 = vadd.f32 %v3912_v50, %v7204_v15  ;;  %v4194_v37 = vld [vmem:[#allocation3 + $0x7d0] sm:$0xff]  ;;  %v4175_v49 = vld [vmem:[#allocation3 + $0x700] sm:$0xff] }
 0xf02   :  { %4208 = vmatpush.msra.mxu3 %v4193_v31  ;;  %4228 = vmatpush.msrb.mxu0 %v4194_v37  ;;  %v4185_v33 = vld [vmem:[#allocation3 + $0x770] sm:$0xff] }
 0xf03   :  { %v4396_v4 = vmul.f32 -1.442695, %v3921_v44  ;;  %4103 = vmatpush.msra.mxu2 %v3991_v34  ;;  %v4192_v44 = vld [vmem:[#allocation3 + $0x7b8] sm:$0xff]  ;;  %v4179_v34 = vld [vmem:[#allocation3 + $0x730] sm:$0xff] }
 0xf04   :  { %v4994_v10 = vpop.eup %4993  ;;  %4209 = vmatpush.msra.mxu3 %v4190_v36  ;;  %4229 = vmatpush.msrb.mxu0 %v4191_v21  ;;  %v4176_v50 = vld [vmem:[#allocation3 + $0x710] sm:$0xff] }
 0xf05   :  { %v4996_v48 = vpop.eup %4995  ;;  %v3925_v59 = vadd.f32 1.0, %v4994_v10  ;;  %4997 = vpow2.f32 %v4396_v4  ;;  %4249 = vmatpush.msrb.mxu1 %v4192_v44  ;;  %v4184_v4 = vld [vmem:[#allocation3 + $0x760] sm:$0xff]  ;;  %v4186_v10 = vld [vmem:[#allocation3 + $0x778] sm:$0xff] }
 0xf06   :  { %v3965_v47 = vadd.f32 1.0, %v4996_v48  ;;  %4210 = vmatpush.msra.mxu3 %v4187_v35  ;;  %4230 = vmatpush.msrb.mxu0 %v4188_v12  ;;  %v4183_v48 = vld [vmem:[#allocation3 + $0x758] sm:$0xff] }
 0xf07   :  { %4999 = vrcp.f32 %v3925_v59  ;;  %v3937_v57 = vand.u32 2147483648, %v3925_v59  ;;  %v3935_v8 = vand.u32 2147483647, %v3925_v59  ;;  %vm3931_vm6 = vweird.f32 %v3925_v59  ;;  %4250 = vmatpush.msrb.mxu1 %v4189_v52 }
 0xf08   :  { %5001 = vrcp.f32 %v3965_v47  ;;  %v3977_v3 = vand.u32 2147483648, %v3965_v47  ;;  %v3975_v58 = vand.u32 2147483647, %v3965_v47  ;;  %vm3971_vm7 = vweird.f32 %v3965_v47  ;;  %4211 = vmatpush.msra.mxu3 %v4184_v4  ;;  %4231 = vmatpush.msrb.mxu0 %v4185_v33 }
 0xf09   :  { %v3938_v15 = vor.u32 1.1754944e-38, %v3937_v57  ;;  %vm3936_vm10 = vcmp.eq.f32.partialorder %v3935_v8, 8.507059e+37  ;;  %4251 = vmatpush.msrb.mxu1 %v4186_v10  ;;  %v4166_v57 = vld [vmem:[#allocation3 + $0x6a0] sm:$0xff] }
 0xf0a   :  { %v3978_v11 = vor.u32 1.1754944e-38, %v3977_v3  ;;  %vm3976_vm11 = vcmp.eq.f32.partialorder %v3975_v58, 8.507059e+37  ;;  %4212 = vmatpush.msra.mxu3 %v4181_v18  ;;  %4232 = vmatpush.msrb.mxu0 %v4182_v62  ;;  %v4167_v3 = vld [vmem:[#allocation3 + $0x6b0] sm:$0xff]  ;;  %v4163_v58 = vld [vmem:[#allocation3 + $0x680] sm:$0xff] }
 0xf0b   :  { %v4998_v46 = vpop.eup %4997  ;;  %4252 = vmatpush.msrb.mxu1 %v4183_v48 }
 0xf0c   :  { %v3945_v39 = vadd.f32 1.0, %v4998_v46  ;;  %4233 = vmatpush.msrb.mxu0 %v4179_v34  ;;  %v4177_v46 = vld [vmem:[#allocation3 + $0x718] sm:$0xff] }
 0xf0d   :  { %v5000_v51 = vpop.eup %4999 }
 0xf0e   :  { %v5002_v56 = vpop.eup %5001  ;;  %v3927_v32 = vmul.f32 %v5000_v51, %v3925_v59  ;;  %5003 = vrcp.f32 %v3945_v39  ;;  %vm3932_vm4 = vweird.f32 %v5000_v51  ;;  %v3957_v6 = vand.u32 2147483648, %v3945_v39  ;;  %v4178_v59 = vld [vmem:[#allocation3 + $0x720] sm:$0xff]  ;;  %4234 = vmatpush.msrb.mxu0 %v4176_v50 }
 0xf0f   :  { %v3967_v24 = vmul.f32 %v5002_v56, %v3965_v47  ;;  %5005 = vtanh.f32 %v3920_v5  ;;  %vm3972_vm5 = vweird.f32 %v5002_v56  ;;  %vm3933_vm8 = vmor %vm3931_vm6, %vm3932_vm4  ;;  %vm3951_vm13 = vweird.f32 %v3945_v39  ;;  %v4180_v47 = vld [vmem:[#allocation3 + $0x738] sm:$0xff]  ;;  %4213 = vmatpush.msra.mxu3 %v4178_v59  ;;  %v4173_v5 = vld [vmem:[#allocation3 + $0x6f0] sm:$0xff] }
 0xf10   :  { %v3928_v55 = vsub.f32 1.0, %v3927_v32  ;;  %vm3973_vm9 = vmor %vm3971_vm7, %vm3972_vm5  ;;  %v3955_v9 = vand.u32 2147483647, %v3945_v39  ;;  %v3958_v53 = vor.u32 1.1754944e-38, %v3957_v6  ;;  %4253 = vmatpush.msrb.mxu1 %v4180_v47  ;;  %4235 = vmatpush.msrb.mxu0 %v4173_v5 }
 0xf11   :  { %v3968_v7 = vsub.f32 1.0, %v3967_v24  ;;  %4214 = vmatpush.msra.mxu3 %v4175_v49  ;;  %v4169_v24 = vld [vmem:[#allocation3 + $0x6c0] sm:$0xff] }
 0xf12   :  { %v3929_v0 = vmul.f32 %v5000_v51, %v3928_v55  ;;  %vm3956_vm15 = vcmp.eq.f32.partialorder %v3955_v9, 8.507059e+37  ;;  %4254 = vmatpush.msrb.mxu1 %v4177_v46  ;;  %v4170_v55 = vld [vmem:[#allocation3 + $0x6d0] sm:$0xff] }
 0xf13   :  { %v3969_v2 = vmul.f32 %v5002_v56, %v3968_v7  ;;  %v4171_v7 = vld [vmem:[#allocation3 + $0x6d8] sm:$0xff]  ;;  %4236 = vmatpush.msrb.mxu0 %v4170_v55 }
 0xf14   :  { %v5004_v1 = vpop.eup %5003  ;;  %v3930_v43 = vadd.f32 %v5000_v51, %v3929_v0  ;;  %v4168_v0 = vld [vmem:[#allocation3 + $0x6b8] sm:$0xff] }
 0xf15   :  { %v3970_v54 = vadd.f32 %v5002_v56, %v3969_v2  ;;  %v3947_v26 = vmul.f32 %v5004_v1, %v3945_v39  ;;  %v5006_v14 = vpop.eup %5005  ;;  %vm3952_vm12 = vweird.f32 %v5004_v1  ;;  %v7218_v39 = vld [vmem:[%s7234_s5] sm:$0xf]  ;;  %4237 = vmatpush.msrb.mxu0 %v4167_v3 }
 0xf16   :  { %v3934_v61 = vsel %vm3933_vm8, %v5000_v51, %v3930_v43  ;;  %vm3953_vm14 = vmor %vm3951_vm13, %vm3952_vm12  ;;  %v4172_v51 = vld [vmem:[#allocation3 + $0x6e0] sm:$0xff]  ;;  %v4042_v32 = vperm.slane %v7218_v39, 0  ;;  %v4165_v43 = vld [vmem:[#allocation3 + $0x698] sm:$0xff] }
 0xf17   :  { %v3939_v16 = vsel %vm3936_vm10, %v3938_v15, %v3934_v61  ;;  %v3974_v23 = vsel %vm3973_vm9, %v5002_v56, %v3970_v54  ;;  %v3948_v45 = vsub.f32 1.0, %v3947_v26  ;;  %v4174_v56 = vld [vmem:[#allocation3 + $0x6f8] sm:$0xff]  ;;  %4215 = vmatpush.msra.mxu3 %v4172_v51  ;;  %v4160_v15 = vld [vmem:[#allocation3 + $0x660] sm:$0xff]  ;;  %v4161_v54 = vld [vmem:[#allocation3 + $0x670] sm:$0xff] }
 0xf18   :  { %v3961_v25 = vmul.f32 %v5006_v14, %v3939_v16  ;;  %v3979_v20 = vsel %vm3976_vm11, %v3978_v11, %v3974_v23  ;;  %4255 = vmatpush.msrb.mxu1 %v4174_v56  ;;  %v4162_v26 = vld [vmem:[#allocation3 + $0x678] sm:$0xff]  ;;  %v4157_v11 = vld [vmem:[#allocation3 + $0x640] sm:$0xff]  ;;  %v4158_v61 = vld [vmem:[#allocation3 + $0x650] sm:$0xff]  ;;  %v4044_v14 = vperm.slane %v7218_v39, 3 }
 0xf19   :  { %v3984_v29 = vmul.f32 %v3982_v63, %v3979_v20  ;;  %v3949_v27 = vmul.f32 %v5004_v1, %v3948_v45  ;;  %4216 = vmatpush.msra.mxu3 %v4169_v24  ;;  %v4159_v16 = vld [vmem:[#allocation3 + $0x658] sm:$0xff]  ;;  %v4154_v23 = vld [vmem:[#allocation3 + $0x620] sm:$0xff]  ;;  %v4155_v45 = vld [vmem:[#allocation3 + $0x630] sm:$0xff] }
 0xf1a   :  { %4256 = vmatpush.msrb.mxu1 %v4171_v7 }
 0xf1b   :  { %v3985_v17 = vadd.f32 %v3984_v29, %v3961_v25  ;;  %v3950_v28 = vadd.f32 %v5004_v1, %v3949_v27  ;;  %4217 = vmatpush.msra.mxu3 %v4166_v57  ;;  %v4156_v25 = vld [vmem:[#allocation3 + $0x638] sm:$0xff]  ;;  %v4151_v29 = vld [vmem:[#allocation3 + $0x600] sm:$0xff]  ;;  %v4152_v27 = vld [vmem:[#allocation3 + $0x610] sm:$0xff] }
 0xf1c   :  { %4257 = vmatpush.msrb.mxu1 %v4168_v0 }
 0xf1d   :  { %5007 = vtanh.f32 %v3985_v17  ;;  %v3954_v13 = vsel %vm3953_vm14, %v5004_v1, %v3950_v28  ;;  %v4164_v1 = vld [vmem:[#allocation3 + $0x690] sm:$0xff]  ;;  %4218 = vmatpush.msra.mxu3 %v4163_v58  ;;  %v4153_v28 = vld [vmem:[#allocation3 + $0x618] sm:$0xff] }
 0xf1e   :  { %v3959_v22 = vsel %vm3956_vm15, %v3958_v53, %v3954_v13  ;;  %4238 = vmatpush.msrb.mxu0 %v4164_v1  ;;  %4258 = vmatpush.msrb.mxu1 %v4165_v43  ;;  %v4043_v53 = vperm.slane %v7218_v39, 2  ;;  %v4199_v39 = vld [vmem:[%s7235_s6] sm:$0xf]  ;;  %s5142_s6 = smov [#allocation10]  }
 0xf1f   :  { %4219 = vmatpush.msra.mxu3 %v4160_v15  ;;  %v4203_v51 = vperm.slane %v4199_v39, 3  ;;  %v4202_v58 = vperm.slane %v4199_v39, 2  ;;  %s4315_s11 = sshll.u32 %s5142_s6, 4  ;;  %s4316_s11 = int_to_ptr.vmem [resolvable:$true] %s4315_s11 }
 0xf20   :  { %4239 = vmatpush.msrb.mxu0 %v4161_v54  ;;  %4259 = vmatpush.msrb.mxu1 %v4162_v26 }
 0xf21   :  { %4220 = vmatpush.msra.mxu3 %v4157_v11 }
 0xf22   :  { %4240 = vmatpush.msrb.mxu0 %v4158_v61  ;;  %4260 = vmatpush.msrb.mxu1 %v4159_v16 }
 0xf23   :  { %v5008_v30 = vpop.eup %5007  ;;  %4221 = vmatpush.msra.mxu3 %v4154_v23 }
 0xf24   :  { %v3987_v41 = vmul.f32 %v5008_v30, %v3959_v22  ;;  %4241 = vmatpush.msrb.mxu0 %v4155_v45  ;;  %4261 = vmatpush.msrb.mxu1 %v4156_v25 }
 0xf25   :  { %4222 = vmatpush.msra.mxu3 %v4151_v29 }
 0xf26   :  { %v4039_v19 = vrot.slane %v3987_v41, 1  ;;  %4242 = vmatpush.msrb.mxu0 %v4152_v27  ;;  %4262 = vmatpush.msrb.mxu1 %v4153_v28 }
 0xf28   :  { %4064 = vmatmul.f32.vlgmr.msra.gmra.mxu0 %v4039_v19  ;;  %4084 = vmatmul.f32.vlgmr.msra.gmra.mxu1 %v4039_v19 }
 0xf29   :  { %4104 = vmatmul.f32.vlgmr.msra.gmra.mxu2 %v4039_v19 }
 0xfa5   :  { %v4065_v8 = vpop.f32.mrf.mxu0  ;;  %v4085_v30 = vpop.f32.mrf.mxu1 }
 0xfa6   :  { %v4066_v2 = vadd.f32 %v4065_v8, %v4042_v32  ;;  %v4086_v40 = vadd.f32 %v4085_v30, %v4043_v53  ;;  %v4201_v32 = vperm.slane %v4199_v39, 0 }
 0xfa8   :  { %v4398_v63 = vmul.f32 -1.442695, %v4066_v2 }
 0xfaa   :  { %5009 = vpow2.f32 %v4398_v63 }
 0xfac   :  { %v4105_v20 = vpop.f32.mrf.mxu2 }
 0xfad   :  { %v4106_v17 = vadd.f32 %v4105_v20, %v4044_v14 }
 0xfaf   :  { %v4399_v6 = vmul.f32 -1.442695, %v4106_v17 }
 0xfb0   :  { %v5010_v9 = vpop.eup %5009 }
 0xfb1   :  { %v4111_v13 = vadd.f32 1.0, %v5010_v9  ;;  %5011 = vpow2.f32 %v4399_v6 }
 0xfb3   :  { %5013 = vrcp.f32 %v4111_v13  ;;  %v4123_v31 = vand.u32 2147483648, %v4111_v13  ;;  %v4121_v38 = vand.u32 2147483647, %v4111_v13  ;;  %vm4117_vm1 = vweird.f32 %v4111_v13 }
 0xfb5   :  { %v4124_v44 = vor.u32 1.1754944e-38, %v4123_v31  ;;  %vm4122_vm3 = vcmp.eq.f32.partialorder %v4121_v38, 8.507059e+37 }
 0xfb7   :  { %v5012_v22 = vpop.eup %5011 }
 0xfb8   :  { %v4131_v41 = vadd.f32 1.0, %v5012_v22 }
 0xfb9   :  { %v5014_v19 = vpop.eup %5013 }
 0xfba   :  { %v4113_v42 = vmul.f32 %v5014_v19, %v4111_v13  ;;  %5015 = vrcp.f32 %v4131_v41  ;;  %vm4118_vm0 = vweird.f32 %v5014_v19  ;;  %v4143_v62 = vand.u32 2147483648, %v4131_v41 }
 0xfbb   :  { %5017 = vtanh.f32 %v4086_v40  ;;  %vm4119_vm2 = vmor %vm4117_vm1, %vm4118_vm0  ;;  %vm4137_vm5 = vweird.f32 %v4131_v41  ;;  %v4141_v59 = vand.u32 2147483647, %v4131_v41 }
 0xfbc   :  { %v4114_v60 = vsub.f32 1.0, %v4113_v42  ;;  %v4144_v47 = vor.u32 1.1754944e-38, %v4143_v62 }
 0xfbd   :  { %vm4142_vm7 = vcmp.eq.f32.partialorder %v4141_v59, 8.507059e+37 }
 0xfbe   :  { %v4115_v37 = vmul.f32 %v5014_v19, %v4114_v60 }
 0xfc0   :  { %v5016_v36 = vpop.eup %5015  ;;  %v4116_v21 = vadd.f32 %v5014_v19, %v4115_v37 }
 0xfc1   :  { %v4133_v35 = vmul.f32 %v5016_v36, %v4131_v41  ;;  %v5018_v52 = vpop.eup %5017  ;;  %vm4138_vm4 = vweird.f32 %v5016_v36 }
 0xfc2   :  { %v4120_v12 = vsel %vm4119_vm2, %v5014_v19, %v4116_v21  ;;  %vm4139_vm6 = vmor %vm4137_vm5, %vm4138_vm4 }
 0xfc3   :  { %v4125_v4 = vsel %vm4122_vm3, %v4124_v44, %v4120_v12  ;;  %v4134_v33 = vsub.f32 1.0, %v4133_v35 }
 0xfc4   :  { %v4147_v10 = vmul.f32 %v5018_v52, %v4125_v4 }
 0xfc5   :  { %v4135_v18 = vmul.f32 %v5016_v36, %v4134_v33 }
 0xfc6   :  { %5019 = vtanh.f32 %v4147_v10 }
 0xfc7   :  { %v4136_v48 = vadd.f32 %v5016_v36, %v4135_v18 }
 0xfc9   :  { %v4140_v34 = vsel %vm4139_vm6, %v5016_v36, %v4136_v48 }
 0xfca   :  { %v4145_v50 = vsel %vm4142_vm7, %v4144_v47, %v4140_v34 }
 0xfcc   :  { %v5020_v49 = vpop.eup %5019 }
 0xfcd   :  { %v4149_v46 = vmul.f32 %v5020_v49, %v4145_v50 }
 0xfcf   :  { %4223 = vmatmul.f32.vlgmr.msra.gmra.mxu3 %v4149_v46  ;;  %4243 = vmatmul.f32.vlgmr.msrb.gmra.mxu0 %v4149_v46 }
 0xfd0   :  { %4263 = vmatmul.f32.vlgmr.msrb.gmra.mxu1 %v4149_v46 }
0x104c   :  { %v4244_v43 = vpop.f32.mrf.mxu0 }
0x104d   :  { %v4264_v5 = vpop.f32.mrf.mxu1  ;;  %v4245_v54 = vadd.f32 %v4244_v43, %v4202_v58 }
0x104e   :  { %v4265_v56 = vadd.f32 %v4264_v5, %v4203_v51 }
0x1050   :  { %v4401_v24 = vmul.f32 -1.442695, %v4265_v56 }
0x1052   :  { %5021 = vpow2.f32 %v4401_v24  ;;  %v4224_v55 = vpop.f32.mrf.mxu3 }
0x1053   :  { %v4225_v7 = vadd.f32 %v4224_v55, %v4201_v32 }
0x1055   :  { %v4400_v57 = vmul.f32 -1.442695, %v4225_v7 }
0x1057   :  { %5023 = vpow2.f32 %v4400_v57 }
0x1058   :  { %v5022_v3 = vpop.eup %5021 }
0x1059   :  { %v4290_v0 = vadd.f32 1.0, %v5022_v3 }
0x105b   :  { %5025 = vrcp.f32 %v4290_v0  ;;  %v4302_v9 = vand.u32 2147483648, %v4290_v0  ;;  %vm4296_vm13 = vweird.f32 %v4290_v0  ;;  %v4300_v13 = vand.u32 2147483647, %v4290_v0 }
0x105d   :  { %v5024_v8 = vpop.eup %5023  ;;  %v4303_v30 = vor.u32 1.1754944e-38, %v4302_v9  ;;  %vm4301_vm15 = vcmp.eq.f32.partialorder %v4300_v13, 8.507059e+37 }
0x105e   :  { %v4270_v2 = vadd.f32 1.0, %v5024_v8 }
0x1060   :  { %5027 = vrcp.f32 %v4270_v2  ;;  %v4282_v14 = vand.u32 2147483648, %v4270_v2  ;;  %v4280_v23 = vand.u32 2147483647, %v4270_v2  ;;  %vm4276_vm9 = vweird.f32 %v4270_v2 }
0x1061   :  { %v5026_v1 = vpop.eup %5025  ;;  %5029 = vtanh.f32 %v4245_v54 }
0x1062   :  { %v4292_v26 = vmul.f32 %v5026_v1, %v4290_v0  ;;  %v4283_v25 = vor.u32 1.1754944e-38, %v4282_v14  ;;  %vm4281_vm11 = vcmp.eq.f32.partialorder %v4280_v23, 8.507059e+37  ;;  %vm4297_vm12 = vweird.f32 %v5026_v1 }
0x1063   :  { %vm4298_vm14 = vmor %vm4296_vm13, %vm4297_vm12 }
0x1064   :  { %v4293_v61 = vsub.f32 1.0, %v4292_v26 }
0x1066   :  { %v5028_v15 = vpop.eup %5027  ;;  %v4294_v20 = vmul.f32 %v5026_v1, %v4293_v61 }
0x1067   :  { %v4272_v63 = vmul.f32 %v5028_v15, %v4270_v2  ;;  %vm4277_vm8 = vweird.f32 %v5028_v15  ;;  %v5030_v27 = vpop.eup %5029 }
0x1068   :  { %vm4278_vm10 = vmor %vm4276_vm9, %vm4277_vm8  ;;  %v4295_v6 = vadd.f32 %v5026_v1, %v4294_v20 }
0x1069   :  { %v4273_v11 = vsub.f32 1.0, %v4272_v63 }
0x106a   :  { %v4299_v53 = vsel %vm4298_vm14, %v5026_v1, %v4295_v6 }
0x106b   :  { %v4274_v16 = vmul.f32 %v5028_v15, %v4273_v11  ;;  %v4304_v41 = vsel %vm4301_vm15, %v4303_v30, %v4299_v53 }
0x106d   :  { %v4275_v45 = vadd.f32 %v5028_v15, %v4274_v16 }
0x106f   :  { %v4279_v29 = vsel %vm4278_vm10, %v5028_v15, %v4275_v45 }
0x1070   :  { %v4284_v17 = vsel %vm4281_vm11, %v4283_v25, %v4279_v29 }
0x1071   :  { %v4306_v28 = vmul.f32 %v5030_v27, %v4284_v17 }
0x1073   :  { %5031 = vtanh.f32 %v4306_v28 }
0x1079   :  { %v5032_v22 = vpop.eup %5031 }
0x107a   :  { %v4308_v19 = vmul.f32 %v5032_v22, %v4304_v41 }
0x107c   :  { %4309 = vst [vmem:[#allocation10] sm:$0x1] %v4308_v19 }
0x107d   :  { %4320 = dma.vmem_to_hbm [thread:$0]  %s4316_s11, 16, %s4318_s14, [#allocation7]  }
0x107e   :  { %5135 = dma.done.wait [#allocation7], 16  }
0x107f   :  { %5136 = vsyncadd [#allocation7], 4294967280 }
0x1080   :  { %4325 = vsyncpa [#allocation6], 1 }
0x1081   :  { %4326 = vsyncpa [#allocation9], 1 }
0x1082   :  { %4327 = vsyncpa [#allocation7], 1 }
0x1083   :  { %4328 = vsyncmov [#allocation4] }
0x1086   :  { %s4329_s15 = vpop.sfrf %4328 }
0x1087   :  { %p4402_p0 = scmp.ne.s32.totalorder %s4329_s15, 0 }
0x1089   :  { %4333 = shalt.err (%p4402_p0)  }

</bundles_post_ra>
